<compile_context>
chip_gen: v6e
topology: v6e:2x2x1
jax: 0.10.0
libtpu: 0.0.40
codegen_flags: <defaults>
</compile_context>

<pallas_src>
import functools

import jax
import jax.numpy as jnp
import numpy as np
from jax import lax
from jax.experimental import pallas as pl
from jax.experimental.pallas import tpu as pltpu


# ----------------------------------------------------------------------------
# Fused kernel
# ----------------------------------------------------------------------------
def _d2dt_fused_kernel(xn_ref, m_ref, w1, b1, w2, b2, w3, b3, w4, b4,
                       w5m, w5c, w5p, b5, o_ref, concat,
                       *, H, W, gc, rpad, shortcut):
    # xn_ref : (1, C, T*H*W)        native-layout input (concat fill + residual add)
    # m_ref  : (9, T*H*W)           per-tap 0/1 validity masks (h/w borders)
    # w1..w4 : (9, gc, Cin_k)       transposed per-tap spatial weights
    # b1..b4 : (gc, 1)
    # w5m/c/p: (NP, Cmax)           transposed temporal tap weights (t-1, t, t+1)
    # b5     : (NP, 1)
    # o_ref  : (1, Cout, T*H*W)     native-layout output block
    # concat : VMEM (Cmax, RPAD + T*H*W + RPAD) f32   channels-first dense concat
    C = xn_ref.shape[1]
    THW = xn_ref.shape[2]
    HW = H * W
    cmax = concat.shape[0]
    cout = o_ref.shape[1]
    R0 = rpad
    f32 = jnp.float32

    # Zero only the column halo (read by row-shifted tap windows at the flat-row
    # extremes); the interior is fully rewritten every grid step.
    concat[:, 0:R0] = jnp.zeros((cmax, R0), f32)
    concat[:, R0 + THW:R0 + THW + R0] = jnp.zeros((cmax, R0), f32)

    # Input occupies channels [0, C) of the interior (channels-first -> no transpose).
    concat[0:C, R0:R0 + THW] = xn_ref[0, :, :].astype(f32)

    # conv1..conv4: (1,3,3) spatial convs + LeakyReLU(0.2), densely concatenated.
    # Each conv = 9 shift-and-accumulate matmuls on contiguous shifted windows.
    w_refs = (w1, w2, w3, w4)
    b_refs = (b1, b2, b3, b4)
    for k in range(4):
        cin = C + k * gc
        acc = jnp.zeros((gc, THW), f32)
        for kh in range(3):
            for kw in range(3):
                s = (kh - 1) * W + (kw - 1)                  # flat row shift of the tap
                tap = kh * 3 + kw
                win = concat[0:cin, R0 + s:R0 + s + THW]     # (cin, THW) shifted window
                p = jnp.dot(w_refs[k][tap], win,
                            preferred_element_type=f32)      # (gc, THW)
                if tap == 4:                                 # centre tap: always valid
                    acc = acc + p
                else:
                    acc = acc + m_ref[tap:tap + 1, :] * p    # mask out border rows
        y = acc + b_refs[k][...]
        y = jnp.where(y >= 0, y, 0.2 * y)                    # LeakyReLU(0.2)
        concat[cin:cin + gc, R0:R0 + THW] = y                # lane-dense store

    # conv5: (3,1,1) temporal conv, split into its three taps (frame-aligned slices,
    # T-boundary zero-padding falls out of the column-range restriction).
    y5 = jnp.dot(w5c[...], concat[:, R0:R0 + THW],
                 preferred_element_type=f32) + b5[...]                       # t   tap
    y_m = jnp.dot(w5m[...], concat[:, R0:R0 + THW - HW],
                  preferred_element_type=f32)                                # t-1 tap
    y_p = jnp.dot(w5p[...], concat[:, R0 + HW:R0 + THW],
                  preferred_element_type=f32)                                # t+1 tap
    npad = b5.shape[0]
    zpad = jnp.zeros((npad, HW), f32)
    y5 = y5 + jnp.concatenate([zpad, y_m], axis=1) \
            + jnp.concatenate([y_p, zpad], axis=1)

    # Already in native (Cout, T*H*W) orientation -> no transpose, lane-dense store.
    out_val = y5[0:cout, :]
    if shortcut:
        out_val = out_val + xn_ref[0, :, :].astype(f32)
    o_ref[0, :, :] = out_val.astype(o_ref.dtype)


# ----------------------------------------------------------------------------
# Wrapper: single pallas_call for the whole dense block
# ----------------------------------------------------------------------------
def d2dt_input_forward(x_ncthw, params, shortcut=True):
    """Fused D2DTInput forward.  x_ncthw: (N, C, T, H, W) (PyTorch Conv3d layout)."""
    N, C, T, H, W = x_ncthw.shape
    gc = params["b1"].shape[0]
    Cout = params["b5"].shape[0]
    cmax = C + 4 * gc
    HW = H * W
    THW = T * HW
    if shortcut and Cout != C:
        raise ValueError("shortcut requires channel_out == channel_in")

    RPAD = max(8, -(-(W + 1) // 8) * 8)      # flat-row halo >= W+1, multiple of 8
    NP = max(8, -(-Cout // 8) * 8)           # conv5 output rows padded to sublane mult

    # Native-layout view is all we need (channels-first slab) -> no input transpose.
    x_nat = x_ncthw.reshape(N, C, THW)

    # Per-tap 0/1 validity masks (h/w borders).  Frame (t) borders are covered by the
    # h masks, and the out-of-range flat rows at t==0 / t==T-1 read the zeroed halo.
    idx = np.arange(THW)
    hh = (idx % HW) // W
    ww = idx % W
    masks_np = np.ones((9, THW), np.float32)
    for kh in range(3):
        for kw in range(3):
            valid = np.ones(THW, dtype=bool)
            if kh == 0:
                valid &= hh >= 1
            if kh == 2:
                valid &= hh <= H - 2
            if kw == 0:
                valid &= ww >= 1
            if kw == 2:
                valid &= ww <= W - 2
            masks_np[kh * 3 + kw] = valid
    masks = jnp.asarray(masks_np)

    # Transposed (channels-first) weights: per-tap (gc, cin) for conv1..4.
    ws, bs = [], []
    for i in range(1, 5):
        cin = C + (i - 1) * gc
        ws.append(jnp.transpose(params[f"w{i}"], (0, 1, 3, 2)).reshape(9, gc, cin)
                  .astype(jnp.float32))
        bs.append(params[f"b{i}"].reshape(gc, 1).astype(jnp.float32))

    w5 = params["w5"].astype(jnp.float32)                    # (3, cmax, Cout)

    def pad5(t):
        return jnp.zeros((NP, cmax), jnp.float32).at[0:Cout, :].set(
            jnp.transpose(w5[t]))

    w5m, w5c, w5p = pad5(0), pad5(1), pad5(2)
    b5 = jnp.zeros((NP, 1), jnp.float32).at[0:Cout, 0].set(
        params["b5"].astype(jnp.float32))

    kern = functools.partial(_d2dt_fused_kernel, H=H, W=W, gc=gc, rpad=RPAD,
                             shortcut=shortcut)

    in_specs = [
        pl.BlockSpec((1, C, THW), lambda i: (i, 0, 0)),      # x, native layout
        pl.BlockSpec((9, THW), lambda i: (0, 0)),            # tap masks
    ]
    for k in range(4):
        cin = C + k * gc
        in_specs.append(pl.BlockSpec((9, gc, cin), lambda i: (0, 0, 0)))
        in_specs.append(pl.BlockSpec((gc, 1), lambda i: (0, 0)))
    for _ in range(3):
        in_specs.append(pl.BlockSpec((NP, cmax), lambda i: (0, 0)))
    in_specs.append(pl.BlockSpec((NP, 1), lambda i: (0, 0)))

    out = pl.pallas_call(
        kern,
        out_shape=jax.ShapeDtypeStruct((N, Cout, THW), x_ncthw.dtype),
        grid=(N,),                                           # N=2 -> both v7x cores
        in_specs=in_specs,
        out_specs=pl.BlockSpec((1, Cout, THW), lambda i: (i, 0, 0)),
        scratch_shapes=[
            # channels-first dense-concat slab with flat-row halo (~200 KB -> fits the
            # v7x 64 MiB/TC budget with huge margin; the old im2col `pat` is gone).
            pltpu.VMEM((cmax, RPAD + THW + RPAD), jnp.float32),
        ],
        compiler_params=pltpu.CompilerParams(
            dimension_semantics=("parallel",),
            vmem_limit_bytes=32 * 1024 * 1024,               # v5e default is only 16 MiB
        ),
    )(x_nat, masks, ws[0], bs[0], ws[1], bs[1], ws[2], bs[2], ws[3], bs[3],
      w5m, w5c, w5p, b5)

    # (N, Cout, T*H*W) is already native memory order -> free reshape, no transpose.
    return out.reshape(N, Cout, T, H, W)


# ----------------------------------------------------------------------------
# Parameter init (synthetic, xavier-like scaled by 0.1)
# ----------------------------------------------------------------------------
def init_params(key, channel_in, channel_out, gc):
    def xavier(k, kh, kw, cin, cout, scale):
        fan_in = kh * kw * cin
        fan_out = kh * kw * cout
        std = float(np.sqrt(2.0 / (fan_in + fan_out)))
        return scale * std * jax.random.normal(k, (kh, kw, cin, cout), jnp.float32)

    ks = jax.random.split(key, 6)
    p = {}
    cins = [channel_in, channel_in + gc, channel_in + 2 * gc, channel_in + 3 * gc]
    for i, cin in enumerate(cins, start=1):
        p[f"w{i}"] = xavier(ks[i - 1], 3, 3, cin, gc, 0.1)
        p[f"b{i}"] = jnp.zeros((gc,), jnp.float32)
    cin5 = channel_in + 4 * gc
    # module zero-inits conv5; small non-zero weights here for a non-trivial test
    p["w5"] = xavier(ks[4], 3, 1, cin5, channel_out, 0.1)[:, 0]   # (3, cin5, cout)
    p["b5"] = jnp.zeros((channel_out,), jnp.float32)
    return p


# ----------------------------------------------------------------------------
# Pure-JAX reference (lax.conv) for correctness checking
# ----------------------------------------------------------------------------
def d2dt_input_reference(x_ncthw, params, shortcut=True):
    x = jnp.transpose(x_ncthw, (0, 2, 3, 4, 1))  # NDHWC (D == T)
    dn = ("NDHWC", "DHWIO", "NDHWC")

    def conv_s(inp, w, b):
        y = lax.conv_general_dilated(
            inp, w[None], (1, 1, 1), [(0, 0), (1, 1), (1, 1)], dimension_numbers=dn
        )
        return y + b

    def conv_t(inp, w, b):
        y = lax.conv_general_dilated(
            inp, w[:, None, None], (1, 1, 1), [(1, 1), (0, 0), (0, 0)],
            dimension_numbers=dn,
        )
        return y + b

    lrelu = lambda v: jnp.where(v >= 0, v, 0.2 * v)
    x1 = lrelu(conv_s(x, params["w1"], params["b1"]))
    x2 = lrelu(conv_s(jnp.concatenate([x, x1], -1), params["w2"], params["b2"]))
    x3 = lrelu(conv_s(jnp.concatenate([x, x1, x2], -1), params["w3"], params["b3"]))
    x4 = lrelu(conv_s(jnp.concatenate([x, x1, x2, x3], -1), params["w4"], params["b4"]))
    x5 = conv_t(jnp.concatenate([x, x1, x2, x3, x4], -1), params["w5"], params["b5"])
    if shortcut:
        x5 = x + x5
    return jnp.transpose(x5, (0, 4, 1, 2, 3))


# ----------------------------------------------------------------------------
if __name__ == "__main__":
    N, C_IN, C_OUT, T, H, W, GC = 2, 4, 4, 4, 8, 8, 32

    key = jax.random.PRNGKey(0)
    k_x, k_p = jax.random.split(key)
    x = jax.random.normal(k_x, (N, C_IN, T, H, W), jnp.float32)
    params = init_params(k_p, C_IN, C_OUT, GC)

    fwd = jax.jit(functools.partial(d2dt_input_forward, shortcut=True))
    out = jax.block_until_ready(fwd(x, params))

    ref = jax.block_until_ready(d2dt_input_reference(x, params, shortcut=True))
    assert out.shape == (N, C_OUT, T, H, W), out.shape
    # f32 end-to-end; tolerance slightly looser than 1e-4 because the per-tap MXU
    # accumulation order differs from XLA's conv.
    np.testing.assert_allclose(np.asarray(out), np.asarray(ref), rtol=1e-3, atol=1e-3)

    print("KERNEL_OK")
</pallas_src>

<mosaic_0001>
module attributes {stable_mosaic.version = 11 : i64} {
  func.func @_d2dt_fused_kernel(%arg0: i32, %arg1: memref<1x4x256xf32, #tpu.memory_space<vmem>>, %arg2: memref<9x256xf32, #tpu.memory_space<vmem>>, %arg3: memref<9x32x4xf32, #tpu.memory_space<vmem>>, %arg4: memref<32x1xf32, #tpu.memory_space<vmem>>, %arg5: memref<9x32x36xf32, #tpu.memory_space<vmem>>, %arg6: memref<32x1xf32, #tpu.memory_space<vmem>>, %arg7: memref<9x32x68xf32, #tpu.memory_space<vmem>>, %arg8: memref<32x1xf32, #tpu.memory_space<vmem>>, %arg9: memref<9x32x100xf32, #tpu.memory_space<vmem>>, %arg10: memref<32x1xf32, #tpu.memory_space<vmem>>, %arg11: memref<8x132xf32, #tpu.memory_space<vmem>>, %arg12: memref<8x132xf32, #tpu.memory_space<vmem>>, %arg13: memref<8x132xf32, #tpu.memory_space<vmem>>, %arg14: memref<8x1xf32, #tpu.memory_space<vmem>>, %arg15: memref<1x4x256xf32, #tpu.memory_space<vmem>>, %arg16: memref<132x288xf32, #tpu.memory_space<vmem>>) attributes {dimension_semantics = [#tpu.dimension_semantics<parallel>], iteration_bounds = array<i64: 2>, scalar_prefetch = 0 : i64, scratch_operands = 1 : i64, tpu.core_type = #tpu.core_type<tc>, window_params = [{transform_indices = @transform_0, window_bounds = array<i64: 1, 4, 256>}, {pipeline_mode = #tpu.pipeline_mode<synchronous>, transform_indices = @transform_1, window_bounds = array<i64: 9, 256>}, {pipeline_mode = #tpu.pipeline_mode<synchronous>, transform_indices = @transform_2, window_bounds = array<i64: 9, 32, 4>}, {pipeline_mode = #tpu.pipeline_mode<synchronous>, transform_indices = @transform_3, window_bounds = array<i64: 32, 1>}, {pipeline_mode = #tpu.pipeline_mode<synchronous>, transform_indices = @transform_4, window_bounds = array<i64: 9, 32, 36>}, {pipeline_mode = #tpu.pipeline_mode<synchronous>, transform_indices = @transform_5, window_bounds = array<i64: 32, 1>}, {pipeline_mode = #tpu.pipeline_mode<synchronous>, transform_indices = @transform_6, window_bounds = array<i64: 9, 32, 68>}, {pipeline_mode = #tpu.pipeline_mode<synchronous>, transform_indices = @transform_7, window_bounds = array<i64: 32, 1>}, {pipeline_mode = #tpu.pipeline_mode<synchronous>, transform_indices = @transform_8, window_bounds = array<i64: 9, 32, 100>}, {pipeline_mode = #tpu.pipeline_mode<synchronous>, transform_indices = @transform_9, window_bounds = array<i64: 32, 1>}, {pipeline_mode = #tpu.pipeline_mode<synchronous>, transform_indices = @transform_10, window_bounds = array<i64: 8, 132>}, {pipeline_mode = #tpu.pipeline_mode<synchronous>, transform_indices = @transform_11, window_bounds = array<i64: 8, 132>}, {pipeline_mode = #tpu.pipeline_mode<synchronous>, transform_indices = @transform_12, window_bounds = array<i64: 8, 132>}, {pipeline_mode = #tpu.pipeline_mode<synchronous>, transform_indices = @transform_13, window_bounds = array<i64: 8, 1>}, {transform_indices = @transform_14, window_bounds = array<i64: 1, 4, 256>}]} {
    %cst = arith.constant 0.000000e+00 : f32
    %0 = vector.broadcast %cst : f32 to vector<132x16xf32>
    %c0 = arith.constant 0 : index
    %c0_0 = arith.constant 0 : index
    %1 = vector.load %arg16[%c0, %c0_0] : memref<132x288xf32, #tpu.memory_space<vmem>>, vector<132x16xf32>
    tpu.vector_store %arg16[%c0, %c0_0], %0 {strides = array<i32>} : memref<132x288xf32, #tpu.memory_space<vmem>>, vector<132x16xf32>,
    %cst_1 = arith.constant 0.000000e+00 : f32
    %2 = vector.broadcast %cst_1 : f32 to vector<132x16xf32>
    %c0_2 = arith.constant 0 : index
    %c272 = arith.constant 272 : index
    %3 = vector.load %arg16[%c0_2, %c272] : memref<132x288xf32, #tpu.memory_space<vmem>>, vector<132x16xf32>
    tpu.vector_store %arg16[%c0_2, %c272], %2 {strides = array<i32>} : memref<132x288xf32, #tpu.memory_space<vmem>>, vector<132x16xf32>,
    %c0_3 = arith.constant 0 : index
    %c0_4 = arith.constant 0 : index
    %c0_5 = arith.constant 0 : index
    %4 = vector.load %arg1[%c0_3, %c0_4, %c0_5] : memref<1x4x256xf32, #tpu.memory_space<vmem>>, vector<1x4x256xf32>
    %5 = vector.shape_cast %4 : vector<1x4x256xf32> to vector<4x256xf32>
    %c0_6 = arith.constant 0 : index
    %c16 = arith.constant 16 : index
    %6 = vector.load %arg16[%c0_6, %c16] : memref<132x288xf32, #tpu.memory_space<vmem>>, vector<4x256xf32>
    tpu.vector_store %arg16[%c0_6, %c16], %5 {strides = array<i32>} : memref<132x288xf32, #tpu.memory_space<vmem>>, vector<4x256xf32>,
    %cst_7 = arith.constant 0.000000e+00 : f32
    %7 = vector.broadcast %cst_7 : f32 to vector<32x256xf32>
    %c0_8 = arith.constant 0 : index
    %c7 = arith.constant 7 : index
    %8 = vector.load %arg16[%c0_8, %c7] : memref<132x288xf32, #tpu.memory_space<vmem>>, vector<4x256xf32>
    %c0_9 = arith.constant 0 : index
    %c0_10 = arith.constant 0 : index
    %c0_11 = arith.constant 0 : index
    %9 = vector.load %arg3[%c0_9, %c0_10, %c0_11] : memref<9x32x4xf32, #tpu.memory_space<vmem>>, vector<1x32x4xf32>
    %10 = vector.shape_cast %9 : vector<1x32x4xf32> to vector<32x4xf32>
    %cst_12 = arith.constant dense<0.000000e+00> : vector<32x256xf32>
    %11 = tpu.matmul %10, %8, %cst_12 {dimension_numbers = #tpu.dot_dimension_numbers<[1], [0], [0], [1], [0, 0, 1, 1], [], []>} : vector<32x4xf32>, vector<4x256xf32>, vector<32x256xf32> -> vector<32x256xf32>
    %c0_13 = arith.constant 0 : index
    %c0_14 = arith.constant 0 : index
    %12 = vector.load %arg2[%c0_13, %c0_14] : memref<9x256xf32, #tpu.memory_space<vmem>>, vector<1x256xf32>
    %13 = vector.broadcast %12 : vector<1x256xf32> to vector<32x256xf32>
    %14 = arith.mulf %13, %11 : vector<32x256xf32>
    %15 = arith.addf %7, %14 : vector<32x256xf32>
    %c0_15 = arith.constant 0 : index
    %c8 = arith.constant 8 : index
    %16 = vector.load %arg16[%c0_15, %c8] : memref<132x288xf32, #tpu.memory_space<vmem>>, vector<4x256xf32>
    %c1 = arith.constant 1 : index
    %c0_16 = arith.constant 0 : index
    %c0_17 = arith.constant 0 : index
    %17 = vector.load %arg3[%c1, %c0_16, %c0_17] : memref<9x32x4xf32, #tpu.memory_space<vmem>>, vector<1x32x4xf32>
    %18 = vector.shape_cast %17 : vector<1x32x4xf32> to vector<32x4xf32>
    %cst_18 = arith.constant dense<0.000000e+00> : vector<32x256xf32>
    %19 = tpu.matmul %18, %16, %cst_18 {dimension_numbers = #tpu.dot_dimension_numbers<[1], [0], [0], [1], [0, 0, 1, 1], [], []>} : vector<32x4xf32>, vector<4x256xf32>, vector<32x256xf32> -> vector<32x256xf32>
    %c1_19 = arith.constant 1 : index
    %c0_20 = arith.constant 0 : index
    %20 = vector.load %arg2[%c1_19, %c0_20] : memref<9x256xf32, #tpu.memory_space<vmem>>, vector<1x256xf32>
    %21 = vector.broadcast %20 : vector<1x256xf32> to vector<32x256xf32>
    %22 = arith.mulf %21, %19 : vector<32x256xf32>
    %23 = arith.addf %15, %22 : vector<32x256xf32>
    %c0_21 = arith.constant 0 : index
    %c9 = arith.constant 9 : index
    %24 = vector.load %arg16[%c0_21, %c9] : memref<132x288xf32, #tpu.memory_space<vmem>>, vector<4x256xf32>
    %c2 = arith.constant 2 : index
    %c0_22 = arith.constant 0 : index
    %c0_23 = arith.constant 0 : index
    %25 = vector.load %arg3[%c2, %c0_22, %c0_23] : memref<9x32x4xf32, #tpu.memory_space<vmem>>, vector<1x32x4xf32>
    %26 = vector.shape_cast %25 : vector<1x32x4xf32> to vector<32x4xf32>
    %cst_24 = arith.constant dense<0.000000e+00> : vector<32x256xf32>
    %27 = tpu.matmul %26, %24, %cst_24 {dimension_numbers = #tpu.dot_dimension_numbers<[1], [0], [0], [1], [0, 0, 1, 1], [], []>} : vector<32x4xf32>, vector<4x256xf32>, vector<32x256xf32> -> vector<32x256xf32>
    %c2_25 = arith.constant 2 : index
    %c0_26 = arith.constant 0 : index
    %28 = vector.load %arg2[%c2_25, %c0_26] : memref<9x256xf32, #tpu.memory_space<vmem>>, vector<1x256xf32>
    %29 = vector.broadcast %28 : vector<1x256xf32> to vector<32x256xf32>
    %30 = arith.mulf %29, %27 : vector<32x256xf32>
    %31 = arith.addf %23, %30 : vector<32x256xf32>
    %c0_27 = arith.constant 0 : index
    %c15 = arith.constant 15 : index
    %32 = vector.load %arg16[%c0_27, %c15] : memref<132x288xf32, #tpu.memory_space<vmem>>, vector<4x256xf32>
    %c3 = arith.constant 3 : index
    %c0_28 = arith.constant 0 : index
    %c0_29 = arith.constant 0 : index
    %33 = vector.load %arg3[%c3, %c0_28, %c0_29] : memref<9x32x4xf32, #tpu.memory_space<vmem>>, vector<1x32x4xf32>
    %34 = vector.shape_cast %33 : vector<1x32x4xf32> to vector<32x4xf32>
    %cst_30 = arith.constant dense<0.000000e+00> : vector<32x256xf32>
    %35 = tpu.matmul %34, %32, %cst_30 {dimension_numbers = #tpu.dot_dimension_numbers<[1], [0], [0], [1], [0, 0, 1, 1], [], []>} : vector<32x4xf32>, vector<4x256xf32>, vector<32x256xf32> -> vector<32x256xf32>
    %c3_31 = arith.constant 3 : index
    %c0_32 = arith.constant 0 : index
    %36 = vector.load %arg2[%c3_31, %c0_32] : memref<9x256xf32, #tpu.memory_space<vmem>>, vector<1x256xf32>
    %37 = vector.broadcast %36 : vector<1x256xf32> to vector<32x256xf32>
    %38 = arith.mulf %37, %35 : vector<32x256xf32>
    %39 = arith.addf %31, %38 : vector<32x256xf32>
    %c0_33 = arith.constant 0 : index
    %c16_34 = arith.constant 16 : index
    %40 = vector.load %arg16[%c0_33, %c16_34] : memref<132x288xf32, #tpu.memory_space<vmem>>, vector<4x256xf32>
    %c4 = arith.constant 4 : index
    %c0_35 = arith.constant 0 : index
    %c0_36 = arith.constant 0 : index
    %41 = vector.load %arg3[%c4, %c0_35, %c0_36] : memref<9x32x4xf32, #tpu.memory_space<vmem>>, vector<1x32x4xf32>
    %42 = vector.shape_cast %41 : vector<1x32x4xf32> to vector<32x4xf32>
    %cst_37 = arith.constant dense<0.000000e+00> : vector<32x256xf32>
    %43 = tpu.matmul %42, %40, %cst_37 {dimension_numbers = #tpu.dot_dimension_numbers<[1], [0], [0], [1], [0, 0, 1, 1], [], []>} : vector<32x4xf32>, vector<4x256xf32>, vector<32x256xf32> -> vector<32x256xf32>
    %44 = arith.addf %39, %43 : vector<32x256xf32>
    %c0_38 = arith.constant 0 : index
    %c17 = arith.constant 17 : index
    %45 = vector.load %arg16[%c0_38, %c17] : memref<132x288xf32, #tpu.memory_space<vmem>>, vector<4x256xf32>
    %c5 = arith.constant 5 : index
    %c0_39 = arith.constant 0 : index
    %c0_40 = arith.constant 0 : index
    %46 = vector.load %arg3[%c5, %c0_39, %c0_40] : memref<9x32x4xf32, #tpu.memory_space<vmem>>, vector<1x32x4xf32>
    %47 = vector.shape_cast %46 : vector<1x32x4xf32> to vector<32x4xf32>
    %cst_41 = arith.constant dense<0.000000e+00> : vector<32x256xf32>
    %48 = tpu.matmul %47, %45, %cst_41 {dimension_numbers = #tpu.dot_dimension_numbers<[1], [0], [0], [1], [0, 0, 1, 1], [], []>} : vector<32x4xf32>, vector<4x256xf32>, vector<32x256xf32> -> vector<32x256xf32>
    %c5_42 = arith.constant 5 : index
    %c0_43 = arith.constant 0 : index
    %49 = vector.load %arg2[%c5_42, %c0_43] : memref<9x256xf32, #tpu.memory_space<vmem>>, vector<1x256xf32>
    %50 = vector.broadcast %49 : vector<1x256xf32> to vector<32x256xf32>
    %51 = arith.mulf %50, %48 : vector<32x256xf32>
    %52 = arith.addf %44, %51 : vector<32x256xf32>
    %c0_44 = arith.constant 0 : index
    %c23 = arith.constant 23 : index
    %53 = vector.load %arg16[%c0_44, %c23] : memref<132x288xf32, #tpu.memory_space<vmem>>, vector<4x256xf32>
    %c6 = arith.constant 6 : index
    %c0_45 = arith.constant 0 : index
    %c0_46 = arith.constant 0 : index
    %54 = vector.load %arg3[%c6, %c0_45, %c0_46] : memref<9x32x4xf32, #tpu.memory_space<vmem>>, vector<1x32x4xf32>
    %55 = vector.shape_cast %54 : vector<1x32x4xf32> to vector<32x4xf32>
    %cst_47 = arith.constant dense<0.000000e+00> : vector<32x256xf32>
    %56 = tpu.matmul %55, %53, %cst_47 {dimension_numbers = #tpu.dot_dimension_numbers<[1], [0], [0], [1], [0, 0, 1, 1], [], []>} : vector<32x4xf32>, vector<4x256xf32>, vector<32x256xf32> -> vector<32x256xf32>
    %c6_48 = arith.constant 6 : index
    %c0_49 = arith.constant 0 : index
    %57 = vector.load %arg2[%c6_48, %c0_49] : memref<9x256xf32, #tpu.memory_space<vmem>>, vector<1x256xf32>
    %58 = vector.broadcast %57 : vector<1x256xf32> to vector<32x256xf32>
    %59 = arith.mulf %58, %56 : vector<32x256xf32>
    %60 = arith.addf %52, %59 : vector<32x256xf32>
    %c0_50 = arith.constant 0 : index
    %c24 = arith.constant 24 : index
    %61 = vector.load %arg16[%c0_50, %c24] : memref<132x288xf32, #tpu.memory_space<vmem>>, vector<4x256xf32>
    %c7_51 = arith.constant 7 : index
    %c0_52 = arith.constant 0 : index
    %c0_53 = arith.constant 0 : index
    %62 = vector.load %arg3[%c7_51, %c0_52, %c0_53] : memref<9x32x4xf32, #tpu.memory_space<vmem>>, vector<1x32x4xf32>
    %63 = vector.shape_cast %62 : vector<1x32x4xf32> to vector<32x4xf32>
    %cst_54 = arith.constant dense<0.000000e+00> : vector<32x256xf32>
    %64 = tpu.matmul %63, %61, %cst_54 {dimension_numbers = #tpu.dot_dimension_numbers<[1], [0], [0], [1], [0, 0, 1, 1], [], []>} : vector<32x4xf32>, vector<4x256xf32>, vector<32x256xf32> -> vector<32x256xf32>
    %c7_55 = arith.constant 7 : index
    %c0_56 = arith.constant 0 : index
    %65 = vector.load %arg2[%c7_55, %c0_56] : memref<9x256xf32, #tpu.memory_space<vmem>>, vector<1x256xf32>
    %66 = vector.broadcast %65 : vector<1x256xf32> to vector<32x256xf32>
    %67 = arith.mulf %66, %64 : vector<32x256xf32>
    %68 = arith.addf %60, %67 : vector<32x256xf32>
    %c0_57 = arith.constant 0 : index
    %c25 = arith.constant 25 : index
    %69 = vector.load %arg16[%c0_57, %c25] : memref<132x288xf32, #tpu.memory_space<vmem>>, vector<4x256xf32>
    %c8_58 = arith.constant 8 : index
    %c0_59 = arith.constant 0 : index
    %c0_60 = arith.constant 0 : index
    %70 = vector.load %arg3[%c8_58, %c0_59, %c0_60] : memref<9x32x4xf32, #tpu.memory_space<vmem>>, vector<1x32x4xf32>
    %71 = vector.shape_cast %70 : vector<1x32x4xf32> to vector<32x4xf32>
    %cst_61 = arith.constant dense<0.000000e+00> : vector<32x256xf32>
    %72 = tpu.matmul %71, %69, %cst_61 {dimension_numbers = #tpu.dot_dimension_numbers<[1], [0], [0], [1], [0, 0, 1, 1], [], []>} : vector<32x4xf32>, vector<4x256xf32>, vector<32x256xf32> -> vector<32x256xf32>
    %c8_62 = arith.constant 8 : index
    %c0_63 = arith.constant 0 : index
    %73 = vector.load %arg2[%c8_62, %c0_63] : memref<9x256xf32, #tpu.memory_space<vmem>>, vector<1x256xf32>
    %74 = vector.broadcast %73 : vector<1x256xf32> to vector<32x256xf32>
    %75 = arith.mulf %74, %72 : vector<32x256xf32>
    %76 = arith.addf %68, %75 : vector<32x256xf32>
    %c0_64 = arith.constant 0 : index
    %c0_65 = arith.constant 0 : index
    %77 = vector.load %arg4[%c0_64, %c0_65] : memref<32x1xf32, #tpu.memory_space<vmem>>, vector<32x1xf32>
    %78 = vector.broadcast %77 : vector<32x1xf32> to vector<32x256xf32>
    %79 = arith.addf %76, %78 : vector<32x256xf32>
    %cst_66 = arith.constant 0.000000e+00 : f32
    %80 = vector.broadcast %cst_66 : f32 to vector<32x256xf32>
    %81 = arith.cmpf oge, %79, %80 : vector<32x256xf32>
    %cst_67 = arith.constant 2.000000e-01 : f32
    %82 = vector.broadcast %cst_67 : f32 to vector<32x256xf32>
    %83 = arith.mulf %82, %79 : vector<32x256xf32>
    %84 = arith.select %81, %79, %83 : vector<32x256xi1>, vector<32x256xf32>
    %c4_68 = arith.constant 4 : index
    %c16_69 = arith.constant 16 : index
    %85 = vector.load %arg16[%c4_68, %c16_69] : memref<132x288xf32, #tpu.memory_space<vmem>>, vector<32x256xf32>
    tpu.vector_store %arg16[%c4_68, %c16_69], %84 {strides = array<i32>} : memref<132x288xf32, #tpu.memory_space<vmem>>, vector<32x256xf32>,
    %cst_70 = arith.constant 0.000000e+00 : f32
    %86 = vector.broadcast %cst_70 : f32 to vector<32x256xf32>
    %c0_71 = arith.constant 0 : index
    %c7_72 = arith.constant 7 : index
    %87 = vector.load %arg16[%c0_71, %c7_72] : memref<132x288xf32, #tpu.memory_space<vmem>>, vector<36x256xf32>
    %c0_73 = arith.constant 0 : index
    %c0_74 = arith.constant 0 : index
    %c0_75 = arith.constant 0 : index
    %88 = vector.load %arg5[%c0_73, %c0_74, %c0_75] : memref<9x32x36xf32, #tpu.memory_space<vmem>>, vector<1x32x36xf32>
    %89 = vector.shape_cast %88 : vector<1x32x36xf32> to vector<32x36xf32>
    %cst_76 = arith.constant dense<0.000000e+00> : vector<32x256xf32>
    %90 = tpu.matmul %89, %87, %cst_76 {dimension_numbers = #tpu.dot_dimension_numbers<[1], [0], [0], [1], [0, 0, 1, 1], [], []>} : vector<32x36xf32>, vector<36x256xf32>, vector<32x256xf32> -> vector<32x256xf32>
    %c0_77 = arith.constant 0 : index
    %c0_78 = arith.constant 0 : index
    %91 = vector.load %arg2[%c0_77, %c0_78] : memref<9x256xf32, #tpu.memory_space<vmem>>, vector<1x256xf32>
    %92 = vector.broadcast %91 : vector<1x256xf32> to vector<32x256xf32>
    %93 = arith.mulf %92, %90 : vector<32x256xf32>
    %94 = arith.addf %86, %93 : vector<32x256xf32>
    %c0_79 = arith.constant 0 : index
    %c8_80 = arith.constant 8 : index
    %95 = vector.load %arg16[%c0_79, %c8_80] : memref<132x288xf32, #tpu.memory_space<vmem>>, vector<36x256xf32>
    %c1_81 = arith.constant 1 : index
    %c0_82 = arith.constant 0 : index
    %c0_83 = arith.constant 0 : index
    %96 = vector.load %arg5[%c1_81, %c0_82, %c0_83] : memref<9x32x36xf32, #tpu.memory_space<vmem>>, vector<1x32x36xf32>
    %97 = vector.shape_cast %96 : vector<1x32x36xf32> to vector<32x36xf32>
    %cst_84 = arith.constant dense<0.000000e+00> : vector<32x256xf32>
    %98 = tpu.matmul %97, %95, %cst_84 {dimension_numbers = #tpu.dot_dimension_numbers<[1], [0], [0], [1], [0, 0, 1, 1], [], []>} : vector<32x36xf32>, vector<36x256xf32>, vector<32x256xf32> -> vector<32x256xf32>
    %c1_85 = arith.constant 1 : index
    %c0_86 = arith.constant 0 : index
    %99 = vector.load %arg2[%c1_85, %c0_86] : memref<9x256xf32, #tpu.memory_space<vmem>>, vector<1x256xf32>
    %100 = vector.broadcast %99 : vector<1x256xf32> to vector<32x256xf32>
    %101 = arith.mulf %100, %98 : vector<32x256xf32>
    %102 = arith.addf %94, %101 : vector<32x256xf32>
    %c0_87 = arith.constant 0 : index
    %c9_88 = arith.constant 9 : index
    %103 = vector.load %arg16[%c0_87, %c9_88] : memref<132x288xf32, #tpu.memory_space<vmem>>, vector<36x256xf32>
    %c2_89 = arith.constant 2 : index
    %c0_90 = arith.constant 0 : index
    %c0_91 = arith.constant 0 : index
    %104 = vector.load %arg5[%c2_89, %c0_90, %c0_91] : memref<9x32x36xf32, #tpu.memory_space<vmem>>, vector<1x32x36xf32>
    %105 = vector.shape_cast %104 : vector<1x32x36xf32> to vector<32x36xf32>
    %cst_92 = arith.constant dense<0.000000e+00> : vector<32x256xf32>
    %106 = tpu.matmul %105, %103, %cst_92 {dimension_numbers = #tpu.dot_dimension_numbers<[1], [0], [0], [1], [0, 0, 1, 1], [], []>} : vector<32x36xf32>, vector<36x256xf32>, vector<32x256xf32> -> vector<32x256xf32>
    %c2_93 = arith.constant 2 : index
    %c0_94 = arith.constant 0 : index
    %107 = vector.load %arg2[%c2_93, %c0_94] : memref<9x256xf32, #tpu.memory_space<vmem>>, vector<1x256xf32>
    %108 = vector.broadcast %107 : vector<1x256xf32> to vector<32x256xf32>
    %109 = arith.mulf %108, %106 : vector<32x256xf32>
    %110 = arith.addf %102, %109 : vector<32x256xf32>
    %c0_95 = arith.constant 0 : index
    %c15_96 = arith.constant 15 : index
    %111 = vector.load %arg16[%c0_95, %c15_96] : memref<132x288xf32, #tpu.memory_space<vmem>>, vector<36x256xf32>
    %c3_97 = arith.constant 3 : index
    %c0_98 = arith.constant 0 : index
    %c0_99 = arith.constant 0 : index
    %112 = vector.load %arg5[%c3_97, %c0_98, %c0_99] : memref<9x32x36xf32, #tpu.memory_space<vmem>>, vector<1x32x36xf32>
    %113 = vector.shape_cast %112 : vector<1x32x36xf32> to vector<32x36xf32>
    %cst_100 = arith.constant dense<0.000000e+00> : vector<32x256xf32>
    %114 = tpu.matmul %113, %111, %cst_100 {dimension_numbers = #tpu.dot_dimension_numbers<[1], [0], [0], [1], [0, 0, 1, 1], [], []>} : vector<32x36xf32>, vector<36x256xf32>, vector<32x256xf32> -> vector<32x256xf32>
    %c3_101 = arith.constant 3 : index
    %c0_102 = arith.constant 0 : index
    %115 = vector.load %arg2[%c3_101, %c0_102] : memref<9x256xf32, #tpu.memory_space<vmem>>, vector<1x256xf32>
    %116 = vector.broadcast %115 : vector<1x256xf32> to vector<32x256xf32>
    %117 = arith.mulf %116, %114 : vector<32x256xf32>
    %118 = arith.addf %110, %117 : vector<32x256xf32>
    %c0_103 = arith.constant 0 : index
    %c16_104 = arith.constant 16 : index
    %119 = vector.load %arg16[%c0_103, %c16_104] : memref<132x288xf32, #tpu.memory_space<vmem>>, vector<36x256xf32>
    %c4_105 = arith.constant 4 : index
    %c0_106 = arith.constant 0 : index
    %c0_107 = arith.constant 0 : index
    %120 = vector.load %arg5[%c4_105, %c0_106, %c0_107] : memref<9x32x36xf32, #tpu.memory_space<vmem>>, vector<1x32x36xf32>
    %121 = vector.shape_cast %120 : vector<1x32x36xf32> to vector<32x36xf32>
    %cst_108 = arith.constant dense<0.000000e+00> : vector<32x256xf32>
    %122 = tpu.matmul %121, %119, %cst_108 {dimension_numbers = #tpu.dot_dimension_numbers<[1], [0], [0], [1], [0, 0, 1, 1], [], []>} : vector<32x36xf32>, vector<36x256xf32>, vector<32x256xf32> -> vector<32x256xf32>
    %123 = arith.addf %118, %122 : vector<32x256xf32>
    %c0_109 = arith.constant 0 : index
    %c17_110 = arith.constant 17 : index
    %124 = vector.load %arg16[%c0_109, %c17_110] : memref<132x288xf32, #tpu.memory_space<vmem>>, vector<36x256xf32>
    %c5_111 = arith.constant 5 : index
    %c0_112 = arith.constant 0 : index
    %c0_113 = arith.constant 0 : index
    %125 = vector.load %arg5[%c5_111, %c0_112, %c0_113] : memref<9x32x36xf32, #tpu.memory_space<vmem>>, vector<1x32x36xf32>
    %126 = vector.shape_cast %125 : vector<1x32x36xf32> to vector<32x36xf32>
    %cst_114 = arith.constant dense<0.000000e+00> : vector<32x256xf32>
    %127 = tpu.matmul %126, %124, %cst_114 {dimension_numbers = #tpu.dot_dimension_numbers<[1], [0], [0], [1], [0, 0, 1, 1], [], []>} : vector<32x36xf32>, vector<36x256xf32>, vector<32x256xf32> -> vector<32x256xf32>
    %c5_115 = arith.constant 5 : index
    %c0_116 = arith.constant 0 : index
    %128 = vector.load %arg2[%c5_115, %c0_116] : memref<9x256xf32, #tpu.memory_space<vmem>>, vector<1x256xf32>
    %129 = vector.broadcast %128 : vector<1x256xf32> to vector<32x256xf32>
    %130 = arith.mulf %129, %127 : vector<32x256xf32>
    %131 = arith.addf %123, %130 : vector<32x256xf32>
    %c0_117 = arith.constant 0 : index
    %c23_118 = arith.constant 23 : index
    %132 = vector.load %arg16[%c0_117, %c23_118] : memref<132x288xf32, #tpu.memory_space<vmem>>, vector<36x256xf32>
    %c6_119 = arith.constant 6 : index
    %c0_120 = arith.constant 0 : index
    %c0_121 = arith.constant 0 : index
    %133 = vector.load %arg5[%c6_119, %c0_120, %c0_121] : memref<9x32x36xf32, #tpu.memory_space<vmem>>, vector<1x32x36xf32>
    %134 = vector.shape_cast %133 : vector<1x32x36xf32> to vector<32x36xf32>
    %cst_122 = arith.constant dense<0.000000e+00> : vector<32x256xf32>
    %135 = tpu.matmul %134, %132, %cst_122 {dimension_numbers = #tpu.dot_dimension_numbers<[1], [0], [0], [1], [0, 0, 1, 1], [], []>} : vector<32x36xf32>, vector<36x256xf32>, vector<32x256xf32> -> vector<32x256xf32>
    %c6_123 = arith.constant 6 : index
    %c0_124 = arith.constant 0 : index
    %136 = vector.load %arg2[%c6_123, %c0_124] : memref<9x256xf32, #tpu.memory_space<vmem>>, vector<1x256xf32>
    %137 = vector.broadcast %136 : vector<1x256xf32> to vector<32x256xf32>
    %138 = arith.mulf %137, %135 : vector<32x256xf32>
    %139 = arith.addf %131, %138 : vector<32x256xf32>
    %c0_125 = arith.constant 0 : index
    %c24_126 = arith.constant 24 : index
    %140 = vector.load %arg16[%c0_125, %c24_126] : memref<132x288xf32, #tpu.memory_space<vmem>>, vector<36x256xf32>
    %c7_127 = arith.constant 7 : index
    %c0_128 = arith.constant 0 : index
    %c0_129 = arith.constant 0 : index
    %141 = vector.load %arg5[%c7_127, %c0_128, %c0_129] : memref<9x32x36xf32, #tpu.memory_space<vmem>>, vector<1x32x36xf32>
    %142 = vector.shape_cast %141 : vector<1x32x36xf32> to vector<32x36xf32>
    %cst_130 = arith.constant dense<0.000000e+00> : vector<32x256xf32>
    %143 = tpu.matmul %142, %140, %cst_130 {dimension_numbers = #tpu.dot_dimension_numbers<[1], [0], [0], [1], [0, 0, 1, 1], [], []>} : vector<32x36xf32>, vector<36x256xf32>, vector<32x256xf32> -> vector<32x256xf32>
    %c7_131 = arith.constant 7 : index
    %c0_132 = arith.constant 0 : index
    %144 = vector.load %arg2[%c7_131, %c0_132] : memref<9x256xf32, #tpu.memory_space<vmem>>, vector<1x256xf32>
    %145 = vector.broadcast %144 : vector<1x256xf32> to vector<32x256xf32>
    %146 = arith.mulf %145, %143 : vector<32x256xf32>
    %147 = arith.addf %139, %146 : vector<32x256xf32>
    %c0_133 = arith.constant 0 : index
    %c25_134 = arith.constant 25 : index
    %148 = vector.load %arg16[%c0_133, %c25_134] : memref<132x288xf32, #tpu.memory_space<vmem>>, vector<36x256xf32>
    %c8_135 = arith.constant 8 : index
    %c0_136 = arith.constant 0 : index
    %c0_137 = arith.constant 0 : index
    %149 = vector.load %arg5[%c8_135, %c0_136, %c0_137] : memref<9x32x36xf32, #tpu.memory_space<vmem>>, vector<1x32x36xf32>
    %150 = vector.shape_cast %149 : vector<1x32x36xf32> to vector<32x36xf32>
    %cst_138 = arith.constant dense<0.000000e+00> : vector<32x256xf32>
    %151 = tpu.matmul %150, %148, %cst_138 {dimension_numbers = #tpu.dot_dimension_numbers<[1], [0], [0], [1], [0, 0, 1, 1], [], []>} : vector<32x36xf32>, vector<36x256xf32>, vector<32x256xf32> -> vector<32x256xf32>
    %c8_139 = arith.constant 8 : index
    %c0_140 = arith.constant 0 : index
    %152 = vector.load %arg2[%c8_139, %c0_140] : memref<9x256xf32, #tpu.memory_space<vmem>>, vector<1x256xf32>
    %153 = vector.broadcast %152 : vector<1x256xf32> to vector<32x256xf32>
    %154 = arith.mulf %153, %151 : vector<32x256xf32>
    %155 = arith.addf %147, %154 : vector<32x256xf32>
    %c0_141 = arith.constant 0 : index
    %c0_142 = arith.constant 0 : index
    %156 = vector.load %arg6[%c0_141, %c0_142] : memref<32x1xf32, #tpu.memory_space<vmem>>, vector<32x1xf32>
    %157 = vector.broadcast %156 : vector<32x1xf32> to vector<32x256xf32>
    %158 = arith.addf %155, %157 : vector<32x256xf32>
    %cst_143 = arith.constant 0.000000e+00 : f32
    %159 = vector.broadcast %cst_143 : f32 to vector<32x256xf32>
    %160 = arith.cmpf oge, %158, %159 : vector<32x256xf32>
    %cst_144 = arith.constant 2.000000e-01 : f32
    %161 = vector.broadcast %cst_144 : f32 to vector<32x256xf32>
    %162 = arith.mulf %161, %158 : vector<32x256xf32>
    %163 = arith.select %160, %158, %162 : vector<32x256xi1>, vector<32x256xf32>
    %c36 = arith.constant 36 : index
    %c16_145 = arith.constant 16 : index
    %164 = vector.load %arg16[%c36, %c16_145] : memref<132x288xf32, #tpu.memory_space<vmem>>, vector<32x256xf32>
    tpu.vector_store %arg16[%c36, %c16_145], %163 {strides = array<i32>} : memref<132x288xf32, #tpu.memory_space<vmem>>, vector<32x256xf32>,
    %cst_146 = arith.constant 0.000000e+00 : f32
    %165 = vector.broadcast %cst_146 : f32 to vector<32x256xf32>
    %c0_147 = arith.constant 0 : index
    %c7_148 = arith.constant 7 : index
    %166 = vector.load %arg16[%c0_147, %c7_148] : memref<132x288xf32, #tpu.memory_space<vmem>>, vector<68x256xf32>
    %c0_149 = arith.constant 0 : index
    %c0_150 = arith.constant 0 : index
    %c0_151 = arith.constant 0 : index
    %167 = vector.load %arg7[%c0_149, %c0_150, %c0_151] : memref<9x32x68xf32, #tpu.memory_space<vmem>>, vector<1x32x68xf32>
    %168 = vector.shape_cast %167 : vector<1x32x68xf32> to vector<32x68xf32>
    %cst_152 = arith.constant dense<0.000000e+00> : vector<32x256xf32>
    %169 = tpu.matmul %168, %166, %cst_152 {dimension_numbers = #tpu.dot_dimension_numbers<[1], [0], [0], [1], [0, 0, 1, 1], [], []>} : vector<32x68xf32>, vector<68x256xf32>, vector<32x256xf32> -> vector<32x256xf32>
    %c0_153 = arith.constant 0 : index
    %c0_154 = arith.constant 0 : index
    %170 = vector.load %arg2[%c0_153, %c0_154] : memref<9x256xf32, #tpu.memory_space<vmem>>, vector<1x256xf32>
    %171 = vector.broadcast %170 : vector<1x256xf32> to vector<32x256xf32>
    %172 = arith.mulf %171, %169 : vector<32x256xf32>
    %173 = arith.addf %165, %172 : vector<32x256xf32>
    %c0_155 = arith.constant 0 : index
    %c8_156 = arith.constant 8 : index
    %174 = vector.load %arg16[%c0_155, %c8_156] : memref<132x288xf32, #tpu.memory_space<vmem>>, vector<68x256xf32>
    %c1_157 = arith.constant 1 : index
    %c0_158 = arith.constant 0 : index
    %c0_159 = arith.constant 0 : index
    %175 = vector.load %arg7[%c1_157, %c0_158, %c0_159] : memref<9x32x68xf32, #tpu.memory_space<vmem>>, vector<1x32x68xf32>
    %176 = vector.shape_cast %175 : vector<1x32x68xf32> to vector<32x68xf32>
    %cst_160 = arith.constant dense<0.000000e+00> : vector<32x256xf32>
    %177 = tpu.matmul %176, %174, %cst_160 {dimension_numbers = #tpu.dot_dimension_numbers<[1], [0], [0], [1], [0, 0, 1, 1], [], []>} : vector<32x68xf32>, vector<68x256xf32>, vector<32x256xf32> -> vector<32x256xf32>
    %c1_161 = arith.constant 1 : index
    %c0_162 = arith.constant 0 : index
    %178 = vector.load %arg2[%c1_161, %c0_162] : memref<9x256xf32, #tpu.memory_space<vmem>>, vector<1x256xf32>
    %179 = vector.broadcast %178 : vector<1x256xf32> to vector<32x256xf32>
    %180 = arith.mulf %179, %177 : vector<32x256xf32>
    %181 = arith.addf %173, %180 : vector<32x256xf32>
    %c0_163 = arith.constant 0 : index
    %c9_164 = arith.constant 9 : index
    %182 = vector.load %arg16[%c0_163, %c9_164] : memref<132x288xf32, #tpu.memory_space<vmem>>, vector<68x256xf32>
    %c2_165 = arith.constant 2 : index
    %c0_166 = arith.constant 0 : index
    %c0_167 = arith.constant 0 : index
    %183 = vector.load %arg7[%c2_165, %c0_166, %c0_167] : memref<9x32x68xf32, #tpu.memory_space<vmem>>, vector<1x32x68xf32>
    %184 = vector.shape_cast %183 : vector<1x32x68xf32> to vector<32x68xf32>
    %cst_168 = arith.constant dense<0.000000e+00> : vector<32x256xf32>
    %185 = tpu.matmul %184, %182, %cst_168 {dimension_numbers = #tpu.dot_dimension_numbers<[1], [0], [0], [1], [0, 0, 1, 1], [], []>} : vector<32x68xf32>, vector<68x256xf32>, vector<32x256xf32> -> vector<32x256xf32>
    %c2_169 = arith.constant 2 : index
    %c0_170 = arith.constant 0 : index
    %186 = vector.load %arg2[%c2_169, %c0_170] : memref<9x256xf32, #tpu.memory_space<vmem>>, vector<1x256xf32>
    %187 = vector.broadcast %186 : vector<1x256xf32> to vector<32x256xf32>
    %188 = arith.mulf %187, %185 : vector<32x256xf32>
    %189 = arith.addf %181, %188 : vector<32x256xf32>
    %c0_171 = arith.constant 0 : index
    %c15_172 = arith.constant 15 : index
    %190 = vector.load %arg16[%c0_171, %c15_172] : memref<132x288xf32, #tpu.memory_space<vmem>>, vector<68x256xf32>
    %c3_173 = arith.constant 3 : index
    %c0_174 = arith.constant 0 : index
    %c0_175 = arith.constant 0 : index
    %191 = vector.load %arg7[%c3_173, %c0_174, %c0_175] : memref<9x32x68xf32, #tpu.memory_space<vmem>>, vector<1x32x68xf32>
    %192 = vector.shape_cast %191 : vector<1x32x68xf32> to vector<32x68xf32>
    %cst_176 = arith.constant dense<0.000000e+00> : vector<32x256xf32>
    %193 = tpu.matmul %192, %190, %cst_176 {dimension_numbers = #tpu.dot_dimension_numbers<[1], [0], [0], [1], [0, 0, 1, 1], [], []>} : vector<32x68xf32>, vector<68x256xf32>, vector<32x256xf32> -> vector<32x256xf32>
    %c3_177 = arith.constant 3 : index
    %c0_178 = arith.constant 0 : index
    %194 = vector.load %arg2[%c3_177, %c0_178] : memref<9x256xf32, #tpu.memory_space<vmem>>, vector<1x256xf32>
    %195 = vector.broadcast %194 : vector<1x256xf32> to vector<32x256xf32>
    %196 = arith.mulf %195, %193 : vector<32x256xf32>
    %197 = arith.addf %189, %196 : vector<32x256xf32>
    %c0_179 = arith.constant 0 : index
    %c16_180 = arith.constant 16 : index
    %198 = vector.load %arg16[%c0_179, %c16_180] : memref<132x288xf32, #tpu.memory_space<vmem>>, vector<68x256xf32>
    %c4_181 = arith.constant 4 : index
    %c0_182 = arith.constant 0 : index
    %c0_183 = arith.constant 0 : index
    %199 = vector.load %arg7[%c4_181, %c0_182, %c0_183] : memref<9x32x68xf32, #tpu.memory_space<vmem>>, vector<1x32x68xf32>
    %200 = vector.shape_cast %199 : vector<1x32x68xf32> to vector<32x68xf32>
    %cst_184 = arith.constant dense<0.000000e+00> : vector<32x256xf32>
    %201 = tpu.matmul %200, %198, %cst_184 {dimension_numbers = #tpu.dot_dimension_numbers<[1], [0], [0], [1], [0, 0, 1, 1], [], []>} : vector<32x68xf32>, vector<68x256xf32>, vector<32x256xf32> -> vector<32x256xf32>
    %202 = arith.addf %197, %201 : vector<32x256xf32>
    %c0_185 = arith.constant 0 : index
    %c17_186 = arith.constant 17 : index
    %203 = vector.load %arg16[%c0_185, %c17_186] : memref<132x288xf32, #tpu.memory_space<vmem>>, vector<68x256xf32>
    %c5_187 = arith.constant 5 : index
    %c0_188 = arith.constant 0 : index
    %c0_189 = arith.constant 0 : index
    %204 = vector.load %arg7[%c5_187, %c0_188, %c0_189] : memref<9x32x68xf32, #tpu.memory_space<vmem>>, vector<1x32x68xf32>
    %205 = vector.shape_cast %204 : vector<1x32x68xf32> to vector<32x68xf32>
    %cst_190 = arith.constant dense<0.000000e+00> : vector<32x256xf32>
    %206 = tpu.matmul %205, %203, %cst_190 {dimension_numbers = #tpu.dot_dimension_numbers<[1], [0], [0], [1], [0, 0, 1, 1], [], []>} : vector<32x68xf32>, vector<68x256xf32>, vector<32x256xf32> -> vector<32x256xf32>
    %c5_191 = arith.constant 5 : index
    %c0_192 = arith.constant 0 : index
    %207 = vector.load %arg2[%c5_191, %c0_192] : memref<9x256xf32, #tpu.memory_space<vmem>>, vector<1x256xf32>
    %208 = vector.broadcast %207 : vector<1x256xf32> to vector<32x256xf32>
    %209 = arith.mulf %208, %206 : vector<32x256xf32>
    %210 = arith.addf %202, %209 : vector<32x256xf32>
    %c0_193 = arith.constant 0 : index
    %c23_194 = arith.constant 23 : index
    %211 = vector.load %arg16[%c0_193, %c23_194] : memref<132x288xf32, #tpu.memory_space<vmem>>, vector<68x256xf32>
    %c6_195 = arith.constant 6 : index
    %c0_196 = arith.constant 0 : index
    %c0_197 = arith.constant 0 : index
    %212 = vector.load %arg7[%c6_195, %c0_196, %c0_197] : memref<9x32x68xf32, #tpu.memory_space<vmem>>, vector<1x32x68xf32>
    %213 = vector.shape_cast %212 : vector<1x32x68xf32> to vector<32x68xf32>
    %cst_198 = arith.constant dense<0.000000e+00> : vector<32x256xf32>
    %214 = tpu.matmul %213, %211, %cst_198 {dimension_numbers = #tpu.dot_dimension_numbers<[1], [0], [0], [1], [0, 0, 1, 1], [], []>} : vector<32x68xf32>, vector<68x256xf32>, vector<32x256xf32> -> vector<32x256xf32>
    %c6_199 = arith.constant 6 : index
    %c0_200 = arith.constant 0 : index
    %215 = vector.load %arg2[%c6_199, %c0_200] : memref<9x256xf32, #tpu.memory_space<vmem>>, vector<1x256xf32>
    %216 = vector.broadcast %215 : vector<1x256xf32> to vector<32x256xf32>
    %217 = arith.mulf %216, %214 : vector<32x256xf32>
    %218 = arith.addf %210, %217 : vector<32x256xf32>
    %c0_201 = arith.constant 0 : index
    %c24_202 = arith.constant 24 : index
    %219 = vector.load %arg16[%c0_201, %c24_202] : memref<132x288xf32, #tpu.memory_space<vmem>>, vector<68x256xf32>
    %c7_203 = arith.constant 7 : index
    %c0_204 = arith.constant 0 : index
    %c0_205 = arith.constant 0 : index
    %220 = vector.load %arg7[%c7_203, %c0_204, %c0_205] : memref<9x32x68xf32, #tpu.memory_space<vmem>>, vector<1x32x68xf32>
    %221 = vector.shape_cast %220 : vector<1x32x68xf32> to vector<32x68xf32>
    %cst_206 = arith.constant dense<0.000000e+00> : vector<32x256xf32>
    %222 = tpu.matmul %221, %219, %cst_206 {dimension_numbers = #tpu.dot_dimension_numbers<[1], [0], [0], [1], [0, 0, 1, 1], [], []>} : vector<32x68xf32>, vector<68x256xf32>, vector<32x256xf32> -> vector<32x256xf32>
    %c7_207 = arith.constant 7 : index
    %c0_208 = arith.constant 0 : index
    %223 = vector.load %arg2[%c7_207, %c0_208] : memref<9x256xf32, #tpu.memory_space<vmem>>, vector<1x256xf32>
    %224 = vector.broadcast %223 : vector<1x256xf32> to vector<32x256xf32>
    %225 = arith.mulf %224, %222 : vector<32x256xf32>
    %226 = arith.addf %218, %225 : vector<32x256xf32>
    %c0_209 = arith.constant 0 : index
    %c25_210 = arith.constant 25 : index
    %227 = vector.load %arg16[%c0_209, %c25_210] : memref<132x288xf32, #tpu.memory_space<vmem>>, vector<68x256xf32>
    %c8_211 = arith.constant 8 : index
    %c0_212 = arith.constant 0 : index
    %c0_213 = arith.constant 0 : index
    %228 = vector.load %arg7[%c8_211, %c0_212, %c0_213] : memref<9x32x68xf32, #tpu.memory_space<vmem>>, vector<1x32x68xf32>
    %229 = vector.shape_cast %228 : vector<1x32x68xf32> to vector<32x68xf32>
    %cst_214 = arith.constant dense<0.000000e+00> : vector<32x256xf32>
    %230 = tpu.matmul %229, %227, %cst_214 {dimension_numbers = #tpu.dot_dimension_numbers<[1], [0], [0], [1], [0, 0, 1, 1], [], []>} : vector<32x68xf32>, vector<68x256xf32>, vector<32x256xf32> -> vector<32x256xf32>
    %c8_215 = arith.constant 8 : index
    %c0_216 = arith.constant 0 : index
    %231 = vector.load %arg2[%c8_215, %c0_216] : memref<9x256xf32, #tpu.memory_space<vmem>>, vector<1x256xf32>
    %232 = vector.broadcast %231 : vector<1x256xf32> to vector<32x256xf32>
    %233 = arith.mulf %232, %230 : vector<32x256xf32>
    %234 = arith.addf %226, %233 : vector<32x256xf32>
    %c0_217 = arith.constant 0 : index
    %c0_218 = arith.constant 0 : index
    %235 = vector.load %arg8[%c0_217, %c0_218] : memref<32x1xf32, #tpu.memory_space<vmem>>, vector<32x1xf32>
    %236 = vector.broadcast %235 : vector<32x1xf32> to vector<32x256xf32>
    %237 = arith.addf %234, %236 : vector<32x256xf32>
    %cst_219 = arith.constant 0.000000e+00 : f32
    %238 = vector.broadcast %cst_219 : f32 to vector<32x256xf32>
    %239 = arith.cmpf oge, %237, %238 : vector<32x256xf32>
    %cst_220 = arith.constant 2.000000e-01 : f32
    %240 = vector.broadcast %cst_220 : f32 to vector<32x256xf32>
    %241 = arith.mulf %240, %237 : vector<32x256xf32>
    %242 = arith.select %239, %237, %241 : vector<32x256xi1>, vector<32x256xf32>
    %c68 = arith.constant 68 : index
    %c16_221 = arith.constant 16 : index
    %243 = vector.load %arg16[%c68, %c16_221] : memref<132x288xf32, #tpu.memory_space<vmem>>, vector<32x256xf32>
    tpu.vector_store %arg16[%c68, %c16_221], %242 {strides = array<i32>} : memref<132x288xf32, #tpu.memory_space<vmem>>, vector<32x256xf32>,
    %cst_222 = arith.constant 0.000000e+00 : f32
    %244 = vector.broadcast %cst_222 : f32 to vector<32x256xf32>
    %c0_223 = arith.constant 0 : index
    %c7_224 = arith.constant 7 : index
    %245 = vector.load %arg16[%c0_223, %c7_224] : memref<132x288xf32, #tpu.memory_space<vmem>>, vector<100x256xf32>
    %c0_225 = arith.constant 0 : index
    %c0_226 = arith.constant 0 : index
    %c0_227 = arith.constant 0 : index
    %246 = vector.load %arg9[%c0_225, %c0_226, %c0_227] : memref<9x32x100xf32, #tpu.memory_space<vmem>>, vector<1x32x100xf32>
    %247 = vector.shape_cast %246 : vector<1x32x100xf32> to vector<32x100xf32>
    %cst_228 = arith.constant dense<0.000000e+00> : vector<32x256xf32>
    %248 = tpu.matmul %247, %245, %cst_228 {dimension_numbers = #tpu.dot_dimension_numbers<[1], [0], [0], [1], [0, 0, 1, 1], [], []>} : vector<32x100xf32>, vector<100x256xf32>, vector<32x256xf32> -> vector<32x256xf32>
    %c0_229 = arith.constant 0 : index
    %c0_230 = arith.constant 0 : index
    %249 = vector.load %arg2[%c0_229, %c0_230] : memref<9x256xf32, #tpu.memory_space<vmem>>, vector<1x256xf32>
    %250 = vector.broadcast %249 : vector<1x256xf32> to vector<32x256xf32>
    %251 = arith.mulf %250, %248 : vector<32x256xf32>
    %252 = arith.addf %244, %251 : vector<32x256xf32>
    %c0_231 = arith.constant 0 : index
    %c8_232 = arith.constant 8 : index
    %253 = vector.load %arg16[%c0_231, %c8_232] : memref<132x288xf32, #tpu.memory_space<vmem>>, vector<100x256xf32>
    %c1_233 = arith.constant 1 : index
    %c0_234 = arith.constant 0 : index
    %c0_235 = arith.constant 0 : index
    %254 = vector.load %arg9[%c1_233, %c0_234, %c0_235] : memref<9x32x100xf32, #tpu.memory_space<vmem>>, vector<1x32x100xf32>
    %255 = vector.shape_cast %254 : vector<1x32x100xf32> to vector<32x100xf32>
    %cst_236 = arith.constant dense<0.000000e+00> : vector<32x256xf32>
    %256 = tpu.matmul %255, %253, %cst_236 {dimension_numbers = #tpu.dot_dimension_numbers<[1], [0], [0], [1], [0, 0, 1, 1], [], []>} : vector<32x100xf32>, vector<100x256xf32>, vector<32x256xf32> -> vector<32x256xf32>
    %c1_237 = arith.constant 1 : index
    %c0_238 = arith.constant 0 : index
    %257 = vector.load %arg2[%c1_237, %c0_238] : memref<9x256xf32, #tpu.memory_space<vmem>>, vector<1x256xf32>
    %258 = vector.broadcast %257 : vector<1x256xf32> to vector<32x256xf32>
    %259 = arith.mulf %258, %256 : vector<32x256xf32>
    %260 = arith.addf %252, %259 : vector<32x256xf32>
    %c0_239 = arith.constant 0 : index
    %c9_240 = arith.constant 9 : index
    %261 = vector.load %arg16[%c0_239, %c9_240] : memref<132x288xf32, #tpu.memory_space<vmem>>, vector<100x256xf32>
    %c2_241 = arith.constant 2 : index
    %c0_242 = arith.constant 0 : index
    %c0_243 = arith.constant 0 : index
    %262 = vector.load %arg9[%c2_241, %c0_242, %c0_243] : memref<9x32x100xf32, #tpu.memory_space<vmem>>, vector<1x32x100xf32>
    %263 = vector.shape_cast %262 : vector<1x32x100xf32> to vector<32x100xf32>
    %cst_244 = arith.constant dense<0.000000e+00> : vector<32x256xf32>
    %264 = tpu.matmul %263, %261, %cst_244 {dimension_numbers = #tpu.dot_dimension_numbers<[1], [0], [0], [1], [0, 0, 1, 1], [], []>} : vector<32x100xf32>, vector<100x256xf32>, vector<32x256xf32> -> vector<32x256xf32>
    %c2_245 = arith.constant 2 : index
    %c0_246 = arith.constant 0 : index
    %265 = vector.load %arg2[%c2_245, %c0_246] : memref<9x256xf32, #tpu.memory_space<vmem>>, vector<1x256xf32>
    %266 = vector.broadcast %265 : vector<1x256xf32> to vector<32x256xf32>
    %267 = arith.mulf %266, %264 : vector<32x256xf32>
    %268 = arith.addf %260, %267 : vector<32x256xf32>
    %c0_247 = arith.constant 0 : index
    %c15_248 = arith.constant 15 : index
    %269 = vector.load %arg16[%c0_247, %c15_248] : memref<132x288xf32, #tpu.memory_space<vmem>>, vector<100x256xf32>
    %c3_249 = arith.constant 3 : index
    %c0_250 = arith.constant 0 : index
    %c0_251 = arith.constant 0 : index
    %270 = vector.load %arg9[%c3_249, %c0_250, %c0_251] : memref<9x32x100xf32, #tpu.memory_space<vmem>>, vector<1x32x100xf32>
    %271 = vector.shape_cast %270 : vector<1x32x100xf32> to vector<32x100xf32>
    %cst_252 = arith.constant dense<0.000000e+00> : vector<32x256xf32>
    %272 = tpu.matmul %271, %269, %cst_252 {dimension_numbers = #tpu.dot_dimension_numbers<[1], [0], [0], [1], [0, 0, 1, 1], [], []>} : vector<32x100xf32>, vector<100x256xf32>, vector<32x256xf32> -> vector<32x256xf32>
    %c3_253 = arith.constant 3 : index
    %c0_254 = arith.constant 0 : index
    %273 = vector.load %arg2[%c3_253, %c0_254] : memref<9x256xf32, #tpu.memory_space<vmem>>, vector<1x256xf32>
    %274 = vector.broadcast %273 : vector<1x256xf32> to vector<32x256xf32>
    %275 = arith.mulf %274, %272 : vector<32x256xf32>
    %276 = arith.addf %268, %275 : vector<32x256xf32>
    %c0_255 = arith.constant 0 : index
    %c16_256 = arith.constant 16 : index
    %277 = vector.load %arg16[%c0_255, %c16_256] : memref<132x288xf32, #tpu.memory_space<vmem>>, vector<100x256xf32>
    %c4_257 = arith.constant 4 : index
    %c0_258 = arith.constant 0 : index
    %c0_259 = arith.constant 0 : index
    %278 = vector.load %arg9[%c4_257, %c0_258, %c0_259] : memref<9x32x100xf32, #tpu.memory_space<vmem>>, vector<1x32x100xf32>
    %279 = vector.shape_cast %278 : vector<1x32x100xf32> to vector<32x100xf32>
    %cst_260 = arith.constant dense<0.000000e+00> : vector<32x256xf32>
    %280 = tpu.matmul %279, %277, %cst_260 {dimension_numbers = #tpu.dot_dimension_numbers<[1], [0], [0], [1], [0, 0, 1, 1], [], []>} : vector<32x100xf32>, vector<100x256xf32>, vector<32x256xf32> -> vector<32x256xf32>
    %281 = arith.addf %276, %280 : vector<32x256xf32>
    %c0_261 = arith.constant 0 : index
    %c17_262 = arith.constant 17 : index
    %282 = vector.load %arg16[%c0_261, %c17_262] : memref<132x288xf32, #tpu.memory_space<vmem>>, vector<100x256xf32>
    %c5_263 = arith.constant 5 : index
    %c0_264 = arith.constant 0 : index
    %c0_265 = arith.constant 0 : index
    %283 = vector.load %arg9[%c5_263, %c0_264, %c0_265] : memref<9x32x100xf32, #tpu.memory_space<vmem>>, vector<1x32x100xf32>
    %284 = vector.shape_cast %283 : vector<1x32x100xf32> to vector<32x100xf32>
    %cst_266 = arith.constant dense<0.000000e+00> : vector<32x256xf32>
    %285 = tpu.matmul %284, %282, %cst_266 {dimension_numbers = #tpu.dot_dimension_numbers<[1], [0], [0], [1], [0, 0, 1, 1], [], []>} : vector<32x100xf32>, vector<100x256xf32>, vector<32x256xf32> -> vector<32x256xf32>
    %c5_267 = arith.constant 5 : index
    %c0_268 = arith.constant 0 : index
    %286 = vector.load %arg2[%c5_267, %c0_268] : memref<9x256xf32, #tpu.memory_space<vmem>>, vector<1x256xf32>
    %287 = vector.broadcast %286 : vector<1x256xf32> to vector<32x256xf32>
    %288 = arith.mulf %287, %285 : vector<32x256xf32>
    %289 = arith.addf %281, %288 : vector<32x256xf32>
    %c0_269 = arith.constant 0 : index
    %c23_270 = arith.constant 23 : index
    %290 = vector.load %arg16[%c0_269, %c23_270] : memref<132x288xf32, #tpu.memory_space<vmem>>, vector<100x256xf32>
    %c6_271 = arith.constant 6 : index
    %c0_272 = arith.constant 0 : index
    %c0_273 = arith.constant 0 : index
    %291 = vector.load %arg9[%c6_271, %c0_272, %c0_273] : memref<9x32x100xf32, #tpu.memory_space<vmem>>, vector<1x32x100xf32>
    %292 = vector.shape_cast %291 : vector<1x32x100xf32> to vector<32x100xf32>
    %cst_274 = arith.constant dense<0.000000e+00> : vector<32x256xf32>
    %293 = tpu.matmul %292, %290, %cst_274 {dimension_numbers = #tpu.dot_dimension_numbers<[1], [0], [0], [1], [0, 0, 1, 1], [], []>} : vector<32x100xf32>, vector<100x256xf32>, vector<32x256xf32> -> vector<32x256xf32>
    %c6_275 = arith.constant 6 : index
    %c0_276 = arith.constant 0 : index
    %294 = vector.load %arg2[%c6_275, %c0_276] : memref<9x256xf32, #tpu.memory_space<vmem>>, vector<1x256xf32>
    %295 = vector.broadcast %294 : vector<1x256xf32> to vector<32x256xf32>
    %296 = arith.mulf %295, %293 : vector<32x256xf32>
    %297 = arith.addf %289, %296 : vector<32x256xf32>
    %c0_277 = arith.constant 0 : index
    %c24_278 = arith.constant 24 : index
    %298 = vector.load %arg16[%c0_277, %c24_278] : memref<132x288xf32, #tpu.memory_space<vmem>>, vector<100x256xf32>
    %c7_279 = arith.constant 7 : index
    %c0_280 = arith.constant 0 : index
    %c0_281 = arith.constant 0 : index
    %299 = vector.load %arg9[%c7_279, %c0_280, %c0_281] : memref<9x32x100xf32, #tpu.memory_space<vmem>>, vector<1x32x100xf32>
    %300 = vector.shape_cast %299 : vector<1x32x100xf32> to vector<32x100xf32>
    %cst_282 = arith.constant dense<0.000000e+00> : vector<32x256xf32>
    %301 = tpu.matmul %300, %298, %cst_282 {dimension_numbers = #tpu.dot_dimension_numbers<[1], [0], [0], [1], [0, 0, 1, 1], [], []>} : vector<32x100xf32>, vector<100x256xf32>, vector<32x256xf32> -> vector<32x256xf32>
    %c7_283 = arith.constant 7 : index
    %c0_284 = arith.constant 0 : index
    %302 = vector.load %arg2[%c7_283, %c0_284] : memref<9x256xf32, #tpu.memory_space<vmem>>, vector<1x256xf32>
    %303 = vector.broadcast %302 : vector<1x256xf32> to vector<32x256xf32>
    %304 = arith.mulf %303, %301 : vector<32x256xf32>
    %305 = arith.addf %297, %304 : vector<32x256xf32>
    %c0_285 = arith.constant 0 : index
    %c25_286 = arith.constant 25 : index
    %306 = vector.load %arg16[%c0_285, %c25_286] : memref<132x288xf32, #tpu.memory_space<vmem>>, vector<100x256xf32>
    %c8_287 = arith.constant 8 : index
    %c0_288 = arith.constant 0 : index
    %c0_289 = arith.constant 0 : index
    %307 = vector.load %arg9[%c8_287, %c0_288, %c0_289] : memref<9x32x100xf32, #tpu.memory_space<vmem>>, vector<1x32x100xf32>
    %308 = vector.shape_cast %307 : vector<1x32x100xf32> to vector<32x100xf32>
    %cst_290 = arith.constant dense<0.000000e+00> : vector<32x256xf32>
    %309 = tpu.matmul %308, %306, %cst_290 {dimension_numbers = #tpu.dot_dimension_numbers<[1], [0], [0], [1], [0, 0, 1, 1], [], []>} : vector<32x100xf32>, vector<100x256xf32>, vector<32x256xf32> -> vector<32x256xf32>
    %c8_291 = arith.constant 8 : index
    %c0_292 = arith.constant 0 : index
    %310 = vector.load %arg2[%c8_291, %c0_292] : memref<9x256xf32, #tpu.memory_space<vmem>>, vector<1x256xf32>
    %311 = vector.broadcast %310 : vector<1x256xf32> to vector<32x256xf32>
    %312 = arith.mulf %311, %309 : vector<32x256xf32>
    %313 = arith.addf %305, %312 : vector<32x256xf32>
    %c0_293 = arith.constant 0 : index
    %c0_294 = arith.constant 0 : index
    %314 = vector.load %arg10[%c0_293, %c0_294] : memref<32x1xf32, #tpu.memory_space<vmem>>, vector<32x1xf32>
    %315 = vector.broadcast %314 : vector<32x1xf32> to vector<32x256xf32>
    %316 = arith.addf %313, %315 : vector<32x256xf32>
    %cst_295 = arith.constant 0.000000e+00 : f32
    %317 = vector.broadcast %cst_295 : f32 to vector<32x256xf32>
    %318 = arith.cmpf oge, %316, %317 : vector<32x256xf32>
    %cst_296 = arith.constant 2.000000e-01 : f32
    %319 = vector.broadcast %cst_296 : f32 to vector<32x256xf32>
    %320 = arith.mulf %319, %316 : vector<32x256xf32>
    %321 = arith.select %318, %316, %320 : vector<32x256xi1>, vector<32x256xf32>
    %c100 = arith.constant 100 : index
    %c16_297 = arith.constant 16 : index
    %322 = vector.load %arg16[%c100, %c16_297] : memref<132x288xf32, #tpu.memory_space<vmem>>, vector<32x256xf32>
    tpu.vector_store %arg16[%c100, %c16_297], %321 {strides = array<i32>} : memref<132x288xf32, #tpu.memory_space<vmem>>, vector<32x256xf32>,
    %c0_298 = arith.constant 0 : index
    %c0_299 = arith.constant 0 : index
    %323 = vector.load %arg12[%c0_298, %c0_299] : memref<8x132xf32, #tpu.memory_space<vmem>>, vector<8x132xf32>
    %c0_300 = arith.constant 0 : index
    %c16_301 = arith.constant 16 : index
    %324 = vector.load %arg16[%c0_300, %c16_301] : memref<132x288xf32, #tpu.memory_space<vmem>>, vector<132x256xf32>
    %cst_302 = arith.constant dense<0.000000e+00> : vector<8x256xf32>
    %325 = tpu.matmul %323, %324, %cst_302 {dimension_numbers = #tpu.dot_dimension_numbers<[1], [0], [0], [1], [0, 0, 1, 1], [], []>} : vector<8x132xf32>, vector<132x256xf32>, vector<8x256xf32> -> vector<8x256xf32>
    %c0_303 = arith.constant 0 : index
    %c0_304 = arith.constant 0 : index
    %326 = vector.load %arg14[%c0_303, %c0_304] : memref<8x1xf32, #tpu.memory_space<vmem>>, vector<8x1xf32>
    %327 = vector.broadcast %326 : vector<8x1xf32> to vector<8x256xf32>
    %328 = arith.addf %325, %327 : vector<8x256xf32>
    %c0_305 = arith.constant 0 : index
    %c0_306 = arith.constant 0 : index
    %329 = vector.load %arg11[%c0_305, %c0_306] : memref<8x132xf32, #tpu.memory_space<vmem>>, vector<8x132xf32>
    %c0_307 = arith.constant 0 : index
    %c16_308 = arith.constant 16 : index
    %330 = vector.load %arg16[%c0_307, %c16_308] : memref<132x288xf32, #tpu.memory_space<vmem>>, vector<132x192xf32>
    %cst_309 = arith.constant dense<0.000000e+00> : vector<8x192xf32>
    %331 = tpu.matmul %329, %330, %cst_309 {dimension_numbers = #tpu.dot_dimension_numbers<[1], [0], [0], [1], [0, 0, 1, 1], [], []>} : vector<8x132xf32>, vector<132x192xf32>, vector<8x192xf32> -> vector<8x192xf32>
    %c0_310 = arith.constant 0 : index
    %c0_311 = arith.constant 0 : index
    %332 = vector.load %arg13[%c0_310, %c0_311] : memref<8x132xf32, #tpu.memory_space<vmem>>, vector<8x132xf32>
    %c0_312 = arith.constant 0 : index
    %c80 = arith.constant 80 : index
    %333 = vector.load %arg16[%c0_312, %c80] : memref<132x288xf32, #tpu.memory_space<vmem>>, vector<132x192xf32>
    %cst_313 = arith.constant dense<0.000000e+00> : vector<8x192xf32>
    %334 = tpu.matmul %332, %333, %cst_313 {dimension_numbers = #tpu.dot_dimension_numbers<[1], [0], [0], [1], [0, 0, 1, 1], [], []>} : vector<8x132xf32>, vector<132x192xf32>, vector<8x192xf32> -> vector<8x192xf32>
    %cst_314 = arith.constant 0.000000e+00 : f32
    %335 = vector.broadcast %cst_314 : f32 to vector<8x64xf32>
    %336 = tpu.concatenate %335, %331 in 1 : vector<8x64xf32>, vector<8x192xf32> -> vector<8x256xf32>
    %337 = arith.addf %328, %336 : vector<8x256xf32>
    %338 = tpu.concatenate %334, %335 in 1 : vector<8x192xf32>, vector<8x64xf32> -> vector<8x256xf32>
    %339 = arith.addf %337, %338 : vector<8x256xf32>
    %340 = vector.extract_strided_slice %339 {offsets = [0, 0], sizes = [4, 256], strides = [1, 1]} : vector<8x256xf32> to vector<4x256xf32>
    %c0_315 = arith.constant 0 : index
    %c0_316 = arith.constant 0 : index
    %c0_317 = arith.constant 0 : index
    %341 = vector.load %arg1[%c0_315, %c0_316, %c0_317] : memref<1x4x256xf32, #tpu.memory_space<vmem>>, vector<1x4x256xf32>
    %342 = vector.shape_cast %341 : vector<1x4x256xf32> to vector<4x256xf32>
    %343 = arith.addf %340, %342 : vector<4x256xf32>
    %c0_318 = arith.constant 0 : index
    %c0_319 = arith.constant 0 : index
    %c0_320 = arith.constant 0 : index
    %344 = vector.load %arg15[%c0_318, %c0_319, %c0_320] : memref<1x4x256xf32, #tpu.memory_space<vmem>>, vector<1x4x256xf32>
    %345 = vector.shape_cast %344 : vector<1x4x256xf32> to vector<4x256xf32>
    %346 = vector.shape_cast %343 : vector<4x256xf32> to vector<1x4x256xf32>
    tpu.vector_store %arg15[%c0_318, %c0_319, %c0_320], %346 {strides = array<i32>} : memref<1x4x256xf32, #tpu.memory_space<vmem>>, vector<1x4x256xf32>,
    return
  }
  func.func @transform_0(%arg0: i32) -> (i32, i32, i32) {
    %c0_i32 = arith.constant 0 : i32
    %c0_i32_0 = arith.constant 0 : i32
    %c0_i32_1 = arith.constant 0 : i32
    return %arg0, %c0_i32, %c0_i32_0 : i32, i32, i32
  }
  func.func @transform_1(%arg0: i32) -> (i32, i32) {
    %c0_i32 = arith.constant 0 : i32
    %c0_i32_0 = arith.constant 0 : i32
    %c0_i32_1 = arith.constant 0 : i32
    return %c0_i32, %c0_i32_0 : i32, i32
  }
  func.func @transform_2(%arg0: i32) -> (i32, i32, i32) {
    %c0_i32 = arith.constant 0 : i32
    %c0_i32_0 = arith.constant 0 : i32
    %c0_i32_1 = arith.constant 0 : i32
    %c0_i32_2 = arith.constant 0 : i32
    return %c0_i32, %c0_i32_0, %c0_i32_1 : i32, i32, i32
  }
  func.func @transform_3(%arg0: i32) -> (i32, i32) {
    %c0_i32 = arith.constant 0 : i32
    %c0_i32_0 = arith.constant 0 : i32
    %c0_i32_1 = arith.constant 0 : i32
    return %c0_i32, %c0_i32_0 : i32, i32
  }
  func.func @transform_4(%arg0: i32) -> (i32, i32, i32) {
    %c0_i32 = arith.constant 0 : i32
    %c0_i32_0 = arith.constant 0 : i32
    %c0_i32_1 = arith.constant 0 : i32
    %c0_i32_2 = arith.constant 0 : i32
    return %c0_i32, %c0_i32_0, %c0_i32_1 : i32, i32, i32
  }
  func.func @transform_5(%arg0: i32) -> (i32, i32) {
    %c0_i32 = arith.constant 0 : i32
    %c0_i32_0 = arith.constant 0 : i32
    %c0_i32_1 = arith.constant 0 : i32
    return %c0_i32, %c0_i32_0 : i32, i32
  }
  func.func @transform_6(%arg0: i32) -> (i32, i32, i32) {
    %c0_i32 = arith.constant 0 : i32
    %c0_i32_0 = arith.constant 0 : i32
    %c0_i32_1 = arith.constant 0 : i32
    %c0_i32_2 = arith.constant 0 : i32
    return %c0_i32, %c0_i32_0, %c0_i32_1 : i32, i32, i32
  }
  func.func @transform_7(%arg0: i32) -> (i32, i32) {
    %c0_i32 = arith.constant 0 : i32
    %c0_i32_0 = arith.constant 0 : i32
    %c0_i32_1 = arith.constant 0 : i32
    return %c0_i32, %c0_i32_0 : i32, i32
  }
  func.func @transform_8(%arg0: i32) -> (i32, i32, i32) {
    %c0_i32 = arith.constant 0 : i32
    %c0_i32_0 = arith.constant 0 : i32
    %c0_i32_1 = arith.constant 0 : i32
    %c0_i32_2 = arith.constant 0 : i32
    return %c0_i32, %c0_i32_0, %c0_i32_1 : i32, i32, i32
  }
  func.func @transform_9(%arg0: i32) -> (i32, i32) {
    %c0_i32 = arith.constant 0 : i32
    %c0_i32_0 = arith.constant 0 : i32
    %c0_i32_1 = arith.constant 0 : i32
    return %c0_i32, %c0_i32_0 : i32, i32
  }
  func.func @transform_10(%arg0: i32) -> (i32, i32) {
    %c0_i32 = arith.constant 0 : i32
    %c0_i32_0 = arith.constant 0 : i32
    %c0_i32_1 = arith.constant 0 : i32
    return %c0_i32, %c0_i32_0 : i32, i32
  }
  func.func @transform_11(%arg0: i32) -> (i32, i32) {
    %c0_i32 = arith.constant 0 : i32
    %c0_i32_0 = arith.constant 0 : i32
    %c0_i32_1 = arith.constant 0 : i32
    return %c0_i32, %c0_i32_0 : i32, i32
  }
  func.func @transform_12(%arg0: i32) -> (i32, i32) {
    %c0_i32 = arith.constant 0 : i32
    %c0_i32_0 = arith.constant 0 : i32
    %c0_i32_1 = arith.constant 0 : i32
    return %c0_i32, %c0_i32_0 : i32, i32
  }
  func.func @transform_13(%arg0: i32) -> (i32, i32) {
    %c0_i32 = arith.constant 0 : i32
    %c0_i32_0 = arith.constant 0 : i32
    %c0_i32_1 = arith.constant 0 : i32
    return %c0_i32, %c0_i32_0 : i32, i32
  }
  func.func @transform_14(%arg0: i32) -> (i32, i32, i32) {
    %c0_i32 = arith.constant 0 : i32
    %c0_i32_0 = arith.constant 0 : i32
    %c0_i32_1 = arith.constant 0 : i32
    return %arg0, %c0_i32, %c0_i32_0 : i32, i32, i32
  }
}

</mosaic_0001>

<bundles_post_ra>
// kernel: d2dt_input_forward.1
= control target key start
LH: loop header
LB: loop body
LE: loop exit
PB: predicated region body
PF: predicated region fallthrough
CT: control target
= control target key end

     0   :  { %19 = vsyncpa [#allocation4], 0  ;;  %s10163_s29 = smov 0   ;;  %s16943_s0 = inlined_call_operand.vmem [shape: f32[2,4,256], index: 0, kind: input, shape index: {}]   ;;  %s16944_s1 = inlined_call_operand.hbm [shape: f32[9,256], index: 1, kind: input, shape index: {}]   ;;  %s16945_s2 = inlined_call_operand.vmem [shape: f32[9,32,4], index: 2, kind: input, shape index: {}]   ;;  %s16946_s3 = inlined_call_operand.vmem [shape: f32[32,1], index: 3, kind: input, shape index: {}]   ;;  %s16947_s4 = inlined_call_operand.vmem [shape: f32[9,32,36], index: 4, kind: input, shape index: {}]   ;;  %s16948_s5 = inlined_call_operand.vmem [shape: f32[32,1], index: 5, kind: input, shape index: {}]   ;;  %s16949_s6 = inlined_call_operand.vmem [shape: f32[9,32,68], index: 6, kind: input, shape index: {}]   ;;  %s16950_s7 = inlined_call_operand.vmem [shape: f32[32,1], index: 7, kind: input, shape index: {}]   ;;  %s16951_s8 = inlined_call_operand.vmem [shape: f32[9,32,100], index: 8, kind: input, shape index: {}]   ;;  %s16952_s9 = inlined_call_operand.vmem [shape: f32[32,1], index: 9, kind: input, shape index: {}]   ;;  %s16953_s10 = inlined_call_operand.vmem [shape: f32[8,132], index: 10, kind: input, shape index: {}]   ;;  %s16954_s11 = inlined_call_operand.vmem [shape: f32[8,132], index: 11, kind: input, shape index: {}]   ;;  %s16955_s12 = inlined_call_operand.vmem [shape: f32[8,132], index: 12, kind: input, shape index: {}]   ;;  %s16956_s13 = inlined_call_operand.vmem [shape: f32[8,1], index: 13, kind: input, shape index: {}]   ;;  %s16957_s14 = inlined_call_operand.vmem [shape: f32[2,4,256], index: 14, kind: output, shape index: {}]  }
   0x1 LB: > { %s10169_s30 = sadd.s32 4294967295, %s10069_s29   ;;  %p9558_p0 = scmp.ge.s32.totalorder %s10069_s29, 1  ;;  %s10069_s29 = sphi %s10163_s29, %s25_s29  }
   0x2   : > { %p355_p1 = scmp.lt.s32.totalorder %s10069_s29, 3  ;;  %s10071_s15 = smov [#allocation3]  }
   0x3   : > { %s367_s16 = sshll.u32 %s10071_s15, 4  ;;  %p9934_p3 = scmp.eq.s32.totalorder %s10169_s30, 0  ;;  %s368_s16 = int_to_ptr.vmem [resolvable:$true] %s367_s16 }
   0x4   : > { %p10173_p2 = pnand %p9558_p0, %p355_p1  ;;  %s10044_s18 = scalar_lea.vmem %s368_s16, 512 }
   0x5   : > { %p10045_p7 = scmp.ne.s32.totalorder %s368_s16, %s10044_s18  ;;  %p10052_p10 = scmp.lt.s32.totalorder %s368_s16, %s368_s16 }
   0x6   : > { %p9930_p4 = pneg %p10173_p2  ;;  %p10053_p11 = scmp.lt.s32.totalorder %s10044_s18, %s10044_s18 }
   0x8   : > { %p9931_p5 = pnand %p9934_p3, %p9930_p4  ;;  %p10054_p12 = por %p10053_p11, %p10052_p10 }
   0xa   : > { %p10035_p6 = pneg %p9931_p5 }
   0xc   : > { %p10047_p8 = pnand %p10045_p7, %p10035_p6 }
   0xe   : > { %p10048_p9 = pneg %p10047_p8 }
  0x10   : > { %p10055_p13 = pnand %p10054_p12, %p10048_p9 }
  0x12   : > { %10058 = shalt.err (!%p10055_p13)
}
  0x13   : > { %s10072_s19 = smov 256   ;;  %s10073_s20 = smov 16  }
  0x14   : > { %9933 = dma.hbm_to_vmem [thread:$0]  (!%p9931_p5), %s16944_s1, 512, %s368_s16, [#allocation4], %s10072_s19, %s10072_s19, %s10073_s20  }
  0x15   : > { %427 = sbr.rel (%p10173_p2) target bundleno = 4062 (0xfde), region = 76 }
  0x1a   : > { %10064 = dma.done.wait (%p9934_p3), [#allocation4], 512  }
  0x1b   : > { %10066 = vsyncadd (%p9934_p3), [#allocation4], 4294966784  ;;  %p473_p0 = scmp.lt.s32.totalorder %s10169_s30, 1  ;;  %vm483_vm0 = vcmask 130048   ;;  %v10074_v0 = vmov 0   ;;  %vm500_vm1 = vcmask 125952  }
  0x1c   : > { %9961 = vset.pattern.permute.xlu1 %v10074_v0  ;;  %9962 = vset.pattern.permute.xlu0 %v10074_v0  ;;  %vm502_vm2 = vcmask 261248   ;;  %v16965_v1 = vmov 0.0   ;;  %v1853_v3 = vld [vmem:[%s16946_s3] sm:$0xff]  ;;  %s10076_s15 = smov 16   ;;  %v1855_v5 = vld [vmem:[%s16946_s3 + $0x10] sm:$0xff]  ;;  %v1856_v6 = vld [vmem:[%s16946_s3 + $0x18] sm:$0xff] }
  0x1d   : > { %s18633_s30 = smov (!%p473_p0, %s10169_s30), 1  ;;  %484 = vst.msk [vmem:[#allocation2] sm:$0xff] %vm483_vm0, %v16965_v1  ;;  %485 = vst.msk [vmem:[#allocation2 + $0x18] sm:$0xff] %vm483_vm0, %v16965_v1  ;;  %637 = vmatprep.mubr.f32.mxu0 %v16965_v1  ;;  %643 = vmatprep.mubr.f32.mxu1 %v16965_v1  ;;  %v1854_v7 = vld [vmem:[%s16946_s3 + $0x8] sm:$0xff]  ;;  %v3673_v8 = vld [vmem:[%s16948_s5] sm:$0xff]  ;;  %vm532_vm3 = vcmask 1043584  }
  0x1e   : > { %486 = vst.msk [vmem:[#allocation2 + $0x30] sm:$0xff] %vm483_vm0, %v16965_v1  ;;  %487 = vst.msk [vmem:[#allocation2 + $0x48] sm:$0xff] %vm483_vm0, %v16965_v1  ;;  %s16958_s23 = sshll.u32 %s18633_s30, 3  ;;  %1859 = vperm.xlu1 %9961, %v1853_v3   ;;  %v3674_v9 = vld [vmem:[%s16948_s5 + $0x8] sm:$0xff]  ;;  %v3675_v10 = vld [vmem:[%s16948_s5 + $0x10] sm:$0xff]  ;;  %s17111_s16 = smov 120  }
  0x1f   : > { %488 = vst.msk [vmem:[#allocation2 + $0x60] sm:$0xff] %vm483_vm0, %v16965_v1  ;;  %489 = vst.msk [vmem:[#allocation2 + $0x78] sm:$0xff] %vm483_vm0, %v16965_v1  ;;  %s10269_s26 = scalar_lea.vmem %s16943_s0, %s16958_s23  ;;  %v3676_v11 = vld [vmem:[%s16948_s5 + $0x18] sm:$0xff]  ;;  %v5875_v12 = vld [vmem:[%s16950_s7 + $0x8] sm:$0xff]  ;;  %s17113_s17 = smov 121   ;;  %vm552_vm4 = vcmask 990208  }
  0x20   : > { %490 = vst.msk [vmem:[#allocation2 + $0x90] sm:$0xff] %vm483_vm0, %v16965_v1  ;;  %491 = vst.msk [vmem:[#allocation2 + $0xa8] sm:$0xff] %vm483_vm0, %v16965_v1  ;;  %v521_v2 = vld [vmem:[%s10269_s26] sm:$0xff]  ;;  %v5877_v14 = vld [vmem:[%s16950_s7 + $0x18] sm:$0xff]  ;;  %s17107_s18 = smov 113   ;;  %s17049_s19 = smov 119  }
  0x21   : > { %492 = vst.msk [vmem:[#allocation2 + $0xc0] sm:$0xff] %vm483_vm0, %v16965_v1  ;;  %493 = vst.msk [vmem:[#allocation2 + $0xd8] sm:$0xff] %vm483_vm0, %v16965_v1  ;;  %v10275_v4 = vcombine.high %v521_v2, %v521_v2  ;;  %524 = vrot.lane.b32.xlu0 %v521_v2, %s10076_s15  ;;  %v5874_v13 = vld [vmem:[%s16950_s7] sm:$0xff]  ;;  %v5876_v15 = vld [vmem:[%s16950_s7 + $0x10] sm:$0xff]  ;;  %s17047_s20 = smov 111   ;;  %s17044_s21 = smov 112  }
  0x22   : > { %494 = vst.msk [vmem:[#allocation2 + $0xf0] sm:$0xff] %vm483_vm0, %v16965_v1  ;;  %495 = vst.msk [vmem:[#allocation2 + $0x108] sm:$0xff] %vm483_vm0, %v16965_v1  ;;  %1869 = vperm.xlu1 %9961, %v1855_v5   ;;  %s16961_s22 = smov 104   ;;  %s16963_s24 = smov 105   ;;  %vm568_vm5 = vcmask 1043456   ;;  %vm849_vm6 = vcmask 973824  }
  0x23   : > { %496 = vst.msk [vmem:[#allocation2 + $0x120] sm:$0xff] %vm483_vm0, %v16965_v1  ;;  %497 = vst.msk [vmem:[#allocation2 + $0x138] sm:$0xff] %vm483_vm0, %v16965_v1  ;;  %s16959_s25 = smov 103   ;;  %v539_v56 = vld [vmem:[%s16945_s2] sm:$0xff]  ;;  %vm16985_vm7 = vcmask 31744   ;;  %v540_v57 = vld [vmem:[%s16945_s2 + $0x8] sm:$0xff] }
  0x24   : > { %498 = vst.msk [vmem:[#allocation2 + $0x150] sm:$0xff] %vm483_vm0, %v16965_v1  ;;  %499 = vst.msk [vmem:[#allocation2 + $0x168] sm:$0xff] %vm483_vm0, %v16965_v1  ;;  %vm701_vm8 = vcmask 982016   ;;  %vm17109_vm9 = vcmask 916480   ;;  %vm17110_vm10 = vcmask 924672   ;;  %v541_v2 = vld [vmem:[%s16945_s2 + $0x10] sm:$0xff] }
  0x25   : > { %503 = vst.msk [vmem:[#allocation2 + $0x10] sm:$0xff] %vm502_vm2, %v16965_v1  ;;  %504 = vst.msk [vmem:[#allocation2 + $0x28] sm:$0xff] %vm502_vm2, %v16965_v1  ;;  %526 = vrot.lane.b32.xlu0 %v10275_v4, %s10076_s15  ;;  %v9583_v3 = vld [vmem:[%s16945_s2 + $0x40] sm:$0xff]  ;;  %vm17052_vm11 = vcmask 859136   ;;  %vm17051_vm12 = vcmask 908288   ;;  %vm16986_vm13 = vcmask 842752  }
  0x26   : > { %501 = vst.msk [vmem:[#allocation2 + $0x180] sm:$0xf] %vm500_vm1, %v16965_v1  ;;  %17192 = vst [vmem:[#allocation6_spill] sm:$0xff] %v10275_v4  ;;  %1874 = vperm.xlu1 %9961, %v1856_v6   ;;  %vm17046_vm14 = vcmask 850944   ;;  %s17231_s27 = smov 103   ;;  %s17542_s28 = smov 112  }
  0x27   : > { %505 = vst.msk [vmem:[#allocation2 + $0x40] sm:$0xff] %vm502_vm2, %v16965_v1  ;;  %506 = vst.msk [vmem:[#allocation2 + $0x58] sm:$0xff] %vm502_vm2, %v16965_v1  ;;  %v10685_v4 = vld [vmem:[#allocation3 + $0x10] ss:$8 sm:$0x3]  ;;  %s18029_s23 = smov 113  }
  0x28   : > { %507 = vst.msk [vmem:[#allocation2 + $0x70] sm:$0xff] %vm502_vm2, %v16965_v1  ;;  %508 = vst.msk [vmem:[#allocation2 + $0x88] sm:$0xff] %vm502_vm2, %v16965_v1 }
  0x29   : > { %509 = vst.msk [vmem:[#allocation2 + $0xa0] sm:$0xff] %vm502_vm2, %v16965_v1  ;;  %510 = vst.msk [vmem:[#allocation2 + $0xb8] sm:$0xff] %vm502_vm2, %v16965_v1  ;;  %1864 = vperm.xlu0 %9962, %v1854_v7  }
  0x2a   : > { %511 = vst.msk [vmem:[#allocation2 + $0xd0] sm:$0xff] %vm502_vm2, %v16965_v1  ;;  %512 = vst.msk [vmem:[#allocation2 + $0xe8] sm:$0xff] %vm502_vm2, %v16965_v1  ;;  %3679 = vperm.xlu1 %9961, %v3673_v8  }
  0x2b   : > { %513 = vst.msk [vmem:[#allocation2 + $0x100] sm:$0xff] %vm502_vm2, %v16965_v1  ;;  %514 = vst.msk [vmem:[#allocation2 + $0x118] sm:$0xff] %vm502_vm2, %v16965_v1 }
  0x2c   : > { %515 = vst.msk [vmem:[#allocation2 + $0x130] sm:$0xff] %vm502_vm2, %v16965_v1  ;;  %516 = vst.msk [vmem:[#allocation2 + $0x148] sm:$0xff] %vm502_vm2, %v16965_v1 }
  0x2d   : > { %517 = vst.msk [vmem:[#allocation2 + $0x160] sm:$0xff] %vm502_vm2, %v16965_v1  ;;  %518 = vst.msk [vmem:[#allocation2 + $0x178] sm:$0xff] %vm502_vm2, %v16965_v1  ;;  %3684 = vperm.xlu0 %9962, %v3674_v9  }
  0x2e   : > { %3689 = vperm.xlu1 %9961, %v3675_v10   ;;  %v542_v10 = vld [vmem:[%s16945_s2 + $0x18] sm:$0xff] }
  0x31   : > { %3694 = vperm.xlu0 %9962, %v3676_v11   ;;  %v9584_v11 = vld [vmem:[%s16945_s2 + $0x48] sm:$0xff] }
  0x32   : > { %5885 = vperm.xlu1 %9961, %v5875_v12   ;;  %v9573_v12 = vld [vmem:[%s16945_s2 + $0x20] sm:$0xff] }
  0x35   : > { %5880 = vperm.xlu0 %9962, %v5874_v13   ;;  %v9585_v13 = vld [vmem:[%s16945_s2 + $0x50] sm:$0xff] }
  0x36   : > { %5895 = vperm.xlu1 %9961, %v5877_v14  }
  0x39   : > { %5890 = vperm.xlu0 %9962, %v5876_v15  }
  0x93   : > { %v525_v16 = vpop.permute.xlu0 %524 }
  0x94   : > { %533 = vst.msk [vmem:[#allocation2] sm:$0xf] %vm532_vm3, %v525_v16 }
  0x97   : > { %v527_v17 = vpop.permute.xlu0 %526 }
  0x98   : > { %v528_v18 = vsel %vm483_vm0, %v525_v16, %v527_v17  ;;  %535 = vst.msk [vmem:[#allocation2 + $0x10] sm:$0xf] %vm500_vm1, %v527_v17  ;;  %v9574_v17 = vld [vmem:[%s16945_s2 + $0x28] sm:$0xff] }
  0x99   : > { %534 = vst [vmem:[#allocation2 + $0x8] sm:$0xf] %v528_v18  ;;  %v10343_v22 = vpop.permute.xlu1 %1859  ;;  %v9586_v18 = vld [vmem:[%s16945_s2 + $0x58] sm:$0xff] }
  0x9a   : > { %17193 = vst [vmem:[#allocation7_spill] sm:$0xff] %v10343_v22 }
  0x9b   : > { %v536_v19 = vld [vmem:[#allocation2] sm:$0xf] }
  0x9c   : > { %695 = vrot.lane.b32.xlu1 %v536_v19, %s17111_s16  ;;  %546 = vrot.lane.b32.xlu0 %v536_v19, %s17113_s17 }
  0x9d   : > { %v10345_v23 = vpop.permute.xlu1 %1869 }
  0x9e   : > { %17194 = vst [vmem:[#allocation8_spill] sm:$0xff] %v10345_v23 }
  0x9f   : > { %v538_v20 = vld [vmem:[#allocation2 + $0x10] sm:$0xf] }
  0xa0   : > { %991 = vrot.lane.b32.xlu1 %v536_v19, %s17107_s18  ;;  %843 = vrot.lane.b32.xlu0 %v536_v19, %s17049_s19  ;;  %v537_v21 = vld [vmem:[#allocation2 + $0x8] sm:$0xf] }
  0xa1   : > { %v10347_v24 = vpop.permute.xlu1 %1874 }
  0xa2   : > { %17195 = vst [vmem:[#allocation9_spill] sm:$0xff] %v10347_v24 }
  0xa4   : > { %1266 = vrot.lane.b32.xlu1 %v536_v19, %s17047_s20  ;;  %1139 = vrot.lane.b32.xlu0 %v536_v19, %s17044_s21  ;;  %v10349_v25 = vpop.permute.xlu0 %1864 }
  0xa5   : > { %17196 = vst [vmem:[#allocation10_spill] sm:$0xff] %v10349_v25  ;;  %v10351_v26 = vpop.permute.xlu1 %3679 }
  0xa6   : > { %17197 = vst [vmem:[#allocation11_spill] sm:$0xff] %v10351_v26 }
  0xa8   : > { %1562 = vrot.lane.b32.xlu1 %v536_v19, %s16961_s22  ;;  %1414 = vrot.lane.b32.xlu0 %v536_v19, %s16963_s24  ;;  %v10353_v27 = vpop.permute.xlu0 %3684 }
  0xa9   : > { %17198 = vst [vmem:[#allocation12_spill] sm:$0xff] %v10353_v27  ;;  %v10355_v28 = vpop.permute.xlu1 %3689 }
  0xaa   : > { %17199 = vst [vmem:[#allocation13_spill] sm:$0xff] %v10355_v28 }
  0xac   : > { %550 = vrot.lane.b32.xlu1 %v538_v20, %s17113_s17  ;;  %1710 = vrot.lane.b32.xlu0 %v536_v19, %s16959_s25  ;;  %v10357_v29 = vpop.permute.xlu0 %3694  ;;  %v9575_v19 = vld [vmem:[%s16945_s2 + $0x30] sm:$0xff] }
  0xad   : > { %17200 = vst [vmem:[#allocation14_spill] sm:$0xff] %v10357_v29  ;;  %v10359_v30 = vpop.permute.xlu1 %5885 }
  0xae   : > { %17201 = vst [vmem:[#allocation15_spill] sm:$0xff] %v10359_v30 }
  0xb0   : > { %847 = vrot.lane.b32.xlu1 %v538_v20, %s17049_s19  ;;  %699 = vrot.lane.b32.xlu0 %v538_v20, %s17111_s16  ;;  %v10361_v31 = vpop.permute.xlu0 %5880 }
  0xb1   : > { %17202 = vst [vmem:[#allocation16_spill] sm:$0xff] %v10361_v31  ;;  %v10363_v32 = vpop.permute.xlu1 %5895 }
  0xb2   : > { %17203 = vst [vmem:[#allocation17_spill] sm:$0xff] %v10363_v32 }
  0xb4   : > { %1143 = vrot.lane.b32.xlu1 %v538_v20, %s17044_s21  ;;  %995 = vrot.lane.b32.xlu0 %v538_v20, %s17107_s18  ;;  %v10365_v33 = vpop.permute.xlu0 %5890 }
  0xb5   : > { %17204 = vst [vmem:[#allocation18_spill] sm:$0xff] %v10365_v33 }
  0xb8   : > { %1418 = vrot.lane.b32.xlu1 %v538_v20, %s16963_s24  ;;  %1270 = vrot.lane.b32.xlu0 %v538_v20, %s17047_s20 }
  0xbc   : > { %1714 = vrot.lane.b32.xlu1 %v538_v20, %s16959_s25  ;;  %1566 = vrot.lane.b32.xlu0 %v538_v20, %s16961_s22  ;;  %v9603_v20 = vld [vmem:[%s16945_s2 + $0x80] sm:$0xff] }
  0xc0   : > { %548 = vrot.lane.b32.xlu1 %v537_v21, %s17113_s17  ;;  %845 = vrot.lane.b32.xlu0 %v537_v21, %s17049_s19 }
  0xc4   : > { %697 = vrot.lane.b32.xlu1 %v537_v21, %s17111_s16  ;;  %1141 = vrot.lane.b32.xlu0 %v537_v21, %s17044_s21 }
  0xc8   : > { %993 = vrot.lane.b32.xlu1 %v537_v21, %s17107_s18  ;;  %1416 = vrot.lane.b32.xlu0 %v537_v21, %s16963_s24  ;;  %s17230_s24 = smov 104  }
  0xcc   : > { %1268 = vrot.lane.b32.xlu1 %v537_v21, %s17047_s20  ;;  %1712 = vrot.lane.b32.xlu0 %v537_v21, %s16959_s25  ;;  %s17541_s25 = smov 111  }
  0xd0   : > { %1564 = vrot.lane.b32.xlu1 %v537_v21, %s16961_s22  ;;  %s17229_s22 = smov 105  }
 0x10e   : > { %v696_v34 = vpop.permute.xlu1 %695  ;;  %v547_v35 = vpop.permute.xlu0 %546 }
 0x112   : > { %v10367_v36 = vpop.permute.xlu1 %991  ;;  %v844_v37 = vpop.permute.xlu0 %843 }
 0x116   : > { %v10369_v38 = vpop.permute.xlu1 %1266  ;;  %v1140_v39 = vpop.permute.xlu0 %1139 }
 0x11a   : > { %v10371_v40 = vpop.permute.xlu1 %1562  ;;  %v10373_v41 = vpop.permute.xlu0 %1414 }
 0x11e   : > { %v551_v42 = vpop.permute.xlu1 %550  ;;  %v10375_v43 = vpop.permute.xlu0 %1710 }
 0x122   : > { %v848_v44 = vpop.permute.xlu1 %847  ;;  %v700_v45 = vpop.permute.xlu0 %699 }
 0x126   : > { %v1144_v46 = vpop.permute.xlu1 %1143  ;;  %v996_v47 = vpop.permute.xlu0 %995 }
 0x12a   : > { %v1419_v48 = vpop.permute.xlu1 %1418  ;;  %v10377_v49 = vpop.permute.xlu0 %1270 }
 0x12e   : > { %v10379_v50 = vpop.permute.xlu1 %1714  ;;  %v10381_v51 = vpop.permute.xlu0 %1566 }
 0x132   : > { %v549_v52 = vpop.permute.xlu1 %548  ;;  %v846_v53 = vpop.permute.xlu0 %845 }
 0x133   : > { %v554_v54 = vsel %vm552_vm4, %v549_v52, %v551_v42  ;;  %v553_v55 = vsel %vm552_vm4, %v547_v35, %v549_v52  ;;  %v851_v59 = vsel %vm849_vm6, %v846_v53, %v848_v44  ;;  %v850_v61 = vsel %vm849_vm6, %v844_v37, %v846_v53  ;;  %v9604_v37 = vld [vmem:[%s16945_s2 + $0x88] sm:$0xff]  ;;  %v9625_v52 = vld [vmem:[%s16945_s2 + $0xd0] sm:$0xff] }
 0x134   : > { %9567 = vmatprep.subr.msk.mxu0 %vm568_vm5, %v554_v54  ;;  %9924 = vmatprep.subr.msk.mxu1 %vm568_vm5, %v554_v54  ;;  %v9614_v54 = vld [vmem:[%s16945_s2 + $0xa8] sm:$0xff] }
 0x135   : > { %9568 = vmatpush1.msk.msra.mxu0 %vm568_vm5, %v553_v55  ;;  %9925 = vmatpush1.msk.msra.mxu1 %vm568_vm5, %v553_v55  ;;  %v9626_v55 = vld [vmem:[%s16945_s2 + $0xd8] sm:$0xff] }
 0x136   : > { %v698_v58 = vpop.permute.xlu1 %697  ;;  %9569 = vmatmul.mubr.msk.f32.vlgmr.msra.gmra.mxu0 %vm16985_vm7, %v539_v56  ;;  %9570 = vmatmul.mubr.msk.f32.vlgmr.msra.gmra.mxu1 %vm16985_vm7, %v540_v57  ;;  %v1142_v60 = vpop.permute.xlu0 %1141  ;;  %v9643_v56 = vld [vmem:[%s16945_s2 + $0x100] sm:$0xff]  ;;  %v9616_v57 = vld [vmem:[%s16945_s2 + $0xb8] sm:$0xff] }
 0x137   : > { %v702_v62 = vsel %vm701_vm8, %v696_v34, %v698_v58  ;;  %9587 = vmatprep.subr.msk.mxu0 %vm568_vm5, %v851_v59  ;;  %v703_v63 = vsel %vm701_vm8, %v698_v58, %v700_v45  ;;  %v1147_v0 = vsel %vm17109_vm9, %v1142_v60, %v1144_v46  ;;  %649 = vmatprep.mubr.f32.mxu1 %v16965_v1  ;;  %v9594_v46 = vld [vmem:[%s16945_s2 + $0x68] sm:$0xff]  ;;  %v9633_v59 = vld [vmem:[%s16945_s2 + $0xe0] sm:$0xff] }
 0x138   : > { %9588 = vmatpush1.msk.msra.mxu0 %vm568_vm5, %v850_v61  ;;  %9577 = vmatprep.subr.msk.mxu1 %vm568_vm5, %v703_v63  ;;  %v1146_v7 = vsel %vm17109_vm9, %v1140_v39, %v1142_v60  ;;  %v9593_v39 = vld [vmem:[%s16945_s2 + $0x60] sm:$0xff]  ;;  %v9644_v58 = vld [vmem:[%s16945_s2 + $0x108] sm:$0xff]  ;;  %v9645_v60 = vld [vmem:[%s16945_s2 + $0x110] sm:$0xff] }
 0x139   : > { %9607 = vmatprep.subr.msk.mxu0 %vm568_vm5, %v1147_v0  ;;  %9578 = vmatpush1.msk.msra.mxu1 %vm568_vm5, %v702_v62  ;;  %v9634_v61 = vld [vmem:[%s16945_s2 + $0xe8] sm:$0xff]  ;;  %v9646_v62 = vld [vmem:[%s16945_s2 + $0x118] sm:$0xff]  ;;  %v9635_v63 = vld [vmem:[%s16945_s2 + $0xf0] sm:$0xff] }
 0x13a   : > { %932 = vmatprep.mubr.f32.mxu0 %v16965_v1  ;;  %v994_v5 = vpop.permute.xlu1 %993  ;;  %v1417_v6 = vpop.permute.xlu0 %1416  ;;  %9571 = vmatmul.mubr.msk.f32.gmra.mxu1 %vm16985_vm7, %v541_v2  ;;  %v9636_v0 = vld [vmem:[%s16945_s2 + $0xf8] sm:$0xff] }
 0x13b   : > { %9589 = vmatmul.mubr.msk.f32.vlgmr.msra.gmra.mxu0 %vm16985_vm7, %v9583_v3  ;;  %v999_v8 = vsel %vm17110_vm10, %v994_v5, %v996_v47  ;;  %v1422_v9 = vsel %vm17052_vm11, %v1417_v6, %v1419_v48  ;;  %655 = vmatprep.mubr.f32.mxu1 %v16965_v1  ;;  %v998_v15 = vsel %vm17110_vm10, %v10367_v36, %v994_v5  ;;  %v9576_v36 = vld [vmem:[%s16945_s2 + $0x38] sm:$0xff]  ;;  %v9623_v48 = vld [vmem:[%s16945_s2 + $0xc0] sm:$0xff] }
 0x13c   : > { %9608 = vmatpush1.msk.msra.mxu0 %vm568_vm5, %v1146_v7  ;;  %9597 = vmatprep.subr.msk.mxu1 %vm568_vm5, %v999_v8  ;;  %v1421_v34 = vsel %vm17052_vm11, %v10373_v41, %v1417_v6  ;;  %v9605_v41 = vld [vmem:[%s16945_s2 + $0x90] sm:$0xff]  ;;  %v9606_v47 = vld [vmem:[%s16945_s2 + $0x98] sm:$0xff] }
 0x13d   : > { %9627 = vmatprep.subr.msk.mxu0 %vm568_vm5, %v1422_v9  ;;  %938 = vmatprep.mubr.f32.mxu0 %v16965_v1 }
 0x13e   : > { %9572 = vmatmul.mubr.msk.f32.gmra.mxu1 %vm16985_vm7, %v542_v10  ;;  %v1269_v14 = vpop.permute.xlu1 %1268  ;;  %v1713_v21 = vpop.permute.xlu0 %1712 }
 0x13f   : > { %9590 = vmatmul.mubr.msk.f32.gmra.mxu0 %vm16985_vm7, %v9584_v11  ;;  %784 = vmatprep.mubr.f32.mxu1 %v16965_v1  ;;  %v1274_v16 = vsel %vm17051_vm12, %v1269_v14, %v10377_v49  ;;  %v1718_v35 = vsel %vm16986_vm13, %v1713_v21, %v10379_v50  ;;  %v1273_v44 = vsel %vm17051_vm12, %v10369_v38, %v1269_v14  ;;  %v9595_v38 = vld [vmem:[%s16945_s2 + $0x70] sm:$0xff]  ;;  %v9596_v50 = vld [vmem:[%s16945_s2 + $0x78] sm:$0xff] }
 0x140   : > { %944 = vmatprep.mubr.f32.mxu0 %v16965_v1  ;;  %v1717_v49 = vsel %vm16986_vm13, %v10375_v43, %v1713_v21  ;;  %v9613_v43 = vld [vmem:[%s16945_s2 + $0xa0] sm:$0xff] }
 0x142   : > { %9579 = vmatmul.mubr.msk.f32.vlgmr.msra.gmra.mxu1 %vm16985_vm7, %v9573_v12  ;;  %v1565_v42 = vpop.permute.xlu1 %1564 }
 0x143   : > { %9591 = vmatmul.mubr.msk.f32.gmra.mxu0 %vm16985_vm7, %v9585_v13  ;;  %9598 = vmatpush1.msk.msra.mxu1 %vm568_vm5, %v998_v15  ;;  %v1570_v45 = vsel %vm17046_vm14, %v1565_v42, %v10381_v51  ;;  %v9624_v51 = vld [vmem:[%s16945_s2 + $0xc8] sm:$0xff]  ;;  %v1569_v53 = vsel %vm17046_vm14, %v10371_v40, %v1565_v42  ;;  %v9615_v40 = vld [vmem:[%s16945_s2 + $0xb0] sm:$0xff] }
 0x144   : > { %790 = vmatprep.mubr.f32.mxu1 %v16965_v1  ;;  %9617 = vmatprep.subr.msk.mxu1 %vm568_vm5, %v1274_v16 }
 0x145   : > { %950 = vmatprep.mubr.f32.mxu0 %v16965_v1 }
 0x146   : > { %9580 = vmatmul.mubr.msk.f32.gmra.mxu1 %vm16985_vm7, %v9574_v17 }
 0x147   : > { %9592 = vmatmul.mubr.msk.f32.gmra.mxu0 %vm16985_vm7, %v9586_v18  ;;  %796 = vmatprep.mubr.f32.mxu1 %v16965_v1 }
 0x148   : > { %1228 = vmatprep.mubr.f32.mxu0 %v16965_v1 }
 0x14a   : > { %9581 = vmatmul.mubr.msk.f32.gmra.mxu1 %vm16985_vm7, %v9575_v19 }
 0x14b   : > { %9609 = vmatmul.mubr.msk.f32.vlgmr.msra.gmra.mxu0 %vm16985_vm7, %v9603_v20  ;;  %802 = vmatprep.mubr.f32.mxu1 %v16965_v1 }
 0x14c   : > { %9628 = vmatpush1.msk.msra.mxu0 %vm568_vm5, %v1421_v34  ;;  %1234 = vmatprep.mubr.f32.mxu0 %v16965_v1 }
 0x14d   : > { %9647 = vmatprep.subr.msk.mxu0 %vm568_vm5, %v1718_v35 }
 0x14e   : > { %9582 = vmatmul.mubr.msk.f32.gmra.mxu1 %vm16985_vm7, %v9576_v36 }
 0x14f   : > { %9610 = vmatmul.mubr.msk.f32.gmra.mxu0 %vm16985_vm7, %v9604_v37  ;;  %1080 = vmatprep.mubr.f32.mxu1 %v16965_v1 }
 0x150   : > { %1240 = vmatprep.mubr.f32.mxu0 %v16965_v1 }
 0x152   : > { %9599 = vmatmul.mubr.msk.f32.vlgmr.msra.gmra.mxu1 %vm16985_vm7, %v9593_v39 }
 0x153   : > { %9611 = vmatmul.mubr.msk.f32.gmra.mxu0 %vm16985_vm7, %v9605_v41  ;;  %9618 = vmatpush1.msk.msra.mxu1 %vm568_vm5, %v1273_v44  ;;  %v664_v44 = vlaneseq }
 0x154   : > { %1086 = vmatprep.mubr.f32.mxu1 %v16965_v1  ;;  %9637 = vmatprep.subr.msk.mxu1 %vm568_vm5, %v1570_v45 }
 0x155   : > { %1246 = vmatprep.mubr.f32.mxu0 %v16965_v1 }
 0x156   : > { %9600 = vmatmul.mubr.msk.f32.gmra.mxu1 %vm16985_vm7, %v9594_v46 }
 0x157   : > { %9612 = vmatmul.mubr.msk.f32.gmra.mxu0 %vm16985_vm7, %v9606_v47  ;;  %1092 = vmatprep.mubr.f32.mxu1 %v16965_v1 }
 0x158   : > { %1503 = vmatprep.mubr.f32.mxu0 %v16965_v1 }
 0x15a   : > { %9601 = vmatmul.mubr.msk.f32.gmra.mxu1 %vm16985_vm7, %v9595_v38 }
 0x15b   : > { %9629 = vmatmul.mubr.msk.f32.vlgmr.msra.gmra.mxu0 %vm16985_vm7, %v9623_v48  ;;  %1098 = vmatprep.mubr.f32.mxu1 %v16965_v1  ;;  %v665_v48 = vshrl.u32 %v664_v44, 7 }
 0x15c   : > { %9648 = vmatpush1.msk.msra.mxu0 %vm568_vm5, %v1717_v49  ;;  %1509 = vmatprep.mubr.f32.mxu0 %v16965_v1 }
 0x15e   : > { %9602 = vmatmul.mubr.msk.f32.gmra.mxu1 %vm16985_vm7, %v9596_v50 }
 0x15f   : > { %9630 = vmatmul.mubr.msk.f32.gmra.mxu0 %vm16985_vm7, %v9624_v51  ;;  %1355 = vmatprep.mubr.f32.mxu1 %v16965_v1  ;;  %v810_v51 = vld [vmem:[#allocation3 + $0x1] ss:$8 sm:$0x3] }
 0x160   : > { %1515 = vmatprep.mubr.f32.mxu0 %v16965_v1 }
 0x162   : > { %9619 = vmatmul.mubr.msk.f32.vlgmr.msra.gmra.mxu1 %vm16985_vm7, %v9613_v43 }
 0x163   : > { %9631 = vmatmul.mubr.msk.f32.gmra.mxu0 %vm16985_vm7, %v9625_v52  ;;  %9638 = vmatpush1.msk.msra.mxu1 %vm568_vm5, %v1569_v53  ;;  %v10667_v53 = vsub.s32 0, %v665_v48 }
 0x164   : > { %1361 = vmatprep.mubr.f32.mxu1 %v16965_v1  ;;  %1521 = vmatprep.mubr.f32.mxu0 %v16965_v1 }
 0x165   : > { %17207 = vst [vmem:[#allocation21_spill] sm:$0xff] %v10667_v53 }
 0x166   : > { %9620 = vmatmul.mubr.msk.f32.gmra.mxu1 %vm16985_vm7, %v9614_v54  ;;  %v10669_v54 = vsub.s32 1, %v665_v48 }
 0x167   : > { %9632 = vmatmul.mubr.msk.f32.gmra.mxu0 %vm16985_vm7, %v9626_v55  ;;  %1367 = vmatprep.mubr.f32.mxu1 %v16965_v1  ;;  %v662_v55 = vld [vmem:[#allocation3] ss:$8 sm:$0x3] }
 0x168   : > { %1799 = vmatprep.mubr.f32.mxu0 %v16965_v1  ;;  %17208 = vst [vmem:[#allocation22_spill] sm:$0xff] %v10669_v54  ;;  %v671_v44 = vrot.slane %v662_v55, %v10669_v54  ;;  %v819_v48 = vrot.slane %v810_v51, %v10669_v54 }
 0x16a   : > { %9621 = vmatmul.mubr.msk.f32.gmra.mxu1 %vm16985_vm7, %v9615_v40 }
 0x16b   : > { %9649 = vmatmul.mubr.msk.f32.vlgmr.msra.gmra.mxu0 %vm16985_vm7, %v9643_v56  ;;  %1373 = vmatprep.mubr.f32.mxu1 %v16965_v1 }
 0x16c   : > { %1805 = vmatprep.mubr.f32.mxu0 %v16965_v1 }
 0x16e   : > { %9622 = vmatmul.mubr.msk.f32.gmra.mxu1 %vm16985_vm7, %v9616_v57  ;;  %v815_v57 = vrot.slane %v810_v51, %v10667_v53 }
 0x16f   : > { %9650 = vmatmul.mubr.msk.f32.gmra.mxu0 %vm16985_vm7, %v9644_v58  ;;  %1651 = vmatprep.mubr.f32.mxu1 %v16965_v1  ;;  %v958_v58 = vld [vmem:[#allocation3 + $0x2] ss:$8 sm:$0x3] }
 0x170   : > { %1811 = vmatprep.mubr.f32.mxu0 %v16965_v1  ;;  %v963_v32 = vrot.slane %v958_v58, %v10667_v53  ;;  %v10689_v33 = vrot.slane %v958_v58, %v10669_v54 }
 0x172   : > { %9639 = vmatmul.mubr.msk.f32.vlgmr.msra.gmra.mxu1 %vm16985_vm7, %v9633_v59  ;;  %v1106_v59 = vld [vmem:[#allocation3 + $0x3] ss:$8 sm:$0x3] }
 0x173   : > { %9651 = vmatmul.mubr.msk.f32.gmra.mxu0 %vm16985_vm7, %v9645_v60  ;;  %1657 = vmatprep.mubr.f32.mxu1 %v16965_v1  ;;  %v10692_v30 = vrot.slane %v1106_v59, %v10667_v53 }
 0x174   : > { %1817 = vmatprep.mubr.f32.mxu0 %v16965_v1 }
 0x176   : > { %9640 = vmatmul.mubr.msk.f32.gmra.mxu1 %vm16985_vm7, %v9634_v61  ;;  %v1381_v61 = vld [vmem:[#allocation3 + $0x5] ss:$8 sm:$0x3] }
 0x177   : > { %9652 = vmatmul.mubr.msk.f32.gmra.mxu0 %vm16985_vm7, %v9646_v62  ;;  %1663 = vmatprep.mubr.f32.mxu1 %v16965_v1  ;;  %v10700_v51 = vrot.slane %v1381_v61, %v10667_v53  ;;  %v10706_v58 = vrot.slane %v1381_v61, %v10669_v54 }
 0x178   : > { %2338 = vmatprep.mubr.f32.mxu0 %v16965_v1 }
 0x17a   : > { %9641 = vmatmul.mubr.msk.f32.gmra.mxu1 %vm16985_vm7, %v9635_v63  ;;  %v1529_v63 = vld [vmem:[#allocation3 + $0x6] ss:$8 sm:$0x3] }
 0x17b   : > { %1669 = vmatprep.mubr.f32.mxu1 %v16965_v1  ;;  %v10703_v27 = vrot.slane %v1529_v63, %v10667_v53  ;;  %v10709_v24 = vrot.slane %v1529_v63, %v10669_v54 }
 0x17d   : > { %17211 = vst [vmem:[#allocation25_spill] sm:$0xff] %v10709_v24 }
 0x17e   : > { %9642 = vmatmul.mubr.msk.f32.gmra.mxu1 %vm16985_vm7, %v9636_v0  ;;  %v667_v0 = vrot.slane %v662_v55, %v10667_v53  ;;  %v10697_v55 = vrot.slane %v1106_v59, %v10669_v54  ;;  %v10719_v59 = vrot.slane %v10685_v4, %v10667_v53 }
 0x17f   : > { %2152 = vmatprep.mubr.f32.mxu1 %v16965_v1  ;;  %v10683_v1 = vld [vmem:[#allocation3 + $0x7] ss:$8 sm:$0x3] }
 0x180   : > { %17214 = vst [vmem:[#allocation28_spill] sm:$0xff] %v10719_v59 }
 0x1f6   : > { %v10609_v2 = vpop.f32.mrf.mxu1  ;;  %v10611_v3 = vpop.f32.mrf.mxu0 }
 0x1f7   : > { %v676_v25 = vmul.f32 %v667_v0, %v10609_v2  ;;  %v674_v61 = vmul.f32 %v667_v0, %v10611_v3 }
 0x1f8   : > { %v10613_v5 = vpop.f32.mrf.mxu1  ;;  %v10615_v6 = vpop.f32.mrf.mxu0 }
 0x1f9   : > { %v677_v22 = vmul.f32 %v671_v44, %v10613_v5 }
 0x1fa   : > { %v10617_v7 = vpop.f32.mrf.mxu1 }
 0x1fb   : > { %v10619_v8 = vpop.f32.mrf.mxu0  ;;  %v678_v63 = vmul.f32 %v667_v0, %v10617_v7 }
 0x1fc   : > { %v10621_v9 = vpop.f32.mrf.mxu1  ;;  %v970_v59 = vmul.f32 %v963_v32, %v10619_v8 }
 0x1fd   : > { %v10623_v10 = vpop.f32.mrf.mxu0 }
 0x1fe   : > { %v10625_v11 = vpop.f32.mrf.mxu1  ;;  %v971_v3 = vmul.f32 %v10689_v33, %v10623_v10 }
 0x1ff   : > { %v10627_v12 = vpop.f32.mrf.mxu0  ;;  %v680_v5 = vmul.f32 %v667_v0, %v10625_v11 }
 0x200   : > { %v10629_v13 = vpop.f32.mrf.mxu1  ;;  %v972_v7 = vmul.f32 %v963_v32, %v10627_v12 }
 0x201   : > { %v10631_v14 = vpop.f32.mrf.mxu0 }
 0x202   : > { %v786_v15 = vpop.f32.mrf.mxu1 }
 0x203   : > { %v10633_v16 = vpop.f32.mrf.mxu0  ;;  %v822_v28 = vmul.f32 %v815_v57, %v786_v15  ;;  %v10715_v15 = vrot.slane %v10683_v1, %v10667_v53 }
 0x204   : > { %v788_v17 = vpop.f32.mrf.mxu1 }
 0x205   : > { %v10635_v18 = vpop.f32.mrf.mxu0  ;;  %17213 = vst [vmem:[#allocation27_spill] sm:$0xff] %v10715_v15  ;;  %v679_v15 = vmul.f32 %v671_v44, %v10621_v9  ;;  %v830_v53 = vadd.f32 %v822_v28, %v674_v61  ;;  %v973_v28 = vmul.f32 %v10689_v33, %v10631_v14 }
 0x206   : > { %v792_v19 = vpop.f32.mrf.mxu1 }
 0x207   : > { %v10637_v20 = vpop.f32.mrf.mxu0 }
 0x208   : > { %v794_v21 = vpop.f32.mrf.mxu1 }
 0x209   : > { %v10639_v34 = vpop.f32.mrf.mxu0 }
 0x20a   : > { %v798_v35 = vpop.f32.mrf.mxu1 }
 0x20b   : > { %v10641_v36 = vpop.f32.mrf.mxu0  ;;  %v826_v2 = vmul.f32 %v815_v57, %v798_v35  ;;  %v974_v35 = vmul.f32 %v963_v32, %v10633_v16 }
 0x20c   : > { %v10643_v37 = vpop.f32.mrf.mxu1 }
 0x20d   : > { %v10645_v39 = vpop.f32.mrf.mxu0  ;;  %v834_v61 = vadd.f32 %v826_v2, %v678_v63 }
 0x20e   : > { %v10647_v41 = vpop.f32.mrf.mxu1 }
 0x20f   : > { %v10649_v42 = vpop.f32.mrf.mxu0  ;;  %v828_v8 = vmul.f32 %v815_v57, %v10647_v41 }
 0x210   : > { %v10651_v45 = vpop.f32.mrf.mxu1 }
 0x211   : > { %v10653_v46 = vpop.f32.mrf.mxu0  ;;  %v829_v10 = vmul.f32 %v819_v48, %v10651_v45 }
 0x212   : > { %v10655_v47 = vpop.f32.mrf.mxu1 }
 0x213   : > { %v10657_v38 = vpop.f32.mrf.mxu0 }
 0x214   : > { %v10659_v49 = vpop.f32.mrf.mxu1 }
 0x215   : > { %v10661_v50 = vpop.f32.mrf.mxu0 }
 0x216   : > { %17205 = vst [vmem:[#allocation19_spill] sm:$0xff] %v10661_v50  ;;  %v10663_v43 = vpop.f32.mrf.mxu1  ;;  %v825_v50 = vmul.f32 %v819_v48, %v794_v21  ;;  %v681_v21 = vmul.f32 %v671_v44, %v10629_v13  ;;  %v975_v13 = vmul.f32 %v10689_v33, %v10635_v18  ;;  %v976_v18 = vmul.f32 %v963_v32, %v10637_v20 }
 0x217   : > { %v10665_v52 = vpop.f32.mrf.mxu0 }
 0x218   : > { %17206 = vst [vmem:[#allocation20_spill] sm:$0xff] %v10665_v52  ;;  %v10671_v40 = vpop.f32.mrf.mxu1  ;;  %v675_v52 = vmul.f32 %v671_v44, %v10615_v6  ;;  %v827_v6 = vmul.f32 %v819_v48, %v10643_v37  ;;  %v833_v11 = vadd.f32 %v825_v50, %v677_v22  ;;  %v978_v37 = vadd.f32 %v970_v59, %v830_v53 }
 0x219   : > { %v10673_v56 = vpop.f32.mrf.mxu0  ;;  %v1120_v22 = vmul.f32 %v10692_v30, %v10663_v43  ;;  %v836_v50 = vadd.f32 %v828_v8, %v680_v5 }
 0x21a   : > { %17209 = vst [vmem:[#allocation23_spill] sm:$0xff] %v10673_v56  ;;  %v10676_v60 = vpop.f32.mrf.mxu1  ;;  %v823_v56 = vmul.f32 %v819_v48, %v788_v17  ;;  %v835_v14 = vadd.f32 %v827_v6, %v679_v15  ;;  %v982_v48 = vadd.f32 %v974_v35, %v834_v61 }
 0x21b   : > { %v10678_v62 = vpop.f32.mrf.mxu0  ;;  %v984_v5 = vadd.f32 %v976_v18, %v836_v50 }
 0x21c   : > { %v1096_v31 = vpop.f32.mrf.mxu1  ;;  %v983_v59 = vadd.f32 %v975_v13, %v835_v14  ;;  %v17217_v13 = vld [vmem:[#allocation25_spill] sm:$0xff] }
 0x21d   : > { %v10694_v29 = vpop.f32.mrf.mxu0 }
 0x21e   : > { %17210 = vst [vmem:[#allocation24_spill] sm:$0xff] %v10694_v29  ;;  %v1100_v26 = vpop.f32.mrf.mxu1 }
 0x21f   : > { %v10711_v23 = vpop.f32.mrf.mxu0 }
 0x220   : > { %17212 = vst [vmem:[#allocation26_spill] sm:$0xff] %v10711_v23  ;;  %v824_v23 = vmul.f32 %v815_v57, %v792_v19  ;;  %v1102_v24 = vpop.f32.mrf.mxu1  ;;  %v837_v57 = vadd.f32 %v829_v10, %v681_v21 }
 0x221   : > { %v10726_v29 = vpop.f32.mrf.mxu0 }
 0x222   : > { %17215 = vst [vmem:[#allocation29_spill] sm:$0xff] %v10726_v29  ;;  %v1357_v17 = vpop.f32.mrf.mxu1  ;;  %v831_v29 = vadd.f32 %v823_v56, %v675_v52  ;;  %v832_v9 = vadd.f32 %v824_v23, %v676_v25  ;;  %v1118_v52 = vmul.f32 %v10692_v30, %v10655_v47  ;;  %v1119_v23 = vmul.f32 %v10697_v55, %v10659_v49 }
 0x223   : > { %v10735_v19 = vpop.f32.mrf.mxu0  ;;  %v1121_v25 = vmul.f32 %v10697_v55, %v10671_v40  ;;  %v1122_v47 = vmul.f32 %v10692_v30, %v10676_v60  ;;  %v981_v56 = vadd.f32 %v973_v28, %v833_v11  ;;  %v1123_v49 = vmul.f32 %v10697_v55, %v1096_v31 }
 0x224   : > { %v1359_v12 = vpop.f32.mrf.mxu1  ;;  %v979_v45 = vadd.f32 %v971_v3, %v831_v29  ;;  %v980_v53 = vadd.f32 %v972_v7, %v832_v9  ;;  %v977_v40 = vmul.f32 %v10689_v33, %v10639_v34  ;;  %v1126_v15 = vadd.f32 %v1118_v52, %v978_v37  ;;  %v17218_v52 = vld [vmem:[#allocation19_spill] sm:$0xff] }
 0x225   : > { %v10743_v0 = vpop.f32.mrf.mxu0  ;;  %v1124_v29 = vmul.f32 %v10692_v30, %v1100_v26  ;;  %v1129_v63 = vadd.f32 %v1121_v25, %v981_v56  ;;  %v1130_v3 = vadd.f32 %v1122_v47, %v982_v48  ;;  %v1125_v31 = vmul.f32 %v10697_v55, %v1102_v24  ;;  %v17216_v61 = vld [vmem:[#allocation24_spill] sm:$0xff]  ;;  %v17222_v48 = vld [vmem:[#allocation23_spill] sm:$0xff] }
 0x226   : > { %v1363_v16 = vpop.f32.mrf.mxu1  ;;  %v1127_v32 = vadd.f32 %v1119_v23, %v979_v45  ;;  %v1128_v20 = vadd.f32 %v1120_v22, %v980_v53  ;;  %v1393_v7 = vmul.f32 %v10700_v51, %v1357_v17  ;;  %v985_v6 = vadd.f32 %v977_v40, %v837_v57  ;;  %v17220_v25 = vld [vmem:[#allocation20_spill] sm:$0xff] }
 0x227   : > { %v10755_v41 = vpop.f32.mrf.mxu0  ;;  %v1131_v21 = vadd.f32 %v1123_v49, %v983_v59  ;;  %v10770_v33 = vrot.slane %v10683_v1, %v10669_v54  ;;  %v10774_v30 = vrot.slane %v10685_v4, %v10669_v54  ;;  %v1253_v34 = vadd.f32 %v10641_v36, %v1126_v15  ;;  %v17219_v23 = vld [vmem:[#allocation26_spill] sm:$0xff] }
 0x228   : > { %v1365_v44 = vpop.f32.mrf.mxu1  ;;  %v1132_v8 = vadd.f32 %v1124_v29, %v984_v5  ;;  %v1394_v9 = vmul.f32 %v10706_v58, %v1359_v12  ;;  %v1395_v24 = vmul.f32 %v10700_v51, %v1363_v16  ;;  %v1254_v55 = vadd.f32 %v10645_v39, %v1127_v32  ;;  %v17223_v29 = vld [vmem:[#allocation27_spill] sm:$0xff]  ;;  %v17224_v32 = vld [vmem:[#allocation28_spill] sm:$0xff] }
 0x229   : > { %v10761_v43 = vpop.f32.mrf.mxu0  ;;  %v1255_v17 = vadd.f32 %v10649_v42, %v1128_v20  ;;  %v1256_v11 = vadd.f32 %v10653_v46, %v1129_v63  ;;  %v1541_v1 = vmul.f32 %v10703_v27, %v10678_v62  ;;  %v1257_v4 = vadd.f32 %v10657_v38, %v1130_v3  ;;  %v17221_v50 = vld [vmem:[#allocation29_spill] sm:$0xff] }
 0x22a   : > { %v1369_v60 = vpop.f32.mrf.mxu1  ;;  %v1133_v37 = vadd.f32 %v1125_v31, %v985_v6  ;;  %v1401_v36 = vadd.f32 %v1393_v7, %v1253_v34  ;;  %v1542_v12 = vmul.f32 %v17217_v13, %v17216_v61  ;;  %v1258_v14 = vadd.f32 %v17218_v52, %v1131_v21 }
 0x22b   : > { %v1801_v2 = vpop.f32.mrf.mxu0  ;;  %v1543_v39 = vmul.f32 %v10703_v27, %v17219_v23  ;;  %v1396_v42 = vmul.f32 %v10706_v58, %v1365_v44  ;;  %v1397_v46 = vmul.f32 %v10700_v51, %v1369_v60  ;;  %v1259_v16 = vadd.f32 %v17220_v25, %v1132_v8 }
 0x22c   : > { %v1371_v28 = vpop.f32.mrf.mxu1  ;;  %v1402_v45 = vadd.f32 %v1394_v9, %v1254_v55  ;;  %v1403_v38 = vadd.f32 %v1395_v24, %v1255_v17  ;;  %v1544_v18 = vmul.f32 %v17217_v13, %v17221_v50  ;;  %v1545_v47 = vmul.f32 %v10703_v27, %v10735_v19 }
 0x22d   : > { %v1803_v26 = vpop.f32.mrf.mxu0  ;;  %v1398_v53 = vmul.f32 %v10706_v58, %v1371_v28  ;;  %v1260_v40 = vadd.f32 %v17222_v48, %v1133_v37  ;;  %v1549_v15 = vadd.f32 %v1541_v1, %v1401_v36  ;;  %v1837_v20 = vmul.f32 %v17224_v32, %v1801_v2 }
 0x22e   : > { %v1375_v35 = vpop.f32.mrf.mxu1  ;;  %v1404_v63 = vadd.f32 %v1396_v42, %v1256_v11  ;;  %v1405_v60 = vadd.f32 %v1397_v46, %v1257_v4  ;;  %v1546_v19 = vmul.f32 %v17217_v13, %v10743_v0  ;;  %v1547_v5 = vmul.f32 %v10703_v27, %v10755_v41  ;;  %v17225_v4 = vld [vmem:[#allocation7_spill] sm:$0xff] }
 0x22f   : > { %v1807_v10 = vpop.f32.mrf.mxu0  ;;  %v1399_v56 = vmul.f32 %v10700_v51, %v1375_v35  ;;  %v1551_v31 = vadd.f32 %v1543_v39, %v1403_v38  ;;  %v1406_v21 = vadd.f32 %v1398_v53, %v1258_v14  ;;  %v1838_v2 = vmul.f32 %v10774_v30, %v1803_v26 }
 0x230   : > { %v1377_v22 = vpop.f32.mrf.mxu1  ;;  %v1839_v55 = vmul.f32 %v17224_v32, %v1807_v10  ;;  %v1552_v41 = vadd.f32 %v1544_v18, %v1404_v63  ;;  %v1553_v17 = vadd.f32 %v1545_v47, %v1405_v60  ;;  %v1548_v11 = vmul.f32 %v17217_v13, %v10761_v43 }
 0x231   : > { %v1809_v62 = vpop.f32.mrf.mxu0  ;;  %v1400_v57 = vmul.f32 %v10706_v58, %v1377_v22  ;;  %v1550_v58 = vadd.f32 %v1542_v12, %v1402_v45  ;;  %v1407_v28 = vadd.f32 %v1399_v56, %v1259_v16  ;;  %v1554_v12 = vadd.f32 %v1546_v19, %v1406_v21  ;;  %v17226_v45 = vld [vmem:[#allocation10_spill] sm:$0xff]  ;;  %v17227_v19 = vld [vmem:[#allocation8_spill] sm:$0xff] }
 0x232   : > { %v1653_v49 = vpop.f32.mrf.mxu1  ;;  %v1840_v35 = vmul.f32 %v10774_v30, %v1809_v62 }
 0x233   : > { %v1813_v44 = vpop.f32.mrf.mxu0  ;;  %v1689_v59 = vmul.f32 %v17223_v29, %v1653_v49  ;;  %v1408_v34 = vadd.f32 %v1400_v57, %v1260_v40  ;;  %v1555_v52 = vadd.f32 %v1547_v5, %v1407_v28 }
 0x234   : > { %v1655_v51 = vpop.f32.mrf.mxu1  ;;  %v1841_v10 = vmul.f32 %v17224_v32, %v1813_v44 }
 0x235   : > { %v1815_v3 = vpop.f32.mrf.mxu0  ;;  %v1697_v7 = vadd.f32 %v1689_v59, %v1549_v15  ;;  %v1690_v6 = vmul.f32 %v10770_v33, %v1655_v51  ;;  %v1556_v14 = vadd.f32 %v1548_v11, %v1408_v34 }
 0x236   : > { %v1659_v8 = vpop.f32.mrf.mxu1  ;;  %v1842_v62 = vmul.f32 %v10774_v30, %v1815_v3 }
 0x237   : > { %v1845_v9 = vadd.f32 %v1837_v20, %v1697_v7  ;;  %v1698_v24 = vadd.f32 %v1690_v6, %v1550_v58  ;;  %v1691_v0 = vmul.f32 %v17223_v29, %v1659_v8  ;;  %v1819_v27 = vpop.f32.mrf.mxu0 }
 0x238   : > { %v1661_v1 = vpop.f32.mrf.mxu1  ;;  %v1843_v16 = vmul.f32 %v17224_v32, %v1819_v27 }
 0x239   : > { %v1877_v37 = vadd.f32 %v17225_v4, %v1845_v9  ;;  %v1846_v36 = vadd.f32 %v1838_v2, %v1698_v24  ;;  %v1699_v26 = vadd.f32 %v1691_v0, %v1551_v31  ;;  %v1692_v61 = vmul.f32 %v10770_v33, %v1661_v1  ;;  %v1821_v13 = vpop.f32.mrf.mxu0  ;;  %v17228_v24 = vld [vmem:[#allocation9_spill] sm:$0xff] }
 0x23a   : > { %v1665_v23 = vpop.f32.mrf.mxu1  ;;  %v1844_v49 = vmul.f32 %v10774_v30, %v1821_v13 }
 0x23b   : > { %v1878_v39 = vadd.f32 %v17225_v4, %v1846_v36  ;;  %v1700_v42 = vadd.f32 %v1692_v61, %v1552_v41  ;;  %v1847_v46 = vadd.f32 %v1839_v55, %v1699_v26  ;;  %v1693_v43 = vmul.f32 %v17223_v29, %v1665_v23 }
 0x23c   : > { %v1667_v22 = vpop.f32.mrf.mxu1  ;;  %vm1885_vm15 = vcmp.ge.f32.partialorder %v1877_v37, 0.0  ;;  %v1893_v25 = vmul.f32 0.2, %v1877_v37 }
 0x23d   : > { %v1879_v38 = vadd.f32 %v17226_v45, %v1847_v46  ;;  %v1701_v50 = vadd.f32 %v1693_v43, %v1553_v17  ;;  %v1848_v18 = vadd.f32 %v1840_v35, %v1700_v42  ;;  %v1694_v47 = vmul.f32 %v10770_v33, %v1667_v22 }
 0x23e   : > { %v1671_v53 = vpop.f32.mrf.mxu1  ;;  %v1901_v56 = vsel %vm1885_vm15, %v1877_v37, %v1893_v25  ;;  %vm1886_vm2 = vcmp.ge.f32.partialorder %v1878_v39, 0.0  ;;  %v1894_v57 = vmul.f32 0.2, %v1878_v39 }
 0x23f   : > { %v1895_v44 = vmul.f32 0.2, %v1879_v38  ;;  %v1880_v48 = vadd.f32 %v17226_v45, %v1848_v18  ;;  %v1702_v40 = vadd.f32 %v1694_v47, %v1554_v12  ;;  %v1849_v15 = vadd.f32 %v1841_v10, %v1701_v50 }
 0x240   : > { %v1695_v59 = vmul.f32 %v17223_v29, %v1671_v53  ;;  %v1673_v32 = vpop.f32.mrf.mxu1  ;;  %v1917_v20 = vrot.slane %v1901_v56, 4  ;;  %v1902_v63 = vsel %vm1886_vm2, %v1878_v39, %v1894_v57  ;;  %vm1887_vm7 = vcmp.ge.f32.partialorder %v1879_v38, 0.0 }
 0x241   : > { %v1896_v60 = vmul.f32 0.2, %v1880_v48  ;;  %v1881_v5 = vadd.f32 %v17227_v19, %v1849_v15  ;;  %v1850_v51 = vadd.f32 %v1842_v62, %v1702_v40  ;;  %v1696_v3 = vmul.f32 %v10770_v33, %v1673_v32 }
 0x242   : > { %v1703_v58 = vadd.f32 %v1695_v59, %v1555_v52  ;;  %1931 = vrot.lane.b32.xlu0 %v1917_v20, %s10076_s15  ;;  %v1918_v30 = vrot.slane %v1902_v63, 4  ;;  %v1903_v31 = vsel %vm1887_vm7, %v1879_v38, %v1895_v44  ;;  %vm1888_vm15 = vcmp.ge.f32.partialorder %v1880_v48, 0.0 }
 0x243   : > { %v1897_v7 = vmul.f32 0.2, %v1881_v5  ;;  %v1882_v6 = vadd.f32 %v17227_v19, %v1850_v51  ;;  %v1704_v29 = vadd.f32 %v1696_v3, %v1556_v14  ;;  %v1919_v21 = vrot.slane %v1903_v31, 4 }
 0x244   : > { %v1851_v28 = vadd.f32 %v1843_v16, %v1703_v58  ;;  %1933 = vrot.lane.b32.xlu1 %v1918_v30, %s10076_s15  ;;  %v1904_v34 = vsel %vm1888_vm15, %v1880_v48, %v1896_v60  ;;  %vm1889_vm2 = vcmp.ge.f32.partialorder %v1881_v5, 0.0 }
 0x245   : > { %v1898_v2 = vmul.f32 0.2, %v1882_v6  ;;  %v1852_v8 = vadd.f32 %v1844_v49, %v1704_v29  ;;  %v1920_v33 = vsel %vm568_vm5, %v1917_v20, %v1919_v21  ;;  %v1921_v9 = vrot.slane %v1904_v34, 4 }
 0x246   : > { %v1883_v0 = vadd.f32 %v17228_v24, %v1851_v28  ;;  %1935 = vrot.lane.b32.xlu0 %v1920_v33, %s10076_s15  ;;  %v1905_v55 = vsel %vm1889_vm2, %v1881_v5, %v1897_v7  ;;  %vm1890_vm7 = vcmp.ge.f32.partialorder %v1882_v6, 0.0  ;;  %vm1971_vm2 = vcmask 1047684  }
 0x247   : > { %v1884_v27 = vadd.f32 %v17228_v24, %v1852_v8  ;;  %v1922_v41 = vsel %vm568_vm5, %v1918_v30, %v1921_v9  ;;  %v1923_v17 = vrot.slane %v1905_v55, 4  ;;  %v1906_v11 = vsel %vm1890_vm7, %v1882_v6, %v1898_v2 }
 0x248   : > { %1937 = vrot.lane.b32.xlu1 %v1922_v41, %s10076_s15  ;;  %v1925_v1 = vrot.slane %v1906_v11, 4  ;;  %vm1891_vm15 = vcmp.ge.f32.partialorder %v1883_v0, 0.0  ;;  %v1899_v35 = vmul.f32 0.2, %v1883_v0  ;;  %vm1974_vm7 = vcmask 130052  }
 0x249   : > { %v1924_v4 = vsel %vm568_vm5, %v1919_v21, %v1923_v17  ;;  %vm1892_vm13 = vcmp.ge.f32.partialorder %v1884_v27, 0.0  ;;  %v1900_v37 = vmul.f32 0.2, %v1884_v27 }
 0x24a   : > { %1939 = vrot.lane.b32.xlu0 %v1924_v4, %s10076_s15  ;;  %v1926_v36 = vsel %vm568_vm5, %v1921_v9, %v1925_v1  ;;  %v1907_v26 = vsel %vm1891_vm15, %v1883_v0, %v1899_v35  ;;  %vm2071_vm15 = vcmask 293888  }
 0x24b   : > { %v1927_v61 = vrot.slane %v1907_v26, 4  ;;  %v1908_v12 = vsel %vm1892_vm13, %v1884_v27, %v1900_v37  ;;  %vm1976_vm13 = vcmask 1047680  }
 0x24c   : > { %1941 = vrot.lane.b32.xlu1 %v1926_v36, %s10076_s15  ;;  %v1929_v52 = vrot.slane %v1908_v12, 4 }
 0x24d   : > { %v1928_v14 = vsel %vm568_vm5, %v1923_v17, %v1927_v61 }
 0x24e   : > { %1947 = vrot.lane.b32.xlu0 %v1927_v61, %s10076_s15  ;;  %v1930_v23 = vsel %vm568_vm5, %v1925_v1, %v1929_v52 }
 0x250   : > { %1949 = vrot.lane.b32.xlu1 %v1929_v52, %s10076_s15 }
 0x252   : > { %1943 = vrot.lane.b32.xlu0 %v1928_v14, %s10076_s15 }
 0x254   : > { %1945 = vrot.lane.b32.xlu1 %v1930_v23, %s10076_s15 }
 0x2b4   : > { %v1932_v10 = vpop.permute.xlu0 %1931 }
 0x2b5   : > { %1972 = vst.msk [vmem:[#allocation2] sm:$0xf0] %vm1971_vm2, %v1932_v10 }
 0x2b6   : > { %v1934_v39 = vpop.permute.xlu1 %1933 }
 0x2b7   : > { %v1951_v42 = vsel %vm483_vm0, %v1932_v10, %v1934_v39  ;;  %1975 = vst.msk [vmem:[#allocation2 + $0x10] sm:$0xf0] %vm1974_vm7, %v1934_v39 }
 0x2b8   : > { %1973 = vst [vmem:[#allocation2 + $0x8] sm:$0xf0] %v1951_v42  ;;  %v1936_v46 = vpop.permute.xlu0 %1935 }
 0x2b9   : > { %1977 = vst.msk [vmem:[#allocation2 + $0x18] sm:$0xff] %vm1976_vm13, %v1936_v46 }
 0x2ba   : > { %v1938_v43 = vpop.permute.xlu1 %1937 }
 0x2bb   : > { %v10852_v13 = vsel %vm483_vm0, %v1936_v46, %v1938_v43  ;;  %1979 = vst.msk [vmem:[#allocation2 + $0x28] sm:$0xff] %vm483_vm0, %v1938_v43 }
 0x2bc   : > { %1978 = vst [vmem:[#allocation2 + $0x20] sm:$0xff] %v10852_v13  ;;  %v1940_v22 = vpop.permute.xlu0 %1939  ;;  %v1989_v62 = vld [vmem:[#allocation2] sm:$0xff] }
 0x2bd   : > { %1980 = vst.msk [vmem:[#allocation2 + $0x30] sm:$0xff] %vm1976_vm13, %v1940_v22  ;;  %2023 = vrot.lane.b32.xlu0 %v1989_v62, %s17113_s17  ;;  %2210 = vrot.lane.b32.xlu1 %v1989_v62, %s17111_s16 }
 0x2be   : > { %v1942_v25 = vpop.permute.xlu1 %1941  ;;  %v10891_v56 = vld [vmem:[#allocation2 + $0x10] sm:$0xff] }
 0x2bf   : > { %v10860_v16 = vsel %vm483_vm0, %v1940_v22, %v1942_v25  ;;  %1982 = vst.msk [vmem:[#allocation2 + $0x40] sm:$0xff] %vm483_vm0, %v1942_v25  ;;  %v10936_v57 = vld [vmem:[#allocation2 + $0x8] sm:$0xff] }
 0x2c0   : > { %1981 = vst [vmem:[#allocation2 + $0x38] sm:$0xff] %v10860_v16  ;;  %v1948_v45 = vpop.permute.xlu0 %1947  ;;  %v1992_v32 = vld [vmem:[#allocation2 + $0x18] sm:$0xff] }
 0x2c1   : > { %1986 = vst.msk [vmem:[#allocation2 + $0x60] sm:$0xf] %vm532_vm3, %v1948_v45  ;;  %2396 = vrot.lane.b32.xlu0 %v1989_v62, %s17049_s19  ;;  %2582 = vrot.lane.b32.xlu1 %v1989_v62, %s17107_s18 }
 0x2c2   : > { %v1950_v38 = vpop.permute.xlu1 %1949  ;;  %v1994_v24 = vld [vmem:[#allocation2 + $0x28] sm:$0xff] }
 0x2c3   : > { %v1955_v50 = vsel %vm483_vm0, %v1948_v45, %v1950_v38  ;;  %1988 = vst.msk [vmem:[#allocation2 + $0x70] sm:$0xf] %vm500_vm1, %v1950_v38 }
 0x2c4   : > { %1987 = vst [vmem:[#allocation2 + $0x68] sm:$0xf] %v1955_v50  ;;  %v1944_v18 = vpop.permute.xlu0 %1943 }
 0x2c5   : > { %2768 = vrot.lane.b32.xlu0 %v1989_v62, %s17044_s21  ;;  %1983 = vst.msk [vmem:[#allocation2 + $0x48] sm:$0xff] %vm1976_vm13, %v1944_v18  ;;  %2934 = vrot.lane.b32.xlu1 %v1989_v62, %s17047_s20 }
 0x2c6   : > { %v1946_v47 = vpop.permute.xlu1 %1945 }
 0x2c7   : > { %v10873_v53 = vsel %vm483_vm0, %v1944_v18, %v1946_v47  ;;  %1985 = vst.msk [vmem:[#allocation2 + $0x58] sm:$0xff] %vm483_vm0, %v1946_v47 }
 0x2c8   : > { %1984 = vst [vmem:[#allocation2 + $0x50] sm:$0xff] %v10873_v53 }
 0x2c9   : > { %3120 = vrot.lane.b32.xlu0 %v1989_v62, %s17229_s22  ;;  %3306 = vrot.lane.b32.xlu1 %v1989_v62, %s17230_s24 }
 0x2cd   : > { %3492 = vrot.lane.b32.xlu0 %v1989_v62, %s17231_s27  ;;  %3864 = vrot.lane.b32.xlu1 %v1989_v62, %s17113_s17 }
 0x2d1   : > { %4091 = vrot.lane.b32.xlu0 %v1989_v62, %s17111_s16  ;;  %4317 = vrot.lane.b32.xlu1 %v1989_v62, %s17049_s19 }
 0x2d5   : > { %4543 = vrot.lane.b32.xlu0 %v1989_v62, %s17107_s18  ;;  %4769 = vrot.lane.b32.xlu1 %v1989_v62, %s17044_s21 }
 0x2d9   : > { %4975 = vrot.lane.b32.xlu0 %v1989_v62, %s17047_s20  ;;  %5201 = vrot.lane.b32.xlu1 %v1989_v62, %s17229_s22 }
 0x2dd   : > { %6089 = vrot.lane.b32.xlu0 %v1989_v62, %s17113_s17  ;;  %5427 = vrot.lane.b32.xlu1 %v1989_v62, %s17230_s24 }
 0x2e1   : > { %6622 = vrot.lane.b32.xlu0 %v1989_v62, %s17049_s19  ;;  %5653 = vrot.lane.b32.xlu1 %v1989_v62, %s17231_s27 }
 0x2e5   : > { %2027 = vrot.lane.b32.xlu0 %v10891_v56, %s17113_s17  ;;  %6356 = vrot.lane.b32.xlu1 %v1989_v62, %s17111_s16 }
 0x2e9   : > { %2400 = vrot.lane.b32.xlu0 %v10891_v56, %s17049_s19  ;;  %2214 = vrot.lane.b32.xlu1 %v10891_v56, %s17111_s16 }
 0x2ed   : > { %2772 = vrot.lane.b32.xlu0 %v10891_v56, %s17044_s21  ;;  %2586 = vrot.lane.b32.xlu1 %v10891_v56, %s17107_s18 }
 0x2f1   : > { %3124 = vrot.lane.b32.xlu0 %v10891_v56, %s17229_s22  ;;  %2938 = vrot.lane.b32.xlu1 %v10891_v56, %s17047_s20 }
 0x2f5   : > { %4095 = vrot.lane.b32.xlu0 %v10891_v56, %s17111_s16  ;;  %3310 = vrot.lane.b32.xlu1 %v10891_v56, %s17230_s24 }
 0x2f9   : > { %4547 = vrot.lane.b32.xlu0 %v10891_v56, %s17107_s18  ;;  %3496 = vrot.lane.b32.xlu1 %v10891_v56, %s17231_s27 }
 0x2fd   : > { %4979 = vrot.lane.b32.xlu0 %v10891_v56, %s17047_s20  ;;  %3868 = vrot.lane.b32.xlu1 %v10891_v56, %s17113_s17 }
 0x301   : > { %5431 = vrot.lane.b32.xlu0 %v10891_v56, %s17230_s24  ;;  %4321 = vrot.lane.b32.xlu1 %v10891_v56, %s17049_s19 }
 0x305   : > { %5657 = vrot.lane.b32.xlu0 %v10891_v56, %s17231_s27  ;;  %4773 = vrot.lane.b32.xlu1 %v10891_v56, %s17044_s21 }
 0x309   : > { %6093 = vrot.lane.b32.xlu0 %v10891_v56, %s17113_s17  ;;  %5205 = vrot.lane.b32.xlu1 %v10891_v56, %s17229_s22 }
 0x30d   : > { %6626 = vrot.lane.b32.xlu0 %v10891_v56, %s17049_s19  ;;  %6360 = vrot.lane.b32.xlu1 %v10891_v56, %s17111_s16 }
 0x311   : > { %2212 = vrot.lane.b32.xlu0 %v10936_v57, %s17111_s16  ;;  %2025 = vrot.lane.b32.xlu1 %v10936_v57, %s17113_s17 }
 0x315   : > { %2584 = vrot.lane.b32.xlu0 %v10936_v57, %s17107_s18  ;;  %2398 = vrot.lane.b32.xlu1 %v10936_v57, %s17049_s19 }
 0x319   : > { %2936 = vrot.lane.b32.xlu0 %v10936_v57, %s17047_s20  ;;  %2770 = vrot.lane.b32.xlu1 %v10936_v57, %s17044_s21 }
 0x31d   : > { %3308 = vrot.lane.b32.xlu0 %v10936_v57, %s17230_s24  ;;  %3122 = vrot.lane.b32.xlu1 %v10936_v57, %s17229_s22 }
 0x321   : > { %3494 = vrot.lane.b32.xlu0 %v10936_v57, %s17231_s27  ;;  %4093 = vrot.lane.b32.xlu1 %v10936_v57, %s17111_s16 }
 0x325   : > { %3866 = vrot.lane.b32.xlu0 %v10936_v57, %s17113_s17  ;;  %4545 = vrot.lane.b32.xlu1 %v10936_v57, %s17107_s18 }
 0x329   : > { %4319 = vrot.lane.b32.xlu0 %v10936_v57, %s17049_s19  ;;  %4977 = vrot.lane.b32.xlu1 %v10936_v57, %s17047_s20 }
 0x32d   : > { %4771 = vrot.lane.b32.xlu0 %v10936_v57, %s17044_s21  ;;  %5429 = vrot.lane.b32.xlu1 %v10936_v57, %s17230_s24 }
 0x32f   : > { %v10970_v49 = vpop.permute.xlu0 %2023  ;;  %v10972_v44 = vpop.permute.xlu1 %2210 }
 0x331   : > { %5203 = vrot.lane.b32.xlu0 %v10936_v57, %s17229_s22  ;;  %5655 = vrot.lane.b32.xlu1 %v10936_v57, %s17231_s27 }
 0x333   : > { %v10978_v48 = vpop.permute.xlu0 %2396  ;;  %v10980_v40 = vpop.permute.xlu1 %2582 }
 0x335   : > { %6358 = vrot.lane.b32.xlu0 %v10936_v57, %s17111_s16  ;;  %6091 = vrot.lane.b32.xlu1 %v10936_v57, %s17113_s17 }
 0x337   : > { %v10986_v15 = vpop.permute.xlu0 %2768  ;;  %v10988_v59 = vpop.permute.xlu1 %2934 }
 0x338   : > { %17232 = vst [vmem:[#allocation24_spill] sm:$0xff] %v10986_v15  ;;  %17233 = vst [vmem:[#allocation25_spill] sm:$0xff] %v10988_v59 }
 0x339   : > { %2216 = vrot.lane.b32.xlu0 %v1992_v32, %s17111_s16  ;;  %6624 = vrot.lane.b32.xlu1 %v10936_v57, %s17049_s19 }
 0x33b   : > { %v10993_v20 = vpop.permute.xlu0 %3120  ;;  %v10995_v63 = vpop.permute.xlu1 %3306 }
 0x33c   : > { %17234 = vst [vmem:[#allocation19_spill] sm:$0xff] %v10993_v20  ;;  %17235 = vst [vmem:[#allocation26_spill] sm:$0xff] %v10995_v63  ;;  %v1998_v20 = vld [vmem:[#allocation2 + $0x48] sm:$0xff] }
 0x33d   : > { %2588 = vrot.lane.b32.xlu0 %v1992_v32, %s17107_s18  ;;  %2029 = vrot.lane.b32.xlu1 %v1992_v32, %s17113_s17 }
 0x33f   : > { %v10999_v60 = vpop.permute.xlu0 %3492  ;;  %v11001_v19 = vpop.permute.xlu1 %3864 }
 0x340   : > { %17236 = vst [vmem:[#allocation20_spill] sm:$0xff] %v10999_v60  ;;  %17237 = vst [vmem:[#allocation29_spill] sm:$0xff] %v11001_v19 }
 0x341   : > { %2940 = vrot.lane.b32.xlu0 %v1992_v32, %s17047_s20  ;;  %2402 = vrot.lane.b32.xlu1 %v1992_v32, %s17049_s19 }
 0x343   : > { %v11005_v5 = vpop.permute.xlu0 %4091  ;;  %v11007_v51 = vpop.permute.xlu1 %4317 }
 0x344   : > { %17238 = vst [vmem:[#allocation23_spill] sm:$0xff] %v11005_v5  ;;  %17239 = vst [vmem:[#allocation27_spill] sm:$0xff] %v11007_v51 }
 0x345   : > { %3312 = vrot.lane.b32.xlu0 %v1992_v32, %s17230_s24  ;;  %2774 = vrot.lane.b32.xlu1 %v1992_v32, %s17044_s21 }
 0x347   : > { %v11011_v3 = vpop.permute.xlu0 %4543  ;;  %v11013_v58 = vpop.permute.xlu1 %4769 }
 0x348   : > { %17240 = vst [vmem:[#allocation28_spill] sm:$0xff] %v11011_v3  ;;  %17241 = vst [vmem:[#allocation7_spill] sm:$0xff] %v11013_v58 }
 0x349   : > { %3870 = vrot.lane.b32.xlu0 %v1992_v32, %s17113_s17  ;;  %3126 = vrot.lane.b32.xlu1 %v1992_v32, %s17229_s22 }
 0x34b   : > { %v11017_v30 = vpop.permute.xlu0 %4975  ;;  %v11019_v31 = vpop.permute.xlu1 %5201 }
 0x34c   : > { %17242 = vst [vmem:[#allocation10_spill] sm:$0xff] %v11017_v30  ;;  %17243 = vst [vmem:[#allocation8_spill] sm:$0xff] %v11019_v31 }
 0x34d   : > { %4323 = vrot.lane.b32.xlu0 %v1992_v32, %s17049_s19  ;;  %3498 = vrot.lane.b32.xlu1 %v1992_v32, %s17231_s27 }
 0x34f   : > { %v11023_v7 = vpop.permute.xlu0 %6089  ;;  %v11025_v6 = vpop.permute.xlu1 %5427 }
 0x350   : > { %17244 = vst [vmem:[#allocation9_spill] sm:$0xff] %v11023_v7  ;;  %17245 = vst [vmem:[#allocation30_spill] sm:$0xff] %v11025_v6 }
 0x351   : > { %4775 = vrot.lane.b32.xlu0 %v1992_v32, %s17044_s21  ;;  %4097 = vrot.lane.b32.xlu1 %v1992_v32, %s17111_s16 }
 0x353   : > { %v11029_v29 = vpop.permute.xlu0 %6622  ;;  %v11031_v21 = vpop.permute.xlu1 %5653 }
 0x354   : > { %17246 = vst [vmem:[#allocation31_spill] sm:$0xff] %v11029_v29  ;;  %17247 = vst [vmem:[#allocation32_spill] sm:$0xff] %v11031_v21 }
 0x355   : > { %5207 = vrot.lane.b32.xlu0 %v1992_v32, %s17229_s22  ;;  %4549 = vrot.lane.b32.xlu1 %v1992_v32, %s17107_s18 }
 0x357   : > { %v11035_v28 = vpop.permute.xlu0 %2027  ;;  %v11037_v34 = vpop.permute.xlu1 %6356 }
 0x358   : > { %17248 = vst [vmem:[#allocation33_spill] sm:$0xff] %v11037_v34 }
 0x359   : > { %5659 = vrot.lane.b32.xlu0 %v1992_v32, %s17231_s27  ;;  %4981 = vrot.lane.b32.xlu1 %v1992_v32, %s17047_s20 }
 0x35b   : > { %v11041_v2 = vpop.permute.xlu0 %2400  ;;  %v11043_v8 = vpop.permute.xlu1 %2214 }
 0x35d   : > { %6362 = vrot.lane.b32.xlu0 %v1992_v32, %s17111_s16  ;;  %5433 = vrot.lane.b32.xlu1 %v1992_v32, %s17230_s24 }
 0x35f   : > { %v11047_v33 = vpop.permute.xlu0 %2772  ;;  %v11049_v9 = vpop.permute.xlu1 %2586 }
 0x360   : > { %17249 = vst [vmem:[#allocation34_spill] sm:$0xff] %v11047_v33 }
 0x361   : > { %2220 = vrot.lane.b32.xlu0 %v1994_v24, %s17111_s16  ;;  %6095 = vrot.lane.b32.xlu1 %v1992_v32, %s17113_s17 }
 0x363   : > { %v11053_v0 = vpop.permute.xlu0 %3124  ;;  %v11055_v55 = vpop.permute.xlu1 %2938 }
 0x364   : > { %17250 = vst [vmem:[#allocation35_spill] sm:$0xff] %v11053_v0  ;;  %17251 = vst [vmem:[#allocation36_spill] sm:$0xff] %v11055_v55 }
 0x365   : > { %2592 = vrot.lane.b32.xlu0 %v1994_v24, %s17107_s18  ;;  %6628 = vrot.lane.b32.xlu1 %v1992_v32, %s17049_s19 }
 0x367   : > { %v11059_v27 = vpop.permute.xlu0 %4095  ;;  %v11061_v41 = vpop.permute.xlu1 %3310 }
 0x368   : > { %17252 = vst [vmem:[#allocation37_spill] sm:$0xff] %v11059_v27  ;;  %17253 = vst [vmem:[#allocation38_spill] sm:$0xff] %v11061_v41 }
 0x369   : > { %2944 = vrot.lane.b32.xlu0 %v1994_v24, %s17047_s20  ;;  %2033 = vrot.lane.b32.xlu1 %v1994_v24, %s17113_s17 }
 0x36b   : > { %v11065_v17 = vpop.permute.xlu0 %4547  ;;  %v11067_v11 = vpop.permute.xlu1 %3496 }
 0x36c   : > { %17254 = vst [vmem:[#allocation39_spill] sm:$0xff] %v11065_v17  ;;  %17255 = vst [vmem:[#allocation40_spill] sm:$0xff] %v11067_v11 }
 0x36d   : > { %3316 = vrot.lane.b32.xlu0 %v1994_v24, %s17230_s24  ;;  %2406 = vrot.lane.b32.xlu1 %v1994_v24, %s17049_s19 }
 0x36f   : > { %v11071_v1 = vpop.permute.xlu0 %4979  ;;  %v11073_v35 = vpop.permute.xlu1 %3868 }
 0x370   : > { %17256 = vst [vmem:[#allocation41_spill] sm:$0xff] %v11071_v1  ;;  %17257 = vst [vmem:[#allocation42_spill] sm:$0xff] %v11073_v35 }
 0x371   : > { %3502 = vrot.lane.b32.xlu0 %v1994_v24, %s17231_s27  ;;  %2778 = vrot.lane.b32.xlu1 %v1994_v24, %s17044_s21 }
 0x373   : > { %v11077_v4 = vpop.permute.xlu0 %5431  ;;  %v11079_v37 = vpop.permute.xlu1 %4321 }
 0x374   : > { %17258 = vst [vmem:[#allocation43_spill] sm:$0xff] %v11077_v4  ;;  %17259 = vst [vmem:[#allocation44_spill] sm:$0xff] %v11079_v37 }
 0x375   : > { %3874 = vrot.lane.b32.xlu0 %v1994_v24, %s17113_s17  ;;  %3130 = vrot.lane.b32.xlu1 %v1994_v24, %s17229_s22 }
 0x377   : > { %v11083_v36 = vpop.permute.xlu0 %5657  ;;  %v11085_v26 = vpop.permute.xlu1 %4773 }
 0x378   : > { %17260 = vst [vmem:[#allocation45_spill] sm:$0xff] %v11083_v36  ;;  %17261 = vst [vmem:[#allocation46_spill] sm:$0xff] %v11085_v26 }
 0x379   : > { %4327 = vrot.lane.b32.xlu0 %v1994_v24, %s17049_s19  ;;  %4101 = vrot.lane.b32.xlu1 %v1994_v24, %s17111_s16 }
 0x37b   : > { %v11089_v61 = vpop.permute.xlu0 %6093  ;;  %v11091_v12 = vpop.permute.xlu1 %5205 }
 0x37c   : > { %17262 = vst [vmem:[#allocation47_spill] sm:$0xff] %v11089_v61  ;;  %17263 = vst [vmem:[#allocation48_spill] sm:$0xff] %v11091_v12 }
 0x37d   : > { %4779 = vrot.lane.b32.xlu0 %v1994_v24, %s17044_s21  ;;  %4553 = vrot.lane.b32.xlu1 %v1994_v24, %s17107_s18 }
 0x37f   : > { %v11095_v52 = vpop.permute.xlu0 %6626  ;;  %v11097_v14 = vpop.permute.xlu1 %6360 }
 0x380   : > { %17264 = vst [vmem:[#allocation49_spill] sm:$0xff] %v11095_v52  ;;  %17265 = vst [vmem:[#allocation50_spill] sm:$0xff] %v11097_v14 }
 0x381   : > { %5437 = vrot.lane.b32.xlu0 %v1994_v24, %s17230_s24  ;;  %4985 = vrot.lane.b32.xlu1 %v1994_v24, %s17047_s20 }
 0x383   : > { %v11101_v23 = vpop.permute.xlu0 %2212  ;;  %v11103_v10 = vpop.permute.xlu1 %2025 }
 0x385   : > { %5663 = vrot.lane.b32.xlu0 %v1994_v24, %s17231_s27  ;;  %5211 = vrot.lane.b32.xlu1 %v1994_v24, %s17229_s22 }
 0x387   : > { %v11107_v39 = vpop.permute.xlu0 %2584  ;;  %v11109_v42 = vpop.permute.xlu1 %2398 }
 0x389   : > { %6366 = vrot.lane.b32.xlu0 %v1994_v24, %s17111_s16  ;;  %6099 = vrot.lane.b32.xlu1 %v1994_v24, %s17113_s17 }
 0x38b   : > { %v11113_v46 = vpop.permute.xlu0 %2936  ;;  %v11115_v43 = vpop.permute.xlu1 %2770 }
 0x38c   : > { %17266 = vst [vmem:[#allocation51_spill] sm:$0xff] %v11113_v46  ;;  %17267 = vst [vmem:[#allocation52_spill] sm:$0xff] %v11115_v43 }
 0x38d   : > { %2031 = vrot.lane.b32.xlu0 %v10852_v13, %s17113_s17  ;;  %6632 = vrot.lane.b32.xlu1 %v1994_v24, %s17049_s19 }
 0x38f   : > { %v11120_v22 = vpop.permute.xlu0 %3308  ;;  %v11122_v62 = vpop.permute.xlu1 %3122 }
 0x390   : > { %17268 = vst [vmem:[#allocation53_spill] sm:$0xff] %v11120_v22  ;;  %17269 = vst [vmem:[#allocation54_spill] sm:$0xff] %v11122_v62 }
 0x391   : > { %2404 = vrot.lane.b32.xlu0 %v10852_v13, %s17049_s19  ;;  %2218 = vrot.lane.b32.xlu1 %v10852_v13, %s17111_s16 }
 0x393   : > { %v11128_v25 = vpop.permute.xlu0 %3494  ;;  %v11130_v45 = vpop.permute.xlu1 %4093 }
 0x394   : > { %17270 = vst [vmem:[#allocation55_spill] sm:$0xff] %v11128_v25  ;;  %17271 = vst [vmem:[#allocation56_spill] sm:$0xff] %v11130_v45 }
 0x395   : > { %2776 = vrot.lane.b32.xlu0 %v10852_v13, %s17044_s21  ;;  %2590 = vrot.lane.b32.xlu1 %v10852_v13, %s17107_s18 }
 0x397   : > { %v11136_v38 = vpop.permute.xlu0 %3866  ;;  %v11138_v50 = vpop.permute.xlu1 %4545 }
 0x398   : > { %17272 = vst [vmem:[#allocation57_spill] sm:$0xff] %v11136_v38  ;;  %17273 = vst [vmem:[#allocation58_spill] sm:$0xff] %v11138_v50 }
 0x399   : > { %3128 = vrot.lane.b32.xlu0 %v10852_v13, %s17229_s22  ;;  %2942 = vrot.lane.b32.xlu1 %v10852_v13, %s17047_s20 }
 0x39b   : > { %v11144_v18 = vpop.permute.xlu0 %4319  ;;  %v11146_v47 = vpop.permute.xlu1 %4977 }
 0x39c   : > { %17274 = vst [vmem:[#allocation59_spill] sm:$0xff] %v11144_v18  ;;  %17275 = vst [vmem:[#allocation60_spill] sm:$0xff] %v11146_v47 }
 0x39d   : > { %4099 = vrot.lane.b32.xlu0 %v10852_v13, %s17111_s16  ;;  %3314 = vrot.lane.b32.xlu1 %v10852_v13, %s17230_s24 }
 0x39f   : > { %v11152_v32 = vpop.permute.xlu0 %4771  ;;  %v11154_v24 = vpop.permute.xlu1 %5429 }
 0x3a0   : > { %17276 = vst [vmem:[#allocation61_spill] sm:$0xff] %v11152_v32  ;;  %17277 = vst [vmem:[#allocation62_spill] sm:$0xff] %v11154_v24  ;;  %v1997_v32 = vld [vmem:[#allocation2 + $0x40] sm:$0xff] }
 0x3a1   : > { %4551 = vrot.lane.b32.xlu0 %v10852_v13, %s17107_s18  ;;  %3500 = vrot.lane.b32.xlu1 %v10852_v13, %s17231_s27 }
 0x3a3   : > { %v11160_v29 = vpop.permute.xlu0 %5203  ;;  %v11162_v52 = vpop.permute.xlu1 %5655 }
 0x3a4   : > { %17278 = vst [vmem:[#allocation63_spill] sm:$0xff] %v11160_v29  ;;  %17279 = vst [vmem:[#allocation64_spill] sm:$0xff] %v11162_v52 }
 0x3a5   : > { %4983 = vrot.lane.b32.xlu0 %v10852_v13, %s17047_s20  ;;  %3872 = vrot.lane.b32.xlu1 %v10852_v13, %s17113_s17 }
 0x3a7   : > { %v11168_v34 = vpop.permute.xlu0 %6358  ;;  %v11170_v14 = vpop.permute.xlu1 %6091 }
 0x3a8   : > { %17280 = vst [vmem:[#allocation65_spill] sm:$0xff] %v11168_v34  ;;  %17281 = vst [vmem:[#allocation66_spill] sm:$0xff] %v11170_v14 }
 0x3a9   : > { %5209 = vrot.lane.b32.xlu0 %v10852_v13, %s17229_s22  ;;  %4325 = vrot.lane.b32.xlu1 %v10852_v13, %s17049_s19 }
 0x3ab   : > { %v11176_v7 = vpop.permute.xlu0 %2216  ;;  %v11178_v61 = vpop.permute.xlu1 %6624 }
 0x3ac   : > { %17282 = vst [vmem:[#allocation67_spill] sm:$0xff] %v11178_v61  ;;  %v1995_v61 = vld [vmem:[#allocation2 + $0x30] sm:$0xff] }
 0x3ad   : > { %6097 = vrot.lane.b32.xlu0 %v10852_v13, %s17113_s17  ;;  %4777 = vrot.lane.b32.xlu1 %v10852_v13, %s17044_s21 }
 0x3af   : > { %v11184_v21 = vpop.permute.xlu0 %2588  ;;  %v11186_v34 = vpop.permute.xlu1 %2029 }
 0x3b1   : > { %6630 = vrot.lane.b32.xlu0 %v10852_v13, %s17049_s19  ;;  %5435 = vrot.lane.b32.xlu1 %v10852_v13, %s17230_s24 }
 0x3b3   : > { %v11192_v14 = vpop.permute.xlu0 %2940  ;;  %v11194_v52 = vpop.permute.xlu1 %2402 }
 0x3b4   : > { %17283 = vst [vmem:[#allocation68_spill] sm:$0xff] %v11192_v14 }
 0x3b5   : > { %2035 = vrot.lane.b32.xlu0 %v1995_v61, %s17113_s17  ;;  %5661 = vrot.lane.b32.xlu1 %v10852_v13, %s17231_s27 }
 0x3b7   : > { %v11199_v36 = vpop.permute.xlu0 %3312  ;;  %v11201_v6 = vpop.permute.xlu1 %2774 }
 0x3b8   : > { %17284 = vst [vmem:[#allocation69_spill] sm:$0xff] %v11199_v36  ;;  %17285 = vst [vmem:[#allocation70_spill] sm:$0xff] %v11201_v6  ;;  %v2002_v36 = vld [vmem:[#allocation2 + $0x68] sm:$0xf] }
 0x3b9   : > { %2408 = vrot.lane.b32.xlu0 %v1995_v61, %s17049_s19  ;;  %6364 = vrot.lane.b32.xlu1 %v10852_v13, %s17111_s16 }
 0x3bb   : > { %v11206_v24 = vpop.permute.xlu0 %3870  ;;  %v11208_v4 = vpop.permute.xlu1 %3126 }
 0x3bc   : > { %17286 = vst [vmem:[#allocation71_spill] sm:$0xff] %v11206_v24  ;;  %17287 = vst [vmem:[#allocation72_spill] sm:$0xff] %v11208_v4 }
 0x3bd   : > { %2780 = vrot.lane.b32.xlu0 %v1995_v61, %s17044_s21  ;;  %2222 = vrot.lane.b32.xlu1 %v1995_v61, %s17111_s16 }
 0x3bf   : > { %v11212_v31 = vpop.permute.xlu0 %4323  ;;  %v11214_v29 = vpop.permute.xlu1 %3498 }
 0x3c0   : > { %17288 = vst [vmem:[#allocation73_spill] sm:$0xff] %v11212_v31  ;;  %17289 = vst [vmem:[#allocation74_spill] sm:$0xff] %v11214_v29 }
 0x3c1   : > { %3132 = vrot.lane.b32.xlu0 %v1995_v61, %s17229_s22  ;;  %2594 = vrot.lane.b32.xlu1 %v1995_v61, %s17107_s18 }
 0x3c3   : > { %v11218_v12 = vpop.permute.xlu0 %4775  ;;  %v11220_v30 = vpop.permute.xlu1 %4097 }
 0x3c4   : > { %17290 = vst [vmem:[#allocation75_spill] sm:$0xff] %v11218_v12  ;;  %17291 = vst [vmem:[#allocation76_spill] sm:$0xff] %v11220_v30 }
 0x3c5   : > { %3504 = vrot.lane.b32.xlu0 %v1995_v61, %s17231_s27  ;;  %2946 = vrot.lane.b32.xlu1 %v1995_v61, %s17047_s20 }
 0x3c7   : > { %v11224_v13 = vpop.permute.xlu0 %5207  ;;  %v11226_v47 = vpop.permute.xlu1 %4549 }
 0x3c8   : > { %17292 = vst [vmem:[#allocation77_spill] sm:$0xff] %v11224_v13  ;;  %17293 = vst [vmem:[#allocation78_spill] sm:$0xff] %v11226_v47 }
 0x3c9   : > { %4103 = vrot.lane.b32.xlu0 %v1995_v61, %s17111_s16  ;;  %3318 = vrot.lane.b32.xlu1 %v1995_v61, %s17230_s24 }
 0x3cb   : > { %v11230_v1 = vpop.permute.xlu0 %5659  ;;  %v11232_v3 = vpop.permute.xlu1 %4981 }
 0x3cc   : > { %17294 = vst [vmem:[#allocation79_spill] sm:$0xff] %v11230_v1  ;;  %17295 = vst [vmem:[#allocation80_spill] sm:$0xff] %v11232_v3 }
 0x3cd   : > { %4555 = vrot.lane.b32.xlu0 %v1995_v61, %s17107_s18  ;;  %3876 = vrot.lane.b32.xlu1 %v1995_v61, %s17113_s17 }
 0x3cf   : > { %v11236_v50 = vpop.permute.xlu0 %6362  ;;  %v11238_v17 = vpop.permute.xlu1 %5433 }
 0x3d0   : > { %17296 = vst [vmem:[#allocation81_spill] sm:$0xff] %v11236_v50  ;;  %17297 = vst [vmem:[#allocation82_spill] sm:$0xff] %v11238_v17 }
 0x3d1   : > { %4987 = vrot.lane.b32.xlu0 %v1995_v61, %s17047_s20  ;;  %4329 = vrot.lane.b32.xlu1 %v1995_v61, %s17049_s19 }
 0x3d3   : > { %v11242_v13 = vpop.permute.xlu0 %2220  ;;  %v11244_v47 = vpop.permute.xlu1 %6095 }
 0x3d4   : > { %17298 = vst [vmem:[#allocation83_spill] sm:$0xff] %v11244_v47 }
 0x3d5   : > { %5665 = vrot.lane.b32.xlu0 %v1995_v61, %s17231_s27  ;;  %4781 = vrot.lane.b32.xlu1 %v1995_v61, %s17044_s21 }
 0x3d7   : > { %v11248_v1 = vpop.permute.xlu0 %2592  ;;  %v11250_v3 = vpop.permute.xlu1 %6628 }
 0x3d8   : > { %17299 = vst [vmem:[#allocation84_spill] sm:$0xff] %v11250_v3 }
 0x3d9   : > { %6101 = vrot.lane.b32.xlu0 %v1995_v61, %s17113_s17  ;;  %5213 = vrot.lane.b32.xlu1 %v1995_v61, %s17229_s22 }
 0x3db   : > { %v11254_v50 = vpop.permute.xlu0 %2944  ;;  %v11256_v17 = vpop.permute.xlu1 %2033 }
 0x3dc   : > { %17300 = vst [vmem:[#allocation85_spill] sm:$0xff] %v11254_v50 }
 0x3dd   : > { %6634 = vrot.lane.b32.xlu0 %v1995_v61, %s17049_s19  ;;  %5439 = vrot.lane.b32.xlu1 %v1995_v61, %s17230_s24 }
 0x3df   : > { %v11260_v47 = vpop.permute.xlu0 %3316  ;;  %v11262_v58 = vpop.permute.xlu1 %2406 }
 0x3e0   : > { %17301 = vst [vmem:[#allocation86_spill] sm:$0xff] %v11260_v47 }
 0x3e1   : > { %2039 = vrot.lane.b32.xlu0 %v1997_v32, %s17113_s17  ;;  %6368 = vrot.lane.b32.xlu1 %v1995_v61, %s17111_s16 }
 0x3e3   : > { %v11266_v3 = vpop.permute.xlu0 %3502  ;;  %v11268_v26 = vpop.permute.xlu1 %2778 }
 0x3e4   : > { %17302 = vst [vmem:[#allocation87_spill] sm:$0xff] %v11266_v3  ;;  %17303 = vst [vmem:[#allocation88_spill] sm:$0xff] %v11268_v26 }
 0x3e5   : > { %2412 = vrot.lane.b32.xlu0 %v1997_v32, %s17049_s19  ;;  %2226 = vrot.lane.b32.xlu1 %v1997_v32, %s17111_s16 }
 0x3e7   : > { %v11272_v12 = vpop.permute.xlu0 %3874  ;;  %v11274_v5 = vpop.permute.xlu1 %3130 }
 0x3e8   : > { %17304 = vst [vmem:[#allocation89_spill] sm:$0xff] %v11272_v12  ;;  %17305 = vst [vmem:[#allocation90_spill] sm:$0xff] %v11274_v5 }
 0x3e9   : > { %2784 = vrot.lane.b32.xlu0 %v1997_v32, %s17044_s21  ;;  %2598 = vrot.lane.b32.xlu1 %v1997_v32, %s17107_s18 }
 0x3eb   : > { %v11278_v45 = vpop.permute.xlu0 %4327  ;;  %v11280_v27 = vpop.permute.xlu1 %4101 }
 0x3ec   : > { %17306 = vst [vmem:[#allocation91_spill] sm:$0xff] %v11278_v45  ;;  %17307 = vst [vmem:[#allocation92_spill] sm:$0xff] %v11280_v27  ;;  %v2001_v45 = vld [vmem:[#allocation2 + $0x60] sm:$0xf] }
 0x3ed   : > { %3136 = vrot.lane.b32.xlu0 %v1997_v32, %s17229_s22  ;;  %2950 = vrot.lane.b32.xlu1 %v1997_v32, %s17047_s20 }
 0x3ef   : > { %v11284_v61 = vpop.permute.xlu0 %4779  ;;  %v11286_v51 = vpop.permute.xlu1 %4553 }
 0x3f0   : > { %17308 = vst [vmem:[#allocation93_spill] sm:$0xff] %v11284_v61  ;;  %17309 = vst [vmem:[#allocation94_spill] sm:$0xff] %v11286_v51 }
 0x3f1   : > { %4107 = vrot.lane.b32.xlu0 %v1997_v32, %s17111_s16  ;;  %3322 = vrot.lane.b32.xlu1 %v1997_v32, %s17230_s24 }
 0x3f3   : > { %v11290_v30 = vpop.permute.xlu0 %5437  ;;  %v11292_v18 = vpop.permute.xlu1 %4985 }
 0x3f4   : > { %17310 = vst [vmem:[#allocation95_spill] sm:$0xff] %v11290_v30  ;;  %17311 = vst [vmem:[#allocation96_spill] sm:$0xff] %v11292_v18 }
 0x3f5   : > { %4559 = vrot.lane.b32.xlu0 %v1997_v32, %s17107_s18  ;;  %3508 = vrot.lane.b32.xlu1 %v1997_v32, %s17231_s27 }
 0x3f7   : > { %v11296_v37 = vpop.permute.xlu0 %5663  ;;  %v11298_v27 = vpop.permute.xlu1 %5211 }
 0x3f8   : > { %17312 = vst [vmem:[#allocation97_spill] sm:$0xff] %v11296_v37  ;;  %17313 = vst [vmem:[#allocation98_spill] sm:$0xff] %v11298_v27 }
 0x3f9   : > { %4991 = vrot.lane.b32.xlu0 %v1997_v32, %s17047_s20  ;;  %3880 = vrot.lane.b32.xlu1 %v1997_v32, %s17113_s17 }
 0x3fb   : > { %v11302_v51 = vpop.permute.xlu0 %6366  ;;  %v11304_v61 = vpop.permute.xlu1 %6099 }
 0x3fc   : > { %17314 = vst [vmem:[#allocation99_spill] sm:$0xff] %v11302_v51  ;;  %17315 = vst [vmem:[#allocation100_spill] sm:$0xff] %v11304_v61 }
 0x3fd   : > { %5217 = vrot.lane.b32.xlu0 %v1997_v32, %s17229_s22  ;;  %4333 = vrot.lane.b32.xlu1 %v1997_v32, %s17049_s19 }
 0x3ff   : > { %v11308_v30 = vpop.permute.xlu0 %2031  ;;  %v11310_v18 = vpop.permute.xlu1 %6632 }
 0x400   : > { %17316 = vst [vmem:[#allocation101_spill] sm:$0xff] %v11310_v18 }
 0x401   : > { %5443 = vrot.lane.b32.xlu0 %v1997_v32, %s17230_s24  ;;  %4785 = vrot.lane.b32.xlu1 %v1997_v32, %s17044_s21 }
 0x403   : > { %v11314_v37 = vpop.permute.xlu0 %2404  ;;  %v11316_v27 = vpop.permute.xlu1 %2218 }
 0x405   : > { %5669 = vrot.lane.b32.xlu0 %v1997_v32, %s17231_s27  ;;  %6372 = vrot.lane.b32.xlu1 %v1997_v32, %s17111_s16 }
 0x407   : > { %v11320_v51 = vpop.permute.xlu0 %2776  ;;  %v11322_v61 = vpop.permute.xlu1 %2590 }
 0x408   : > { %17317 = vst [vmem:[#allocation102_spill] sm:$0xff] %v11320_v51 }
 0x409   : > { %6105 = vrot.lane.b32.xlu0 %v1997_v32, %s17113_s17  ;;  %2037 = vrot.lane.b32.xlu1 %v10860_v16, %s17113_s17 }
 0x40b   : > { %v11327_v18 = vpop.permute.xlu0 %3128  ;;  %v11329_v31 = vpop.permute.xlu1 %2942 }
 0x40c   : > { %17318 = vst [vmem:[#allocation103_spill] sm:$0xff] %v11327_v18  ;;  %17319 = vst [vmem:[#allocation104_spill] sm:$0xff] %v11329_v31 }
 0x40d   : > { %6638 = vrot.lane.b32.xlu0 %v1997_v32, %s17049_s19  ;;  %2234 = vrot.lane.b32.xlu1 %v2001_v45, %s17111_s16 }
 0x40f   : > { %v11333_v19 = vpop.permute.xlu0 %4099  ;;  %v11335_v38 = vpop.permute.xlu1 %3314 }
 0x410   : > { %17320 = vst [vmem:[#allocation105_spill] sm:$0xff] %v11333_v19  ;;  %17321 = vst [vmem:[#allocation106_spill] sm:$0xff] %v11335_v38 }
 0x411   : > { %2047 = vrot.lane.b32.xlu0 %v2001_v45, %s17113_s17  ;;  %2410 = vrot.lane.b32.xlu1 %v10860_v16, %s17049_s19 }
 0x413   : > { %v11340_v35 = vpop.permute.xlu0 %4551  ;;  %v11342_v24 = vpop.permute.xlu1 %3500 }
 0x414   : > { %17322 = vst [vmem:[#allocation107_spill] sm:$0xff] %v11340_v35  ;;  %17323 = vst [vmem:[#allocation108_spill] sm:$0xff] %v11342_v24 }
 0x415   : > { %2224 = vrot.lane.b32.xlu0 %v10860_v16, %s17111_s16  ;;  %2606 = vrot.lane.b32.xlu1 %v2001_v45, %s17107_s18 }
 0x417   : > { %v11347_v32 = vpop.permute.xlu0 %4983  ;;  %v11349_v12 = vpop.permute.xlu1 %3872 }
 0x418   : > { %17324 = vst [vmem:[#allocation109_spill] sm:$0xff] %v11347_v32  ;;  %17325 = vst [vmem:[#allocation110_spill] sm:$0xff] %v11349_v12 }
 0x419   : > { %2420 = vrot.lane.b32.xlu0 %v2001_v45, %s17049_s19  ;;  %2782 = vrot.lane.b32.xlu1 %v10860_v16, %s17044_s21 }
 0x41b   : > { %v11354_v19 = vpop.permute.xlu0 %5209  ;;  %v11356_v54 = vpop.permute.xlu1 %4325 }
 0x41c   : > { %17326 = vst [vmem:[#allocation111_spill] sm:$0xff] %v11354_v19  ;;  %17327 = vst [vmem:[#allocation112_spill] sm:$0xff] %v11356_v54 }
 0x41d   : > { %2596 = vrot.lane.b32.xlu0 %v10860_v16, %s17107_s18  ;;  %2958 = vrot.lane.b32.xlu1 %v2001_v45, %s17047_s20 }
 0x41f   : > { %v11361_v35 = vpop.permute.xlu0 %6097  ;;  %v11363_v60 = vpop.permute.xlu1 %4777 }
 0x420   : > { %17328 = vst [vmem:[#allocation113_spill] sm:$0xff] %v11361_v35  ;;  %17329 = vst [vmem:[#allocation114_spill] sm:$0xff] %v11363_v60 }
 0x421   : > { %2792 = vrot.lane.b32.xlu0 %v2001_v45, %s17044_s21  ;;  %3134 = vrot.lane.b32.xlu1 %v10860_v16, %s17229_s22 }
 0x423   : > { %v11368_v32 = vpop.permute.xlu0 %6630  ;;  %v11370_v12 = vpop.permute.xlu1 %5435 }
 0x424   : > { %17330 = vst [vmem:[#allocation115_spill] sm:$0xff] %v11368_v32  ;;  %17331 = vst [vmem:[#allocation116_spill] sm:$0xff] %v11370_v12 }
 0x425   : > { %2948 = vrot.lane.b32.xlu0 %v10860_v16, %s17047_s20  ;;  %4105 = vrot.lane.b32.xlu1 %v10860_v16, %s17111_s16 }
 0x427   : > { %v11376_v19 = vpop.permute.xlu0 %2035  ;;  %v11378_v35 = vpop.permute.xlu1 %5661 }
 0x428   : > { %17332 = vst [vmem:[#allocation117_spill] sm:$0xff] %v11378_v35 }
 0x429   : > { %3144 = vrot.lane.b32.xlu0 %v2001_v45, %s17229_s22  ;;  %4557 = vrot.lane.b32.xlu1 %v10860_v16, %s17107_s18 }
 0x42b   : > { %v11383_v60 = vpop.permute.xlu0 %2408  ;;  %v11385_v32 = vpop.permute.xlu1 %6364 }
 0x42c   : > { %17333 = vst [vmem:[#allocation118_spill] sm:$0xff] %v11385_v32 }
 0x42d   : > { %3320 = vrot.lane.b32.xlu0 %v10860_v16, %s17230_s24  ;;  %4989 = vrot.lane.b32.xlu1 %v10860_v16, %s17047_s20 }
 0x42f   : > { %v11391_v12 = vpop.permute.xlu0 %2780  ;;  %v11393_v54 = vpop.permute.xlu1 %2222 }
 0x430   : > { %17334 = vst [vmem:[#allocation119_spill] sm:$0xff] %v11391_v12 }
 0x431   : > { %3330 = vrot.lane.b32.xlu0 %v2001_v45, %s17230_s24  ;;  %5215 = vrot.lane.b32.xlu1 %v10860_v16, %s17229_s22 }
 0x433   : > { %v11398_v35 = vpop.permute.xlu0 %3132  ;;  %v11400_v25 = vpop.permute.xlu1 %2594 }
 0x434   : > { %17335 = vst [vmem:[#allocation120_spill] sm:$0xff] %v11398_v35 }
 0x435   : > { %3516 = vrot.lane.b32.xlu0 %v2001_v45, %s17231_s27  ;;  %5441 = vrot.lane.b32.xlu1 %v10860_v16, %s17230_s24 }
 0x437   : > { %v11405_v32 = vpop.permute.xlu0 %3504  ;;  %v11407_v11 = vpop.permute.xlu1 %2946 }
 0x438   : > { %17336 = vst [vmem:[#allocation121_spill] sm:$0xff] %v11405_v32  ;;  %17337 = vst [vmem:[#allocation122_spill] sm:$0xff] %v11407_v11 }
 0x439   : > { %3506 = vrot.lane.b32.xlu0 %v10860_v16, %s17231_s27  ;;  %5667 = vrot.lane.b32.xlu1 %v10860_v16, %s17231_s27 }
 0x43b   : > { %v11413_v29 = vpop.permute.xlu0 %4103  ;;  %v11415_v24 = vpop.permute.xlu1 %3318 }
 0x43c   : > { %17338 = vst [vmem:[#allocation123_spill] sm:$0xff] %v11413_v29  ;;  %17339 = vst [vmem:[#allocation124_spill] sm:$0xff] %v11415_v24 }
 0x43d   : > { %3878 = vrot.lane.b32.xlu0 %v10860_v16, %s17113_s17  ;;  %6103 = vrot.lane.b32.xlu1 %v10860_v16, %s17113_s17 }
 0x43f   : > { %v11421_v45 = vpop.permute.xlu0 %4555  ;;  %v11423_v3 = vpop.permute.xlu1 %3876 }
 0x440   : > { %17340 = vst [vmem:[#allocation125_spill] sm:$0xff] %v11421_v45  ;;  %17341 = vst [vmem:[#allocation126_spill] sm:$0xff] %v11423_v3 }
 0x441   : > { %4331 = vrot.lane.b32.xlu0 %v10860_v16, %s17049_s19  ;;  %6636 = vrot.lane.b32.xlu1 %v10860_v16, %s17049_s19 }
 0x443   : > { %v11429_v32 = vpop.permute.xlu0 %4987  ;;  %v11431_v29 = vpop.permute.xlu1 %4329 }
 0x444   : > { %17342 = vst [vmem:[#allocation127_spill] sm:$0xff] %v11429_v32  ;;  %17343 = vst [vmem:[#allocation128_spill] sm:$0xff] %v11431_v29 }
 0x445   : > { %4783 = vrot.lane.b32.xlu0 %v10860_v16, %s17044_s21  ;;  %2041 = vrot.lane.b32.xlu1 %v1998_v20, %s17113_s17 }
 0x447   : > { %v11436_v62 = vpop.permute.xlu0 %5665  ;;  %v11438_v45 = vpop.permute.xlu1 %4781 }
 0x448   : > { %17344 = vst [vmem:[#allocation129_spill] sm:$0xff] %v11436_v62  ;;  %17345 = vst [vmem:[#allocation130_spill] sm:$0xff] %v11438_v45 }
 0x449   : > { %6370 = vrot.lane.b32.xlu0 %v10860_v16, %s17111_s16  ;;  %2414 = vrot.lane.b32.xlu1 %v1998_v20, %s17049_s19 }
 0x44b   : > { %v11443_v3 = vpop.permute.xlu0 %6101  ;;  %v11445_v32 = vpop.permute.xlu1 %5213 }
 0x44c   : > { %17346 = vst [vmem:[#allocation131_spill] sm:$0xff] %v11443_v3  ;;  %17347 = vst [vmem:[#allocation132_spill] sm:$0xff] %v11445_v32 }
 0x44d   : > { %2228 = vrot.lane.b32.xlu0 %v1998_v20, %s17111_s16  ;;  %2786 = vrot.lane.b32.xlu1 %v1998_v20, %s17044_s21 }
 0x44f   : > { %v11449_v29 = vpop.permute.xlu0 %6634  ;;  %v11451_v0 = vpop.permute.xlu1 %5439 }
 0x450   : > { %17348 = vst [vmem:[#allocation133_spill] sm:$0xff] %v11449_v29  ;;  %17349 = vst [vmem:[#allocation134_spill] sm:$0xff] %v11451_v0 }
 0x451   : > { %2600 = vrot.lane.b32.xlu0 %v1998_v20, %s17107_s18  ;;  %3138 = vrot.lane.b32.xlu1 %v1998_v20, %s17229_s22 }
 0x453   : > { %v11455_v62 = vpop.permute.xlu0 %2039  ;;  %v11457_v16 = vpop.permute.xlu1 %6368 }
 0x454   : > { %17350 = vst [vmem:[#allocation135_spill] sm:$0xff] %v11457_v16 }
 0x455   : > { %2952 = vrot.lane.b32.xlu0 %v1998_v20, %s17047_s20  ;;  %3324 = vrot.lane.b32.xlu1 %v1998_v20, %s17230_s24 }
 0x457   : > { %v11461_v3 = vpop.permute.xlu0 %2412  ;;  %v11463_v32 = vpop.permute.xlu1 %2226 }
 0x459   : > { %3882 = vrot.lane.b32.xlu0 %v1998_v20, %s17113_s17  ;;  %3510 = vrot.lane.b32.xlu1 %v1998_v20, %s17231_s27 }
 0x45b   : > { %v11467_v29 = vpop.permute.xlu0 %2784  ;;  %v11469_v0 = vpop.permute.xlu1 %2598 }
 0x45c   : > { %17351 = vst [vmem:[#allocation136_spill] sm:$0xff] %v11467_v29 }
 0x45d   : > { %4335 = vrot.lane.b32.xlu0 %v1998_v20, %s17049_s19  ;;  %4109 = vrot.lane.b32.xlu1 %v1998_v20, %s17111_s16 }
 0x45f   : > { %v11473_v16 = vpop.permute.xlu0 %3136  ;;  %v11475_v45 = vpop.permute.xlu1 %2950 }
 0x460   : > { %17352 = vst [vmem:[#allocation137_spill] sm:$0xff] %v11473_v16  ;;  %17353 = vst [vmem:[#allocation138_spill] sm:$0xff] %v11475_v45  ;;  %v2003_v16 = vld [vmem:[#allocation2 + $0x70] sm:$0xf] }
 0x461   : > { %4787 = vrot.lane.b32.xlu0 %v1998_v20, %s17044_s21  ;;  %4561 = vrot.lane.b32.xlu1 %v1998_v20, %s17107_s18 }
 0x463   : > { %v11479_v4 = vpop.permute.xlu0 %4107  ;;  %v11481_v18 = vpop.permute.xlu1 %3322 }
 0x464   : > { %17354 = vst [vmem:[#allocation139_spill] sm:$0xff] %v11479_v4  ;;  %17355 = vst [vmem:[#allocation140_spill] sm:$0xff] %v11481_v18 }
 0x465   : > { %5219 = vrot.lane.b32.xlu0 %v1998_v20, %s17229_s22  ;;  %4993 = vrot.lane.b32.xlu1 %v1998_v20, %s17047_s20 }
 0x467   : > { %v11485_v5 = vpop.permute.xlu0 %4559  ;;  %v11487_v63 = vpop.permute.xlu1 %3508 }
 0x468   : > { %17356 = vst [vmem:[#allocation141_spill] sm:$0xff] %v11485_v5  ;;  %17357 = vst [vmem:[#allocation142_spill] sm:$0xff] %v11487_v63 }
 0x469   : > { %5671 = vrot.lane.b32.xlu0 %v1998_v20, %s17231_s27  ;;  %5445 = vrot.lane.b32.xlu1 %v1998_v20, %s17230_s24 }
 0x46b   : > { %v11491_v35 = vpop.permute.xlu0 %4991  ;;  %v11493_v22 = vpop.permute.xlu1 %3880 }
 0x46c   : > { %17358 = vst [vmem:[#allocation143_spill] sm:$0xff] %v11491_v35  ;;  %17359 = vst [vmem:[#allocation144_spill] sm:$0xff] %v11493_v22 }
 0x46d   : > { %6374 = vrot.lane.b32.xlu0 %v1998_v20, %s17111_s16  ;;  %6107 = vrot.lane.b32.xlu1 %v1998_v20, %s17113_s17 }
 0x46f   : > { %v11497_v4 = vpop.permute.xlu0 %5217  ;;  %v11499_v41 = vpop.permute.xlu1 %4333 }
 0x470   : > { %17360 = vst [vmem:[#allocation145_spill] sm:$0xff] %v11497_v4  ;;  %17361 = vst [vmem:[#allocation146_spill] sm:$0xff] %v11499_v41 }
 0x471   : > { %2051 = vrot.lane.b32.xlu0 %v2003_v16, %s17113_s17  ;;  %6640 = vrot.lane.b32.xlu1 %v1998_v20, %s17049_s19 }
 0x473   : > { %v11503_v5 = vpop.permute.xlu0 %5443  ;;  %v11505_v63 = vpop.permute.xlu1 %4785 }
 0x474   : > { %17362 = vst [vmem:[#allocation147_spill] sm:$0xff] %v11503_v5  ;;  %17363 = vst [vmem:[#allocation148_spill] sm:$0xff] %v11505_v63  ;;  %v11531_v63 = vld [vmem:[#allocation2 + $0x58] sm:$0xff] }
 0x475   : > { %2424 = vrot.lane.b32.xlu0 %v2003_v16, %s17049_s19  ;;  %2238 = vrot.lane.b32.xlu1 %v2003_v16, %s17111_s16 }
 0x477   : > { %v11509_v35 = vpop.permute.xlu0 %5669  ;;  %v11511_v22 = vpop.permute.xlu1 %6372 }
 0x478   : > { %17364 = vst [vmem:[#allocation149_spill] sm:$0xff] %v11509_v35  ;;  %17365 = vst [vmem:[#allocation150_spill] sm:$0xff] %v11511_v22 }
 0x479   : > { %2796 = vrot.lane.b32.xlu0 %v2003_v16, %s17044_s21  ;;  %2610 = vrot.lane.b32.xlu1 %v2003_v16, %s17107_s18 }
 0x47b   : > { %v11515_v4 = vpop.permute.xlu0 %6105  ;;  %v11517_v41 = vpop.permute.xlu1 %2037 }
 0x47c   : > { %17366 = vst [vmem:[#allocation151_spill] sm:$0xff] %v11515_v4 }
 0x47d   : > { %3148 = vrot.lane.b32.xlu0 %v2003_v16, %s17229_s22  ;;  %2962 = vrot.lane.b32.xlu1 %v2003_v16, %s17047_s20 }
 0x47f   : > { %v11521_v20 = vpop.permute.xlu0 %6638  ;;  %v11523_v5 = vpop.permute.xlu1 %2234 }
 0x480   : > { %17367 = vst [vmem:[#allocation152_spill] sm:$0xff] %v11521_v20 }
 0x481   : > { %3520 = vrot.lane.b32.xlu0 %v2003_v16, %s17231_s27  ;;  %3334 = vrot.lane.b32.xlu1 %v2003_v16, %s17230_s24 }
 0x483   : > { %v11527_v22 = vpop.permute.xlu0 %2047  ;;  %v11529_v35 = vpop.permute.xlu1 %2410 }
 0x485   : > { %2232 = vrot.lane.b32.xlu0 %v11531_v63, %s17111_s16  ;;  %2045 = vrot.lane.b32.xlu1 %v11531_v63, %s17113_s17 }
 0x487   : > { %v11537_v4 = vpop.permute.xlu0 %2224  ;;  %v11539_v20 = vpop.permute.xlu1 %2606 }
 0x489   : > { %2236 = vrot.lane.b32.xlu0 %v2002_v36, %s17111_s16  ;;  %2049 = vrot.lane.b32.xlu1 %v2002_v36, %s17113_s17 }
 0x48b   : > { %v11543_v16 = vpop.permute.xlu0 %2420  ;;  %v11545_v38 = vpop.permute.xlu1 %2782 }
 0x48c   : > { %17368 = vst [vmem:[#allocation153_spill] sm:$0xff] %v11545_v38 }
 0x48d   : > { %2604 = vrot.lane.b32.xlu0 %v11531_v63, %s17107_s18  ;;  %2418 = vrot.lane.b32.xlu1 %v11531_v63, %s17049_s19 }
 0x48f   : > { %v11551_v47 = vpop.permute.xlu0 %2596  ;;  %v11553_v24 = vpop.permute.xlu1 %2958 }
 0x490   : > { %17369 = vst [vmem:[#allocation154_spill] sm:$0xff] %v11553_v24 }
 0x491   : > { %2608 = vrot.lane.b32.xlu0 %v2002_v36, %s17107_s18  ;;  %2422 = vrot.lane.b32.xlu1 %v2002_v36, %s17049_s19 }
 0x493   : > { %v11557_v18 = vpop.permute.xlu0 %2792  ;;  %v11559_v15 = vpop.permute.xlu1 %3134 }
 0x494   : > { %17370 = vst [vmem:[#allocation155_spill] sm:$0xff] %v11557_v18  ;;  %17371 = vst [vmem:[#allocation156_spill] sm:$0xff] %v11559_v15 }
 0x495   : > { %2956 = vrot.lane.b32.xlu0 %v11531_v63, %s17047_s20  ;;  %2790 = vrot.lane.b32.xlu1 %v11531_v63, %s17044_s21 }
 0x497   : > { %v11565_v43 = vpop.permute.xlu0 %2948  ;;  %v11567_v33 = vpop.permute.xlu1 %4105 }
 0x498   : > { %17372 = vst [vmem:[#allocation157_spill] sm:$0xff] %v11565_v43  ;;  %17373 = vst [vmem:[#allocation158_spill] sm:$0xff] %v11567_v33 }
 0x499   : > { %2960 = vrot.lane.b32.xlu0 %v2002_v36, %s17047_s20  ;;  %2794 = vrot.lane.b32.xlu1 %v2002_v36, %s17044_s21 }
 0x49b   : > { %v11571_v6 = vpop.permute.xlu0 %3144  ;;  %v11573_v51 = vpop.permute.xlu1 %4557 }
 0x49c   : > { %17374 = vst [vmem:[#allocation159_spill] sm:$0xff] %v11571_v6  ;;  %17375 = vst [vmem:[#allocation160_spill] sm:$0xff] %v11573_v51 }
 0x49d   : > { %3332 = vrot.lane.b32.xlu0 %v2002_v36, %s17230_s24  ;;  %3142 = vrot.lane.b32.xlu1 %v11531_v63, %s17229_s22 }
 0x49f   : > { %v11578_v15 = vpop.permute.xlu0 %3320  ;;  %v11580_v26 = vpop.permute.xlu1 %4989 }
 0x4a0   : > { %17376 = vst [vmem:[#allocation161_spill] sm:$0xff] %v11578_v15  ;;  %17377 = vst [vmem:[#allocation162_spill] sm:$0xff] %v11580_v26 }
 0x4a1   : > { %3328 = vrot.lane.b32.xlu0 %v11531_v63, %s17230_s24  ;;  %3146 = vrot.lane.b32.xlu1 %v2002_v36, %s17229_s22 }
 0x4a3   : > { %v11585_v33 = vpop.permute.xlu0 %3330  ;;  %v11587_v59 = vpop.permute.xlu1 %5215 }
 0x4a4   : > { %17378 = vst [vmem:[#allocation163_spill] sm:$0xff] %v11585_v33  ;;  %17379 = vst [vmem:[#allocation164_spill] sm:$0xff] %v11587_v59 }
 0x4a5   : > { %3514 = vrot.lane.b32.xlu0 %v11531_v63, %s17231_s27  ;;  %3518 = vrot.lane.b32.xlu1 %v2002_v36, %s17231_s27 }
 0x4a7   : > { %v11592_v51 = vpop.permute.xlu0 %3516  ;;  %v11594_v6 = vpop.permute.xlu1 %5441 }
 0x4a8   : > { %17380 = vst [vmem:[#allocation165_spill] sm:$0xff] %v11592_v51  ;;  %17381 = vst [vmem:[#allocation166_spill] sm:$0xff] %v11594_v6 }
 0x4a9   : > { %3886 = vrot.lane.b32.xlu0 %v11531_v63, %s17113_s17  ;;  %4113 = vrot.lane.b32.xlu1 %v11531_v63, %s17111_s16 }
 0x4ab   : > { %v11600_v26 = vpop.permute.xlu0 %3506  ;;  %v11602_v15 = vpop.permute.xlu1 %5667 }
 0x4ac   : > { %17382 = vst [vmem:[#allocation167_spill] sm:$0xff] %v11600_v26  ;;  %17383 = vst [vmem:[#allocation168_spill] sm:$0xff] %v11602_v15 }
 0x4ad   : > { %4339 = vrot.lane.b32.xlu0 %v11531_v63, %s17049_s19  ;;  %4565 = vrot.lane.b32.xlu1 %v11531_v63, %s17107_s18 }
 0x4af   : > { %v11608_v36 = vpop.permute.xlu0 %3878  ;;  %v11610_v59 = vpop.permute.xlu1 %6103 }
 0x4b0   : > { %17384 = vst [vmem:[#allocation169_spill] sm:$0xff] %v11608_v36  ;;  %17385 = vst [vmem:[#allocation170_spill] sm:$0xff] %v11610_v59 }
 0x4b1   : > { %4791 = vrot.lane.b32.xlu0 %v11531_v63, %s17044_s21  ;;  %4997 = vrot.lane.b32.xlu1 %v11531_v63, %s17047_s20 }
 0x4b3   : > { %v11616_v6 = vpop.permute.xlu0 %4331  ;;  %v11618_v26 = vpop.permute.xlu1 %6636 }
 0x4b4   : > { %17386 = vst [vmem:[#allocation171_spill] sm:$0xff] %v11616_v6  ;;  %17387 = vst [vmem:[#allocation172_spill] sm:$0xff] %v11618_v26 }
 0x4b5   : > { %5449 = vrot.lane.b32.xlu0 %v11531_v63, %s17230_s24  ;;  %5223 = vrot.lane.b32.xlu1 %v11531_v63, %s17229_s22 }
 0x4b7   : > { %v11624_v15 = vpop.permute.xlu0 %4783  ;;  %v11626_v36 = vpop.permute.xlu1 %2041 }
 0x4b8   : > { %17388 = vst [vmem:[#allocation173_spill] sm:$0xff] %v11624_v15 }
 0x4b9   : > { %5675 = vrot.lane.b32.xlu0 %v11531_v63, %s17231_s27  ;;  %6111 = vrot.lane.b32.xlu1 %v11531_v63, %s17113_s17 }
 0x4bb   : > { %v11632_v59 = vpop.permute.xlu0 %6370  ;;  %v11634_v6 = vpop.permute.xlu1 %2414 }
 0x4bc   : > { %17389 = vst [vmem:[#allocation174_spill] sm:$0xff] %v11632_v59 }
 0x4bd   : > { %6378 = vrot.lane.b32.xlu0 %v11531_v63, %s17111_s16  ;;  %2230 = vrot.lane.b32.xlu1 %v10873_v53, %s17111_s16 }
 0x4bf   : > { %v11640_v26 = vpop.permute.xlu0 %2228  ;;  %v11642_v15 = vpop.permute.xlu1 %2786 }
 0x4c0   : > { %17390 = vst [vmem:[#allocation175_spill] sm:$0xff] %v11642_v15 }
 0x4c1   : > { %2043 = vrot.lane.b32.xlu0 %v10873_v53, %s17113_s17  ;;  %2602 = vrot.lane.b32.xlu1 %v10873_v53, %s17107_s18 }
 0x4c3   : > { %v11648_v51 = vpop.permute.xlu0 %2600  ;;  %v11650_v59 = vpop.permute.xlu1 %3138 }
 0x4c4   : > { %17391 = vst [vmem:[#allocation176_spill] sm:$0xff] %v11650_v59 }
 0x4c5   : > { %2416 = vrot.lane.b32.xlu0 %v10873_v53, %s17049_s19  ;;  %2954 = vrot.lane.b32.xlu1 %v10873_v53, %s17047_s20 }
 0x4c7   : > { %v11656_v33 = vpop.permute.xlu0 %2952  ;;  %v11658_v12 = vpop.permute.xlu1 %3324 }
 0x4c8   : > { %17392 = vst [vmem:[#allocation177_spill] sm:$0xff] %v11656_v33  ;;  %17393 = vst [vmem:[#allocation178_spill] sm:$0xff] %v11658_v12 }
 0x4c9   : > { %2788 = vrot.lane.b32.xlu0 %v10873_v53, %s17044_s21  ;;  %3326 = vrot.lane.b32.xlu1 %v10873_v53, %s17230_s24 }
 0x4cb   : > { %v11664_v46 = vpop.permute.xlu0 %3882  ;;  %v11666_v55 = vpop.permute.xlu1 %3510 }
 0x4cc   : > { %17394 = vst [vmem:[#allocation179_spill] sm:$0xff] %v11664_v46  ;;  %17395 = vst [vmem:[#allocation180_spill] sm:$0xff] %v11666_v55 }
 0x4cd   : > { %3140 = vrot.lane.b32.xlu0 %v10873_v53, %s17229_s22  ;;  %3512 = vrot.lane.b32.xlu1 %v10873_v53, %s17231_s27 }
 0x4cf   : > { %v11672_v59 = vpop.permute.xlu0 %4335  ;;  %v11674_v38 = vpop.permute.xlu1 %4109 }
 0x4d0   : > { %17396 = vst [vmem:[#allocation181_spill] sm:$0xff] %v11672_v59  ;;  %17397 = vst [vmem:[#allocation182_spill] sm:$0xff] %v11674_v38 }
 0x4d1   : > { %4111 = vrot.lane.b32.xlu0 %v10873_v53, %s17111_s16  ;;  %3884 = vrot.lane.b32.xlu1 %v10873_v53, %s17113_s17 }
 0x4d3   : > { %v11680_v12 = vpop.permute.xlu0 %4787  ;;  %v11682_v46 = vpop.permute.xlu1 %4561 }
 0x4d4   : > { %17398 = vst [vmem:[#allocation183_spill] sm:$0xff] %v11680_v12  ;;  %17399 = vst [vmem:[#allocation184_spill] sm:$0xff] %v11682_v46 }
 0x4d5   : > { %4563 = vrot.lane.b32.xlu0 %v10873_v53, %s17107_s18  ;;  %4337 = vrot.lane.b32.xlu1 %v10873_v53, %s17049_s19 }
 0x4d7   : > { %v11688_v55 = vpop.permute.xlu0 %5219  ;;  %v11690_v59 = vpop.permute.xlu1 %4993 }
 0x4d8   : > { %17400 = vst [vmem:[#allocation185_spill] sm:$0xff] %v11688_v55  ;;  %17401 = vst [vmem:[#allocation186_spill] sm:$0xff] %v11690_v59  ;;  %v6017_v59 = vld [vmem:[#allocation2 + $0x50] sm:$0xff] }
 0x4d9   : > { %4995 = vrot.lane.b32.xlu0 %v10873_v53, %s17047_s20  ;;  %4789 = vrot.lane.b32.xlu1 %v10873_v53, %s17044_s21  ;;  %s17540_s21 = smov 119  }
 0x4db   : > { %v11696_v38 = vpop.permute.xlu0 %5671  ;;  %v11698_v12 = vpop.permute.xlu1 %5445 }
 0x4dc   : > { %17402 = vst [vmem:[#allocation187_spill] sm:$0xff] %v11696_v38  ;;  %17403 = vst [vmem:[#allocation188_spill] sm:$0xff] %v11698_v12 }
 0x4dd   : > { %5221 = vrot.lane.b32.xlu0 %v10873_v53, %s17229_s22  ;;  %5447 = vrot.lane.b32.xlu1 %v10873_v53, %s17230_s24 }
 0x4df   : > { %v11704_v46 = vpop.permute.xlu0 %6374  ;;  %v11706_v55 = vpop.permute.xlu1 %6107 }
 0x4e0   : > { %17404 = vst [vmem:[#allocation189_spill] sm:$0xff] %v11704_v46  ;;  %17405 = vst [vmem:[#allocation190_spill] sm:$0xff] %v11706_v55 }
 0x4e1   : > { %6109 = vrot.lane.b32.xlu0 %v6017_v59, %s17113_s17  ;;  %5673 = vrot.lane.b32.xlu1 %v10873_v53, %s17231_s27  ;;  %v9964_v53 = vld [vmem:[#allocation2] sm:$0xff] }
 0x4e3   : > { %v2052_v29 = vpop.permute.xlu0 %2051  ;;  %v11711_v38 = vpop.permute.xlu1 %6640 }
 0x4e4   : > { %17406 = vst [vmem:[#allocation191_spill] sm:$0xff] %v11711_v38 }
 0x4e5   : > { %6642 = vrot.lane.b32.xlu0 %v6017_v59, %s17049_s19  ;;  %6376 = vrot.lane.b32.xlu1 %v6017_v59, %s17111_s16 }
 0x4e7   : > { %v11715_v12 = vpop.permute.xlu0 %2424  ;;  %v2239_v15 = vpop.permute.xlu1 %2238 }
 0x4e9   : > { %6890 = vrot.lane.b32.xlu0 %v10936_v57, %s17107_s18  ;;  %6644 = vrot.lane.b32.xlu1 %v11531_v63, %s17049_s19 }
 0x4eb   : > { %v11721_v46 = vpop.permute.xlu0 %2796  ;;  %v11723_v55 = vpop.permute.xlu1 %2610 }
 0x4ed   : > { %6888 = vrot.lane.b32.xlu1 %v9964_v53, %s17107_s18 }
 0x4ef   : > { %v11726_v38 = vpop.permute.xlu0 %3148  ;;  %v11728_v14 = vpop.permute.xlu1 %2962 }
 0x4f0   : > { %17407 = vst [vmem:[#allocation192_spill] sm:$0xff] %v11726_v38 }
 0x4f1   : > { %6892 = vrot.lane.b32.xlu1 %v10891_v56, %s17107_s18 }
 0x4f3   : > { %v11732_v59 = vpop.permute.xlu0 %3520  ;;  %v11734_v57 = vpop.permute.xlu1 %3334 }
 0x4f4   : > { %17408 = vst [vmem:[#allocation193_spill] sm:$0xff] %v11732_v59  ;;  %17409 = vst [vmem:[#allocation194_spill] sm:$0xff] %v11734_v57 }
 0x4f7   : > { %v2233_v31 = vpop.permute.xlu0 %2232  ;;  %v2046_v63 = vpop.permute.xlu1 %2045 }
 0x4fb   : > { %v2237_v50 = vpop.permute.xlu0 %2236  ;;  %v2050_v18 = vpop.permute.xlu1 %2049 }
 0x4fc   : > { %v2248_v11 = vsel %vm701_vm8, %v11523_v5, %v2237_v50  ;;  %v2061_v53 = vsel %vm552_vm4, %v11527_v22, %v2050_v18  ;;  %v2062_v38 = vsel %vm552_vm4, %v2050_v18, %v2052_v29  ;;  %v2249_v43 = vsel %vm701_vm8, %v2237_v50, %v2239_v15 }
 0x4fd   : > { %9653 = vmatprep.subr.msk.mxu1 %vm568_vm5, %v2062_v38  ;;  %9663 = vmatprep.subr.msk.mxu0 %vm568_vm5, %v2249_v43 }
 0x4fe   : > { %9654 = vmatpush1.msk.msra.mxu1 %vm568_vm5, %v2061_v53  ;;  %9664 = vmatpush1.msk.msra.mxu0 %vm568_vm5, %v2248_v11 }
 0x4ff   : > { %v11746_v56 = vpop.permute.xlu0 %2604  ;;  %v11748_v59 = vpop.permute.xlu1 %2418 }
 0x503   : > { %v2609_v5 = vpop.permute.xlu0 %2608  ;;  %v11750_v57 = vpop.permute.xlu1 %2422 }
 0x507   : > { %v11752_v22 = vpop.permute.xlu0 %2956  ;;  %v11754_v29 = vpop.permute.xlu1 %2790 }
 0x508   : > { %17410 = vst [vmem:[#allocation195_spill] sm:$0xff] %v11752_v22  ;;  %17411 = vst [vmem:[#allocation196_spill] sm:$0xff] %v11754_v29 }
 0x50b   : > { %v11756_v15 = vpop.permute.xlu0 %2960  ;;  %v11758_v38 = vpop.permute.xlu1 %2794 }
 0x50c   : > { %17412 = vst [vmem:[#allocation197_spill] sm:$0xff] %v11758_v38 }
 0x50f   : > { %v11760_v43 = vpop.permute.xlu0 %3332  ;;  %v11762_v50 = vpop.permute.xlu1 %3142 }
 0x510   : > { %17413 = vst [vmem:[#allocation198_spill] sm:$0xff] %v11760_v43  ;;  %17414 = vst [vmem:[#allocation199_spill] sm:$0xff] %v11762_v50 }
 0x513   : > { %v11764_v11 = vpop.permute.xlu0 %3328  ;;  %v11766_v18 = vpop.permute.xlu1 %3146 }
 0x514   : > { %17415 = vst [vmem:[#allocation200_spill] sm:$0xff] %v11764_v11  ;;  %17416 = vst [vmem:[#allocation201_spill] sm:$0xff] %v11766_v18 }
 0x517   : > { %v11768_v53 = vpop.permute.xlu0 %3514  ;;  %v11770_v45 = vpop.permute.xlu1 %3518 }
 0x518   : > { %17417 = vst [vmem:[#allocation202_spill] sm:$0xff] %v11768_v53  ;;  %17418 = vst [vmem:[#allocation203_spill] sm:$0xff] %v11770_v45 }
 0x51b   : > { %v11772_v33 = vpop.permute.xlu0 %3886  ;;  %v11774_v22 = vpop.permute.xlu1 %4113 }
 0x51c   : > { %17419 = vst [vmem:[#allocation204_spill] sm:$0xff] %v11772_v33  ;;  %17420 = vst [vmem:[#allocation205_spill] sm:$0xff] %v11774_v22 }
 0x51f   : > { %v11776_v29 = vpop.permute.xlu0 %4339  ;;  %v11778_v24 = vpop.permute.xlu1 %4565 }
 0x520   : > { %17421 = vst [vmem:[#allocation206_spill] sm:$0xff] %v11776_v29  ;;  %17422 = vst [vmem:[#allocation207_spill] sm:$0xff] %v11778_v24 }
 0x523   : > { %v11780_v38 = vpop.permute.xlu0 %4791  ;;  %v11782_v43 = vpop.permute.xlu1 %4997 }
 0x524   : > { %17423 = vst [vmem:[#allocation208_spill] sm:$0xff] %v11780_v38  ;;  %17424 = vst [vmem:[#allocation209_spill] sm:$0xff] %v11782_v43 }
 0x527   : > { %v11784_v50 = vpop.permute.xlu0 %5449  ;;  %v11786_v11 = vpop.permute.xlu1 %5223 }
 0x528   : > { %17425 = vst [vmem:[#allocation210_spill] sm:$0xff] %v11784_v50  ;;  %17426 = vst [vmem:[#allocation211_spill] sm:$0xff] %v11786_v11  ;;  %v2245_v50 = vsel %vm701_vm8, %v11537_v4, %v11463_v32  ;;  %v17430_v32 = vmov 0.0   ;;  %v3459_v11 = vld [vmem:[#allocation3 + $0x7] ss:$8 sm:$0x3] }
 0x52b   : > { %v11788_v18 = vpop.permute.xlu0 %5675  ;;  %v11790_v53 = vpop.permute.xlu1 %6111 }
 0x52c   : > { %17427 = vst [vmem:[#allocation212_spill] sm:$0xff] %v11788_v18  ;;  %17428 = vst [vmem:[#allocation213_spill] sm:$0xff] %v11790_v53  ;;  %v2244_v53 = vsel %vm701_vm8, %v11393_v54, %v11537_v4  ;;  %v2058_v54 = vsel %vm552_vm4, %v11517_v41, %v11455_v62  ;;  %v2241_v4 = vsel %vm701_vm8, %v11101_v23, %v11043_v8 }
 0x52d   : > { %v2056_v8 = vsel %vm552_vm4, %v11308_v30, %v11256_v17  ;;  %v9660_v17 = vld [vmem:[%s16947_s4 + $0x28] sm:$0xff] }
 0x52f   : > { %v11792_v45 = vpop.permute.xlu0 %6378  ;;  %v2231_v33 = vpop.permute.xlu1 %2230 }
 0x530   : > { %17429 = vst [vmem:[#allocation214_spill] sm:$0xff] %v11792_v45  ;;  %v2247_v22 = vsel %vm701_vm8, %v2231_v33, %v2233_v31  ;;  %v2246_v24 = vsel %vm701_vm8, %v11640_v26, %v2231_v33  ;;  %v2243_v31 = vsel %vm701_vm8, %v11316_v27, %v11242_v13  ;;  %v2242_v26 = vsel %vm701_vm8, %v11176_v7, %v11316_v27 }
 0x531   : > { %2298 = vmatprep.subr.mxu0 %v2247_v22  ;;  %v2057_v7 = vsel %vm552_vm4, %v11376_v19, %v11517_v41  ;;  %v2240_v27 = vsel %vm701_vm8, %v10972_v44, %v11101_v23  ;;  %v2621_v13 = vsel %vm17110_vm10, %v2609_v5, %v11723_v55  ;;  %v2055_v19 = vsel %vm552_vm4, %v11186_v34, %v11308_v30  ;;  %v2004_v34 = vld [vmem:[%s16947_s4] sm:$0xff] }
 0x532   : > { %2299 = vmatpush1.msra.mxu0 %v2246_v24  ;;  %v9659_v24 = vld [vmem:[%s16947_s4 + $0x20] sm:$0xff]  ;;  %v2620_v44 = vsel %vm17110_vm10, %v11539_v20, %v2609_v5  ;;  %v2054_v41 = vsel %vm552_vm4, %v11103_v10, %v11035_v28  ;;  %v2053_v30 = vsel %vm552_vm4, %v10970_v49, %v11103_v10  ;;  %v2435_v49 = vsel %vm849_vm6, %v11750_v57, %v11715_v12  ;;  %v2005_v20 = vld [vmem:[%s16947_s4 + $0x8] sm:$0xff] }
 0x533   : > { %v2044_v43 = vpop.permute.xlu0 %2043  ;;  %2300 = vmatprep.subr.mxu0 %v2245_v50  ;;  %v2603_v62 = vpop.permute.xlu1 %2602  ;;  %v2617_v10 = vsel %vm17110_vm10, %v11551_v47, %v11469_v0  ;;  %v2615_v0 = vsel %vm17110_vm10, %v11322_v61, %v11248_v1  ;;  %v2614_v1 = vsel %vm17110_vm10, %v11184_v21, %v11322_v61  ;;  %v2612_v21 = vsel %vm17110_vm10, %v10980_v40, %v11107_v39  ;;  %v9662_v61 = vld [vmem:[%s16947_s4 + $0x38] sm:$0xff]  ;;  %v2006_v40 = vld [vmem:[%s16947_s4 + $0x10] sm:$0xff]  ;;  %v9669_v5 = vld [vmem:[%s16947_s4 + $0x40] sm:$0xff] }
 0x534   : > { %2301 = vmatpush1.msra.mxu0 %v2244_v53  ;;  %v2060_v45 = vsel %vm552_vm4, %v2044_v43, %v2046_v63  ;;  %v2059_v33 = vsel %vm552_vm4, %v11626_v36, %v2044_v43  ;;  %v2619_v55 = vsel %vm17110_vm10, %v2603_v62, %v11746_v56  ;;  %v2618_v28 = vsel %vm17110_vm10, %v11648_v51, %v2603_v62  ;;  %v17434_v63 = vld [vmem:[#allocation177_spill] sm:$0xff]  ;;  %v17437_v53 = vld [vmem:[#allocation122_spill] sm:$0xff]  ;;  %v17442_v62 = vld [vmem:[#allocation68_spill] sm:$0xff] }
 0x535   : > { %2112 = vmatprep.subr.mxu1 %v2060_v45  ;;  %2302 = vmatprep.subr.mxu0 %v2243_v31  ;;  %v2434_v51 = vsel %vm849_vm6, %v11543_v16, %v11750_v57  ;;  %v2616_v45 = vsel %vm17110_vm10, %v11400_v25, %v11551_v47  ;;  %v9661_v25 = vld [vmem:[%s16947_s4 + $0x30] sm:$0xff]  ;;  %v2431_v16 = vsel %vm849_vm6, %v11529_v35, %v11461_v3  ;;  %v9680_v57 = vld [vmem:[%s16947_s4 + $0x68] sm:$0xff] }
 0x536   : > { %2113 = vmatpush1.msra.mxu1 %v2059_v33  ;;  %2303 = vmatpush1.msra.mxu0 %v2242_v26  ;;  %v2613_v36 = vsel %vm17110_vm10, %v11107_v39, %v11049_v9  ;;  %v2429_v3 = vsel %vm849_vm6, %v11314_v37, %v11262_v58  ;;  %v2973_v9 = vsel %vm17051_vm12, %v11756_v15, %v11728_v14  ;;  %v9679_v14 = vld [vmem:[%s16947_s4 + $0x60] sm:$0xff]  ;;  %v17436_v43 = vld [vmem:[#allocation157_spill] sm:$0xff] }
 0x537   : > { %2114 = vmatprep.subr.mxu1 %v2058_v54  ;;  %2304 = vmatprep.subr.mxu0 %v2241_v4  ;;  %v2417_v23 = vpop.permute.xlu0 %2416  ;;  %v2427_v58 = vsel %vm849_vm6, %v11109_v42, %v11041_v2  ;;  %v2955_v39 = vpop.permute.xlu1 %2954  ;;  %v2007_v2 = vld [vmem:[%s16947_s4 + $0x18] sm:$0xff]  ;;  %v2968_v31 = vsel %vm17051_vm12, %v17437_v53, %v17436_v43  ;;  %v17438_v33 = vld [vmem:[#allocation155_spill] sm:$0xff]  ;;  %v17439_v54 = vld [vmem:[#allocation85_spill] sm:$0xff] }
 0x538   : > { %2115 = vmatpush1.msra.mxu1 %v2057_v7  ;;  %2305 = vmatpush1.msra.mxu0 %v2240_v27  ;;  %v2433_v12 = vsel %vm849_vm6, %v2417_v23, %v11748_v59  ;;  %v2432_v47 = vsel %vm849_vm6, %v11634_v6, %v2417_v23  ;;  %v2430_v6 = vsel %vm849_vm6, %v11383_v60, %v11529_v35  ;;  %v17440_v4 = vld [vmem:[#allocation104_spill] sm:$0xff] }
 0x539   : > { %2116 = vmatprep.subr.mxu1 %v2056_v8  ;;  %9665 = vmatmul.mubr.msk.f32.vlgmr.msra.gmra.mxu0 %vm2071_vm15, %v9659_v24  ;;  %v2428_v60 = vsel %vm849_vm6, %v11194_v52, %v11314_v37  ;;  %v2426_v35 = vsel %vm849_vm6, %v10978_v48, %v11109_v42  ;;  %v17431_v37 = vld [vmem:[#allocation197_spill] sm:$0xff]  ;;  %v17432_v48 = vld [vmem:[#allocation154_spill] sm:$0xff]  ;;  %v2970_v56 = vsel %vm17051_vm12, %v17434_v63, %v2955_v39  ;;  %v17441_v7 = vld [vmem:[#allocation196_spill] sm:$0xff] }
 0x53a   : > { %9683 = vmatprep.subr.msk.mxu0 %vm568_vm5, %v2621_v13  ;;  %2117 = vmatpush1.msra.mxu1 %v2055_v19  ;;  %v2807_v52 = vsel %vm17109_vm9, %v17431_v37, %v11721_v46  ;;  %v2972_v42 = vsel %vm17051_vm12, %v17432_v48, %v11756_v15  ;;  %v17433_v46 = vld [vmem:[#allocation195_spill] sm:$0xff]  ;;  %v17435_v15 = vld [vmem:[#allocation138_spill] sm:$0xff]  ;;  %v2806_v26 = vsel %vm17109_vm9, %v17438_v33, %v17431_v37  ;;  %v17466_v53 = vld [vmem:[#allocation124_spill] sm:$0xff] }
 0x53b   : > { %9684 = vmatpush1.msk.msra.mxu0 %vm568_vm5, %v2620_v44  ;;  %2118 = vmatprep.subr.mxu1 %v2054_v41  ;;  %v2971_v59 = vsel %vm17051_vm12, %v2955_v39, %v17433_v46  ;;  %v2789_v22 = vpop.permute.xlu0 %2788  ;;  %v2969_v50 = vsel %vm17051_vm12, %v17436_v43, %v17435_v15  ;;  %v2967_v24 = vsel %vm17051_vm12, %v17440_v4, %v17439_v54  ;;  %v17443_v13 = vld [vmem:[#allocation175_spill] sm:$0xff]  ;;  %v9670_v44 = vld [vmem:[%s16947_s4 + $0x48] sm:$0xff]  ;;  %v9672_v39 = vld [vmem:[%s16947_s4 + $0x58] sm:$0xff] }
 0x53c   : > { %2670 = vmatprep.subr.mxu0 %v2619_v55  ;;  %2119 = vmatpush1.msra.mxu1 %v2053_v30  ;;  %v2805_v27 = vsel %vm17109_vm9, %v2789_v22, %v17441_v7  ;;  %v2966_v8 = vsel %vm17051_vm12, %v17442_v62, %v17440_v4  ;;  %v2804_v19 = vsel %vm17109_vm9, %v17443_v13, %v2789_v22  ;;  %v17444_v41 = vld [vmem:[#allocation136_spill] sm:$0xff]  ;;  %v17445_v55 = vld [vmem:[#allocation153_spill] sm:$0xff]  ;;  %v9699_v37 = vld [vmem:[%s16947_s4 + $0xa0] sm:$0xff] }
 0x53d   : > { %2344 = vmatprep.mubr.f32.mxu0 %v17430_v32  ;;  %2671 = vmatpush1.msra.mxu0 %v2618_v28  ;;  %v2803_v30 = vsel %vm17109_vm9, %v17445_v55, %v17444_v41  ;;  %v17447_v28 = vld [vmem:[#allocation51_spill] sm:$0xff]  ;;  %v17462_v63 = vld [vmem:[#allocation178_spill] sm:$0xff]  ;;  %v17464_v15 = vld [vmem:[#allocation140_spill] sm:$0xff] }
 0x53e   : > { %9655 = vmatmul.mubr.msk.f32.vlgmr.msra.gmra.mxu1 %vm2071_vm15, %v2004_v34  ;;  %9666 = vmatmul.mubr.msk.f32.gmra.mxu0 %vm2071_vm15, %v9660_v17  ;;  %v9681_v34 = vld [vmem:[%s16947_s4 + $0x70] sm:$0xff]  ;;  %v17446_v17 = vld [vmem:[#allocation36_spill] sm:$0xff]  ;;  %v17467_v33 = vld [vmem:[#allocation199_spill] sm:$0xff] }
 0x53f   : > { %9673 = vmatprep.subr.msk.mxu1 %vm568_vm5, %v2435_v49  ;;  %2672 = vmatprep.subr.mxu0 %v2617_v10  ;;  %v2965_v23 = vsel %vm17051_vm12, %v17447_v28, %v17446_v17  ;;  %v17448_v49 = vld [vmem:[#allocation119_spill] sm:$0xff]  ;;  %v3141_v46 = vpop.permute.xlu0 %3140  ;;  %v17465_v43 = vld [vmem:[#allocation161_spill] sm:$0xff]  ;;  %v17468_v54 = vld [vmem:[#allocation86_spill] sm:$0xff] }
 0x540   : > { %9674 = vmatpush1.msk.msra.mxu1 %vm568_vm5, %v2434_v51  ;;  %2673 = vmatpush1.msra.mxu0 %v2616_v45  ;;  %v2802_v10 = vsel %vm17109_vm9, %v17448_v49, %v17445_v55  ;;  %v17449_v51 = vld [vmem:[#allocation25_spill] sm:$0xff]  ;;  %v17469_v4 = vld [vmem:[#allocation106_spill] sm:$0xff]  ;;  %v17470_v7 = vld [vmem:[#allocation176_spill] sm:$0xff] }
 0x541   : > { %2484 = vmatprep.subr.mxu1 %v2433_v12  ;;  %2674 = vmatprep.subr.mxu0 %v2615_v0  ;;  %v2964_v45 = vsel %vm17051_vm12, %v17449_v51, %v17447_v28  ;;  %v17450_v12 = vld [vmem:[#allocation88_spill] sm:$0xff]  ;;  %v17451_v0 = vld [vmem:[#allocation102_spill] sm:$0xff]  ;;  %v17471_v62 = vld [vmem:[#allocation69_spill] sm:$0xff] }
 0x542   : > { %2158 = vmatprep.mubr.f32.mxu1 %v17430_v32  ;;  %2350 = vmatprep.mubr.f32.mxu0 %v17430_v32  ;;  %v9690_v13 = vld [vmem:[%s16947_s4 + $0x88] sm:$0xff]  ;;  %v17477_v49 = vld [vmem:[#allocation26_spill] sm:$0xff] }
 0x543   : > { %2485 = vmatpush1.msra.mxu1 %v2432_v47  ;;  %2675 = vmatpush1.msra.mxu0 %v2614_v1  ;;  %v17453_v47 = vld [vmem:[#allocation198_spill] sm:$0xff]  ;;  %v17473_v41 = vld [vmem:[#allocation156_spill] sm:$0xff] }
 0x544   : > { %9656 = vmatmul.mubr.msk.f32.gmra.mxu1 %vm2071_vm15, %v2005_v20  ;;  %9667 = vmatmul.mubr.msk.f32.gmra.mxu0 %vm2071_vm15, %v9661_v25  ;;  %v2801_v20 = vsel %vm17109_vm9, %v17451_v0, %v17450_v12  ;;  %v17452_v25 = vld [vmem:[#allocation194_spill] sm:$0xff]  ;;  %v17476_v28 = vld [vmem:[#allocation120_spill] sm:$0xff] }
 0x545   : > { %2486 = vmatprep.subr.mxu1 %v2431_v16  ;;  %2676 = vmatprep.subr.mxu0 %v2613_v36  ;;  %v3345_v1 = vsel %vm17046_vm14, %v17453_v47, %v17452_v25  ;;  %v17454_v16 = vld [vmem:[#allocation70_spill] sm:$0xff] }
 0x546   : > { %2487 = vmatpush1.msra.mxu1 %v2430_v6  ;;  %2677 = vmatpush1.msra.mxu0 %v2612_v21  ;;  %v2800_v36 = vsel %vm17109_vm9, %v17454_v16, %v17451_v0  ;;  %v9671_v6 = vld [vmem:[%s16947_s4 + $0x50] sm:$0xff]  ;;  %v9682_v21 = vld [vmem:[%s16947_s4 + $0x78] sm:$0xff] }
 0x547   : > { %2488 = vmatprep.subr.mxu1 %v2429_v3  ;;  %9703 = vmatprep.subr.msk.mxu0 %vm568_vm5, %v2973_v9  ;;  %v17455_v3 = vld [vmem:[#allocation34_spill] sm:$0xff]  ;;  %v17456_v9 = vld [vmem:[#allocation52_spill] sm:$0xff]  ;;  %v9691_v0 = vld [vmem:[%s16947_s4 + $0x90] sm:$0xff] }
 0x548   : > { %2164 = vmatprep.mubr.f32.mxu1 %v17430_v32  ;;  %2356 = vmatprep.mubr.f32.mxu0 %v17430_v32  ;;  %v17478_v51 = vld [vmem:[#allocation90_spill] sm:$0xff] }
 0x549   : > { %2489 = vmatpush1.msra.mxu1 %v2428_v60  ;;  %9668 = vmatmul.mubr.msk.f32.gmra.mxu0 %vm2071_vm15, %v9662_v61  ;;  %v2799_v61 = vsel %vm17109_vm9, %v17456_v9, %v17455_v3  ;;  %v17482_v16 = vld [vmem:[#allocation54_spill] sm:$0xff]  ;;  %v17484_v3 = vld [vmem:[#allocation193_spill] sm:$0xff] }
 0x54a   : > { %9657 = vmatmul.mubr.msk.f32.gmra.mxu1 %vm2071_vm15, %v2006_v40  ;;  %2490 = vmatprep.subr.mxu1 %v2427_v58  ;;  %v17457_v40 = vld [vmem:[#allocation24_spill] sm:$0xff] }
 0x54b   : > { %2491 = vmatpush1.msra.mxu1 %v2426_v35  ;;  %2170 = vmatprep.mubr.f32.mxu1 %v17430_v32  ;;  %v2798_v60 = vsel %vm17109_vm9, %v17457_v40, %v17456_v9  ;;  %v17458_v58 = vld [vmem:[#allocation192_spill] sm:$0xff]  ;;  %v17459_v35 = vld [vmem:[#allocation201_spill] sm:$0xff]  ;;  %v17485_v9 = vld [vmem:[#allocation203_spill] sm:$0xff] }
 0x54c   : > { %9693 = vmatprep.subr.msk.mxu1 %vm568_vm5, %v2807_v52  ;;  %2710 = vmatprep.mubr.f32.mxu0 %v17430_v32  ;;  %v3327_v52 = vpop.permute.xlu1 %3326  ;;  %v9692_v40 = vld [vmem:[%s16947_s4 + $0x98] sm:$0xff] }
 0x54d   : > { %9685 = vmatmul.mubr.msk.f32.vlgmr.msra.gmra.mxu0 %vm2071_vm15, %v9679_v14  ;;  %v3159_v14 = vsel %vm17052_vm11, %v17459_v35, %v17458_v58  ;;  %v9709_v58 = vld [vmem:[%s16947_s4 + $0xc0] sm:$0xff] }
 0x54e   : > { %9658 = vmatmul.mubr.msk.f32.gmra.mxu1 %vm2071_vm15, %v2007_v2  ;;  %9704 = vmatpush1.msk.msra.mxu0 %vm568_vm5, %v2972_v42  ;;  %v17460_v2 = vld [vmem:[#allocation163_spill] sm:$0xff] }
 0x54f   : > { %3022 = vmatprep.subr.mxu0 %v2971_v59  ;;  %2524 = vmatprep.mubr.f32.mxu1 %v17430_v32  ;;  %v3344_v48 = vsel %vm17046_vm14, %v17460_v2, %v17453_v47  ;;  %v9689_v42 = vld [vmem:[%s16947_s4 + $0x80] sm:$0xff]  ;;  %v17461_v59 = vld [vmem:[#allocation200_spill] sm:$0xff]  ;;  %v9701_v47 = vld [vmem:[%s16947_s4 + $0xb0] sm:$0xff] }
 0x550   : > { %3023 = vmatpush1.msra.mxu0 %v2970_v56  ;;  %2716 = vmatprep.mubr.f32.mxu0 %v17430_v32  ;;  %v3342_v56 = vsel %vm17046_vm14, %v17462_v63, %v3327_v52  ;;  %v17493_v63 = vld [vmem:[#allocation167_spill] sm:$0xff] }
 0x551   : > { %3024 = vmatprep.subr.mxu0 %v2969_v50  ;;  %9686 = vmatmul.mubr.msk.f32.gmra.mxu0 %vm2071_vm15, %v9680_v57  ;;  %v3343_v57 = vsel %vm17046_vm14, %v3327_v52, %v17461_v59  ;;  %v3341_v50 = vsel %vm17046_vm14, %v17465_v43, %v17464_v15  ;;  %v17488_v52 = vld [vmem:[#allocation202_spill] sm:$0xff]  ;;  %v9720_v59 = vld [vmem:[%s16947_s4 + $0xe8] sm:$0xff]  ;;  %v17497_v15 = vld [vmem:[#allocation87_spill] sm:$0xff] }
 0x552   : > { %9675 = vmatmul.mubr.msk.f32.vlgmr.msra.gmra.mxu1 %vm2071_vm15, %v9669_v5  ;;  %3025 = vmatpush1.msra.mxu0 %v2968_v31  ;;  %v17463_v5 = vld [vmem:[#allocation159_spill] sm:$0xff]  ;;  %v3340_v31 = vsel %vm17046_vm14, %v17466_v53, %v17465_v43  ;;  %v17498_v43 = vld [vmem:[#allocation108_spill] sm:$0xff]  ;;  %v9711_v53 = vld [vmem:[%s16947_s4 + $0xd0] sm:$0xff] }
 0x553   : > { %9694 = vmatpush1.msk.msra.mxu1 %vm568_vm5, %v2806_v26  ;;  %3026 = vmatprep.subr.mxu0 %v2967_v24  ;;  %v3158_v22 = vsel %vm17052_vm11, %v17463_v5, %v17459_v35  ;;  %v3157_v26 = vsel %vm17052_vm11, %v3141_v46, %v17467_v33  ;;  %v3339_v24 = vsel %vm17046_vm14, %v17469_v4, %v17468_v54  ;;  %v3513_v35 = vpop.permute.xlu1 %3512  ;;  %v17495_v5 = vld [vmem:[#allocation121_spill] sm:$0xff]  ;;  %v17501_v54 = vld [vmem:[#allocation40_spill] sm:$0xff] }
 0x554   : > { %2856 = vmatprep.subr.mxu1 %v2805_v27  ;;  %3027 = vmatpush1.msra.mxu0 %v2966_v8  ;;  %v3156_v27 = vsel %vm17052_vm11, %v17470_v7, %v3141_v46  ;;  %v3338_v8 = vsel %vm17046_vm14, %v17471_v62, %v17469_v4  ;;  %v17502_v4 = vld [vmem:[#allocation55_spill] sm:$0xff]  ;;  %v17504_v7 = vld [vmem:[#allocation20_spill] sm:$0xff]  ;;  %v9712_v62 = vld [vmem:[%s16947_s4 + $0xd8] sm:$0xff] }
 0x555   : > { %2857 = vmatpush1.msra.mxu1 %v2804_v19  ;;  %2530 = vmatprep.mubr.f32.mxu1 %v17430_v32  ;;  %v9700_v19 = vld [vmem:[%s16947_s4 + $0xa8] sm:$0xff] }
 0x556   : > { %2722 = vmatprep.mubr.f32.mxu0 %v17430_v32  ;;  %2858 = vmatprep.subr.mxu1 %v2803_v30  ;;  %v17474_v30 = vld [vmem:[#allocation38_spill] sm:$0xff] }
 0x557   : > { %3028 = vmatprep.subr.mxu0 %v2965_v23  ;;  %9676 = vmatmul.mubr.msk.f32.gmra.mxu1 %vm2071_vm15, %v9670_v44  ;;  %v17472_v44 = vld [vmem:[#allocation137_spill] sm:$0xff]  ;;  %v3154_v23 = vsel %vm17052_vm11, %v17476_v28, %v17473_v41 }
 0x558   : > { %9687 = vmatmul.mubr.msk.f32.gmra.mxu0 %vm2071_vm15, %v9681_v34  ;;  %2859 = vmatpush1.msra.mxu1 %v2802_v10  ;;  %v3155_v55 = vsel %vm17052_vm11, %v17473_v41, %v17472_v44  ;;  %v17475_v34 = vld [vmem:[#allocation53_spill] sm:$0xff]  ;;  %v9732_v41 = vld [vmem:[%s16947_s4 + $0x118] sm:$0xff] }
 0x559   : > { %3029 = vmatpush1.msra.mxu0 %v2964_v45  ;;  %2860 = vmatprep.subr.mxu1 %v2801_v20  ;;  %v3337_v17 = vsel %vm17046_vm14, %v17475_v34, %v17474_v30  ;;  %v3336_v10 = vsel %vm17046_vm14, %v17477_v49, %v17475_v34  ;;  %v17479_v45 = vld [vmem:[#allocation103_spill] sm:$0xff]  ;;  %v17480_v20 = vld [vmem:[#allocation72_spill] sm:$0xff]  ;;  %vm17486_vm14 = vcmask 842752   ;;  %v9731_v44 = vld [vmem:[%s16947_s4 + $0x110] sm:$0xff] }
 0x55a   : > { %9723 = vmatprep.subr.msk.mxu0 %vm568_vm5, %v3345_v1  ;;  %2861 = vmatpush1.msra.mxu1 %v2800_v36  ;;  %v3153_v12 = vsel %vm17052_vm11, %v17479_v45, %v17478_v51  ;;  %v3152_v25 = vsel %vm17052_vm11, %v17480_v20, %v17479_v45  ;;  %v17481_v1 = vld [vmem:[#allocation35_spill] sm:$0xff]  ;;  %vm17489_vm12 = vmmov %vm17486_vm14 }
 0x55b   : > { %2536 = vmatprep.mubr.f32.mxu1 %v17430_v32  ;;  %2728 = vmatprep.mubr.f32.mxu0 %v17430_v32  ;;  %v3151_v36 = vsel %vm17052_vm11, %v17482_v16, %v17481_v1  ;;  %v3529_v2 = vsel %vm17489_vm12, %v3513_v35, %v17488_v52 }
 0x55c   : > { %2862 = vmatprep.subr.mxu1 %v2799_v61  ;;  %9677 = vmatmul.mubr.msk.f32.gmra.mxu1 %vm2071_vm15, %v9671_v6  ;;  %v17483_v6 = vld [vmem:[#allocation19_spill] sm:$0xff]  ;;  %v3531_v61 = vsel %vm17486_vm14, %v17485_v9, %v17484_v3 }
 0x55d   : > { %9688 = vmatmul.mubr.msk.f32.gmra.mxu0 %vm2071_vm15, %v9682_v21  ;;  %2863 = vmatpush1.msra.mxu1 %v2798_v60  ;;  %v3150_v21 = vsel %vm17052_vm11, %v17483_v6, %v17482_v16  ;;  %v9702_v60 = vld [vmem:[%s16947_s4 + $0xb8] sm:$0xff]  ;;  %vm17491_vm11 = vmmov %vm17489_vm12 }
 0x55e   : > { %9713 = vmatprep.subr.msk.mxu1 %vm568_vm5, %v3159_v14  ;;  %2542 = vmatprep.mubr.f32.mxu1 %v17430_v32  ;;  %v9719_v14 = vld [vmem:[%s16947_s4 + $0xe0] sm:$0xff]  ;;  %vm17494_vm12 = vmmov %vm17491_vm11 }
 0x55f   : > { %3062 = vmatprep.mubr.f32.mxu0 %v17430_v32 }
 0x560   : > { %9678 = vmatmul.mubr.msk.f32.gmra.mxu1 %vm2071_vm15, %v9672_v39  ;;  %v17487_v39 = vld [vmem:[#allocation165_spill] sm:$0xff] }
 0x561   : > { %9705 = vmatmul.mubr.msk.f32.vlgmr.msra.gmra.mxu0 %vm2071_vm15, %v9699_v37  ;;  %2896 = vmatprep.mubr.f32.mxu1 %v17430_v32  ;;  %v3530_v37 = vsel %vm17486_vm14, %v17487_v39, %v17485_v9  ;;  %vm17496_vm14 = vmmov %vm17491_vm11 }
 0x562   : > { %9724 = vmatpush1.msk.msra.mxu0 %vm568_vm5, %v3344_v48  ;;  %3068 = vmatprep.mubr.f32.mxu0 %v17430_v32  ;;  %v9710_v48 = vld [vmem:[%s16947_s4 + $0xc8] sm:$0xff] }
 0x563   : > { %3394 = vmatprep.subr.mxu0 %v3343_v57  ;;  %v17492_v57 = vld [vmem:[#allocation142_spill] sm:$0xff] }
 0x564   : > { %3395 = vmatpush1.msra.mxu0 %v3342_v56  ;;  %9695 = vmatmul.mubr.msk.f32.vlgmr.msra.gmra.mxu1 %vm2071_vm15, %v9689_v42  ;;  %v17490_v42 = vld [vmem:[#allocation180_spill] sm:$0xff]  ;;  %v3527_v56 = vsel %vm17494_vm12, %v17493_v63, %v17492_v57  ;;  %vm17500_vm12 = vmmov %vm17491_vm11  ;;  %v2177_v57 = vld [vmem:[#allocation3] ss:$8 sm:$0x3] }
 0x565   : > { %3396 = vmatprep.subr.mxu0 %v3341_v50  ;;  %9714 = vmatpush1.msk.msra.mxu1 %vm568_vm5, %v3158_v22  ;;  %v3528_v46 = vsel %vm17491_vm11, %v17490_v42, %v3513_v35  ;;  %v3526_v22 = vsel %vm17496_vm14, %v17495_v5, %v17493_v63  ;;  %v3525_v50 = vsel %vm17491_vm11, %v17498_v43, %v17497_v15  ;;  %vm17503_vm14 = vmmov %vm17491_vm11  ;;  %v2363_v63 = vld [vmem:[#allocation3 + $0x1] ss:$8 sm:$0x3] }
 0x566   : > { %3397 = vmatpush1.msra.mxu0 %v3340_v31  ;;  %3208 = vmatprep.subr.mxu1 %v3157_v26  ;;  %v17499_v31 = vld [vmem:[#allocation74_spill] sm:$0xff]  ;;  %v9721_v26 = vld [vmem:[%s16947_s4 + $0xf0] sm:$0xff] }
 0x567   : > { %3398 = vmatprep.subr.mxu0 %v3339_v24  ;;  %3209 = vmatpush1.msra.mxu1 %v3156_v27  ;;  %v3524_v33 = vsel %vm17500_vm12, %v17499_v31, %v17498_v43  ;;  %v3523_v24 = vsel %vm17503_vm14, %v17502_v4, %v17501_v54  ;;  %v3522_v27 = vsel %vm17491_vm11, %v17504_v7, %v17502_v4  ;;  %v2735_v4 = vld [vmem:[#allocation3 + $0x3] ss:$8 sm:$0x3] }
 0x568   : > { %3399 = vmatpush1.msra.mxu0 %v3338_v8  ;;  %2902 = vmatprep.mubr.f32.mxu1 %v17430_v32  ;;  %v9722_v8 = vld [vmem:[%s16947_s4 + $0xf8] sm:$0xff] }
 0x569   : > { %3210 = vmatprep.subr.mxu1 %v3155_v55  ;;  %3400 = vmatprep.subr.mxu0 %v3337_v17 }
 0x56a   : > { %9696 = vmatmul.mubr.msk.f32.gmra.mxu1 %vm2071_vm15, %v9690_v13  ;;  %9706 = vmatmul.mubr.msk.f32.gmra.mxu0 %vm2071_vm15, %v9700_v19  ;;  %v9729_v13 = vld [vmem:[%s16947_s4 + $0x100] sm:$0xff]  ;;  %v9730_v19 = vld [vmem:[%s16947_s4 + $0x108] sm:$0xff] }
 0x56b   : > { %3211 = vmatpush1.msra.mxu1 %v3154_v23  ;;  %3401 = vmatpush1.msra.mxu0 %v3336_v10 }
 0x56c   : > { %3212 = vmatprep.subr.mxu1 %v3153_v12  ;;  %2908 = vmatprep.mubr.f32.mxu1 %v17430_v32 }
 0x56d   : > { %3213 = vmatpush1.msra.mxu1 %v3152_v25  ;;  %3074 = vmatprep.mubr.f32.mxu0 %v17430_v32 }
 0x56e   : > { %3214 = vmatprep.subr.mxu1 %v3151_v36  ;;  %9697 = vmatmul.mubr.msk.f32.gmra.mxu1 %vm2071_vm15, %v9691_v0 }
 0x56f   : > { %9707 = vmatmul.mubr.msk.f32.gmra.mxu0 %vm2071_vm15, %v9701_v47  ;;  %3215 = vmatpush1.msra.mxu1 %v3150_v21 }
 0x570   : > { %9733 = vmatprep.subr.msk.mxu1 %vm568_vm5, %v3531_v61  ;;  %2914 = vmatprep.mubr.f32.mxu1 %v17430_v32 }
 0x571   : > { %3080 = vmatprep.mubr.f32.mxu0 %v17430_v32 }
 0x572   : > { %9698 = vmatmul.mubr.msk.f32.gmra.mxu1 %vm2071_vm15, %v9692_v40 }
 0x573   : > { %9708 = vmatmul.mubr.msk.f32.gmra.mxu0 %vm2071_vm15, %v9702_v60  ;;  %3248 = vmatprep.mubr.f32.mxu1 %v17430_v32 }
 0x574   : > { %3434 = vmatprep.mubr.f32.mxu0 %v17430_v32 }
 0x576   : > { %9715 = vmatmul.mubr.msk.f32.vlgmr.msra.gmra.mxu1 %vm2071_vm15, %v9709_v58 }
 0x577   : > { %9734 = vmatpush1.msk.msra.mxu1 %vm568_vm5, %v3530_v37  ;;  %9725 = vmatmul.mubr.msk.f32.vlgmr.msra.gmra.mxu0 %vm2071_vm15, %v9719_v14 }
 0x578   : > { %3580 = vmatprep.subr.mxu1 %v3529_v2  ;;  %3254 = vmatprep.mubr.f32.mxu1 %v17430_v32 }
 0x579   : > { %3581 = vmatpush1.msra.mxu1 %v3528_v46  ;;  %3440 = vmatprep.mubr.f32.mxu0 %v17430_v32 }
 0x57a   : > { %3582 = vmatprep.subr.mxu1 %v3527_v56  ;;  %9716 = vmatmul.mubr.msk.f32.gmra.mxu1 %vm2071_vm15, %v9710_v48  ;;  %v17505_v56 = vld [vmem:[#allocation21_spill] sm:$0xff] }
 0x57b   : > { %3583 = vmatpush1.msra.mxu1 %v3526_v22  ;;  %9726 = vmatmul.mubr.msk.f32.gmra.mxu0 %vm2071_vm15, %v9720_v59  ;;  %v2182_v5 = vrot.slane %v2177_v57, %v17505_v56  ;;  %v2368_v22 = vrot.slane %v2363_v63, %v17505_v56 }
 0x57c   : > { %3584 = vmatprep.subr.mxu1 %v3525_v50  ;;  %3260 = vmatprep.mubr.f32.mxu1 %v17430_v32  ;;  %v17506_v50 = vld [vmem:[#allocation22_spill] sm:$0xff] }
 0x57d   : > { %3585 = vmatpush1.msra.mxu1 %v3524_v33  ;;  %3446 = vmatprep.mubr.f32.mxu0 %v17430_v32  ;;  %v2372_v31 = vrot.slane %v2363_v63, %v17506_v50  ;;  %v2549_v33 = vld [vmem:[#allocation3 + $0x2] ss:$8 sm:$0x3]  ;;  %v12294_v29 = vrot.slane %v2735_v4, %v17506_v50 }
 0x57e   : > { %3586 = vmatprep.subr.mxu1 %v3523_v24  ;;  %9717 = vmatmul.mubr.msk.f32.gmra.mxu1 %vm2071_vm15, %v9711_v53  ;;  %v2186_v53 = vrot.slane %v2177_v57, %v17506_v50 }
 0x57f   : > { %3587 = vmatpush1.msra.mxu1 %v3522_v27  ;;  %9727 = vmatmul.mubr.msk.f32.gmra.mxu0 %vm2071_vm15, %v9721_v26  ;;  %v12283_v27 = vrot.slane %v2549_v33, %v17505_v56 }
 0x580   : > { %3266 = vmatprep.mubr.f32.mxu1 %v17430_v32  ;;  %3452 = vmatprep.mubr.f32.mxu0 %v17430_v32 }
 0x582   : > { %9718 = vmatmul.mubr.msk.f32.gmra.mxu1 %vm2071_vm15, %v9712_v62  ;;  %v12286_v62 = vrot.slane %v2549_v33, %v17506_v50 }
 0x583   : > { %9728 = vmatmul.mubr.msk.f32.gmra.mxu0 %vm2071_vm15, %v9722_v8  ;;  %3620 = vmatprep.mubr.f32.mxu1 %v17430_v32  ;;  %v3087_v8 = vld [vmem:[#allocation3 + $0x5] ss:$8 sm:$0x3] }
 0x584   : > { %4033 = vmatprep.mubr.f32.mxu0 %v17430_v32 }
 0x586   : > { %9735 = vmatmul.mubr.msk.f32.vlgmr.msra.gmra.mxu1 %vm2071_vm15, %v9729_v13 }
 0x587   : > { %3626 = vmatprep.mubr.f32.mxu1 %v17430_v32 }
 0x58a   : > { %9736 = vmatmul.mubr.msk.f32.gmra.mxu1 %vm2071_vm15, %v9730_v19  ;;  %v3273_v19 = vld [vmem:[#allocation3 + $0x6] ss:$8 sm:$0x3] }
 0x58b   : > { %3632 = vmatprep.mubr.f32.mxu1 %v17430_v32 }
 0x58e   : > { %9737 = vmatmul.mubr.msk.f32.gmra.mxu1 %vm2071_vm15, %v9731_v44 }
 0x58f   : > { %3638 = vmatprep.mubr.f32.mxu1 %v17430_v32 }
 0x592   : > { %9738 = vmatmul.mubr.msk.f32.gmra.mxu1 %vm2071_vm15, %v9732_v41 }
 0x593   : > { %4259 = vmatprep.mubr.f32.mxu1 %v17430_v32  ;;  %v12299_v32 = vrot.slane %v3087_v8, %v17505_v56 }
 0x5f9   : > { %v2340_v55 = vpop.f32.mrf.mxu0 }
 0x5fa   : > { %v2375_v7 = vmul.f32 %v2368_v22, %v2340_v55  ;;  %v2740_v55 = vrot.slane %v2735_v4, %v17505_v56 }
 0x5fb   : > { %v2342_v30 = vpop.f32.mrf.mxu0 }
 0x5fc   : > { %v2376_v41 = vmul.f32 %v2372_v31, %v2342_v30 }
 0x5fe   : > { %v2154_v34 = vpop.f32.mrf.mxu1  ;;  %v2346_v17 = vpop.f32.mrf.mxu0 }
 0x5ff   : > { %v2189_v24 = vmul.f32 %v2182_v5, %v2154_v34  ;;  %v2377_v63 = vmul.f32 %v2368_v22, %v2346_v17  ;;  %v12307_v17 = vrot.slane %v3273_v19, %v17505_v56 }
 0x600   : > { %v2156_v28 = vpop.f32.mrf.mxu1  ;;  %v2348_v23 = vpop.f32.mrf.mxu0 }
 0x601   : > { %v2190_v44 = vmul.f32 %v2186_v53, %v2156_v28  ;;  %v2378_v34 = vmul.f32 %v2372_v31, %v2348_v23  ;;  %v12302_v28 = vrot.slane %v3087_v8, %v17506_v50  ;;  %17513 = vst [vmem:[#allocation122_spill] sm:$0xff] %v12307_v17  ;;  %v12310_v23 = vrot.slane %v3273_v19, %v17506_v50 }
 0x604   : > { %v2160_v49 = vpop.f32.mrf.mxu1  ;;  %v12224_v10 = vpop.f32.mrf.mxu0 }
 0x605   : > { %v2191_v57 = vmul.f32 %v2182_v5, %v2160_v49  ;;  %v2383_v49 = vadd.f32 %v2375_v7, %v2189_v24  ;;  %v2379_v4 = vmul.f32 %v2368_v22, %v12224_v10 }
 0x606   : > { %v2162_v51 = vpop.f32.mrf.mxu1  ;;  %v12226_v45 = vpop.f32.mrf.mxu0 }
 0x607   : > { %v2192_v38 = vmul.f32 %v2186_v53, %v2162_v51  ;;  %v2385_v8 = vadd.f32 %v2377_v63, %v2191_v57 }
 0x609   : > { %v12228_v12 = vpop.f32.mrf.mxu0  ;;  %v2386_v17 = vadd.f32 %v2378_v34, %v2192_v38 }
 0x60a   : > { %v2166_v0 = vpop.f32.mrf.mxu1 }
 0x60b   : > { %v12230_v20 = vpop.f32.mrf.mxu0  ;;  %v2193_v51 = vmul.f32 %v2182_v5, %v2166_v0 }
 0x60c   : > { %v12232_v25 = vpop.f32.mrf.mxu1 }
 0x60d   : > { %v12234_v47 = vpop.f32.mrf.mxu0  ;;  %v2194_v7 = vmul.f32 %v2186_v53, %v12232_v25  ;;  %v2387_v38 = vadd.f32 %v2379_v4, %v2193_v51 }
 0x60e   : > { %v12236_v1 = vpop.f32.mrf.mxu1 }
 0x60f   : > { %v12238_v16 = vpop.f32.mrf.mxu0 }
 0x610   : > { %v12240_v36 = vpop.f32.mrf.mxu1 }
 0x611   : > { %v12242_v6 = vpop.f32.mrf.mxu0  ;;  %v2196_v25 = vmul.f32 %v2186_v53, %v12240_v36  ;;  %v12346_v53 = vrot.slane %v3459_v11, %v17506_v50 }
 0x612   : > { %v2526_v21 = vpop.f32.mrf.mxu1 }
 0x613   : > { %v12244_v9 = vpop.f32.mrf.mxu0 }
 0x614   : > { %v2528_v3 = vpop.f32.mrf.mxu1 }
 0x615   : > { %v2562_v19 = vmul.f32 %v12286_v62, %v2528_v3  ;;  %v2195_v3 = vmul.f32 %v2182_v5, %v12236_v1 }
 0x617   : > { %v2532_v61 = vpop.f32.mrf.mxu1 }
 0x618   : > { %v12246_v40 = vpop.f32.mrf.mxu0  ;;  %v2563_v0 = vmul.f32 %v12283_v27, %v2532_v61  ;;  %v2747_v61 = vmul.f32 %v2740_v55, %v12234_v47  ;;  %v2750_v47 = vmul.f32 %v12294_v29, %v12244_v9 }
 0x619   : > { %v2534_v60 = vpop.f32.mrf.mxu1  ;;  %v2751_v4 = vmul.f32 %v2740_v55, %v12246_v40 }
 0x61a   : > { %v12248_v58 = vpop.f32.mrf.mxu0  ;;  %v2564_v10 = vmul.f32 %v12286_v62, %v2534_v60  ;;  %v2748_v60 = vmul.f32 %v12294_v29, %v12238_v16  ;;  %v2571_v34 = vadd.f32 %v2563_v0, %v2385_v8 }
 0x61b   : > { %v2752_v40 = vmul.f32 %v12294_v29, %v12248_v58 }
 0x61c   : > { %v12250_v35 = vpop.f32.mrf.mxu1  ;;  %v2572_v51 = vadd.f32 %v2564_v10, %v2386_v17 }
 0x61d   : > { %v12252_v14 = vpop.f32.mrf.mxu0 }
 0x61e   : > { %v12254_v39 = vpop.f32.mrf.mxu1  ;;  %v2758_v10 = vadd.f32 %v2750_v47, %v2572_v51 }
 0x61f   : > { %v12256_v37 = vpop.f32.mrf.mxu0 }
 0x620   : > { %v12258_v52 = vpop.f32.mrf.mxu1 }
 0x621   : > { %v12262_v48 = vpop.f32.mrf.mxu0 }
 0x622   : > { %v12260_v2 = vpop.f32.mrf.mxu1 }
 0x623   : > { %v12268_v59 = vpop.f32.mrf.mxu0 }
 0x624   : > { %v12264_v42 = vpop.f32.mrf.mxu1 }
 0x626   : > { %v12266_v46 = vpop.f32.mrf.mxu1 }
 0x62a   : > { %v12272_v15 = vpop.f32.mrf.mxu1  ;;  %v12274_v43 = vpop.f32.mrf.mxu0 }
 0x62c   : > { %v12278_v26 = vpop.f32.mrf.mxu1  ;;  %v12280_v54 = vpop.f32.mrf.mxu0 }
 0x62d   : > { %17507 = vst [vmem:[#allocation197_spill] sm:$0xff] %v12278_v26  ;;  %17508 = vst [vmem:[#allocation154_spill] sm:$0xff] %v12280_v54  ;;  %v2380_v54 = vmul.f32 %v2372_v31, %v12226_v45  ;;  %v2565_v45 = vmul.f32 %v12283_v27, %v12250_v35 }
 0x62e   : > { %v12288_v13 = vpop.f32.mrf.mxu1 }
 0x62f   : > { %17509 = vst [vmem:[#allocation195_spill] sm:$0xff] %v12288_v13  ;;  %v12290_v18 = vpop.f32.mrf.mxu0  ;;  %v2384_v13 = vadd.f32 %v2376_v41, %v2190_v44  ;;  %v2381_v44 = vmul.f32 %v2368_v22, %v12228_v12  ;;  %v2382_v41 = vmul.f32 %v2372_v31, %v12230_v20  ;;  %v2749_v12 = vmul.f32 %v2740_v55, %v12242_v6  ;;  %v3645_v22 = vld [vmem:[#allocation3 + $0x10] ss:$8 sm:$0x3] }
 0x630   : > { %17510 = vst [vmem:[#allocation177_spill] sm:$0xff] %v12290_v18  ;;  %v12296_v33 = vpop.f32.mrf.mxu1  ;;  %v2566_v20 = vmul.f32 %v12286_v62, %v12254_v39  ;;  %v2388_v5 = vadd.f32 %v2380_v54, %v2194_v7  ;;  %v2573_v16 = vadd.f32 %v2565_v45, %v2387_v38  ;;  %v2567_v39 = vmul.f32 %v12283_v27, %v12258_v52 }
 0x631   : > { %17511 = vst [vmem:[#allocation138_spill] sm:$0xff] %v12296_v33  ;;  %v12304_v30 = vpop.f32.mrf.mxu0  ;;  %v12316_v33 = vrot.slane %v3459_v11, %v17505_v56  ;;  %v2570_v31 = vadd.f32 %v2562_v19, %v2384_v13  ;;  %v2389_v6 = vadd.f32 %v2381_v44, %v2195_v3  ;;  %v2568_v13 = vmul.f32 %v12286_v62, %v12260_v2 }
 0x632   : > { %17512 = vst [vmem:[#allocation157_spill] sm:$0xff] %v12304_v30  ;;  %v12313_v18 = vpop.f32.mrf.mxu1  ;;  %v2561_v30 = vmul.f32 %v12283_v27, %v2526_v21  ;;  %v12353_v17 = vrot.slane %v3645_v22, %v17505_v56  ;;  %v2390_v9 = vadd.f32 %v2382_v41, %v2196_v25  ;;  %v2574_v54 = vadd.f32 %v2566_v20, %v2388_v5 }
 0x633   : > { %v12320_v26 = vpop.f32.mrf.mxu0  ;;  %v2753_v11 = vmul.f32 %v2740_v55, %v12252_v14  ;;  %v2756_v19 = vadd.f32 %v2748_v60, %v2570_v31  ;;  %v2757_v0 = vadd.f32 %v2749_v12, %v2571_v34  ;;  %v2754_v2 = vmul.f32 %v12294_v29, %v12256_v37 }
 0x634   : > { %v12325_v24 = vpop.f32.mrf.mxu1  ;;  %v2569_v63 = vadd.f32 %v2561_v30, %v2383_v49  ;;  %v3099_v62 = vmul.f32 %v12299_v32, %v12262_v48  ;;  %v2759_v7 = vadd.f32 %v2751_v4, %v2573_v16  ;;  %v2575_v41 = vadd.f32 %v2567_v39, %v2389_v6  ;;  %v17516_v60 = vld [vmem:[#allocation154_spill] sm:$0xff] }
 0x635   : > { %v12332_v21 = vpop.f32.mrf.mxu0  ;;  %v2576_v58 = vadd.f32 %v2568_v13, %v2390_v9  ;;  %v2922_v45 = vadd.f32 %v12266_v46, %v2756_v19  ;;  %v3100_v14 = vmul.f32 %v12302_v28, %v12268_v59  ;;  %v2923_v38 = vadd.f32 %v12272_v15, %v2757_v0 }
 0x636   : > { %v3250_v57 = vpop.f32.mrf.mxu1  ;;  %v2755_v49 = vadd.f32 %v2747_v61, %v2569_v63  ;;  %v3101_v29 = vmul.f32 %v12299_v32, %v12274_v43  ;;  %v2760_v37 = vadd.f32 %v2752_v40, %v2574_v54  ;;  %v17515_v61 = vld [vmem:[#allocation197_spill] sm:$0xff]  ;;  %v3102_v25 = vmul.f32 %v12302_v28, %v17516_v60  ;;  %v17517_v63 = vld [vmem:[#allocation195_spill] sm:$0xff] }
 0x637   : > { %v3436_v35 = vpop.f32.mrf.mxu0  ;;  %v2924_v48 = vadd.f32 %v17515_v61, %v2758_v10  ;;  %v2925_v12 = vadd.f32 %v17517_v63, %v2759_v7  ;;  %v17518_v46 = vld [vmem:[#allocation177_spill] sm:$0xff]  ;;  %v3108_v5 = vadd.f32 %v3100_v14, %v2922_v45  ;;  %v2761_v16 = vadd.f32 %v2753_v11, %v2575_v41 }
 0x638   : > { %v3252_v1 = vpop.f32.mrf.mxu1  ;;  %v2921_v27 = vadd.f32 %v12264_v42, %v2755_v49  ;;  %v17514_v42 = vld [vmem:[#allocation122_spill] sm:$0xff]  ;;  %v3103_v20 = vmul.f32 %v12299_v32, %v17518_v46  ;;  %v2762_v4 = vadd.f32 %v2754_v2, %v2576_v58  ;;  %v12381_v39 = vrot.slane %v3645_v22, %v17506_v50 }
 0x639   : > { %v3438_v36 = vpop.f32.mrf.mxu0  ;;  %v3285_v3 = vmul.f32 %v17514_v42, %v3250_v57  ;;  %v17519_v34 = vld [vmem:[#allocation138_spill] sm:$0xff]  ;;  %v17520_v51 = vld [vmem:[#allocation157_spill] sm:$0xff]  ;;  %v3286_v47 = vmul.f32 %v12310_v23, %v3252_v1  ;;  %v3109_v13 = vadd.f32 %v3101_v29, %v2923_v38  ;;  %v3471_v54 = vmul.f32 %v12316_v33, %v3436_v35 }
 0x63a   : > { %v3256_v30 = vpop.f32.mrf.mxu1  ;;  %v3107_v31 = vadd.f32 %v3099_v62, %v2921_v27  ;;  %v2926_v15 = vadd.f32 %v17519_v34, %v2760_v37  ;;  %v3104_v43 = vmul.f32 %v12302_v28, %v17520_v51  ;;  %v3110_v49 = vadd.f32 %v3102_v25, %v2924_v48  ;;  %v17521_v25 = vld [vmem:[#allocation11_spill] sm:$0xff] }
 0x63b   : > { %v3442_v8 = vpop.f32.mrf.mxu0  ;;  %v3287_v40 = vmul.f32 %v17514_v42, %v3256_v30  ;;  %v3111_v19 = vadd.f32 %v3103_v20, %v2925_v12  ;;  %v2927_v11 = vadd.f32 %v12313_v18, %v2761_v16  ;;  %v3294_v2 = vadd.f32 %v3286_v47, %v3108_v5 }
 0x63c   : > { %v3258_v52 = vpop.f32.mrf.mxu1  ;;  %v3293_v9 = vadd.f32 %v3285_v3, %v3107_v31  ;;  %v3112_v27 = vadd.f32 %v3104_v43, %v2926_v15  ;;  %v3472_v22 = vmul.f32 %v12346_v53, %v3438_v36  ;;  %v3105_v7 = vmul.f32 %v12299_v32, %v12320_v26 }
 0x63d   : > { %v3444_v44 = vpop.f32.mrf.mxu0  ;;  %v3288_v0 = vmul.f32 %v12310_v23, %v3258_v52  ;;  %v2928_v35 = vadd.f32 %v12325_v24, %v2762_v4  ;;  %v3106_v30 = vmul.f32 %v12302_v28, %v12332_v21  ;;  %v3295_v45 = vadd.f32 %v3287_v40, %v3109_v13  ;;  %v17522_v13 = vld [vmem:[#allocation12_spill] sm:$0xff] }
 0x63e   : > { %v3262_v55 = vpop.f32.mrf.mxu1  ;;  %v3479_v58 = vadd.f32 %v3471_v54, %v3293_v9  ;;  %v3473_v14 = vmul.f32 %v12316_v33, %v3442_v8  ;;  %v3474_v38 = vmul.f32 %v12346_v53, %v3444_v44  ;;  %v3480_v24 = vadd.f32 %v3472_v22, %v3294_v2 }
 0x63f   : > { %v3448_v57 = vpop.f32.mrf.mxu0  ;;  %v3289_v1 = vmul.f32 %v17514_v42, %v3262_v55  ;;  %v3296_v55 = vadd.f32 %v3288_v0, %v3110_v49  ;;  %v3113_v21 = vadd.f32 %v3105_v7, %v2927_v11  ;;  %v3114_v46 = vadd.f32 %v3106_v30, %v2928_v35  ;;  %v17523_v7 = vld [vmem:[#allocation13_spill] sm:$0xff] }
 0x640   : > { %v3264_v59 = vpop.f32.mrf.mxu1  ;;  %v3475_v32 = vmul.f32 %v12316_v33, %v3448_v57  ;;  %v3481_v60 = vadd.f32 %v3473_v14, %v3295_v45 }
 0x641   : > { %v3450_v62 = vpop.f32.mrf.mxu0  ;;  %v3290_v52 = vmul.f32 %v12310_v23, %v3264_v59  ;;  %v3297_v36 = vadd.f32 %v3289_v1, %v3111_v19  ;;  %v3482_v20 = vadd.f32 %v3474_v38, %v3296_v55 }
 0x642   : > { %v3268_v6 = vpop.f32.mrf.mxu1  ;;  %v3476_v8 = vmul.f32 %v12346_v53, %v3450_v62 }
 0x643   : > { %v3454_v29 = vpop.f32.mrf.mxu0  ;;  %v3298_v3 = vadd.f32 %v3290_v52, %v3112_v27  ;;  %v3291_v61 = vmul.f32 %v17514_v42, %v3268_v6  ;;  %v3483_v59 = vadd.f32 %v3475_v32, %v3297_v36 }
 0x644   : > { %v3270_v10 = vpop.f32.mrf.mxu1  ;;  %v3477_v5 = vmul.f32 %v12316_v33, %v3454_v29 }
 0x645   : > { %v3292_v31 = vmul.f32 %v12310_v23, %v3270_v10  ;;  %v3456_v15 = vpop.f32.mrf.mxu0  ;;  %v3299_v47 = vadd.f32 %v3291_v61, %v3113_v21  ;;  %v3484_v57 = vadd.f32 %v3476_v8, %v3298_v3 }
 0x646   : > { %v3622_v41 = vpop.f32.mrf.mxu1  ;;  %v3478_v40 = vmul.f32 %v12346_v53, %v3456_v15 }
 0x647   : > { %v3657_v18 = vmul.f32 %v12353_v17, %v3622_v41  ;;  %v3300_v54 = vadd.f32 %v3292_v31, %v3114_v46  ;;  %v3485_v27 = vadd.f32 %v3477_v5, %v3299_v47  ;;  %v12444_v47 = vpop.permute.xlu0 %4111 }
 0x648   : > { %v3624_v26 = vpop.f32.mrf.mxu1  ;;  %17527 = vst [vmem:[#allocation104_spill] sm:$0xff] %v12444_v47 }
 0x649   : > { %v3665_v37 = vadd.f32 %v3657_v18, %v3479_v58  ;;  %v3658_v28 = vmul.f32 %v12381_v39, %v3624_v26  ;;  %v3486_v36 = vadd.f32 %v3478_v40, %v3300_v54 }
 0x64a   : > { %v3628_v48 = vpop.f32.mrf.mxu1 }
 0x64b   : > { %v3697_v63 = vadd.f32 %v17521_v25, %v3665_v37  ;;  %v3666_v12 = vadd.f32 %v3658_v28, %v3480_v24  ;;  %v3659_v44 = vmul.f32 %v12353_v17, %v3628_v48  ;;  %v17524_v24 = vld [vmem:[#allocation14_spill] sm:$0xff]  ;;  %v12448_v5 = vpop.permute.xlu0 %4563 }
 0x64c   : > { %v3630_v34 = vpop.f32.mrf.mxu1  ;;  %17529 = vst [vmem:[#allocation68_spill] sm:$0xff] %v12448_v5 }
 0x64d   : > { %vm3705_vm15 = vcmp.ge.f32.partialorder %v3697_v63, 0.0  ;;  %v3713_v51 = vmul.f32 0.2, %v3697_v63  ;;  %v3698_v42 = vadd.f32 %v17521_v25, %v3666_v12  ;;  %v3667_v43 = vadd.f32 %v3659_v44, %v3481_v60 }
 0x64e   : > { %v3660_v16 = vmul.f32 %v12381_v39, %v3630_v34  ;;  %v3634_v4 = vpop.f32.mrf.mxu1 }
 0x64f   : > { %vm3706_vm12 = vcmp.ge.f32.partialorder %v3698_v42, 0.0  ;;  %v3714_v6 = vmul.f32 0.2, %v3698_v42  ;;  %v3699_v9 = vadd.f32 %v17522_v13, %v3667_v43  ;;  %v3661_v23 = vmul.f32 %v12353_v17, %v3634_v4  ;;  %v12452_v4 = vpop.permute.xlu0 %4995 }
 0x650   : > { %v3668_v49 = vadd.f32 %v3660_v16, %v3482_v20  ;;  %v3636_v19 = vpop.f32.mrf.mxu1  ;;  %v3721_v0 = vsel %vm3705_vm15, %v3697_v63, %v3713_v51  ;;  %v12438_v51 = vpop.permute.xlu1 %3884  ;;  %17531 = vst [vmem:[#allocation136_spill] sm:$0xff] %v12452_v4 }
 0x651   : > { %vm3707_vm14 = vcmp.ge.f32.partialorder %v3699_v9, 0.0  ;;  %v3715_v1 = vmul.f32 0.2, %v3699_v9  ;;  %v3669_v10 = vadd.f32 %v3661_v23, %v3483_v59  ;;  %v3662_v33 = vmul.f32 %v12381_v39, %v3636_v19 }
 0x652   : > { %v3700_v11 = vadd.f32 %v17522_v13, %v3668_v49  ;;  %v3737_v2 = vrot.slane %v3721_v0, 4  ;;  %v3640_v22 = vpop.f32.mrf.mxu1  ;;  %v3722_v62 = vsel %vm3706_vm12, %v3698_v42, %v3714_v6 }
 0x653   : > { %v3701_v35 = vadd.f32 %v17523_v7, %v3669_v10  ;;  %v3670_v30 = vadd.f32 %v3662_v33, %v3484_v57  ;;  %v3663_v53 = vmul.f32 %v12353_v17, %v3640_v22  ;;  %v3738_v52 = vrot.slane %v3722_v62, 4  ;;  %v12456_v13 = vpop.permute.xlu0 %5221 }
 0x654   : > { %vm3708_vm11 = vcmp.ge.f32.partialorder %v3700_v11, 0.0  ;;  %v3716_v41 = vmul.f32 0.2, %v3700_v11  ;;  %3751 = vrot.lane.b32.xlu1 %v3737_v2, %s10076_s15  ;;  %v3642_v58 = vpop.f32.mrf.mxu1  ;;  %v3723_v45 = vsel %vm3707_vm14, %v3699_v9, %v3715_v1  ;;  %v12440_v42 = vpop.permute.xlu1 %4337  ;;  %17533 = vst [vmem:[#allocation36_spill] sm:$0xff] %v12456_v13 }
 0x655   : > { %vm3709_vm15 = vcmp.ge.f32.partialorder %v3701_v35, 0.0  ;;  %v3717_v14 = vmul.f32 0.2, %v3701_v35  ;;  %v3702_v18 = vadd.f32 %v17523_v7, %v3670_v30  ;;  %v3671_v55 = vadd.f32 %v3663_v53, %v3485_v27  ;;  %3753 = vrot.lane.b32.xlu0 %v3738_v52, %s10076_s15  ;;  %17525 = vst [vmem:[#allocation155_spill] sm:$0xff] %v12440_v42  ;;  %v13230_v42 = vld [vmem:[#allocation2] sm:$0xff] }
 0x656   : > { %v3664_v38 = vmul.f32 %v12381_v39, %v3642_v58  ;;  %v3739_v32 = vrot.slane %v3723_v45, 4  ;;  %v3724_v17 = vsel %vm3708_vm11, %v3700_v11, %v3716_v41  ;;  %17661 = vst [vmem:[#allocation277_spill] sm:$0xff] %v13230_v42 }
 0x657   : > { %vm3710_vm12 = vcmp.ge.f32.partialorder %v3702_v18, 0.0  ;;  %v3718_v26 = vmul.f32 0.2, %v3702_v18  ;;  %v3703_v29 = vadd.f32 %v17524_v24, %v3671_v55  ;;  %v3741_v37 = vrot.slane %v3724_v17, 4  ;;  %v12460_v23 = vpop.permute.xlu0 %6109 }
 0x658   : > { %v3672_v28 = vadd.f32 %v3664_v38, %v3486_v36  ;;  %v3740_v21 = vsel %vm568_vm5, %v3737_v2, %v3739_v32  ;;  %v3725_v3 = vsel %vm3709_vm15, %v3701_v35, %v3717_v14  ;;  %v12442_v43 = vpop.permute.xlu1 %4789  ;;  %17535 = vst [vmem:[#allocation119_spill] sm:$0xff] %v12460_v23  ;;  %vm3952_vm15 = vcmask 556032  }
 0x659   : > { %vm3711_vm14 = vcmp.ge.f32.partialorder %v3703_v29, 0.0  ;;  %v3719_v61 = vmul.f32 0.2, %v3703_v29  ;;  %3755 = vrot.lane.b32.xlu1 %v3740_v21, %s10076_s15  ;;  %v3742_v8 = vsel %vm568_vm5, %v3738_v52, %v3741_v37  ;;  %v3743_v48 = vrot.slane %v3725_v3, 4  ;;  %17526 = vst [vmem:[#allocation85_spill] sm:$0xff] %v12442_v43 }
 0x65a   : > { %v3704_v39 = vadd.f32 %v17524_v24, %v3672_v28  ;;  %3757 = vrot.lane.b32.xlu0 %v3742_v8, %s10076_s15  ;;  %v3726_v60 = vsel %vm3710_vm12, %v3702_v18, %v3718_v26  ;;  %vm17776_vm12 = vcmask 859136  }
 0x65b   : > { %v3744_v25 = vsel %vm568_vm5, %v3739_v32, %v3743_v48  ;;  %v3745_v63 = vrot.slane %v3726_v60, 4  ;;  %v3727_v12 = vsel %vm3711_vm14, %v3703_v29, %v3719_v61  ;;  %v12464_v40 = vpop.permute.xlu0 %6642  ;;  %vm17781_vm14 = vmmov %vm17776_vm12 }
 0x65c   : > { %vm3712_vm11 = vcmp.ge.f32.partialorder %v3704_v39, 0.0  ;;  %v3720_v44 = vmul.f32 0.2, %v3704_v39  ;;  %v3747_v20 = vrot.slane %v3727_v12, 4  ;;  %v12446_v57 = vpop.permute.xlu1 %5447  ;;  %17537 = vst [vmem:[#allocation88_spill] sm:$0xff] %v12464_v40 }
 0x65d   : > { %3759 = vrot.lane.b32.xlu1 %v3744_v25, %s10076_s15  ;;  %v3746_v46 = vsel %vm568_vm5, %v3741_v37, %v3745_v63  ;;  %17528 = vst [vmem:[#allocation196_spill] sm:$0xff] %v12446_v57 }
 0x65e   : > { %3761 = vrot.lane.b32.xlu0 %v3746_v46, %s10076_s15  ;;  %v3728_v59 = vsel %vm3712_vm11, %v3704_v39, %v3720_v44  ;;  %v3748_v34 = vsel %vm568_vm5, %v3743_v48, %v3747_v20  ;;  %vm17785_vm11 = vcmask 908288  }
 0x65f   : > { %v3749_v31 = vrot.slane %v3728_v59, 4  ;;  %v12468_v19 = vpop.permute.xlu0 %6890 }
 0x660   : > { %v12450_v16 = vpop.permute.xlu1 %5673  ;;  %17539 = vst [vmem:[#allocation194_spill] sm:$0xff] %v12468_v19 }
 0x661   : > { %3767 = vrot.lane.b32.xlu1 %v3747_v20, %s10076_s15  ;;  %v3750_v15 = vsel %vm568_vm5, %v3745_v63, %v3749_v31  ;;  %17530 = vst [vmem:[#allocation175_spill] sm:$0xff] %v12450_v16 }
 0x662   : > { %3769 = vrot.lane.b32.xlu0 %v3749_v31, %s10076_s15 }
 0x664   : > { %v12454_v6 = vpop.permute.xlu1 %6376 }
 0x665   : > { %3763 = vrot.lane.b32.xlu1 %v3748_v34, %s10076_s15  ;;  %17532 = vst [vmem:[#allocation153_spill] sm:$0xff] %v12454_v6 }
 0x666   : > { %3765 = vrot.lane.b32.xlu0 %v3750_v15, %s10076_s15 }
 0x668   : > { %v12458_v9 = vpop.permute.xlu1 %6644 }
 0x669   : > { %17534 = vst [vmem:[#allocation51_spill] sm:$0xff] %v12458_v9 }
 0x66c   : > { %v12462_v54 = vpop.permute.xlu1 %6888 }
 0x66d   : > { %17536 = vst [vmem:[#allocation25_spill] sm:$0xff] %v12462_v54 }
 0x670   : > { %v12466_v49 = vpop.permute.xlu1 %6892 }
 0x671   : > { %17538 = vst [vmem:[#allocation102_spill] sm:$0xff] %v12466_v49 }
 0x6c6   : > { %v3752_v0 = vpop.permute.xlu1 %3751 }
 0x6c7   : > { %3791 = vst.msk [vmem:[#allocation2 + $0x60] sm:$0xf0] %vm1971_vm2, %v3752_v0  ;;  %v3754_v1 = vpop.permute.xlu0 %3753 }
 0x6c8   : > { %v3771_v10 = vsel %vm483_vm0, %v3752_v0, %v3754_v1  ;;  %3793 = vst.msk [vmem:[#allocation2 + $0x70] sm:$0xf0] %vm1974_vm7, %v3754_v1 }
 0x6c9   : > { %3792 = vst [vmem:[#allocation2 + $0x68] sm:$0xf0] %v3771_v10 }
 0x6cb   : > { %v3756_v33 = vpop.permute.xlu1 %3755 }
 0x6cc   : > { %3794 = vst.msk [vmem:[#allocation2 + $0x78] sm:$0xff] %vm1976_vm13, %v3756_v33  ;;  %v3758_v27 = vpop.permute.xlu0 %3757 }
 0x6cd   : > { %v12475_v11 = vsel %vm483_vm0, %v3756_v33, %v3758_v27  ;;  %3796 = vst.msk [vmem:[#allocation2 + $0x88] sm:$0xff] %vm483_vm0, %v3758_v27 }
 0x6ce   : > { %3795 = vst [vmem:[#allocation2 + $0x80] sm:$0xff] %v12475_v11  ;;  %v12479_v2 = vld [vmem:[#allocation2 + $0x60] sm:$0xff] }
 0x6cf   : > { %4115 = vrot.lane.b32.xlu0 %v12479_v2, %s17111_s16  ;;  %3888 = vrot.lane.b32.xlu1 %v12479_v2, %s17113_s17  ;;  %v3760_v22 = vpop.permute.xlu1 %3759  ;;  %v12520_v45 = vld [vmem:[#allocation2 + $0x70] sm:$0xff] }
 0x6d0   : > { %3797 = vst.msk [vmem:[#allocation2 + $0x90] sm:$0xff] %vm1976_vm13, %v3760_v22  ;;  %v3762_v62 = vpop.permute.xlu0 %3761  ;;  %v12538_v14 = vld [vmem:[#allocation2 + $0x68] sm:$0xff] }
 0x6d1   : > { %v12487_v7 = vsel %vm483_vm0, %v3760_v22, %v3762_v62  ;;  %3799 = vst.msk [vmem:[#allocation2 + $0xa0] sm:$0xff] %vm483_vm0, %v3762_v62 }
 0x6d2   : > { %3798 = vst [vmem:[#allocation2 + $0x98] sm:$0xff] %v12487_v7 }
 0x6d3   : > { %4567 = vrot.lane.b32.xlu0 %v12479_v2, %s17107_s18  ;;  %4341 = vrot.lane.b32.xlu1 %v12479_v2, %s17540_s21  ;;  %v3768_v35 = vpop.permute.xlu1 %3767  ;;  %v12576_v18 = vld [vmem:[#allocation2 + $0x78] sm:$0xff] }
 0x6d4   : > { %3803 = vst.msk [vmem:[#allocation2 + $0xc0] sm:$0xf] %vm532_vm3, %v3768_v35  ;;  %v3770_v30 = vpop.permute.xlu0 %3769  ;;  %v12602_v55 = vld [vmem:[#allocation2 + $0x88] sm:$0xff] }
 0x6d5   : > { %v3775_v53 = vsel %vm483_vm0, %v3768_v35, %v3770_v30  ;;  %3805 = vst.msk [vmem:[#allocation2 + $0xd0] sm:$0xf] %vm500_vm1, %v3770_v30 }
 0x6d6   : > { %3804 = vst [vmem:[#allocation2 + $0xc8] sm:$0xf] %v3775_v53 }
 0x6d7   : > { %4999 = vrot.lane.b32.xlu0 %v12479_v2, %s17541_s25  ;;  %4793 = vrot.lane.b32.xlu1 %v12479_v2, %s17542_s28  ;;  %v3764_v52 = vpop.permute.xlu1 %3763  ;;  %v12696_v46 = vld [vmem:[#allocation2 + $0x90] sm:$0xff] }
 0x6d8   : > { %3800 = vst.msk [vmem:[#allocation2 + $0xa8] sm:$0xff] %vm1976_vm13, %v3764_v52  ;;  %v3766_v41 = vpop.permute.xlu0 %3765  ;;  %v12754_v53 = vld [vmem:[#allocation2 + $0xa0] sm:$0xff] }
 0x6d9   : > { %v12504_v58 = vsel %vm483_vm0, %v3764_v52, %v3766_v41  ;;  %3802 = vst.msk [vmem:[#allocation2 + $0xb8] sm:$0xff] %vm483_vm0, %v3766_v41 }
 0x6da   : > { %3801 = vst [vmem:[#allocation2 + $0xb0] sm:$0xff] %v12504_v58 }
 0x6db   : > { %5677 = vrot.lane.b32.xlu0 %v12479_v2, %s17231_s27  ;;  %5225 = vrot.lane.b32.xlu1 %v12479_v2, %s17229_s22 }
 0x6df   : > { %6113 = vrot.lane.b32.xlu0 %v12479_v2, %s17113_s17  ;;  %5451 = vrot.lane.b32.xlu1 %v12479_v2, %s17230_s24 }
 0x6e3   : > { %6646 = vrot.lane.b32.xlu0 %v12479_v2, %s17540_s21  ;;  %6380 = vrot.lane.b32.xlu1 %v12479_v2, %s17111_s16 }
 0x6e7   : > { %4119 = vrot.lane.b32.xlu0 %v12520_v45, %s17111_s16  ;;  %3892 = vrot.lane.b32.xlu1 %v12520_v45, %s17113_s17 }
 0x6eb   : > { %4571 = vrot.lane.b32.xlu0 %v12520_v45, %s17107_s18  ;;  %4345 = vrot.lane.b32.xlu1 %v12520_v45, %s17540_s21 }
 0x6ef   : > { %5003 = vrot.lane.b32.xlu0 %v12520_v45, %s17541_s25  ;;  %4797 = vrot.lane.b32.xlu1 %v12520_v45, %s17542_s28 }
 0x6f3   : > { %5229 = vrot.lane.b32.xlu0 %v12520_v45, %s17229_s22  ;;  %6384 = vrot.lane.b32.xlu1 %v12520_v45, %s17111_s16 }
 0x6f7   : > { %5455 = vrot.lane.b32.xlu0 %v12520_v45, %s17230_s24  ;;  %4117 = vrot.lane.b32.xlu1 %v12538_v14, %s17111_s16 }
 0x6fb   : > { %5681 = vrot.lane.b32.xlu0 %v12520_v45, %s17231_s27  ;;  %4569 = vrot.lane.b32.xlu1 %v12538_v14, %s17107_s18 }
 0x6ff   : > { %6117 = vrot.lane.b32.xlu0 %v12520_v45, %s17113_s17  ;;  %5001 = vrot.lane.b32.xlu1 %v12538_v14, %s17541_s25 }
 0x703   : > { %6650 = vrot.lane.b32.xlu0 %v12520_v45, %s17540_s21  ;;  %5227 = vrot.lane.b32.xlu1 %v12538_v14, %s17229_s22 }
 0x707   : > { %6916 = vrot.lane.b32.xlu0 %v12520_v45, %s17107_s18  ;;  %5453 = vrot.lane.b32.xlu1 %v12538_v14, %s17230_s24 }
 0x70b   : > { %5679 = vrot.lane.b32.xlu1 %v12538_v14, %s17231_s27  ;;  %3890 = vrot.lane.b32.xlu0 %v12538_v14, %s17113_s17 }
 0x70f   : > { %6115 = vrot.lane.b32.xlu1 %v12538_v14, %s17113_s17  ;;  %4343 = vrot.lane.b32.xlu0 %v12538_v14, %s17540_s21 }
 0x713   : > { %6648 = vrot.lane.b32.xlu1 %v12538_v14, %s17540_s21  ;;  %4795 = vrot.lane.b32.xlu0 %v12538_v14, %s17542_s28 }
 0x717   : > { %6914 = vrot.lane.b32.xlu1 %v12538_v14, %s17107_s18  ;;  %6382 = vrot.lane.b32.xlu0 %v12538_v14, %s17111_s16 }
 0x71b   : > { %4121 = vrot.lane.b32.xlu1 %v12576_v18, %s17111_s16  ;;  %3894 = vrot.lane.b32.xlu0 %v12576_v18, %s17113_s17 }
 0x71f   : > { %4573 = vrot.lane.b32.xlu1 %v12576_v18, %s17107_s18  ;;  %4347 = vrot.lane.b32.xlu0 %v12576_v18, %s17540_s21 }
 0x723   : > { %5005 = vrot.lane.b32.xlu1 %v12576_v18, %s17541_s25  ;;  %4799 = vrot.lane.b32.xlu0 %v12576_v18, %s17542_s28 }
 0x727   : > { %5457 = vrot.lane.b32.xlu1 %v12576_v18, %s17230_s24  ;;  %5231 = vrot.lane.b32.xlu0 %v12576_v18, %s17229_s22 }
 0x72b   : > { %6119 = vrot.lane.b32.xlu1 %v12576_v18, %s17113_s17  ;;  %5683 = vrot.lane.b32.xlu0 %v12576_v18, %s17231_s27 }
 0x72f   : > { %6652 = vrot.lane.b32.xlu1 %v12576_v18, %s17540_s21  ;;  %6386 = vrot.lane.b32.xlu0 %v12576_v18, %s17111_s16 }
 0x733   : > { %6918 = vrot.lane.b32.xlu1 %v12576_v18, %s17107_s18  ;;  %3898 = vrot.lane.b32.xlu0 %v12602_v55, %s17113_s17 }
 0x737   : > { %4125 = vrot.lane.b32.xlu1 %v12602_v55, %s17111_s16  ;;  %4351 = vrot.lane.b32.xlu0 %v12602_v55, %s17540_s21 }
 0x73b   : > { %4577 = vrot.lane.b32.xlu1 %v12602_v55, %s17107_s18  ;;  %4803 = vrot.lane.b32.xlu0 %v12602_v55, %s17542_s28 }
 0x73f   : > { %5009 = vrot.lane.b32.xlu1 %v12602_v55, %s17541_s25  ;;  %5461 = vrot.lane.b32.xlu0 %v12602_v55, %s17230_s24 }
 0x741   : > { %v12620_v36 = vpop.permute.xlu0 %4115  ;;  %v12622_v38 = vpop.permute.xlu1 %3888 }
 0x742   : > { %17543 = vst [vmem:[#allocation198_spill] sm:$0xff] %v12620_v36 }
 0x743   : > { %5235 = vrot.lane.b32.xlu1 %v12602_v55, %s17229_s22  ;;  %5687 = vrot.lane.b32.xlu0 %v12602_v55, %s17231_s27 }
 0x745   : > { %v12628_v32 = vpop.permute.xlu0 %4567  ;;  %v12630_v17 = vpop.permute.xlu1 %4341 }
 0x746   : > { %17544 = vst [vmem:[#allocation70_spill] sm:$0xff] %v12628_v32 }
 0x747   : > { %6123 = vrot.lane.b32.xlu1 %v12602_v55, %s17113_s17  ;;  %6390 = vrot.lane.b32.xlu0 %v12602_v55, %s17111_s16 }
 0x749   : > { %v12636_v26 = vpop.permute.xlu0 %4999  ;;  %v12638_v24 = vpop.permute.xlu1 %4793 }
 0x74a   : > { %17545 = vst [vmem:[#allocation34_spill] sm:$0xff] %v12636_v26  ;;  %17546 = vst [vmem:[#allocation52_spill] sm:$0xff] %v12638_v24  ;;  %v13095_v24 = vld [vmem:[#allocation2 + $0x58] sm:$0xff] }
 0x74b   : > { %6656 = vrot.lane.b32.xlu1 %v12602_v55, %s17540_s21  ;;  %6922 = vrot.lane.b32.xlu0 %v12602_v55, %s17107_s18 }
 0x74d   : > { %v12644_v29 = vpop.permute.xlu0 %5677  ;;  %v12646_v37 = vpop.permute.xlu1 %5225 }
 0x74e   : > { %17547 = vst [vmem:[#allocation24_spill] sm:$0xff] %v12644_v29  ;;  %17548 = vst [vmem:[#allocation192_spill] sm:$0xff] %v12646_v37 }
 0x74f   : > { %4123 = vrot.lane.b32.xlu0 %v12475_v11, %s17111_s16  ;;  %3896 = vrot.lane.b32.xlu1 %v12475_v11, %s17113_s17 }
 0x751   : > { %v12652_v28 = vpop.permute.xlu0 %6113  ;;  %v12654_v21 = vpop.permute.xlu1 %5451 }
 0x752   : > { %17549 = vst [vmem:[#allocation201_spill] sm:$0xff] %v12652_v28  ;;  %17550 = vst [vmem:[#allocation163_spill] sm:$0xff] %v12654_v21 }
 0x753   : > { %4575 = vrot.lane.b32.xlu0 %v12475_v11, %s17107_s18  ;;  %4349 = vrot.lane.b32.xlu1 %v12475_v11, %s17540_s21 }
 0x755   : > { %v12660_v3 = vpop.permute.xlu0 %6646  ;;  %v12662_v61 = vpop.permute.xlu1 %6380 }
 0x756   : > { %17551 = vst [vmem:[#allocation200_spill] sm:$0xff] %v12660_v3  ;;  %17552 = vst [vmem:[#allocation178_spill] sm:$0xff] %v12662_v61 }
 0x757   : > { %5007 = vrot.lane.b32.xlu0 %v12475_v11, %s17541_s25  ;;  %4801 = vrot.lane.b32.xlu1 %v12475_v11, %s17542_s28 }
 0x759   : > { %v12668_v8 = vpop.permute.xlu0 %4119  ;;  %v12670_v48 = vpop.permute.xlu1 %3892 }
 0x75b   : > { %5233 = vrot.lane.b32.xlu0 %v12475_v11, %s17229_s22  ;;  %5459 = vrot.lane.b32.xlu1 %v12475_v11, %s17230_s24 }
 0x75d   : > { %v12676_v39 = vpop.permute.xlu0 %4571  ;;  %v12678_v60 = vpop.permute.xlu1 %4345 }
 0x75e   : > { %17553 = vst [vmem:[#allocation159_spill] sm:$0xff] %v12676_v39 }
 0x75f   : > { %6121 = vrot.lane.b32.xlu0 %v12475_v11, %s17113_s17  ;;  %5685 = vrot.lane.b32.xlu1 %v12475_v11, %s17231_s27 }
 0x761   : > { %v12684_v25 = vpop.permute.xlu0 %5003  ;;  %v12686_v63 = vpop.permute.xlu1 %4797 }
 0x762   : > { %17554 = vst [vmem:[#allocation140_spill] sm:$0xff] %v12684_v25  ;;  %17555 = vst [vmem:[#allocation161_spill] sm:$0xff] %v12686_v63  ;;  %v13133_v63 = vld [vmem:[#allocation2 + $0x40] sm:$0xff] }
 0x763   : > { %6654 = vrot.lane.b32.xlu0 %v12475_v11, %s17540_s21  ;;  %6388 = vrot.lane.b32.xlu1 %v12475_v11, %s17111_s16 }
 0x765   : > { %v12692_v12 = vpop.permute.xlu0 %5229  ;;  %v12694_v44 = vpop.permute.xlu1 %6384 }
 0x766   : > { %17556 = vst [vmem:[#allocation124_spill] sm:$0xff] %v12692_v12  ;;  %17557 = vst [vmem:[#allocation199_spill] sm:$0xff] %v12694_v44 }
 0x767   : > { %6920 = vrot.lane.b32.xlu1 %v12475_v11, %s17107_s18  ;;  %4127 = vrot.lane.b32.xlu0 %v12696_v46, %s17111_s16 }
 0x769   : > { %v12702_v20 = vpop.permute.xlu0 %5455  ;;  %v12704_v59 = vpop.permute.xlu1 %4117 }
 0x76a   : > { %17558 = vst [vmem:[#allocation86_spill] sm:$0xff] %v12702_v20  ;;  %v12899_v20 = vld [vmem:[#allocation2 + $0xa8] sm:$0xff] }
 0x76b   : > { %4579 = vrot.lane.b32.xlu0 %v12696_v46, %s17107_s18  ;;  %3900 = vrot.lane.b32.xlu1 %v12696_v46, %s17113_s17 }
 0x76d   : > { %v12710_v31 = vpop.permute.xlu0 %5681  ;;  %v12712_v34 = vpop.permute.xlu1 %4569 }
 0x76e   : > { %17559 = vst [vmem:[#allocation106_spill] sm:$0xff] %v12710_v31  ;;  %17560 = vst [vmem:[#allocation176_spill] sm:$0xff] %v12712_v34 }
 0x76f   : > { %5011 = vrot.lane.b32.xlu0 %v12696_v46, %s17541_s25  ;;  %4353 = vrot.lane.b32.xlu1 %v12696_v46, %s17540_s21 }
 0x771   : > { %v12718_v15 = vpop.permute.xlu0 %6117  ;;  %v12720_v0 = vpop.permute.xlu1 %5001 }
 0x772   : > { %17561 = vst [vmem:[#allocation69_spill] sm:$0xff] %v12718_v15  ;;  %17562 = vst [vmem:[#allocation137_spill] sm:$0xff] %v12720_v0  ;;  %v12981_v0 = vld [vmem:[#allocation2 + $0xb8] sm:$0xff] }
 0x773   : > { %5689 = vrot.lane.b32.xlu0 %v12696_v46, %s17231_s27  ;;  %4805 = vrot.lane.b32.xlu1 %v12696_v46, %s17542_s28 }
 0x775   : > { %v12726_v1 = vpop.permute.xlu0 %6650  ;;  %v12728_v10 = vpop.permute.xlu1 %5227 }
 0x776   : > { %17563 = vst [vmem:[#allocation156_spill] sm:$0xff] %v12726_v1  ;;  %17564 = vst [vmem:[#allocation38_spill] sm:$0xff] %v12728_v10 }
 0x777   : > { %6125 = vrot.lane.b32.xlu0 %v12696_v46, %s17113_s17  ;;  %5237 = vrot.lane.b32.xlu1 %v12696_v46, %s17229_s22 }
 0x779   : > { %v12734_v33 = vpop.permute.xlu0 %6916  ;;  %v12736_v27 = vpop.permute.xlu1 %5453 }
 0x77a   : > { %17565 = vst [vmem:[#allocation53_spill] sm:$0xff] %v12734_v33  ;;  %17566 = vst [vmem:[#allocation120_spill] sm:$0xff] %v12736_v27 }
 0x77b   : > { %6658 = vrot.lane.b32.xlu0 %v12696_v46, %s17540_s21  ;;  %5463 = vrot.lane.b32.xlu1 %v12696_v46, %s17230_s24 }
 0x77d   : > { %v12742_v22 = vpop.permute.xlu0 %3890  ;;  %v12744_v62 = vpop.permute.xlu1 %5679 }
 0x77e   : > { %17567 = vst [vmem:[#allocation26_spill] sm:$0xff] %v12744_v62 }
 0x77f   : > { %7190 = vrot.lane.b32.xlu0 %v12696_v46, %s17542_s28  ;;  %6392 = vrot.lane.b32.xlu1 %v12696_v46, %s17111_s16 }
 0x781   : > { %v12750_v35 = vpop.permute.xlu0 %4343  ;;  %v12752_v30 = vpop.permute.xlu1 %6115 }
 0x782   : > { %17568 = vst [vmem:[#allocation90_spill] sm:$0xff] %v12752_v30 }
 0x783   : > { %4131 = vrot.lane.b32.xlu0 %v12754_v53, %s17111_s16  ;;  %6924 = vrot.lane.b32.xlu1 %v12696_v46, %s17107_s18 }
 0x785   : > { %v12760_v52 = vpop.permute.xlu0 %4795  ;;  %v12762_v41 = vpop.permute.xlu1 %6648 }
 0x786   : > { %17569 = vst [vmem:[#allocation103_spill] sm:$0xff] %v12760_v52  ;;  %17570 = vst [vmem:[#allocation72_spill] sm:$0xff] %v12762_v41  ;;  %v3830_v41 = vld [vmem:[#allocation2 + $0xc0] sm:$0xf]  ;;  %v13125_v52 = vld [vmem:[#allocation2 + $0x38] sm:$0xff] }
 0x787   : > { %4583 = vrot.lane.b32.xlu0 %v12754_v53, %s17107_s18  ;;  %3904 = vrot.lane.b32.xlu1 %v12754_v53, %s17113_s17 }
 0x789   : > { %v12768_v54 = vpop.permute.xlu0 %6382  ;;  %v12770_v19 = vpop.permute.xlu1 %6914 }
 0x78a   : > { %17571 = vst [vmem:[#allocation35_spill] sm:$0xff] %v12768_v54  ;;  %17572 = vst [vmem:[#allocation54_spill] sm:$0xff] %v12770_v19 }
 0x78b   : > { %5015 = vrot.lane.b32.xlu0 %v12754_v53, %s17541_s25  ;;  %4357 = vrot.lane.b32.xlu1 %v12754_v53, %s17540_s21 }
 0x78d   : > { %v12776_v49 = vpop.permute.xlu0 %3894  ;;  %v12778_v33 = vpop.permute.xlu1 %4121 }
 0x78f   : > { %5241 = vrot.lane.b32.xlu0 %v12754_v53, %s17229_s22  ;;  %4809 = vrot.lane.b32.xlu1 %v12754_v53, %s17542_s28 }
 0x791   : > { %v12784_v40 = vpop.permute.xlu0 %4347  ;;  %v12786_v9 = vpop.permute.xlu1 %4573 }
 0x792   : > { %17573 = vst [vmem:[#allocation19_spill] sm:$0xff] %v12786_v9 }
 0x793   : > { %5467 = vrot.lane.b32.xlu0 %v12754_v53, %s17230_s24  ;;  %6396 = vrot.lane.b32.xlu1 %v12754_v53, %s17111_s16 }
 0x795   : > { %v12792_v19 = vpop.permute.xlu0 %4799  ;;  %v12794_v3 = vpop.permute.xlu1 %5005 }
 0x796   : > { %17574 = vst [vmem:[#allocation193_spill] sm:$0xff] %v12792_v19  ;;  %17575 = vst [vmem:[#allocation203_spill] sm:$0xff] %v12794_v3 }
 0x797   : > { %5693 = vrot.lane.b32.xlu0 %v12754_v53, %s17231_s27  ;;  %3912 = vrot.lane.b32.xlu1 %v3830_v41, %s17113_s17 }
 0x799   : > { %v12799_v1 = vpop.permute.xlu0 %5231  ;;  %v12801_v6 = vpop.permute.xlu1 %5457 }
 0x79a   : > { %17576 = vst [vmem:[#allocation165_spill] sm:$0xff] %v12799_v1  ;;  %17577 = vst [vmem:[#allocation202_spill] sm:$0xff] %v12801_v6 }
 0x79b   : > { %6129 = vrot.lane.b32.xlu0 %v12754_v53, %s17113_s17  ;;  %4129 = vrot.lane.b32.xlu1 %v12487_v7, %s17111_s16 }
 0x79d   : > { %v12807_v61 = vpop.permute.xlu0 %5683  ;;  %v12809_v54 = vpop.permute.xlu1 %6119 }
 0x79e   : > { %17578 = vst [vmem:[#allocation180_spill] sm:$0xff] %v12807_v61  ;;  %17579 = vst [vmem:[#allocation142_spill] sm:$0xff] %v12809_v54 }
 0x79f   : > { %6662 = vrot.lane.b32.xlu0 %v12754_v53, %s17540_s21  ;;  %4365 = vrot.lane.b32.xlu1 %v3830_v41, %s17540_s21 }
 0x7a1   : > { %v12814_v44 = vpop.permute.xlu0 %6386  ;;  %v12816_v23 = vpop.permute.xlu1 %6652 }
 0x7a2   : > { %17580 = vst [vmem:[#allocation167_spill] sm:$0xff] %v12814_v44  ;;  %17581 = vst [vmem:[#allocation121_spill] sm:$0xff] %v12816_v23 }
 0x7a3   : > { %6928 = vrot.lane.b32.xlu0 %v12754_v53, %s17107_s18  ;;  %4581 = vrot.lane.b32.xlu1 %v12487_v7, %s17107_s18 }
 0x7a5   : > { %v12822_v28 = vpop.permute.xlu0 %3898  ;;  %v12824_v30 = vpop.permute.xlu1 %6918 }
 0x7a6   : > { %17582 = vst [vmem:[#allocation87_spill] sm:$0xff] %v12824_v30 }
 0x7a7   : > { %7194 = vrot.lane.b32.xlu0 %v12754_v53, %s17542_s28  ;;  %4817 = vrot.lane.b32.xlu1 %v3830_v41, %s17542_s28 }
 0x7a9   : > { %v12829_v15 = vpop.permute.xlu0 %4351  ;;  %v12831_v44 = vpop.permute.xlu1 %4125 }
 0x7ab   : > { %3902 = vrot.lane.b32.xlu0 %v12487_v7, %s17113_s17  ;;  %5013 = vrot.lane.b32.xlu1 %v12487_v7, %s17541_s25 }
 0x7ad   : > { %v12837_v23 = vpop.permute.xlu0 %4803  ;;  %v12839_v54 = vpop.permute.xlu1 %4577 }
 0x7ae   : > { %17583 = vst [vmem:[#allocation108_spill] sm:$0xff] %v12837_v23  ;;  %17584 = vst [vmem:[#allocation74_spill] sm:$0xff] %v12839_v54  ;;  %v13153_v23 = vld [vmem:[#allocation2 + $0x30] sm:$0xff] }
 0x7af   : > { %4139 = vrot.lane.b32.xlu0 %v3830_v41, %s17111_s16  ;;  %5249 = vrot.lane.b32.xlu1 %v3830_v41, %s17229_s22 }
 0x7b1   : > { %v12843_v30 = vpop.permute.xlu0 %5461  ;;  %v12845_v50 = vpop.permute.xlu1 %5009 }
 0x7b2   : > { %17585 = vst [vmem:[#allocation40_spill] sm:$0xff] %v12843_v30  ;;  %17586 = vst [vmem:[#allocation55_spill] sm:$0xff] %v12845_v50 }
 0x7b3   : > { %4355 = vrot.lane.b32.xlu0 %v12487_v7, %s17540_s21  ;;  %5239 = vrot.lane.b32.xlu1 %v12487_v7, %s17229_s22 }
 0x7b5   : > { %v12851_v56 = vpop.permute.xlu0 %5687  ;;  %v12853_v16 = vpop.permute.xlu1 %5235 }
 0x7b6   : > { %17587 = vst [vmem:[#allocation20_spill] sm:$0xff] %v12851_v56  ;;  %17588 = vst [vmem:[#allocation122_spill] sm:$0xff] %v12853_v16 }
 0x7b7   : > { %4591 = vrot.lane.b32.xlu0 %v3830_v41, %s17107_s18  ;;  %5465 = vrot.lane.b32.xlu1 %v12487_v7, %s17230_s24 }
 0x7b9   : > { %v12858_v29 = vpop.permute.xlu0 %6390  ;;  %v12860_v62 = vpop.permute.xlu1 %6123 }
 0x7ba   : > { %17589 = vst [vmem:[#allocation197_spill] sm:$0xff] %v12858_v29  ;;  %17590 = vst [vmem:[#allocation154_spill] sm:$0xff] %v12860_v62 }
 0x7bb   : > { %4807 = vrot.lane.b32.xlu0 %v12487_v7, %s17542_s28  ;;  %5691 = vrot.lane.b32.xlu1 %v12487_v7, %s17231_s27 }
 0x7bd   : > { %v12866_v31 = vpop.permute.xlu0 %6922  ;;  %v12868_v61 = vpop.permute.xlu1 %6656 }
 0x7be   : > { %17591 = vst [vmem:[#allocation195_spill] sm:$0xff] %v12866_v31  ;;  %17592 = vst [vmem:[#allocation177_spill] sm:$0xff] %v12868_v61 }
 0x7bf   : > { %5023 = vrot.lane.b32.xlu0 %v3830_v41, %s17541_s25  ;;  %6127 = vrot.lane.b32.xlu1 %v12487_v7, %s17113_s17 }
 0x7c1   : > { %v12873_v56 = vpop.permute.xlu0 %4123  ;;  %v12875_v29 = vpop.permute.xlu1 %3896 }
 0x7c3   : > { %5475 = vrot.lane.b32.xlu0 %v3830_v41, %s17230_s24  ;;  %6660 = vrot.lane.b32.xlu1 %v12487_v7, %s17540_s21 }
 0x7c5   : > { %v12880_v62 = vpop.permute.xlu0 %4575  ;;  %v12882_v57 = vpop.permute.xlu1 %4349 }
 0x7c6   : > { %17593 = vst [vmem:[#allocation138_spill] sm:$0xff] %v12880_v62 }
 0x7c7   : > { %5701 = vrot.lane.b32.xlu0 %v3830_v41, %s17231_s27  ;;  %6926 = vrot.lane.b32.xlu1 %v12487_v7, %s17107_s18 }
 0x7c9   : > { %v12887_v31 = vpop.permute.xlu0 %5007  ;;  %v12889_v61 = vpop.permute.xlu1 %4801 }
 0x7ca   : > { %17594 = vst [vmem:[#allocation157_spill] sm:$0xff] %v12887_v31  ;;  %17595 = vst [vmem:[#allocation11_spill] sm:$0xff] %v12889_v61 }
 0x7cb   : > { %6394 = vrot.lane.b32.xlu0 %v12487_v7, %s17111_s16  ;;  %7192 = vrot.lane.b32.xlu1 %v12487_v7, %s17542_s28 }
 0x7cd   : > { %v12895_v21 = vpop.permute.xlu0 %5233  ;;  %v12897_v27 = vpop.permute.xlu1 %5459 }
 0x7ce   : > { %17596 = vst [vmem:[#allocation12_spill] sm:$0xff] %v12895_v21  ;;  %17597 = vst [vmem:[#allocation13_spill] sm:$0xff] %v12897_v27  ;;  %v3832_v21 = vld [vmem:[#allocation2 + $0xd0] sm:$0xf] }
 0x7cf   : > { %3906 = vrot.lane.b32.xlu0 %v12899_v20, %s17113_s17  ;;  %4133 = vrot.lane.b32.xlu1 %v12899_v20, %s17111_s16 }
 0x7d1   : > { %v12905_v41 = vpop.permute.xlu0 %6121  ;;  %v12907_v6 = vpop.permute.xlu1 %5685 }
 0x7d2   : > { %17598 = vst [vmem:[#allocation14_spill] sm:$0xff] %v12905_v41  ;;  %17599 = vst [vmem:[#allocation215_spill] sm:$0xff] %v12907_v6 }
 0x7d3   : > { %4359 = vrot.lane.b32.xlu0 %v12899_v20, %s17540_s21  ;;  %4585 = vrot.lane.b32.xlu1 %v12899_v20, %s17107_s18 }
 0x7d5   : > { %v12913_v30 = vpop.permute.xlu0 %6654  ;;  %v12915_v27 = vpop.permute.xlu1 %6388 }
 0x7d6   : > { %17600 = vst [vmem:[#allocation216_spill] sm:$0xff] %v12913_v30  ;;  %17601 = vst [vmem:[#allocation217_spill] sm:$0xff] %v12915_v27 }
 0x7d7   : > { %4811 = vrot.lane.b32.xlu0 %v12899_v20, %s17542_s28  ;;  %5017 = vrot.lane.b32.xlu1 %v12899_v20, %s17541_s25 }
 0x7d9   : > { %v12921_v13 = vpop.permute.xlu0 %4127  ;;  %v12923_v41 = vpop.permute.xlu1 %6920 }
 0x7da   : > { %17602 = vst [vmem:[#allocation218_spill] sm:$0xff] %v12923_v41 }
 0x7db   : > { %5243 = vrot.lane.b32.xlu0 %v12899_v20, %s17229_s22  ;;  %5469 = vrot.lane.b32.xlu1 %v12899_v20, %s17230_s24 }
 0x7dd   : > { %v12929_v6 = vpop.permute.xlu0 %4579  ;;  %v12931_v30 = vpop.permute.xlu1 %3900 }
 0x7de   : > { %17603 = vst [vmem:[#allocation219_spill] sm:$0xff] %v12929_v6  ;;  %v13115_v6 = vld [vmem:[#allocation2 + $0x48] sm:$0xff] }
 0x7df   : > { %5695 = vrot.lane.b32.xlu0 %v12899_v20, %s17231_s27  ;;  %6131 = vrot.lane.b32.xlu1 %v12899_v20, %s17113_s17 }
 0x7e1   : > { %v12937_v27 = vpop.permute.xlu0 %5011  ;;  %v12939_v37 = vpop.permute.xlu1 %4353 }
 0x7e2   : > { %17604 = vst [vmem:[#allocation220_spill] sm:$0xff] %v12937_v27 }
 0x7e3   : > { %6398 = vrot.lane.b32.xlu0 %v12899_v20, %s17111_s16  ;;  %6664 = vrot.lane.b32.xlu1 %v12899_v20, %s17540_s21 }
 0x7e5   : > { %v12945_v41 = vpop.permute.xlu0 %5689  ;;  %v12947_v10 = vpop.permute.xlu1 %4805 }
 0x7e6   : > { %17605 = vst [vmem:[#allocation221_spill] sm:$0xff] %v12945_v41  ;;  %17606 = vst [vmem:[#allocation222_spill] sm:$0xff] %v12947_v10  ;;  %v13163_v10 = vld [vmem:[#allocation2 + $0x20] sm:$0xff] }
 0x7e7   : > { %7196 = vrot.lane.b32.xlu0 %v12899_v20, %s17542_s28  ;;  %6930 = vrot.lane.b32.xlu1 %v12899_v20, %s17107_s18 }
 0x7e9   : > { %v12953_v12 = vpop.permute.xlu0 %6125  ;;  %v12955_v1 = vpop.permute.xlu1 %5237 }
 0x7ea   : > { %17607 = vst [vmem:[#allocation223_spill] sm:$0xff] %v12953_v12  ;;  %17608 = vst [vmem:[#allocation224_spill] sm:$0xff] %v12955_v1 }
 0x7eb   : > { %4143 = vrot.lane.b32.xlu0 %v3832_v21, %s17111_s16  ;;  %3916 = vrot.lane.b32.xlu1 %v3832_v21, %s17113_s17 }
 0x7ed   : > { %v12959_v16 = vpop.permute.xlu0 %6658  ;;  %v12961_v41 = vpop.permute.xlu1 %5463 }
 0x7ee   : > { %17609 = vst [vmem:[#allocation225_spill] sm:$0xff] %v12959_v16  ;;  %17610 = vst [vmem:[#allocation226_spill] sm:$0xff] %v12961_v41 }
 0x7ef   : > { %4595 = vrot.lane.b32.xlu0 %v3832_v21, %s17107_s18  ;;  %4369 = vrot.lane.b32.xlu1 %v3832_v21, %s17540_s21 }
 0x7f1   : > { %v12965_v4 = vpop.permute.xlu0 %7190  ;;  %v12967_v26 = vpop.permute.xlu1 %6392 }
 0x7f2   : > { %17611 = vst [vmem:[#allocation227_spill] sm:$0xff] %v12965_v4  ;;  %17612 = vst [vmem:[#allocation228_spill] sm:$0xff] %v12967_v26 }
 0x7f3   : > { %5027 = vrot.lane.b32.xlu0 %v3832_v21, %s17541_s25  ;;  %4821 = vrot.lane.b32.xlu1 %v3832_v21, %s17542_s28 }
 0x7f5   : > { %v12971_v12 = vpop.permute.xlu0 %4131  ;;  %v12973_v1 = vpop.permute.xlu1 %6924 }
 0x7f6   : > { %17613 = vst [vmem:[#allocation229_spill] sm:$0xff] %v12973_v1  ;;  %v3831_v1 = vld [vmem:[#allocation2 + $0xc8] sm:$0xf] }
 0x7f7   : > { %5253 = vrot.lane.b32.xlu0 %v3832_v21, %s17229_s22  ;;  %5479 = vrot.lane.b32.xlu1 %v3832_v21, %s17230_s24 }
 0x7f9   : > { %v12977_v16 = vpop.permute.xlu0 %4583  ;;  %v12979_v41 = vpop.permute.xlu1 %3904 }
 0x7fa   : > { %17614 = vst [vmem:[#allocation230_spill] sm:$0xff] %v12977_v16 }
 0x7fb   : > { %5705 = vrot.lane.b32.xlu0 %v3832_v21, %s17231_s27  ;;  %4137 = vrot.lane.b32.xlu1 %v12981_v0, %s17111_s16 }
 0x7fd   : > { %v12986_v4 = vpop.permute.xlu0 %5015  ;;  %v12988_v26 = vpop.permute.xlu1 %4357 }
 0x7fe   : > { %17615 = vst [vmem:[#allocation231_spill] sm:$0xff] %v12986_v4 }
 0x7ff   : > { %3910 = vrot.lane.b32.xlu0 %v12981_v0, %s17113_s17  ;;  %4141 = vrot.lane.b32.xlu1 %v3831_v1, %s17111_s16 }
 0x801   : > { %v12993_v25 = vpop.permute.xlu0 %5241  ;;  %v12995_v3 = vpop.permute.xlu1 %4809 }
 0x802   : > { %17616 = vst [vmem:[#allocation232_spill] sm:$0xff] %v12993_v25  ;;  %17617 = vst [vmem:[#allocation233_spill] sm:$0xff] %v12995_v3  ;;  %v13183_v3 = vld [vmem:[#allocation2 + $0x18] sm:$0xff] }
 0x803   : > { %3914 = vrot.lane.b32.xlu0 %v3831_v1, %s17113_s17  ;;  %4589 = vrot.lane.b32.xlu1 %v12981_v0, %s17107_s18  ;;  %17653 = vst [vmem:[#allocation269_spill] sm:$0xff] %v13183_v3 }
 0x805   : > { %v13000_v21 = vpop.permute.xlu0 %5467  ;;  %v13002_v31 = vpop.permute.xlu1 %6396 }
 0x806   : > { %17618 = vst [vmem:[#allocation234_spill] sm:$0xff] %v13000_v21  ;;  %17619 = vst [vmem:[#allocation235_spill] sm:$0xff] %v13002_v31 }
 0x807   : > { %4363 = vrot.lane.b32.xlu0 %v12981_v0, %s17540_s21  ;;  %4593 = vrot.lane.b32.xlu1 %v3831_v1, %s17107_s18 }
 0x809   : > { %v13007_v50 = vpop.permute.xlu0 %5693  ;;  %v13009_v27 = vpop.permute.xlu1 %3912 }
 0x80a   : > { %17620 = vst [vmem:[#allocation236_spill] sm:$0xff] %v13007_v50 }
 0x80b   : > { %4367 = vrot.lane.b32.xlu0 %v3831_v1, %s17540_s21  ;;  %5021 = vrot.lane.b32.xlu1 %v12981_v0, %s17541_s25 }
 0x80d   : > { %v13014_v25 = vpop.permute.xlu0 %6129  ;;  %v13016_v4 = vpop.permute.xlu1 %4129 }
 0x80e   : > { %17621 = vst [vmem:[#allocation237_spill] sm:$0xff] %v13014_v25 }
 0x80f   : > { %4815 = vrot.lane.b32.xlu0 %v12981_v0, %s17542_s28  ;;  %5025 = vrot.lane.b32.xlu1 %v3831_v1, %s17541_s25 }
 0x811   : > { %v13021_v31 = vpop.permute.xlu0 %6662  ;;  %v13023_v21 = vpop.permute.xlu1 %4365 }
 0x812   : > { %17622 = vst [vmem:[#allocation238_spill] sm:$0xff] %v13021_v31 }
 0x813   : > { %4819 = vrot.lane.b32.xlu0 %v3831_v1, %s17542_s28  ;;  %5251 = vrot.lane.b32.xlu1 %v3831_v1, %s17229_s22 }
 0x815   : > { %v13027_v50 = vpop.permute.xlu0 %6928  ;;  %v13029_v5 = vpop.permute.xlu1 %4581 }
 0x816   : > { %17623 = vst [vmem:[#allocation239_spill] sm:$0xff] %v13027_v50  ;;  %17624 = vst [vmem:[#allocation240_spill] sm:$0xff] %v13029_v5 }
 0x817   : > { %5477 = vrot.lane.b32.xlu0 %v3831_v1, %s17230_s24  ;;  %5247 = vrot.lane.b32.xlu1 %v12981_v0, %s17229_s22 }
 0x819   : > { %v13034_v25 = vpop.permute.xlu0 %7194  ;;  %v13036_v32 = vpop.permute.xlu1 %4817 }
 0x81a   : > { %17625 = vst [vmem:[#allocation241_spill] sm:$0xff] %v13034_v25  ;;  %17626 = vst [vmem:[#allocation242_spill] sm:$0xff] %v13036_v32  ;;  %v13205_v32 = vld [vmem:[#allocation2 + $0x10] sm:$0xff] }
 0x81b   : > { %5473 = vrot.lane.b32.xlu0 %v12981_v0, %s17230_s24  ;;  %5703 = vrot.lane.b32.xlu1 %v3831_v1, %s17231_s27  ;;  %17657 = vst [vmem:[#allocation273_spill] sm:$0xff] %v13205_v32 }
 0x81d   : > { %v13041_v31 = vpop.permute.xlu0 %3902  ;;  %v13043_v34 = vpop.permute.xlu1 %5013 }
 0x81e   : > { %17627 = vst [vmem:[#allocation243_spill] sm:$0xff] %v13043_v34 }
 0x81f   : > { %5699 = vrot.lane.b32.xlu0 %v12981_v0, %s17231_s27  ;;  %6135 = vrot.lane.b32.xlu1 %v12981_v0, %s17113_s17 }
 0x821   : > { %v13049_v50 = vpop.permute.xlu0 %4139  ;;  %v13051_v25 = vpop.permute.xlu1 %5249 }
 0x822   : > { %17628 = vst [vmem:[#allocation244_spill] sm:$0xff] %v13051_v25 }
 0x823   : > { %6402 = vrot.lane.b32.xlu0 %v12981_v0, %s17111_s16  ;;  %6668 = vrot.lane.b32.xlu1 %v12981_v0, %s17540_s21 }
 0x825   : > { %v13057_v1 = vpop.permute.xlu0 %4355  ;;  %v13059_v39 = vpop.permute.xlu1 %5239 }
 0x826   : > { %17629 = vst [vmem:[#allocation245_spill] sm:$0xff] %v13059_v39 }
 0x827   : > { %6934 = vrot.lane.b32.xlu0 %v12981_v0, %s17107_s18  ;;  %3908 = vrot.lane.b32.xlu1 %v12504_v58, %s17113_s17 }
 0x829   : > { %v13065_v34 = vpop.permute.xlu0 %4591  ;;  %v13067_v9 = vpop.permute.xlu1 %5465 }
 0x82a   : > { %17630 = vst [vmem:[#allocation246_spill] sm:$0xff] %v13065_v34  ;;  %17631 = vst [vmem:[#allocation247_spill] sm:$0xff] %v13067_v9  ;;  %v13087_v9 = vld [vmem:[#allocation2 + $0x50] sm:$0xff] }
 0x82b   : > { %7200 = vrot.lane.b32.xlu0 %v12981_v0, %s17542_s28  ;;  %7186 = vrot.lane.b32.xlu1 %v12475_v11, %s17542_s28 }
 0x82d   : > { %v13073_v25 = vpop.permute.xlu0 %4807  ;;  %v13075_v43 = vpop.permute.xlu1 %5691 }
 0x82e   : > { %17632 = vst [vmem:[#allocation248_spill] sm:$0xff] %v13073_v25  ;;  %17633 = vst [vmem:[#allocation249_spill] sm:$0xff] %v13075_v43  ;;  %v13171_v25 = vld [vmem:[#allocation2 + $0x28] sm:$0xff] }
 0x82f   : > { %7188 = vrot.lane.b32.xlu0 %v12602_v55, %s17542_s28  ;;  %6912 = vrot.lane.b32.xlu1 %v12479_v2, %s17107_s18 }
 0x831   : > { %v13081_v39 = vpop.permute.xlu0 %5023  ;;  %v13083_v62 = vpop.permute.xlu1 %6127 }
 0x832   : > { %17634 = vst [vmem:[#allocation250_spill] sm:$0xff] %v13081_v39  ;;  %17635 = vst [vmem:[#allocation251_spill] sm:$0xff] %v13083_v62 }
 0x833   : > { %7184 = vrot.lane.b32.xlu0 %v12576_v18, %s17542_s28  ;;  %6908 = vrot.lane.b32.xlu1 %v13087_v9, %s17107_s18 }
 0x835   : > { %v13091_v54 = vpop.permute.xlu0 %5475  ;;  %v13093_v43 = vpop.permute.xlu1 %6660 }
 0x836   : > { %17636 = vst [vmem:[#allocation252_spill] sm:$0xff] %v13091_v54  ;;  %17637 = vst [vmem:[#allocation253_spill] sm:$0xff] %v13093_v43 }
 0x837   : > { %6910 = vrot.lane.b32.xlu0 %v13095_v24, %s17107_s18  ;;  %4361 = vrot.lane.b32.xlu1 %v12504_v58, %s17540_s21 }
 0x839   : > { %v13101_v62 = vpop.permute.xlu0 %5701  ;;  %v13103_v39 = vpop.permute.xlu1 %6926 }
 0x83a   : > { %17638 = vst [vmem:[#allocation254_spill] sm:$0xff] %v13101_v62  ;;  %17639 = vst [vmem:[#allocation255_spill] sm:$0xff] %v13103_v39 }
 0x83b   : > { %4135 = vrot.lane.b32.xlu0 %v12504_v58, %s17111_s16  ;;  %7180 = vrot.lane.b32.xlu1 %v12538_v14, %s17542_s28 }
 0x83d   : > { %v13109_v54 = vpop.permute.xlu0 %6394  ;;  %v13111_v43 = vpop.permute.xlu1 %7192 }
 0x83e   : > { %17640 = vst [vmem:[#allocation256_spill] sm:$0xff] %v13109_v54  ;;  %17641 = vst [vmem:[#allocation257_spill] sm:$0xff] %v13111_v43 }
 0x83f   : > { %7182 = vrot.lane.b32.xlu0 %v12520_v45, %s17542_s28  ;;  %6906 = vrot.lane.b32.xlu1 %v13115_v6, %s17107_s18 }
 0x841   : > { %v13119_v62 = vpop.permute.xlu0 %3906  ;;  %v13121_v39 = vpop.permute.xlu1 %4133 }
 0x843   : > { %7178 = vrot.lane.b32.xlu0 %v12479_v2, %s17542_s28  ;;  %6902 = vrot.lane.b32.xlu1 %v13125_v52, %s17107_s18 }
 0x845   : > { %v13129_v43 = vpop.permute.xlu0 %4359  ;;  %v13131_v54 = vpop.permute.xlu1 %4585 }
 0x846   : > { %17642 = vst [vmem:[#allocation258_spill] sm:$0xff] %v13131_v54 }
 0x847   : > { %6904 = vrot.lane.b32.xlu0 %v13133_v63, %s17107_s18  ;;  %7174 = vrot.lane.b32.xlu1 %v13087_v9, %s17542_s28 }
 0x849   : > { %v13139_v5 = vpop.permute.xlu0 %4811  ;;  %v13141_v16 = vpop.permute.xlu1 %5017 }
 0x84a   : > { %17643 = vst [vmem:[#allocation259_spill] sm:$0xff] %v13139_v5  ;;  %17644 = vst [vmem:[#allocation260_spill] sm:$0xff] %v13141_v16 }
 0x84b   : > { %7176 = vrot.lane.b32.xlu0 %v13095_v24, %s17542_s28  ;;  %4813 = vrot.lane.b32.xlu1 %v12504_v58, %s17542_s28 }
 0x84d   : > { %v13147_v19 = vpop.permute.xlu0 %5243  ;;  %v13149_v61 = vpop.permute.xlu1 %5469 }
 0x84e   : > { %17645 = vst [vmem:[#allocation261_spill] sm:$0xff] %v13147_v19  ;;  %17646 = vst [vmem:[#allocation262_spill] sm:$0xff] %v13149_v61 }
 0x84f   : > { %4587 = vrot.lane.b32.xlu0 %v12504_v58, %s17107_s18  ;;  %6900 = vrot.lane.b32.xlu1 %v13153_v23, %s17107_s18 }
 0x851   : > { %v13157_v54 = vpop.permute.xlu0 %5695  ;;  %v13159_v16 = vpop.permute.xlu1 %6131 }
 0x852   : > { %17647 = vst [vmem:[#allocation263_spill] sm:$0xff] %v13157_v54  ;;  %17648 = vst [vmem:[#allocation264_spill] sm:$0xff] %v13159_v16 }
 0x853   : > { %7172 = vrot.lane.b32.xlu0 %v13115_v6, %s17542_s28  ;;  %6896 = vrot.lane.b32.xlu1 %v13163_v10, %s17107_s18 }
 0x855   : > { %v13167_v61 = vpop.permute.xlu0 %6398  ;;  %v13169_v19 = vpop.permute.xlu1 %6664 }
 0x856   : > { %17649 = vst [vmem:[#allocation265_spill] sm:$0xff] %v13167_v61  ;;  %17650 = vst [vmem:[#allocation266_spill] sm:$0xff] %v13169_v19 }
 0x857   : > { %6898 = vrot.lane.b32.xlu0 %v13171_v25, %s17107_s18  ;;  %7168 = vrot.lane.b32.xlu1 %v13125_v52, %s17542_s28 }
 0x859   : > { %v13177_v16 = vpop.permute.xlu0 %7196  ;;  %v13179_v54 = vpop.permute.xlu1 %6930 }
 0x85a   : > { %17651 = vst [vmem:[#allocation267_spill] sm:$0xff] %v13177_v16  ;;  %17652 = vst [vmem:[#allocation268_spill] sm:$0xff] %v13179_v54 }
 0x85b   : > { %7170 = vrot.lane.b32.xlu0 %v13133_v63, %s17542_s28  ;;  %6894 = vrot.lane.b32.xlu1 %v13183_v3, %s17107_s18 }
 0x85d   : > { %v4144_v19 = vpop.permute.xlu0 %4143  ;;  %v3917_v61 = vpop.permute.xlu1 %3916 }
 0x85f   : > { %7166 = vrot.lane.b32.xlu0 %v13153_v23, %s17542_s28  ;;  %7162 = vrot.lane.b32.xlu1 %v13163_v10, %s17542_s28 }
 0x861   : > { %v13191_v34 = vpop.permute.xlu0 %4595  ;;  %v13193_v16 = vpop.permute.xlu1 %4369 }
 0x862   : > { %17654 = vst [vmem:[#allocation270_spill] sm:$0xff] %v13191_v34 }
 0x863   : > { %5019 = vrot.lane.b32.xlu0 %v12504_v58, %s17541_s25  ;;  %7160 = vrot.lane.b32.xlu1 %v13183_v3, %s17542_s28 }
 0x865   : > { %v13199_v54 = vpop.permute.xlu0 %5027  ;;  %v13201_v5 = vpop.permute.xlu1 %4821 }
 0x866   : > { %17655 = vst [vmem:[#allocation271_spill] sm:$0xff] %v13199_v54  ;;  %17656 = vst [vmem:[#allocation272_spill] sm:$0xff] %v13201_v5  ;;  %v13221_v5 = vld [vmem:[#allocation2 + $0x8] sm:$0xff] }
 0x867   : > { %5245 = vrot.lane.b32.xlu0 %v12504_v58, %s17229_s22  ;;  %7158 = vrot.lane.b32.xlu1 %v13205_v32, %s17542_s28 }
 0x869   : > { %v13209_v34 = vpop.permute.xlu0 %5253  ;;  %v13211_v47 = vpop.permute.xlu1 %5479 }
 0x86a   : > { %17658 = vst [vmem:[#allocation274_spill] sm:$0xff] %v13209_v34  ;;  %17659 = vst [vmem:[#allocation275_spill] sm:$0xff] %v13211_v47 }
 0x86b   : > { %7164 = vrot.lane.b32.xlu0 %v13171_v25, %s17542_s28  ;;  %5471 = vrot.lane.b32.xlu1 %v12504_v58, %s17230_s24 }
 0x86d   : > { %v13217_v54 = vpop.permute.xlu0 %5705  ;;  %v13219_v3 = vpop.permute.xlu1 %4137 }
 0x86e   : > { %17660 = vst [vmem:[#allocation276_spill] sm:$0xff] %v13217_v54 }
 0x86f   : > { %7156 = vrot.lane.b32.xlu0 %v13221_v5, %s17542_s28  ;;  %5697 = vrot.lane.b32.xlu1 %v12504_v58, %s17231_s27 }
 0x871   : > { %v3911_v34 = vpop.permute.xlu0 %3910  ;;  %v4142_v47 = vpop.permute.xlu1 %4141 }
 0x872   : > { %v4161_v32 = vsel %vm701_vm8, %v13049_v50, %v4142_v47  ;;  %v4162_v36 = vsel %vm701_vm8, %v4142_v47, %v4144_v19 }
 0x873   : > { %7154 = vrot.lane.b32.xlu0 %v13230_v42, %s17542_s28  ;;  %7446 = vrot.lane.b32.xlu1 %v12981_v0, %s17541_s25 }
 0x874   : > { %9749 = vmatprep.subr.msk.mxu1 %vm568_vm5, %v4162_v36 }
 0x875   : > { %9750 = vmatpush1.msk.msra.mxu1 %vm568_vm5, %v4161_v32  ;;  %v3915_v58 = vpop.permute.xlu0 %3914  ;;  %v13238_v54 = vpop.permute.xlu1 %4589 }
 0x876   : > { %v3934_v50 = vsel %vm552_vm4, %v13009_v27, %v3915_v58  ;;  %v3935_v47 = vsel %vm552_vm4, %v3915_v58, %v3917_v61 }
 0x877   : > { %7442 = vrot.lane.b32.xlu0 %v12899_v20, %s17541_s25  ;;  %7440 = vrot.lane.b32.xlu1 %v12754_v53, %s17541_s25 }
 0x878   : > { %9739 = vmatprep.subr.msk.mxu0 %vm568_vm5, %v3935_v47 }
 0x879   : > { %9740 = vmatpush1.msk.msra.mxu0 %vm568_vm5, %v3934_v50  ;;  %v13249_v19 = vpop.permute.xlu0 %4363  ;;  %v13251_v36 = vpop.permute.xlu1 %4593 }
 0x87b   : > { %7438 = vrot.lane.b32.xlu0 %v12487_v7, %s17541_s25  ;;  %7712 = vrot.lane.b32.xlu1 %v12981_v0, %s17229_s22 }
 0x87d   : > { %v13257_v32 = vpop.permute.xlu0 %4367  ;;  %v13259_v61 = vpop.permute.xlu1 %5021 }
 0x87e   : > { %17662 = vst [vmem:[#allocation278_spill] sm:$0xff] %v13259_v61 }
 0x87f   : > { %7436 = vrot.lane.b32.xlu0 %v12696_v46, %s17541_s25  ;;  %7708 = vrot.lane.b32.xlu1 %v12899_v20, %s17229_s22 }
 0x881   : > { %v13265_v27 = vpop.permute.xlu0 %4815  ;;  %v13267_v58 = vpop.permute.xlu1 %5025 }
 0x883   : > { %7432 = vrot.lane.b32.xlu0 %v12475_v11, %s17541_s25  ;;  %7434 = vrot.lane.b32.xlu1 %v12602_v55, %s17541_s25 }
 0x885   : > { %v13273_v0 = vpop.permute.xlu0 %4819  ;;  %v13275_v50 = vpop.permute.xlu1 %5251 }
 0x887   : > { %7704 = vrot.lane.b32.xlu0 %v12487_v7, %s17229_s22  ;;  %7706 = vrot.lane.b32.xlu1 %v12754_v53, %s17229_s22 }
 0x889   : > { %v13281_v20 = vpop.permute.xlu0 %5477  ;;  %v13283_v47 = vpop.permute.xlu1 %5247 }
 0x88b   : > { %7430 = vrot.lane.b32.xlu0 %v12576_v18, %s17541_s25  ;;  %7702 = vrot.lane.b32.xlu1 %v12696_v46, %s17229_s22 }
 0x88d   : > { %v13289_v42 = vpop.permute.xlu0 %5473  ;;  %v13291_v61 = vpop.permute.xlu1 %5703 }
 0x88e   : > { %17663 = vst [vmem:[#allocation279_spill] sm:$0xff] %v13289_v42  ;;  %17664 = vst [vmem:[#allocation280_spill] sm:$0xff] %v13291_v61 }
 0x88f   : > { %7426 = vrot.lane.b32.xlu0 %v12538_v14, %s17541_s25  ;;  %7428 = vrot.lane.b32.xlu1 %v12520_v45, %s17541_s25 }
 0x891   : > { %v13297_v7 = vpop.permute.xlu0 %5699  ;;  %v13299_v53 = vpop.permute.xlu1 %6135 }
 0x892   : > { %17665 = vst [vmem:[#allocation281_spill] sm:$0xff] %v13297_v7  ;;  %17666 = vst [vmem:[#allocation282_spill] sm:$0xff] %v13299_v53 }
 0x893   : > { %7698 = vrot.lane.b32.xlu0 %v12475_v11, %s17229_s22  ;;  %7700 = vrot.lane.b32.xlu1 %v12602_v55, %s17229_s22 }
 0x895   : > { %v13305_v46 = vpop.permute.xlu0 %6402  ;;  %v13307_v42 = vpop.permute.xlu1 %6668 }
 0x896   : > { %17667 = vst [vmem:[#allocation283_spill] sm:$0xff] %v13305_v46  ;;  %17668 = vst [vmem:[#allocation284_spill] sm:$0xff] %v13307_v42 }
 0x897   : > { %7424 = vrot.lane.b32.xlu0 %v12479_v2, %s17541_s25  ;;  %7696 = vrot.lane.b32.xlu1 %v12576_v18, %s17229_s22  ;;  %v3931_v18 = vsel %vm552_vm4, %v13041_v31, %v12979_v41  ;;  %v3928_v41 = vsel %vm552_vm4, %v12776_v49, %v12875_v29 }
 0x899   : > { %v13313_v61 = vpop.permute.xlu0 %6934  ;;  %v3909_v7 = vpop.permute.xlu1 %3908 }
 0x89a   : > { %17669 = vst [vmem:[#allocation285_spill] sm:$0xff] %v13313_v61  ;;  %v3933_v53 = vsel %vm552_vm4, %v3909_v7, %v3911_v34  ;;  %v3932_v11 = vsel %vm552_vm4, %v13119_v62, %v3909_v7  ;;  %v3930_v34 = vsel %vm552_vm4, %v12931_v30, %v13041_v31  ;;  %v3929_v62 = vsel %vm552_vm4, %v12875_v29, %v12822_v28  ;;  %v17675_v29 = vld [vmem:[#allocation179_spill] sm:$0xff] }
 0x89b   : > { %7420 = vrot.lane.b32.xlu0 %v13087_v9, %s17541_s25  ;;  %7422 = vrot.lane.b32.xlu1 %v13095_v24, %s17541_s25  ;;  %v3927_v31 = vsel %vm552_vm4, %v12742_v22, %v12670_v48  ;;  %v3926_v28 = vsel %vm552_vm4, %v12622_v38, %v12742_v22  ;;  %v3924_v48 = vsel %vm552_vm4, %v17675_v29, %v12438_v51  ;;  %v17677_v38 = vld [vmem:[#allocation144_spill] sm:$0xff]  ;;  %v17678_v22 = vld [vmem:[#allocation169_spill] sm:$0xff] }
 0x89c   : > { %3985 = vmatprep.subr.mxu0 %v3933_v53  ;;  %v3923_v53 = vsel %vm552_vm4, %v17678_v22, %v17677_v38  ;;  %v17687_v38 = vld [vmem:[#allocation29_spill] sm:$0xff] }
 0x89d   : > { %3986 = vmatpush1.msra.mxu0 %v3932_v11  ;;  %v13322_v55 = vpop.permute.xlu0 %7200  ;;  %v13327_v61 = vpop.permute.xlu1 %7186 }
 0x89e   : > { %17670 = vst [vmem:[#allocation286_spill] sm:$0xff] %v13322_v55  ;;  %17671 = vst [vmem:[#allocation287_spill] sm:$0xff] %v13327_v61  ;;  %3987 = vmatprep.subr.mxu0 %v3931_v18  ;;  %v17680_v18 = vld [vmem:[#allocation126_spill] sm:$0xff] }
 0x89f   : > { %3988 = vmatpush1.msra.mxu0 %v3930_v34  ;;  %7692 = vrot.lane.b32.xlu0 %v12538_v14, %s17229_s22  ;;  %v3922_v34 = vsel %vm552_vm4, %v17680_v18, %v17678_v22  ;;  %v4388_v18 = vsel %vm849_vm6, %v13257_v32, %v13193_v16 }
 0x8a0   : > { %7694 = vrot.lane.b32.xlu1 %v12520_v45, %s17229_s22  ;;  %3989 = vmatprep.subr.mxu0 %v3929_v62  ;;  %v17674_v45 = vld [vmem:[#allocation204_spill] sm:$0xff] }
 0x8a1   : > { %3990 = vmatpush1.msra.mxu0 %v3928_v41  ;;  %v13342_v7 = vpop.permute.xlu0 %7188  ;;  %v13347_v14 = vpop.permute.xlu1 %6912  ;;  %v3925_v49 = vsel %vm552_vm4, %v12438_v51, %v17674_v45  ;;  %v17682_v51 = vld [vmem:[#allocation110_spill] sm:$0xff]  ;;  %v17683_v41 = vld [vmem:[#allocation71_spill] sm:$0xff] }
 0x8a2   : > { %17672 = vst [vmem:[#allocation288_spill] sm:$0xff] %v13342_v7  ;;  %17673 = vst [vmem:[#allocation289_spill] sm:$0xff] %v13347_v14  ;;  %3991 = vmatprep.subr.mxu0 %v3927_v31  ;;  %v3920_v31 = vsel %vm552_vm4, %v17683_v41, %v17682_v51  ;;  %v17685_v45 = vld [vmem:[#allocation42_spill] sm:$0xff] }
 0x8a3   : > { %3992 = vmatpush1.msra.mxu0 %v3926_v28  ;;  %7418 = vrot.lane.b32.xlu0 %v13115_v6, %s17541_s25  ;;  %v17958_v7 = vld [vmem:[#allocation22_spill] sm:$0xff] }
 0x8a4   : > { %7690 = vrot.lane.b32.xlu1 %v12479_v2, %s17229_s22  ;;  %3993 = vmatprep.subr.mxu0 %v3925_v49  ;;  %v17681_v2 = vld [vmem:[#allocation89_spill] sm:$0xff] }
 0x8a5   : > { %3994 = vmatpush1.msra.mxu0 %v3924_v48  ;;  %v13362_v30 = vpop.permute.xlu0 %7184  ;;  %v13367_v11 = vpop.permute.xlu1 %6908  ;;  %v3921_v62 = vsel %vm552_vm4, %v17682_v51, %v17681_v2  ;;  %v17686_v49 = vld [vmem:[#allocation57_spill] sm:$0xff] }
 0x8a6   : > { %17676 = vst [vmem:[#allocation204_spill] sm:$0xff] %v13362_v30  ;;  %17679 = vst [vmem:[#allocation179_spill] sm:$0xff] %v13367_v11  ;;  %3995 = vmatprep.subr.mxu0 %v3923_v53  ;;  %v3919_v29 = vsel %vm552_vm4, %v17686_v49, %v17685_v45  ;;  %v3918_v22 = vsel %vm552_vm4, %v17687_v38, %v17686_v49  ;;  %v3833_v53 = vld [vmem:[%s16949_s6] sm:$0xff]  ;;  %v17698_v45 = vld [vmem:[#allocation181_spill] sm:$0xff] }
 0x8a7   : > { %3996 = vmatpush1.msra.mxu0 %v3922_v34  ;;  %7414 = vrot.lane.b32.xlu0 %v13125_v52, %s17541_s25  ;;  %v4387_v34 = vsel %vm849_vm6, %v13023_v21, %v13257_v32 }
 0x8a8   : > { %7416 = vrot.lane.b32.xlu1 %v13133_v63, %s17541_s25  ;;  %3997 = vmatprep.subr.mxu0 %v3921_v62 }
 0x8a9   : > { %3998 = vmatpush1.msra.mxu0 %v3920_v31  ;;  %v13382_v28 = vpop.permute.xlu0 %6910  ;;  %v4362_v48 = vpop.permute.xlu1 %4361 }
 0x8aa   : > { %17684 = vst [vmem:[#allocation144_spill] sm:$0xff] %v13382_v28  ;;  %3999 = vmatprep.subr.mxu0 %v3919_v29  ;;  %v4385_v62 = vsel %vm849_vm6, %v13129_v43, %v4362_v48  ;;  %v4383_v43 = vsel %vm849_vm6, %v12939_v37, %v13057_v1  ;;  %v4157_v37 = vsel %vm701_vm8, %v12921_v13, %v13016_v4  ;;  %v17699_v29 = vld [vmem:[#allocation205_spill] sm:$0xff]  ;;  %v5394_v28 = vld [vmem:[#allocation3 + $0x6] ss:$8 sm:$0x3] }
 0x8ab   : > { %4000 = vmatpush1.msra.mxu0 %v3918_v22  ;;  %7686 = vrot.lane.b32.xlu0 %v13087_v9, %s17229_s22  ;;  %v4386_v9 = vsel %vm849_vm6, %v4362_v48, %v13249_v19  ;;  %v4379_v13 = vsel %vm849_vm6, %v12630_v17, %v12750_v35  ;;  %v17696_v17 = vld [vmem:[#allocation198_spill] sm:$0xff]  ;;  %v17700_v48 = vld [vmem:[#allocation104_spill] sm:$0xff]  ;;  %v17702_v22 = vld [vmem:[#allocation171_spill] sm:$0xff] }
 0x8ac   : > { %7688 = vrot.lane.b32.xlu1 %v13095_v24, %s17229_s22  ;;  %9759 = vmatprep.subr.msk.mxu0 %vm568_vm5, %v4388_v18  ;;  %v17689_v24 = vmov 0.0   ;;  %v4152_v38 = vsel %vm701_vm8, %v17700_v48, %v17699_v29  ;;  %v17703_v18 = vld [vmem:[#allocation182_spill] sm:$0xff]  ;;  %v17720_v29 = vld [vmem:[#allocation56_spill] sm:$0xff] }
 0x8ad   : > { %9741 = vmatmul.mubr.msk.f32.vlgmr.msra.gmra.mxu0 %vm3952_vm15, %v3833_v53  ;;  %v4136_v2 = vpop.permute.xlu0 %4135  ;;  %v13405_v51 = vpop.permute.xlu1 %7180 }
 0x8ae   : > { %17688 = vst [vmem:[#allocation169_spill] sm:$0xff] %v13405_v51  ;;  %9760 = vmatpush1.msk.msra.mxu0 %vm568_vm5, %v4387_v34  ;;  %v4160_v16 = vsel %vm701_vm8, %v4136_v2, %v13219_v3  ;;  %4039 = vmatprep.mubr.f32.mxu0 %v17689_v24  ;;  %v4159_v21 = vsel %vm701_vm8, %v13121_v39, %v4136_v2  ;;  %v3834_v39 = vld [vmem:[%s16949_s6 + $0x8] sm:$0xff] }
 0x8af   : > { %4437 = vmatprep.subr.mxu0 %v4386_v9  ;;  %7412 = vrot.lane.b32.xlu0 %v13153_v23, %s17541_s25  ;;  %v4384_v3 = vsel %vm849_vm6, %v13057_v1, %v12988_v26  ;;  %v4382_v26 = vsel %vm849_vm6, %v12882_v57, %v12829_v15  ;;  %v4381_v1 = vsel %vm849_vm6, %v12784_v40, %v12882_v57 }
 0x8b0   : > { %4438 = vmatpush1.msra.mxu0 %v4385_v62  ;;  %7684 = vrot.lane.b32.xlu1 %v13115_v6, %s17229_s22  ;;  %v4158_v6 = vsel %vm701_vm8, %v13016_v4, %v12971_v12  ;;  %v4156_v12 = vsel %vm701_vm8, %v12873_v56, %v12831_v44  ;;  %v4380_v4 = vsel %vm849_vm6, %v12750_v35, %v12678_v60  ;;  %v3835_v44 = vld [vmem:[%s16949_s6 + $0x10] sm:$0xff]  ;;  %v17706_v62 = vld [vmem:[#allocation139_spill] sm:$0xff] }
 0x8b1   : > { %4211 = vmatprep.subr.mxu1 %v4160_v16  ;;  %4439 = vmatprep.subr.mxu0 %v4384_v3  ;;  %v13427_v19 = vpop.permute.xlu0 %7182  ;;  %v13429_v32 = vpop.permute.xlu1 %6906  ;;  %v4155_v57 = vsel %vm701_vm8, %v12778_v33, %v12873_v56  ;;  %v4154_v60 = vsel %vm701_vm8, %v12704_v59, %v12668_v8  ;;  %v17694_v56 = vld [vmem:[#allocation206_spill] sm:$0xff]  ;;  %v17695_v33 = vld [vmem:[#allocation155_spill] sm:$0xff]  ;;  %v4153_v35 = vsel %vm701_vm8, %v17696_v17, %v12704_v59  ;;  %v13488_v8 = vld [vmem:[#allocation2 + $0xb0] sm:$0xff] }
 0x8b2   : > { %17690 = vst [vmem:[#allocation126_spill] sm:$0xff] %v13427_v19  ;;  %17691 = vst [vmem:[#allocation89_spill] sm:$0xff] %v13429_v32  ;;  %4212 = vmatpush1.msra.mxu1 %v4159_v21  ;;  %4440 = vmatpush1.msra.mxu0 %v4383_v43  ;;  %v4378_v41 = vsel %vm849_vm6, %v17695_v33, %v17694_v56  ;;  %v4377_v49 = vsel %vm849_vm6, %v17698_v45, %v17695_v33  ;;  %v17701_v59 = vld [vmem:[#allocation146_spill] sm:$0xff]  ;;  %v17708_v43 = vld [vmem:[#allocation91_spill] sm:$0xff] }
 0x8b3   : > { %4213 = vmatprep.subr.mxu1 %v4158_v6  ;;  %4441 = vmatprep.subr.mxu0 %v4382_v26  ;;  %v4376_v53 = vsel %vm849_vm6, %v17702_v22, %v17701_v59  ;;  %v4151_v34 = vsel %vm701_vm8, %v17703_v18, %v17700_v48  ;;  %v3836_v16 = vld [vmem:[%s16949_s6 + $0x18] sm:$0xff]  ;;  %v17710_v26 = vld [vmem:[#allocation123_spill] sm:$0xff] }
 0x8b4   : > { %9742 = vmatmul.mubr.msk.f32.gmra.mxu0 %vm3952_vm15, %v3834_v39  ;;  %4214 = vmatpush1.msra.mxu1 %v4157_v37  ;;  %v17707_v21 = vld [vmem:[#allocation158_spill] sm:$0xff]  ;;  %v17709_v39 = vld [vmem:[#allocation112_spill] sm:$0xff]  ;;  %v17716_v56 = vld [vmem:[#allocation59_spill] sm:$0xff] }
 0x8b5   : > { %4442 = vmatpush1.msra.mxu0 %v4381_v1  ;;  %7408 = vrot.lane.b32.xlu0 %v13163_v10, %s17541_s25  ;;  %v13452_v15 = vpop.permute.xlu0 %7178  ;;  %v13465_v40 = vpop.permute.xlu1 %6902  ;;  %v4150_v3 = vsel %vm701_vm8, %v17707_v21, %v17706_v62  ;;  %v4374_v6 = vsel %vm849_vm6, %v17709_v39, %v17708_v43  ;;  %v4149_v37 = vsel %vm701_vm8, %v17710_v26, %v17707_v21  ;;  %v9755_v59 = vld [vmem:[%s16949_s6 + $0x40] sm:$0xff]  ;;  %v17727_v26 = vld [vmem:[#allocation233_spill] sm:$0xff] }
 0x8b6   : > { %17692 = vst [vmem:[#allocation110_spill] sm:$0xff] %v13452_v15  ;;  %7410 = vrot.lane.b32.xlu1 %v13171_v25, %s17541_s25  ;;  %4215 = vmatprep.subr.mxu1 %v4156_v12  ;;  %17693 = vst [vmem:[#allocation71_spill] sm:$0xff] %v13465_v40  ;;  %v17712_v12 = vld [vmem:[#allocation73_spill] sm:$0xff]  ;;  %v17722_v18 = vld [vmem:[#allocation23_spill] sm:$0xff] }
 0x8b7   : > { %4443 = vmatprep.subr.mxu0 %v4380_v4  ;;  %4216 = vmatpush1.msra.mxu1 %v4155_v57  ;;  %v4373_v4 = vsel %vm849_vm6, %v17712_v12, %v17709_v39  ;;  %v17713_v57 = vld [vmem:[#allocation92_spill] sm:$0xff]  ;;  %v17954_v15 = vld [vmem:[#allocation21_spill] sm:$0xff] }
 0x8b8   : > { %4444 = vmatpush1.msra.mxu0 %v4379_v13  ;;  %4045 = vmatprep.mubr.f32.mxu0 %v17689_v24  ;;  %v17714_v13 = vld [vmem:[#allocation105_spill] sm:$0xff] }
 0x8b9   : > { %4217 = vmatprep.subr.mxu1 %v4154_v60  ;;  %4445 = vmatprep.subr.mxu0 %v4378_v41  ;;  %v13480_v31 = vpop.permute.xlu0 %6904  ;;  %v13504_v9 = vpop.permute.xlu1 %7174  ;;  %v17715_v60 = vld [vmem:[#allocation44_spill] sm:$0xff] }
 0x8ba   : > { %17697 = vst [vmem:[#allocation42_spill] sm:$0xff] %v13480_v31  ;;  %9743 = vmatmul.mubr.msk.f32.gmra.mxu0 %vm3952_vm15, %v3835_v44  ;;  %4218 = vmatpush1.msra.mxu1 %v4153_v35  ;;  %17705 = vst [vmem:[#allocation57_spill] sm:$0xff] %v13504_v9  ;;  %v4148_v44 = vsel %vm701_vm8, %v17714_v13, %v17713_v57  ;;  %v4372_v33 = vsel %vm849_vm6, %v17716_v56, %v17715_v60  ;;  %v17717_v41 = vld [vmem:[#allocation76_spill] sm:$0xff]  ;;  %v17718_v35 = vld [vmem:[#allocation27_spill] sm:$0xff] }
 0x8bb   : > { %4446 = vmatpush1.msra.mxu0 %v4377_v49  ;;  %7680 = vrot.lane.b32.xlu0 %v13125_v52, %s17229_s22  ;;  %v17704_v52 = vld [vmem:[#allocation128_spill] sm:$0xff]  ;;  %v4147_v17 = vsel %vm701_vm8, %v17717_v41, %v17714_v13  ;;  %v4371_v45 = vsel %vm849_vm6, %v17718_v35, %v17716_v56  ;;  %v17719_v49 = vld [vmem:[#allocation37_spill] sm:$0xff]  ;;  %v17729_v57 = vld [vmem:[#allocation222_spill] sm:$0xff] }
 0x8bc   : > { %6400 = vrot.lane.b32.xlu1 %v13488_v8, %s17111_s16  ;;  %4219 = vmatprep.subr.mxu1 %v4152_v38  ;;  %v4375_v2 = vsel %vm849_vm6, %v17704_v52, %v17702_v22  ;;  %v4146_v48 = vsel %vm701_vm8, %v17720_v29, %v17719_v49  ;;  %v17721_v22 = vld [vmem:[#allocation272_spill] sm:$0xff]  ;;  %v9745_v52 = vld [vmem:[%s16949_s6 + $0x20] sm:$0xff]  ;;  %v17731_v56 = vld [vmem:[#allocation258_spill] sm:$0xff]  ;;  %s18027_s16 = smov 121  }
 0x8bd   : > { %4447 = vmatprep.subr.mxu0 %v4376_v53  ;;  %4220 = vmatpush1.msra.mxu1 %v4151_v34  ;;  %v13519_v1 = vpop.permute.xlu0 %7176  ;;  %v4814_v38 = vpop.permute.xlu1 %4813  ;;  %v4840_v53 = vsel %vm17109_vm9, %v13273_v0, %v17721_v22  ;;  %v4145_v34 = vsel %vm701_vm8, %v17722_v18, %v17720_v29  ;;  %v9756_v60 = vld [vmem:[%s16949_s6 + $0x48] sm:$0xff]  ;;  %v17733_v41 = vld [vmem:[#allocation11_spill] sm:$0xff]  ;;  %v17734_v35 = vld [vmem:[#allocation193_spill] sm:$0xff] }
 0x8be   : > { %4448 = vmatpush1.msra.mxu0 %v4375_v2  ;;  %4051 = vmatprep.mubr.f32.mxu0 %v17689_v24  ;;  %17711 = vst [vmem:[#allocation29_spill] sm:$0xff] %v13519_v1  ;;  %v4838_v21 = vsel %vm17109_vm9, %v4814_v38, %v13265_v27  ;;  %v17736_v49 = vld [vmem:[#allocation240_spill] sm:$0xff]  ;;  %v17739_v22 = vld [vmem:[#allocation219_spill] sm:$0xff]  ;;  %v9747_v18 = vld [vmem:[%s16949_s6 + $0x30] sm:$0xff] }
 0x8bf   : > { %4221 = vmatprep.subr.mxu1 %v4150_v3  ;;  %4449 = vmatprep.subr.mxu0 %v4374_v6  ;;  %v17724_v3 = vld [vmem:[#allocation259_spill] sm:$0xff]  ;;  %v17726_v6 = vld [vmem:[#allocation246_spill] sm:$0xff] }
 0x8c0   : > { %9744 = vmatmul.mubr.msk.f32.gmra.mxu0 %vm3952_vm15, %v3836_v16  ;;  %4222 = vmatpush1.msra.mxu1 %v4149_v37  ;;  %v17723_v16 = vld [vmem:[#allocation242_spill] sm:$0xff]  ;;  %v4837_v43 = vsel %vm17109_vm9, %v17724_v3, %v4814_v38  ;;  %v4613_v27 = vsel %vm17110_vm10, %v17726_v6, %v13251_v36  ;;  %v17728_v37 = vld [vmem:[#allocation248_spill] sm:$0xff]  ;;  %v17738_v38 = vld [vmem:[#allocation103_spill] sm:$0xff] }
 0x8c1   : > { %4450 = vmatpush1.msra.mxu0 %v4373_v4  ;;  %6133 = vrot.lane.b32.xlu0 %v13488_v8, %s17113_s17  ;;  %v4588_v2 = vpop.permute.xlu0 %4587  ;;  %v4839_v62 = vsel %vm17109_vm9, %v17723_v16, %v13273_v0  ;;  %v17725_v0 = vld [vmem:[#allocation270_spill] sm:$0xff]  ;;  %v4836_v12 = vsel %vm17109_vm9, %v17728_v37, %v17727_v26  ;;  %v9746_v4 = vld [vmem:[%s16949_s6 + $0x28] sm:$0xff]  ;;  %v9757_v16 = vld [vmem:[%s16949_s6 + $0x50] sm:$0xff]  ;;  %s18028_s17 = smov 120  }
 0x8c2   : > { %6932 = vrot.lane.b32.xlu1 %v13488_v8, %s17107_s18  ;;  %4223 = vmatprep.subr.mxu1 %v4148_v44  ;;  %v4614_v39 = vsel %vm17110_vm10, %v13251_v36, %v17725_v0  ;;  %v4835_v36 = vsel %vm17109_vm9, %v17729_v57, %v17728_v37  ;;  %v4612_v13 = vsel %vm17110_vm10, %v4588_v2, %v13238_v54  ;;  %v17732_v54 = vld [vmem:[#allocation108_spill] sm:$0xff]  ;;  %v17744_v3 = vld [vmem:[#allocation138_spill] sm:$0xff]  ;;  %v17747_v6 = vld [vmem:[#allocation19_spill] sm:$0xff] }
 0x8c3   : > { %4451 = vmatprep.subr.mxu0 %v4372_v33  ;;  %4224 = vmatpush1.msra.mxu1 %v4147_v17  ;;  %v4611_v33 = vsel %vm17110_vm10, %v17731_v56, %v4588_v2  ;;  %v4834_v17 = vsel %vm17109_vm9, %v17733_v41, %v17732_v54  ;;  %v17745_v0 = vld [vmem:[#allocation208_spill] sm:$0xff]  ;;  %v17749_v37 = vld [vmem:[#allocation159_spill] sm:$0xff]  ;;  %v17754_v56 = vld [vmem:[#allocation70_spill] sm:$0xff] }
 0x8c4   : > { %4452 = vmatpush1.msra.mxu0 %v4371_v45  ;;  %4225 = vmatprep.subr.mxu1 %v4146_v48  ;;  %v4833_v45 = vsel %vm17109_vm9, %v17734_v35, %v17733_v41  ;;  %v17737_v48 = vld [vmem:[#allocation161_spill] sm:$0xff]  ;;  %v17751_v57 = vld [vmem:[#allocation148_spill] sm:$0xff]  ;;  %v9748_v54 = vld [vmem:[%s16949_s6 + $0x38] sm:$0xff] }
 0x8c5   : > { %4485 = vmatprep.mubr.f32.mxu0 %v17689_v24  ;;  %9779 = vmatprep.subr.msk.mxu0 %vm568_vm5, %v4840_v53  ;;  %v13592_v44 = vpop.permute.xlu0 %7172  ;;  %v4609_v53 = vsel %vm17110_vm10, %v17739_v22, %v17736_v49  ;;  %v17755_v41 = vld [vmem:[#allocation130_spill] sm:$0xff] }
 0x8c6   : > { %4226 = vmatpush1.msra.mxu1 %v4145_v34  ;;  %9761 = vmatmul.mubr.msk.f32.vlgmr.msra.gmra.mxu0 %vm3952_vm15, %v9755_v59  ;;  %17730 = vst [vmem:[#allocation206_spill] sm:$0xff] %v13592_v44  ;;  %v4832_v59 = vsel %vm17109_vm9, %v17738_v38, %v17737_v48  ;;  %v9758_v48 = vld [vmem:[%s16949_s6 + $0x58] sm:$0xff] }
 0x8c7   : > { %9780 = vmatpush1.msk.msra.mxu0 %vm568_vm5, %v4839_v62  ;;  %6666 = vrot.lane.b32.xlu0 %v13488_v8, %s17540_s21  ;;  %v13635_v62 = vpop.permute.xlu1 %6900  ;;  %v17762_v22 = vld [vmem:[#allocation114_spill] sm:$0xff] }
 0x8c8   : > { %7198 = vrot.lane.b32.xlu1 %v13488_v8, %s17542_s28  ;;  %9751 = vmatmul.mubr.msk.f32.vlgmr.msra.gmra.mxu1 %vm3952_vm15, %v9745_v52  ;;  %v17741_v52 = vld [vmem:[#allocation52_spill] sm:$0xff]  ;;  %17742 = vst [vmem:[#allocation198_spill] sm:$0xff] %v13635_v62  ;;  %v4284_v44 = vld [vmem:[#allocation3 + $0x1] ss:$8 sm:$0x3] }
 0x8c9   : > { %9769 = vmatprep.subr.msk.mxu1 %vm568_vm5, %v4614_v39  ;;  %4889 = vmatprep.subr.mxu0 %v4838_v21  ;;  %v13624_v34 = vpop.permute.xlu0 %6898  ;;  %v4831_v2 = vsel %vm17109_vm9, %v17741_v52, %v17738_v38  ;;  %v17743_v21 = vld [vmem:[#allocation74_spill] sm:$0xff]  ;;  %v17760_v38 = vld [vmem:[#allocation273_spill] sm:$0xff]  ;;  %v4289_v51 = vrot.slane %v4284_v44, %v17954_v15  ;;  %v4293_v62 = vrot.slane %v4284_v44, %v17958_v7 }
 0x8ca   : > { %9770 = vmatpush1.msk.msra.mxu1 %vm568_vm5, %v4613_v27  ;;  %4890 = vmatpush1.msra.mxu0 %v4837_v43  ;;  %17740 = vst [vmem:[#allocation155_spill] sm:$0xff] %v13624_v34  ;;  %v4608_v43 = vsel %vm17110_vm10, %v17744_v3, %v17743_v21  ;;  %v4607_v27 = vsel %vm17110_vm10, %v17747_v6, %v17744_v3  ;;  %v17766_v3 = vld [vmem:[#allocation141_spill] sm:$0xff]  ;;  %v4058_v1 = vld [vmem:[#allocation3] ss:$8 sm:$0x3] }
 0x8cb   : > { %4891 = vmatprep.subr.mxu0 %v4836_v12  ;;  %4265 = vmatprep.mubr.f32.mxu1 %v17689_v24  ;;  %v17750_v12 = vld [vmem:[#allocation176_spill] sm:$0xff]  ;;  %v13672_v35 = vpop.permute.xlu1 %6896  ;;  %v5168_v31 = vld [vmem:[#allocation3 + $0x5] ss:$8 sm:$0x3]  ;;  %v4067_v14 = vrot.slane %v4058_v1, %v17958_v7 }
 0x8cc   : > { %4892 = vmatpush1.msra.mxu0 %v4835_v36  ;;  %7444 = vrot.lane.b32.xlu0 %v13488_v8, %s17541_s25  ;;  %v17752_v36 = vld [vmem:[#allocation173_spill] sm:$0xff]  ;;  %17756 = vst [vmem:[#allocation205_spill] sm:$0xff] %v13672_v35  ;;  %v14195_v42 = vrot.slane %v5168_v31, %v17954_v15  ;;  %v14198_v46 = vrot.slane %v5168_v31, %v17958_v7 }
 0x8cd   : > { %9752 = vmatmul.mubr.msk.f32.gmra.mxu1 %vm3952_vm15, %v9746_v4  ;;  %7682 = vrot.lane.b32.xlu1 %v13133_v63, %s17229_s22  ;;  %v17735_v63 = vld [vmem:[#allocation230_spill] sm:$0xff]  ;;  %v4606_v4 = vsel %vm17110_vm10, %v17750_v12, %v17749_v37 }
 0x8ce   : > { %4491 = vmatprep.mubr.f32.mxu0 %v17689_v24  ;;  %4663 = vmatprep.subr.mxu1 %v4612_v13  ;;  %v4610_v29 = vsel %vm17110_vm10, %v17736_v49, %v17735_v63  ;;  %v4828_v13 = vsel %vm17109_vm9, %v17752_v36, %v17751_v57  ;;  %v17758_v63 = vld [vmem:[#allocation207_spill] sm:$0xff]  ;;  %v17759_v49 = vld [vmem:[#allocation68_spill] sm:$0xff] }
 0x8cf   : > { %4893 = vmatprep.subr.mxu0 %v4834_v17  ;;  %9762 = vmatmul.mubr.msk.f32.gmra.mxu0 %vm3952_vm15, %v9756_v60  ;;  %v13660_v60 = vpop.permute.xlu0 %7170  ;;  %v4827_v17 = vsel %vm17109_vm9, %v17755_v41, %v17752_v36  ;;  %v17774_v57 = vld [vmem:[#allocation107_spill] sm:$0xff] }
 0x8d0   : > { %4664 = vmatpush1.msra.mxu1 %v4611_v33  ;;  %4894 = vmatpush1.msra.mxu0 %v4833_v45  ;;  %17753 = vst [vmem:[#allocation181_spill] sm:$0xff] %v13660_v60  ;;  %v4605_v33 = vsel %vm17110_vm10, %v17754_v56, %v17750_v12  ;;  %v17757_v45 = vld [vmem:[#allocation269_spill] sm:$0xff]  ;;  %v13710_v12 = vpop.permute.xlu1 %7168  ;;  %v17775_v56 = vld [vmem:[#allocation274_spill] sm:$0xff] }
 0x8d1   : > { %4665 = vmatprep.subr.mxu1 %v4610_v29  ;;  %4895 = vmatprep.subr.mxu0 %v4832_v59  ;;  %v4604_v29 = vsel %vm17110_vm10, %v17759_v49, %v17758_v63  ;;  %v17761_v59 = vld [vmem:[#allocation93_spill] sm:$0xff]  ;;  %17772 = vst [vmem:[#allocation146_spill] sm:$0xff] %v13710_v12  ;;  %v17779_v63 = vld [vmem:[#allocation58_spill] sm:$0xff] }
 0x8d2   : > { %4271 = vmatprep.mubr.f32.mxu1 %v17689_v24  ;;  %4666 = vmatpush1.msra.mxu1 %v4609_v53  ;;  %v4826_v53 = vsel %vm17109_vm9, %v17762_v22, %v17761_v59  ;;  %v17782_v59 = vld [vmem:[#allocation28_spill] sm:$0xff] }
 0x8d3   : > { %4896 = vmatpush1.msra.mxu0 %v4831_v2  ;;  %7710 = vrot.lane.b32.xlu0 %v13488_v8, %s17229_s22  ;;  %v17746_v8 = vld [vmem:[#allocation85_spill] sm:$0xff]  ;;  %v17764_v2 = vld [vmem:[#allocation75_spill] sm:$0xff]  ;;  %v13696_v21 = vpop.permute.xlu0 %7166 }
 0x8d4   : > { %9753 = vmatmul.mubr.msk.f32.gmra.mxu1 %vm3952_vm15, %v9747_v18  ;;  %7678 = vrot.lane.b32.xlu1 %v13153_v23, %s17229_s22  ;;  %v4830_v39 = vsel %vm17109_vm9, %v17746_v8, %v17745_v0  ;;  %v17748_v23 = vld [vmem:[#allocation183_spill] sm:$0xff]  ;;  %v17763_v18 = vld [vmem:[#allocation184_spill] sm:$0xff]  ;;  %17765 = vst [vmem:[#allocation104_spill] sm:$0xff] %v13696_v21 }
 0x8d5   : > { %4497 = vmatprep.mubr.f32.mxu0 %v17689_v24  ;;  %4667 = vmatprep.subr.mxu1 %v4608_v43  ;;  %v4829_v26 = vsel %vm17109_vm9, %v17748_v23, %v17746_v8  ;;  %v4603_v52 = vsel %vm17110_vm10, %v17763_v18, %v17759_v49  ;;  %v17767_v43 = vld [vmem:[#allocation160_spill] sm:$0xff]  ;;  %v17768_v8 = vld [vmem:[#allocation46_spill] sm:$0xff]  ;;  %v13744_v18 = vpop.permute.xlu1 %6894 }
 0x8d6   : > { %4897 = vmatprep.subr.mxu0 %v4830_v39  ;;  %9763 = vmatmul.mubr.msk.f32.gmra.mxu0 %vm3952_vm15, %v9757_v16  ;;  %v4825_v16 = vsel %vm17109_vm9, %v17764_v2, %v17762_v22  ;;  %v4602_v0 = vsel %vm17110_vm10, %v17767_v43, %v17766_v3  ;;  %v17769_v39 = vld [vmem:[#allocation61_spill] sm:$0xff]  ;;  %v4597_v22 = vsel %vm17110_vm10, %v17782_v59, %v17779_v63  ;;  %v17786_v2 = vld [vmem:[#allocation278_spill] sm:$0xff] }
 0x8d7   : > { %4668 = vmatpush1.msra.mxu1 %v4607_v27  ;;  %4898 = vmatpush1.msra.mxu0 %v4829_v26  ;;  %v4824_v6 = vsel %vm17109_vm9, %v17769_v39, %v17768_v8  ;;  %v17770_v27 = vld [vmem:[#allocation125_spill] sm:$0xff]  ;;  %v17771_v26 = vld [vmem:[#allocation7_spill] sm:$0xff]  ;;  %17783 = vst [vmem:[#allocation171_spill] sm:$0xff] %v13744_v18  ;;  %v17788_v3 = vld [vmem:[#allocation250_spill] sm:$0xff] }
 0x8d8   : > { %4669 = vmatprep.subr.mxu1 %v4606_v4  ;;  %4899 = vmatprep.subr.mxu0 %v4828_v13  ;;  %v4601_v23 = vsel %vm17110_vm10, %v17770_v27, %v17767_v43  ;;  %v4823_v37 = vsel %vm17109_vm9, %v17771_v26, %v17769_v39  ;;  %v17773_v4 = vld [vmem:[#allocation94_spill] sm:$0xff]  ;;  %v9775_v13 = vld [vmem:[%s16949_s6 + $0x80] sm:$0xff]  ;;  %vm17791_vm9 = vmmov %vm17785_vm11 }
 0x8d9   : > { %4277 = vmatprep.mubr.f32.mxu1 %v17689_v24  ;;  %4670 = vmatpush1.msra.mxu1 %v4605_v33  ;;  %v4600_v36 = vsel %vm17110_vm10, %v17774_v57, %v17773_v4  ;;  %v5272_v33 = vsel %vm17776_vm12, %v13275_v50, %v17775_v56  ;;  %vm17787_vm12 = vmmov %vm17785_vm11  ;;  %v17794_v27 = vld [vmem:[#allocation243_spill] sm:$0xff]  ;;  %v13777_v26 = vpop.permute.xlu1 %7162  ;;  %v17812_v59 = vld [vmem:[#allocation34_spill] sm:$0xff] }
 0x8da   : > { %4900 = vmatpush1.msra.mxu0 %v4827_v17  ;;  %7406 = vrot.lane.b32.xlu0 %v17757_v45, %s17541_s25  ;;  %v17778_v17 = vld [vmem:[#allocation39_spill] sm:$0xff]  ;;  %17795 = vst [vmem:[#allocation182_spill] sm:$0xff] %v13777_v26 }
 0x8db   : > { %9754 = vmatmul.mubr.msk.f32.gmra.mxu1 %vm3952_vm15, %v9748_v54  ;;  %4671 = vmatprep.subr.mxu1 %v4604_v29  ;;  %v17777_v54 = vld [vmem:[#allocation78_spill] sm:$0xff]  ;;  %v4598_v49 = vsel %vm17110_vm10, %v17779_v63, %v17778_v17  ;;  %v5020_v29 = vpop.permute.xlu0 %5019 }
 0x8dc   : > { %7404 = vrot.lane.b32.xlu1 %v17760_v38, %s17541_s25  ;;  %4503 = vmatprep.mubr.f32.mxu0 %v17689_v24  ;;  %v4599_v41 = vsel %vm17110_vm10, %v17777_v54, %v17774_v57  ;;  %v9767_v57 = vld [vmem:[%s16949_s6 + $0x70] sm:$0xff]  ;;  %v4510_v18 = vld [vmem:[#allocation3 + $0x2] ss:$8 sm:$0x3] }
 0x8dd   : > { %4901 = vmatprep.subr.mxu0 %v4826_v53  ;;  %9764 = vmatmul.mubr.msk.f32.gmra.mxu0 %vm3952_vm15, %v9758_v48  ;;  %v9765_v53 = vld [vmem:[%s16949_s6 + $0x60] sm:$0xff]  ;;  %v4515_v40 = vrot.slane %v4510_v18, %v17954_v15 }
 0x8de   : > { %4672 = vmatpush1.msra.mxu1 %v4603_v52  ;;  %4902 = vmatpush1.msra.mxu0 %v4825_v16  ;;  %v5044_v16 = vsel %vm17787_vm12, %v5020_v29, %v17786_v2  ;;  %vm17798_vm12 = vcmask 859136  }
 0x8df   : > { %4673 = vmatprep.subr.mxu1 %v4602_v0  ;;  %4903 = vmatprep.subr.mxu0 %v4824_v6  ;;  %v17790_v0 = vld [vmem:[#allocation260_spill] sm:$0xff]  ;;  %v5246_v39 = vpop.permute.xlu0 %5245  ;;  %v17793_v6 = vld [vmem:[#allocation231_spill] sm:$0xff] }
 0x8e0   : > { %4674 = vmatpush1.msra.mxu1 %v4601_v23  ;;  %4904 = vmatpush1.msra.mxu0 %v4823_v37  ;;  %v5043_v8 = vsel %vm17791_vm9, %v17790_v0, %v5020_v29  ;;  %v5042_v23 = vsel %vm17791_vm9, %v17794_v27, %v17793_v6  ;;  %v17796_v37 = vld [vmem:[#allocation220_spill] sm:$0xff]  ;;  %v17809_v29 = vld [vmem:[#allocation245_spill] sm:$0xff]  ;;  %v17819_v0 = vld [vmem:[#allocation122_spill] sm:$0xff] }
 0x8e1   : > { %7402 = vrot.lane.b32.xlu0 %v13221_v5, %s17541_s25  ;;  %4675 = vmatprep.subr.mxu1 %v4600_v36  ;;  %v5270_v36 = vsel %vm17798_vm12, %v5246_v39, %v13283_v47  ;;  %v17805_v47 = vld [vmem:[#allocation140_spill] sm:$0xff] }
 0x8e2   : > { %7676 = vrot.lane.b32.xlu1 %v13171_v25, %s17229_s22  ;;  %4937 = vmatprep.mubr.f32.mxu0 %v17689_v24  ;;  %v17780_v25 = vld [vmem:[#allocation244_spill] sm:$0xff] }
 0x8e3   : > { %9799 = vmatprep.subr.msk.mxu0 %vm568_vm5, %v5272_v33  ;;  %4676 = vmatpush1.msra.mxu1 %v4599_v41  ;;  %v5271_v48 = vsel %vm17781_vm14, %v17780_v25, %v13275_v50  ;;  %v17784_v50 = vld [vmem:[#allocation271_spill] sm:$0xff]  ;;  %vm17789_vm14 = vmmov %vm17785_vm11  ;;  %v17802_v33 = vld [vmem:[#allocation261_spill] sm:$0xff] }
 0x8e4   : > { %9781 = vmatmul.mubr.msk.f32.vlgmr.msra.gmra.mxu0 %vm3952_vm15, %v9775_v13  ;;  %4677 = vmatprep.subr.mxu1 %v4598_v49  ;;  %v5046_v52 = vsel %vm17785_vm11, %v13267_v58, %v17784_v50  ;;  %v5045_v43 = vsel %vm17789_vm14, %v17788_v3, %v13267_v58  ;;  %v17792_v58 = vld [vmem:[#allocation277_spill] sm:$0xff]  ;;  %vm17797_vm11 = vmmov %vm17791_vm9  ;;  %v17804_v41 = vld [vmem:[#allocation203_spill] sm:$0xff] }
 0x8e5   : > { %9800 = vmatpush1.msk.msra.mxu0 %vm568_vm5, %v5271_v48  ;;  %4678 = vmatpush1.msra.mxu1 %v4597_v22  ;;  %v5041_v4 = vsel %vm17797_vm11, %v17796_v37, %v17794_v27  ;;  %v17800_v13 = vld [vmem:[#allocation157_spill] sm:$0xff]  ;;  %vm17801_vm14 = vmmov %vm17791_vm9  ;;  %v17808_v49 = vld [vmem:[#allocation232_spill] sm:$0xff]  ;;  %v13809_v48 = vpop.permute.xlu1 %7160 }
 0x8e6   : > { %4711 = vmatprep.mubr.f32.mxu1 %v17689_v24  ;;  %7674 = vrot.lane.b32.xlu0 %v13163_v10, %s17229_s22  ;;  %v9766_v10 = vld [vmem:[%s16949_s6 + $0x68] sm:$0xff]  ;;  %vm17803_vm9 = vmmov %vm17798_vm12  ;;  %v5039_v17 = vsel %vm17797_vm11, %v17804_v41, %v17800_v13  ;;  %17811 = vst [vmem:[#allocation128_spill] sm:$0xff] %v13809_v48  ;;  %v9777_v50 = vld [vmem:[%s16949_s6 + $0x90] sm:$0xff] }
 0x8e7   : > { %9771 = vmatmul.mubr.msk.f32.vlgmr.msra.gmra.mxu1 %vm3952_vm15, %v9765_v53  ;;  %9789 = vmatprep.subr.msk.mxu1 %vm568_vm5, %v5046_v52  ;;  %v5269_v54 = vsel %vm17803_vm9, %v17802_v33, %v5246_v39  ;;  %vm17807_vm12 = vmmov %vm17797_vm11  ;;  %v9768_v53 = vld [vmem:[%s16949_s6 + $0x78] sm:$0xff]  ;;  %v17814_v52 = vld [vmem:[#allocation224_spill] sm:$0xff] }
 0x8e8   : > { %7672 = vrot.lane.b32.xlu1 %v17757_v45, %s17229_s22  ;;  %9790 = vmatpush1.msk.msra.mxu1 %vm568_vm5, %v5045_v43  ;;  %v9776_v45 = vld [vmem:[%s16949_s6 + $0x88] sm:$0xff]  ;;  %v17822_v39 = vld [vmem:[#allocation186_spill] sm:$0xff] }
 0x8e9   : > { %4717 = vmatprep.mubr.f32.mxu1 %v17689_v24  ;;  %5095 = vmatprep.subr.mxu1 %v5044_v16  ;;  %v17816_v16 = vld [vmem:[#allocation209_spill] sm:$0xff]  ;;  %v17817_v3 = vld [vmem:[#allocation136_spill] sm:$0xff]  ;;  %v9778_v33 = vld [vmem:[%s16949_s6 + $0x98] sm:$0xff] }
 0x8ea   : > { %7400 = vrot.lane.b32.xlu0 %v17792_v58, %s17541_s25  ;;  %5096 = vmatpush1.msra.mxu1 %v5043_v8  ;;  %v17820_v8 = vld [vmem:[#allocation12_spill] sm:$0xff] }
 0x8eb   : > { %9772 = vmatmul.mubr.msk.f32.gmra.mxu1 %vm3952_vm15, %v9766_v10  ;;  %5097 = vmatprep.subr.mxu1 %v5042_v23  ;;  %v17824_v23 = vld [vmem:[#allocation143_spill] sm:$0xff] }
 0x8ec   : > { %7670 = vrot.lane.b32.xlu1 %v17760_v38, %s17229_s22  ;;  %4723 = vmatprep.mubr.f32.mxu1 %v17689_v24  ;;  %v17799_v38 = vld [vmem:[#allocation55_spill] sm:$0xff] }
 0x8ed   : > { %4943 = vmatprep.mubr.f32.mxu0 %v17689_v24  ;;  %5098 = vmatpush1.msra.mxu1 %v5041_v4  ;;  %v5040_v56 = vsel %vm17801_vm14, %v17800_v13, %v17799_v38  ;;  %vm17810_vm14 = vmmov %vm17803_vm9  ;;  %v17827_v4 = vld [vmem:[#allocation124_spill] sm:$0xff]  ;;  %v13847_v38 = vpop.permute.xlu1 %7158  ;;  %v17831_v13 = vld [vmem:[#allocation127_spill] sm:$0xff] }
 0x8ee   : > { %7668 = vrot.lane.b32.xlu0 %v13221_v5, %s17229_s22  ;;  %9782 = vmatmul.mubr.msk.f32.gmra.mxu0 %vm3952_vm15, %v9776_v45  ;;  %v17806_v5 = vld [vmem:[#allocation137_spill] sm:$0xff]  ;;  %v5268_v25 = vsel %vm17810_vm14, %v17809_v29, %v17808_v49  ;;  %vm17813_vm9 = vmmov %vm17797_vm11  ;;  %v17825_v45 = vld [vmem:[#allocation162_spill] sm:$0xff]  ;;  %17830 = vst [vmem:[#allocation139_spill] sm:$0xff] %v13847_v38 }
 0x8ef   : > { %9773 = vmatmul.mubr.msk.f32.gmra.mxu1 %vm3952_vm15, %v9767_v57  ;;  %5099 = vmatprep.subr.mxu1 %v5040_v56  ;;  %v5038_v63 = vsel %vm17807_vm12, %v17806_v5, %v17805_v47  ;;  %v5037_v22 = vsel %vm17813_vm9, %v17812_v59, %v17806_v5  ;;  %vm17815_vm11 = vmmov %vm17810_vm14  ;;  %v5035_v6 = vsel %vm17813_vm9, %v17822_v39, %v17817_v3  ;;  %v17828_v57 = vld [vmem:[#allocation38_spill] sm:$0xff]  ;;  %v17836_v47 = vld [vmem:[#allocation109_spill] sm:$0xff] }
 0x8f0   : > { %5321 = vmatprep.subr.mxu0 %v5270_v36  ;;  %5100 = vmatpush1.msra.mxu1 %v5039_v17  ;;  %v5267_v2 = vsel %vm17815_vm11, %v17814_v52, %v17809_v29  ;;  %vm17818_vm12 = vmmov %vm17813_vm9  ;;  %v17835_v17 = vld [vmem:[#allocation96_spill] sm:$0xff] }
 0x8f1   : > { %5322 = vmatpush1.msra.mxu0 %v5269_v54  ;;  %5101 = vmatprep.subr.mxu1 %v5038_v63  ;;  %v5036_v43 = vsel %vm17818_vm12, %v17817_v3, %v17816_v16  ;;  %vm17821_vm14 = vmmov %vm17815_vm11  ;;  %v17833_v54 = vld [vmem:[#allocation192_spill] sm:$0xff]  ;;  %v5032_v5 = vsel %vm17813_vm9, %v17836_v47, %v17835_v17  ;;  %v17837_v63 = vld [vmem:[#allocation211_spill] sm:$0xff]  ;;  %v5472_v39 = vpop.permute.xlu1 %5471 }
 0x8f2   : > { %5323 = vmatprep.subr.mxu0 %v5268_v25  ;;  %4729 = vmatprep.mubr.f32.mxu1 %v17689_v24  ;;  %v5266_v10 = vsel %vm17821_vm14, %v17820_v8, %v17819_v0  ;;  %vm17826_vm10 = vmmov %vm17813_vm9  ;;  %v17838_v49 = vld [vmem:[#allocation36_spill] sm:$0xff]  ;;  %v17847_v16 = vld [vmem:[#allocation145_spill] sm:$0xff] }
 0x8f3   : > { %4949 = vmatprep.mubr.f32.mxu0 %v17689_v24  ;;  %5102 = vmatpush1.msra.mxu1 %v5037_v22  ;;  %v5034_v37 = vsel %vm17826_vm10, %v17825_v45, %v17824_v23  ;;  %vm17829_vm12 = vmmov %vm17815_vm11  ;;  %v17840_v25 = vld [vmem:[#allocation80_spill] sm:$0xff]  ;;  %v17842_v22 = vld [vmem:[#allocation185_spill] sm:$0xff] }
 0x8f4   : > { %5324 = vmatpush1.msra.mxu0 %v5267_v2  ;;  %7666 = vrot.lane.b32.xlu0 %v17792_v58, %s17229_s22  ;;  %v17823_v58 = vld [vmem:[#allocation165_spill] sm:$0xff]  ;;  %v5264_v36 = vsel %vm17829_vm12, %v17828_v57, %v17827_v4  ;;  %vm17832_vm14 = vmmov %vm17813_vm9  ;;  %v17845_v52 = vld [vmem:[#allocation60_spill] sm:$0xff] }
 0x8f5   : > { %9774 = vmatmul.mubr.msk.f32.gmra.mxu1 %vm3952_vm15, %v9768_v53  ;;  %9783 = vmatmul.mubr.msk.f32.gmra.mxu0 %vm3952_vm15, %v9777_v50  ;;  %v5265_v27 = vsel %vm17815_vm11, %v17823_v58, %v17820_v8  ;;  %v5033_v56 = vsel %vm17832_vm14, %v17831_v13, %v17825_v45  ;;  %vm17834_vm10 = vmmov %vm17815_vm11  ;;  %v17844_v50 = vld [vmem:[#allocation41_spill] sm:$0xff]  ;;  %v17848_v3 = vld [vmem:[#allocation164_spill] sm:$0xff] }
 0x8f6   : > { %5103 = vmatprep.subr.mxu1 %v5036_v43  ;;  %5325 = vmatprep.subr.mxu0 %v5266_v10  ;;  %v5263_v41 = vsel %vm17834_vm10, %v17833_v54, %v17828_v57  ;;  %vm17839_vm11 = vmmov %vm17834_vm10  ;;  %v9785_v0 = vld [vmem:[%s16949_s6 + $0xa0] sm:$0xff]  ;;  %v17850_v8 = vld [vmem:[#allocation10_spill] sm:$0xff] }
 0x8f7   : > { %5104 = vmatpush1.msra.mxu1 %v5035_v6  ;;  %5326 = vmatpush1.msra.mxu0 %v5265_v27  ;;  %v5262_v29 = vsel %vm17839_vm11, %v17838_v49, %v17837_v63  ;;  %vm17841_vm12 = vmmov %vm17813_vm9  ;;  %v17852_v6 = vld [vmem:[#allocation132_spill] sm:$0xff]  ;;  %v17854_v27 = vld [vmem:[#allocation98_spill] sm:$0xff] }
 0x8f8   : > { %5105 = vmatprep.subr.mxu1 %v5034_v37  ;;  %5327 = vmatprep.subr.mxu0 %v5264_v36  ;;  %v5031_v59 = vsel %vm17841_vm12, %v17840_v25, %v17836_v47  ;;  %vm17843_vm14 = vmmov %vm17834_vm10  ;;  %v17855_v23 = vld [vmem:[#allocation111_spill] sm:$0xff]  ;;  %v17859_v57 = vld [vmem:[#allocation252_spill] sm:$0xff] }
 0x8f9   : > { %4955 = vmatprep.mubr.f32.mxu0 %v17689_v24  ;;  %5106 = vmatpush1.msra.mxu1 %v5033_v56  ;;  %v5261_v53 = vsel %vm17843_vm14, %v17842_v22, %v17838_v49  ;;  %vm17846_vm10 = vmmov %vm17813_vm9  ;;  %v17857_v37 = vld [vmem:[#allocation275_spill] sm:$0xff]  ;;  %v17861_v13 = vld [vmem:[#allocation77_spill] sm:$0xff] }
 0x8fa   : > { %5328 = vmatpush1.msra.mxu0 %v5263_v41  ;;  %5107 = vmatprep.subr.mxu1 %v5032_v5  ;;  %v5030_v2 = vsel %vm17846_vm10, %v17845_v52, %v17844_v50  ;;  %vm17849_vm9 = vmmov %vm17839_vm11  ;;  %v17864_v54 = vld [vmem:[#allocation63_spill] sm:$0xff]  ;;  %v9786_v63 = vld [vmem:[%s16949_s6 + $0xa8] sm:$0xff] }
 0x8fb   : > { %9784 = vmatmul.mubr.msk.f32.gmra.mxu0 %vm3952_vm15, %v9778_v33  ;;  %5329 = vmatprep.subr.mxu0 %v5262_v29  ;;  %v5260_v43 = vsel %vm17849_vm9, %v17848_v3, %v17847_v16  ;;  %vm17851_vm11 = vmmov %vm17846_vm10  ;;  %vm17858_vm10 = vcmask 850944   ;;  %v17863_v33 = vld [vmem:[#allocation48_spill] sm:$0xff]  ;;  %v17866_v17 = vld [vmem:[#allocation279_spill] sm:$0xff] }
 0x8fc   : > { %5108 = vmatpush1.msra.mxu1 %v5031_v59  ;;  %5330 = vmatpush1.msra.mxu0 %v5261_v53  ;;  %v5029_v10 = vsel %vm17851_vm11, %v17850_v8, %v17845_v52  ;;  %vm17853_vm12 = vmmov %vm17849_vm9  ;;  %v5498_v4 = vsel %vm17858_vm10, %v13281_v20, %v17857_v37  ;;  %v9795_v49 = vld [vmem:[%s16949_s6 + $0xc0] sm:$0xff]  ;;  %v17870_v29 = vld [vmem:[#allocation262_spill] sm:$0xff]  ;;  %v5698_v59 = vpop.permute.xlu1 %5697 }
 0x8fd   : > { %5109 = vmatprep.subr.mxu1 %v5030_v2  ;;  %5331 = vmatprep.subr.mxu0 %v5260_v43  ;;  %v5259_v58 = vsel %vm17853_vm12, %v17852_v6, %v17848_v3  ;;  %vm17856_vm14 = vmmov %vm17849_vm9  ;;  %v17871_v22 = vld [vmem:[#allocation234_spill] sm:$0xff]  ;;  %v17872_v53 = vld [vmem:[#allocation247_spill] sm:$0xff] }
 0x8fe   : > { %5110 = vmatpush1.msra.mxu1 %v5029_v10  ;;  %5143 = vmatprep.mubr.f32.mxu1 %v17689_v24  ;;  %v5258_v45 = vsel %vm17856_vm14, %v17855_v23, %v17854_v27  ;;  %vm17860_vm9 = vmmov %vm17858_vm10  ;;  %v17874_v52 = vld [vmem:[#allocation276_spill] sm:$0xff]  ;;  %v17877_v3 = vld [vmem:[#allocation254_spill] sm:$0xff] }
 0x8ff   : > { %5332 = vmatpush1.msra.mxu0 %v5259_v58  ;;  %9791 = vmatmul.mubr.msk.f32.vlgmr.msra.gmra.mxu1 %vm3952_vm15, %v9785_v0  ;;  %v5497_v36 = vsel %vm17860_vm9, %v17859_v57, %v13281_v20  ;;  %vm17862_vm11 = vmmov %vm17853_vm12  ;;  %v17868_v20 = vld [vmem:[#allocation8_spill] sm:$0xff]  ;;  %v5495_v25 = vsel %vm17860_vm9, %v17870_v29, %v5472_v39  ;;  %v17879_v0 = vld [vmem:[#allocation226_spill] sm:$0xff] }
 0x900   : > { %5333 = vmatprep.subr.mxu0 %v5258_v45  ;;  %9809 = vmatprep.subr.msk.mxu1 %vm568_vm5, %v5498_v4  ;;  %v5257_v56 = vsel %vm17862_vm11, %v17861_v13, %v17855_v23  ;;  %vm17865_vm12 = vmmov %vm17862_vm11  ;;  %v17875_v2 = vld [vmem:[#allocation280_spill] sm:$0xff]  ;;  %v17883_v58 = vld [vmem:[#allocation281_spill] sm:$0xff]  ;;  %v14176_v34 = vpop.permute.xlu1 %7446 }
 0x901   : > { %5334 = vmatpush1.msra.mxu0 %v5257_v56  ;;  %9810 = vmatpush1.msk.msra.mxu1 %vm568_vm5, %v5497_v36  ;;  %v5256_v41 = vsel %vm17865_vm12, %v17864_v54, %v17863_v33  ;;  %vm17867_vm14 = vmmov %vm17860_vm9  ;;  %vm17876_vm12 = vcmask 842752   ;;  %v17881_v10 = vld [vmem:[#allocation40_spill] sm:$0xff]  ;;  %v9787_v23 = vld [vmem:[%s16949_s6 + $0xb0] sm:$0xff]  ;;  %17956 = vst [vmem:[#allocation44_spill] sm:$0xff] %v14176_v34 }
 0x902   : > { %v5496_v47 = vsel %vm17867_vm14, %v5472_v39, %v17866_v17  ;;  %5335 = vmatprep.subr.mxu0 %v5256_v41  ;;  %vm17869_vm10 = vmmov %vm17862_vm11  ;;  %5149 = vmatprep.mubr.f32.mxu1 %v17689_v24  ;;  %v5724_v16 = vsel %vm17876_vm12, %v17875_v2, %v17874_v52  ;;  %v17882_v39 = vld [vmem:[#allocation13_spill] sm:$0xff]  ;;  %v9796_v45 = vld [vmem:[%s16949_s6 + $0xc8] sm:$0xff] }
 0x903   : > { %5547 = vmatprep.subr.mxu1 %v5496_v47  ;;  %v5255_v5 = vsel %vm17869_vm10, %v17868_v20, %v17864_v54  ;;  %5369 = vmatprep.mubr.f32.mxu0 %v17689_v24  ;;  %vm17873_vm11 = vmmov %vm17860_vm9  ;;  %v5492_v6 = vsel %vm17860_vm9, %v17882_v39, %v17881_v10  ;;  %v17885_v37 = vld [vmem:[#allocation202_spill] sm:$0xff]  ;;  %v17887_v57 = vld [vmem:[#allocation263_spill] sm:$0xff] }
 0x904   : > { %5336 = vmatpush1.msra.mxu0 %v5255_v5  ;;  %5548 = vmatpush1.msra.mxu1 %v5495_v25  ;;  %v5494_v50 = vsel %vm17873_vm11, %v17872_v53, %v17871_v22  ;;  %vm17878_vm14 = vmmov %vm17876_vm12  ;;  %v17889_v13 = vld [vmem:[#allocation86_spill] sm:$0xff]  ;;  %v17890_v56 = vld [vmem:[#allocation120_spill] sm:$0xff] }
 0x905   : > { %9792 = vmatmul.mubr.msk.f32.gmra.mxu1 %vm3952_vm15, %v9786_v63  ;;  %9801 = vmatmul.mubr.msk.f32.vlgmr.msra.gmra.mxu0 %vm3952_vm15, %v9795_v49  ;;  %v5723_v43 = vsel %vm17878_vm14, %v17877_v3, %v17875_v2  ;;  %vm17880_vm10 = vmmov %vm17860_vm9  ;;  %v17892_v54 = vld [vmem:[#allocation236_spill] sm:$0xff]  ;;  %v17893_v41 = vld [vmem:[#allocation249_spill] sm:$0xff] }
 0x906   : > { %5549 = vmatprep.subr.mxu1 %v5494_v50  ;;  %9819 = vmatprep.subr.msk.mxu0 %vm568_vm5, %v5724_v16  ;;  %v5493_v8 = vsel %vm17880_vm10, %v17879_v0, %v17872_v53  ;;  %vm17884_vm11 = vmmov %vm17876_vm12  ;;  %v17895_v47 = vld [vmem:[#allocation163_spill] sm:$0xff]  ;;  %v17897_v5 = vld [vmem:[#allocation221_spill] sm:$0xff] }
 0x907   : > { %5550 = vmatpush1.msra.mxu1 %v5493_v8  ;;  %9820 = vmatpush1.msk.msra.mxu0 %vm568_vm5, %v5723_v43  ;;  %v5722_v27 = vsel %vm17884_vm11, %v5698_v59, %v17883_v58  ;;  %vm17886_vm12 = vmmov %vm17860_vm9  ;;  %v17899_v49 = vld [vmem:[#allocation210_spill] sm:$0xff]  ;;  %v17900_v29 = vld [vmem:[#allocation196_spill] sm:$0xff] }
 0x908   : > { %5551 = vmatprep.subr.mxu1 %v5492_v6  ;;  %5773 = vmatprep.subr.mxu0 %v5722_v27  ;;  %v5491_v4 = vsel %vm17886_vm12, %v17885_v37, %v17882_v39  ;;  %vm17888_vm14 = vmmov %vm17884_vm11  ;;  %v17903_v22 = vld [vmem:[#allocation215_spill] sm:$0xff]  ;;  %v9788_v50 = vld [vmem:[%s16949_s6 + $0xb8] sm:$0xff] }
 0x909   : > { %5155 = vmatprep.mubr.f32.mxu1 %v17689_v24  ;;  %5375 = vmatprep.mubr.f32.mxu0 %v17689_v24  ;;  %v5721_v36 = vsel %vm17888_vm14, %v17887_v57, %v5698_v59  ;;  %vm17891_vm10 = vmmov %vm17860_vm9  ;;  %v17902_v59 = vld [vmem:[#allocation20_spill] sm:$0xff]  ;;  %v9797_v52 = vld [vmem:[%s16949_s6 + $0xd0] sm:$0xff] }
 0x90a   : > { %5552 = vmatpush1.msra.mxu1 %v5491_v4  ;;  %5774 = vmatpush1.msra.mxu0 %v5721_v36  ;;  %v5490_v33 = vsel %vm17891_vm10, %v17890_v56, %v17889_v13  ;;  %vm17894_vm9 = vmmov %vm17884_vm11  ;;  %v17905_v2 = vld [vmem:[#allocation188_spill] sm:$0xff]  ;;  %v17909_v0 = vld [vmem:[#allocation147_spill] sm:$0xff] }
 0x90b   : > { %9793 = vmatmul.mubr.msk.f32.gmra.mxu1 %vm3952_vm15, %v9787_v23  ;;  %9802 = vmatmul.mubr.msk.f32.gmra.mxu0 %vm3952_vm15, %v9796_v45  ;;  %v5720_v17 = vsel %vm17894_vm9, %v17893_v41, %v17892_v54  ;;  %vm17896_vm11 = vmmov %vm17891_vm10  ;;  %v17907_v3 = vld [vmem:[#allocation180_spill] sm:$0xff]  ;;  %v17910_v8 = vld [vmem:[#allocation166_spill] sm:$0xff] }
 0x90c   : > { %5553 = vmatprep.subr.mxu1 %v5490_v33  ;;  %5775 = vmatprep.subr.mxu0 %v5720_v17  ;;  %v5489_v20 = vsel %vm17896_vm11, %v17895_v47, %v17890_v56  ;;  %vm17898_vm12 = vmmov %vm17894_vm9  ;;  %v17912_v39 = vld [vmem:[#allocation106_spill] sm:$0xff]  ;;  %v17917_v45 = vld [vmem:[#allocation24_spill] sm:$0xff] }
 0x90d   : > { %v5719_v63 = vsel %vm17898_vm12, %v17897_v5, %v17893_v41  ;;  %5554 = vmatpush1.msra.mxu1 %v5489_v20  ;;  %vm17901_vm14 = vmmov %vm17891_vm10  ;;  %5161 = vmatprep.mubr.f32.mxu1 %v17689_v24  ;;  %v17913_v6 = vld [vmem:[#allocation26_spill] sm:$0xff]  ;;  %v17919_v4 = vld [vmem:[#allocation95_spill] sm:$0xff] }
 0x90e   : > { %5776 = vmatpush1.msra.mxu0 %v5719_v63  ;;  %v5488_v25 = vsel %vm17901_vm14, %v17900_v29, %v17899_v49  ;;  %vm17904_vm10 = vmmov %vm17894_vm9  ;;  %5381 = vmatprep.mubr.f32.mxu0 %v17689_v24  ;;  %v17915_v27 = vld [vmem:[#allocation134_spill] sm:$0xff]  ;;  %v17920_v57 = vld [vmem:[#allocation116_spill] sm:$0xff] }
 0x90f   : > { %v5718_v53 = vsel %vm17904_vm10, %v17903_v22, %v17902_v59  ;;  %5555 = vmatprep.subr.mxu1 %v5488_v25  ;;  %vm17906_vm9 = vmmov %vm17896_vm11  ;;  %9794 = vmatmul.mubr.msk.f32.gmra.mxu1 %vm3952_vm15, %v9788_v50  ;;  %v17922_v13 = vld [vmem:[#allocation212_spill] sm:$0xff]  ;;  %v17923_v56 = vld [vmem:[#allocation175_spill] sm:$0xff] }
 0x910   : > { %5777 = vmatprep.subr.mxu0 %v5718_v53  ;;  %v5487_v16 = vsel %vm17906_vm9, %v17905_v2, %v17900_v29  ;;  %vm17908_vm11 = vmmov %vm17904_vm10  ;;  %9803 = vmatmul.mubr.msk.f32.gmra.mxu0 %vm3952_vm15, %v9797_v52  ;;  %v17925_v54 = vld [vmem:[#allocation82_spill] sm:$0xff]  ;;  %v17927_v47 = vld [vmem:[#allocation187_spill] sm:$0xff] }
 0x911   : > { %v5717_v43 = vsel %vm17908_vm11, %v17907_v3, %v17903_v22  ;;  %5556 = vmatpush1.msra.mxu1 %v5487_v16  ;;  %vm17911_vm12 = vmmov %vm17906_vm9  ;;  %v9798_v17 = vld [vmem:[%s16949_s6 + $0xd8] sm:$0xff]  ;;  %5387 = vmatprep.mubr.f32.mxu0 %v17689_v24  ;;  %v17929_v5 = vld [vmem:[#allocation43_spill] sm:$0xff] }
 0x912   : > { %5778 = vmatpush1.msra.mxu0 %v5717_v43  ;;  %v5486_v10 = vsel %vm17911_vm12, %v17910_v8, %v17909_v0  ;;  %vm17914_vm14 = vmmov %vm17904_vm10  ;;  %v17930_v63 = vld [vmem:[#allocation62_spill] sm:$0xff]  ;;  %v17932_v29 = vld [vmem:[#allocation149_spill] sm:$0xff]  ;;  %5595 = vmatprep.mubr.f32.mxu1 %v17689_v24 }
 0x913   : > { %v5716_v58 = vsel %vm17914_vm14, %v17913_v6, %v17912_v39  ;;  %5557 = vmatprep.subr.mxu1 %v5486_v10  ;;  %vm17916_vm10 = vmmov %vm17906_vm9  ;;  %v17933_v25 = vld [vmem:[#allocation168_spill] sm:$0xff]  ;;  %v9805_v22 = vld [vmem:[%s16949_s6 + $0xe0] sm:$0xff] }
 0x914   : > { %5779 = vmatprep.subr.mxu0 %v5716_v58  ;;  %v5485_v23 = vsel %vm17916_vm10, %v17915_v27, %v17910_v8  ;;  %vm17918_vm9 = vmmov %vm17908_vm11  ;;  %9804 = vmatmul.mubr.msk.f32.gmra.mxu0 %vm3952_vm15, %v9798_v17  ;;  %v17935_v53 = vld [vmem:[#allocation30_spill] sm:$0xff]  ;;  %v17937_v52 = vld [vmem:[#allocation129_spill] sm:$0xff] }
 0x915   : > { %v5715_v37 = vsel %vm17918_vm9, %v17917_v45, %v17913_v6  ;;  %5558 = vmatpush1.msra.mxu1 %v5485_v23  ;;  %vm17921_vm11 = vmmov %vm17916_vm10  ;;  %v17939_v16 = vld [vmem:[#allocation97_spill] sm:$0xff]  ;;  %v17941_v0 = vld [vmem:[#allocation79_spill] sm:$0xff]  ;;  %5821 = vmatprep.mubr.f32.mxu0 %v17689_v24 }
 0x916   : > { %5780 = vmatpush1.msra.mxu0 %v5715_v37  ;;  %v5484_v36 = vsel %vm17921_vm11, %v17920_v57, %v17919_v4  ;;  %vm17924_vm12 = vmmov %vm17918_vm9  ;;  %v17940_v3 = vld [vmem:[#allocation117_spill] sm:$0xff]  ;;  %v9806_v10 = vld [vmem:[%s16949_s6 + $0xe8] sm:$0xff] }
 0x917   : > { %v5714_v33 = vsel %vm17924_vm12, %v17923_v56, %v17922_v13  ;;  %5559 = vmatprep.subr.mxu1 %v5484_v36  ;;  %vm17926_vm14 = vmmov %vm17916_vm10  ;;  %v17943_v39 = vld [vmem:[#allocation45_spill] sm:$0xff]  ;;  %v17944_v6 = vld [vmem:[#allocation64_spill] sm:$0xff] }
 0x918   : > { %5781 = vmatprep.subr.mxu0 %v5714_v33  ;;  %v5483_v41 = vsel %vm17926_vm14, %v17925_v54, %v17920_v57  ;;  %vm17928_vm10 = vmmov %vm17918_vm9  ;;  %v9815_v27 = vld [vmem:[%s16949_s6 + $0x100] sm:$0xff]  ;;  %v17946_v23 = vld [vmem:[#allocation32_spill] sm:$0xff] }
 0x919   : > { %5560 = vmatpush1.msra.mxu1 %v5483_v41  ;;  %v5713_v20 = vsel %vm17928_vm10, %v17927_v47, %v17923_v56  ;;  %vm17931_vm9 = vmmov %vm17921_vm11  ;;  %v5710_v43 = vsel %vm17928_vm10, %v17940_v3, %v17939_v16  ;;  %v9807_v37 = vld [vmem:[%s16949_s6 + $0xf0] sm:$0xff]  ;;  %v9816_v4 = vld [vmem:[%s16949_s6 + $0x108] sm:$0xff] }
 0x91a   : > { %v5482_v49 = vsel %vm17931_vm9, %v17930_v63, %v17929_v5  ;;  %5782 = vmatpush1.msra.mxu0 %v5713_v20  ;;  %vm17934_vm11 = vmmov %vm17928_vm10  ;;  %v9808_v57 = vld [vmem:[%s16949_s6 + $0xf8] sm:$0xff]  ;;  %v9817_v36 = vld [vmem:[%s16949_s6 + $0x110] sm:$0xff] }
 0x91b   : > { %5561 = vmatprep.subr.mxu1 %v5482_v49  ;;  %v5712_v59 = vsel %vm17934_vm11, %v17933_v25, %v17932_v29  ;;  %vm17936_vm12 = vmmov %vm17931_vm9  ;;  %v9818_v13 = vld [vmem:[%s16949_s6 + $0x118] sm:$0xff] }
 0x91c   : > { %5783 = vmatprep.subr.mxu0 %v5712_v59  ;;  %v5481_v50 = vsel %vm17936_vm12, %v17935_v53, %v17930_v63  ;;  %vm17938_vm14 = vmmov %vm17928_vm10 }
 0x91d   : > { %5562 = vmatpush1.msra.mxu1 %v5481_v50  ;;  %v5711_v2 = vsel %vm17938_vm14, %v17937_v52, %v17933_v25  ;;  %vm17942_vm9 = vmmov %vm17928_vm10 }
 0x91e   : > { %5784 = vmatpush1.msra.mxu0 %v5711_v2  ;;  %9811 = vmatmul.mubr.msk.f32.vlgmr.msra.gmra.mxu1 %vm3952_vm15, %v9805_v22  ;;  %v5709_v8 = vsel %vm17942_vm9, %v17941_v0, %v17940_v3  ;;  %vm17945_vm11 = vmmov %vm17942_vm9 }
 0x91f   : > { %5785 = vmatprep.subr.mxu0 %v5710_v43  ;;  %5601 = vmatprep.mubr.f32.mxu1 %v17689_v24  ;;  %v5708_v58 = vsel %vm17945_vm11, %v17944_v6, %v17943_v39  ;;  %vm17947_vm12 = vmmov %vm17942_vm9 }
 0x920   : > { %5786 = vmatpush1.msra.mxu0 %v5709_v8  ;;  %v5707_v45 = vsel %vm17947_vm12, %v17946_v23, %v17944_v6 }
 0x921   : > { %5787 = vmatprep.subr.mxu0 %v5708_v58 }
 0x922   : > { %5788 = vmatpush1.msra.mxu0 %v5707_v45  ;;  %9812 = vmatmul.mubr.msk.f32.gmra.mxu1 %vm3952_vm15, %v9806_v10  ;;  %v14140_v45 = vpop.permute.xlu0 %7164 }
 0x923   : > { %9821 = vmatmul.mubr.msk.f32.vlgmr.msra.gmra.mxu0 %vm3952_vm15, %v9815_v27  ;;  %5607 = vmatprep.mubr.f32.mxu1 %v17689_v24  ;;  %17948 = vst [vmem:[#allocation158_spill] sm:$0xff] %v14140_v45 }
 0x924   : > { %5827 = vmatprep.mubr.f32.mxu0 %v17689_v24 }
 0x926   : > { %9813 = vmatmul.mubr.msk.f32.gmra.mxu1 %vm3952_vm15, %v9807_v37 }
 0x927   : > { %9822 = vmatmul.mubr.msk.f32.gmra.mxu0 %vm3952_vm15, %v9816_v4  ;;  %5613 = vmatprep.mubr.f32.mxu1 %v17689_v24 }
 0x928   : > { %5833 = vmatprep.mubr.f32.mxu0 %v17689_v24 }
 0x92a   : > { %9814 = vmatmul.mubr.msk.f32.gmra.mxu1 %vm3952_vm15, %v9808_v57 }
 0x92b   : > { %9823 = vmatmul.mubr.msk.f32.gmra.mxu0 %vm3952_vm15, %v9817_v36  ;;  %6298 = vmatprep.mubr.f32.mxu1 %v17689_v24  ;;  %v14148_v36 = vpop.permute.xlu0 %7156 }
 0x92c   : > { %5839 = vmatprep.mubr.f32.mxu0 %v17689_v24  ;;  %17949 = vst [vmem:[#allocation91_spill] sm:$0xff] %v14148_v36 }
 0x92f   : > { %9824 = vmatmul.mubr.msk.f32.gmra.mxu0 %vm3952_vm15, %v9818_v13  ;;  %v14156_v26 = vpop.permute.xlu0 %7154 }
 0x930   : > { %6564 = vmatprep.mubr.f32.mxu0 %v17689_v24  ;;  %17950 = vst [vmem:[#allocation112_spill] sm:$0xff] %v14156_v26  ;;  %v4063_v26 = vrot.slane %v4058_v1, %v17954_v15  ;;  %v4519_v24 = vrot.slane %v4510_v18, %v17958_v7  ;;  %v14204_v1 = vrot.slane %v5394_v28, %v17958_v7 }
 0x932   : > { %17963 = vst [vmem:[#allocation272_spill] sm:$0xff] %v14204_v1 }
 0x933   : > { %v14164_v60 = vpop.permute.xlu0 %7442 }
 0x934   : > { %17952 = vst [vmem:[#allocation73_spill] sm:$0xff] %v14164_v60  ;;  %v4736_v60 = vld [vmem:[#allocation3 + $0x3] ss:$8 sm:$0x3] }
 0x935   : > { %v4741_v34 = vrot.slane %v4736_v60, %v17954_v15 }
 0x937   : > { %v14178_v30 = vpop.permute.xlu0 %7438 }
 0x938   : > { %17957 = vst [vmem:[#allocation59_spill] sm:$0xff] %v14178_v30  ;;  %v4745_v30 = vrot.slane %v4736_v60, %v17958_v7 }
 0x96d   : > { %v4035_v56 = vpop.f32.mrf.mxu0 }
 0x96e   : > { %v4070_v55 = vmul.f32 %v4063_v26, %v4035_v56 }
 0x96f   : > { %v14086_v33 = vpop.f32.mrf.mxu0 }
 0x970   : > { %v4071_v31 = vmul.f32 %v4067_v14, %v14086_v33 }
 0x974   : > { %v14088_v54 = vpop.f32.mrf.mxu0 }
 0x976   : > { %v14090_v41 = vpop.f32.mrf.mxu0 }
 0x97a   : > { %v14092_v17 = vpop.f32.mrf.mxu0 }
 0x97c   : > { %v14094_v47 = vpop.f32.mrf.mxu0 }
 0x980   : > { %v14096_v20 = vpop.f32.mrf.mxu0 }
 0x981   : > { %v4076_v33 = vmul.f32 %v4063_v26, %v14096_v20 }
 0x982   : > { %v14098_v5 = vpop.f32.mrf.mxu0 }
 0x986   : > { %v14100_v49 = vpop.f32.mrf.mxu0 }
 0x987   : > { %v4522_v60 = vmul.f32 %v4515_v40, %v14100_v49  ;;  %v4075_v49 = vmul.f32 %v4067_v14, %v14094_v47 }
 0x988   : > { %v4261_v63 = vpop.f32.mrf.mxu1  ;;  %v14104_v25 = vpop.f32.mrf.mxu0 }
 0x989   : > { %v4296_v61 = vmul.f32 %v4289_v51, %v4261_v63 }
 0x98a   : > { %v14102_v29 = vpop.f32.mrf.mxu1 }
 0x98b   : > { %v4304_v18 = vadd.f32 %v4296_v61, %v4070_v55  ;;  %v4297_v56 = vmul.f32 %v4293_v62, %v14102_v29  ;;  %v4073_v61 = vmul.f32 %v4067_v14, %v14090_v41  ;;  %v4074_v55 = vmul.f32 %v4063_v26, %v14092_v17 }
 0x98d   : > { %v14106_v59 = vpop.f32.mrf.mxu1  ;;  %v4530_v41 = vadd.f32 %v4522_v60, %v4304_v18 }
 0x98f   : > { %v14108_v22 = vpop.f32.mrf.mxu0  ;;  %v14110_v53 = vpop.f32.mrf.mxu1 }
 0x991   : > { %v14112_v50 = vpop.f32.mrf.mxu0 }
 0x994   : > { %v14114_v52 = vpop.f32.mrf.mxu1 }
 0x996   : > { %v14116_v2 = vpop.f32.mrf.mxu0  ;;  %v14118_v16 = vpop.f32.mrf.mxu1 }
 0x997   : > { %v4301_v29 = vmul.f32 %v4293_v62, %v14118_v16 }
 0x998   : > { %v14120_v3 = vpop.f32.mrf.mxu0 }
 0x999   : > { %v4527_v20 = vmul.f32 %v4519_v24, %v14120_v3 }
 0x99b   : > { %v14122_v43 = vpop.f32.mrf.mxu1 }
 0x99d   : > { %v14124_v0 = vpop.f32.mrf.mxu0  ;;  %v14126_v8 = vpop.f32.mrf.mxu1 }
 0x99e   : > { %v4303_v17 = vmul.f32 %v4293_v62, %v14126_v8 }
 0x99f   : > { %v14128_v10 = vpop.f32.mrf.mxu0 }
 0x9a4   : > { %v14132_v6 = vpop.f32.mrf.mxu0 }
 0x9a6   : > { %v14138_v23 = vpop.f32.mrf.mxu0 }
 0x9a7   : > { %v14130_v39 = vpop.f32.mrf.mxu1 }
 0x9a9   : > { %v14134_v58 = vpop.f32.mrf.mxu1 }
 0x9ab   : > { %v14136_v27 = vpop.f32.mrf.mxu1 }
 0x9ad   : > { %v14142_v37 = vpop.f32.mrf.mxu1 }
 0x9ae   : > { %v14144_v4 = vpop.f32.mrf.mxu0  ;;  %v4751_v3 = vmul.f32 %v4745_v30, %v14142_v37 }
 0x9af   : > { %v14146_v57 = vpop.f32.mrf.mxu1 }
 0x9b0   : > { %v14150_v13 = vpop.f32.mrf.mxu0  ;;  %v4752_v8 = vmul.f32 %v4741_v34, %v14146_v57 }
 0x9b1   : > { %v14152_v38 = vpop.f32.mrf.mxu1 }
 0x9b5   : > { %v14154_v48 = vpop.f32.mrf.mxu0  ;;  %v14158_v21 = vpop.f32.mrf.mxu1 }
 0x9b7   : > { %v14160_v12 = vpop.f32.mrf.mxu0  ;;  %v14162_v45 = vpop.f32.mrf.mxu1 }
 0x9b8   : > { %17951 = vst [vmem:[#allocation123_spill] sm:$0xff] %v14160_v12  ;;  %v14211_v12 = vpop.permute.xlu0 %7436 }
 0x9b9   : > { %17965 = vst [vmem:[#allocation242_spill] sm:$0xff] %v14211_v12  ;;  %v4305_v12 = vadd.f32 %v4297_v56, %v4071_v31  ;;  %v4753_v56 = vmul.f32 %v4745_v30, %v14152_v38  ;;  %v4755_v31 = vmul.f32 %v4745_v30, %v14162_v45 }
 0x9bb   : > { %v14166_v9 = vpop.f32.mrf.mxu0 }
 0x9bc   : > { %17953 = vst [vmem:[#allocation92_spill] sm:$0xff] %v14166_v9  ;;  %v4298_v9 = vmul.f32 %v4289_v51, %v14106_v59 }
 0x9bd   : > { %v14174_v35 = vpop.f32.mrf.mxu0 }
 0x9be   : > { %17955 = vst [vmem:[#allocation105_spill] sm:$0xff] %v14174_v35  ;;  %v14201_v35 = vrot.slane %v5394_v28, %v17954_v15  ;;  %v4300_v28 = vmul.f32 %v4289_v51, %v14114_v52  ;;  %v4302_v52 = vmul.f32 %v4289_v51, %v14122_v43  ;;  %v4748_v51 = vmul.f32 %v4741_v34, %v14130_v39 }
 0x9bf   : > { %v14168_v36 = vpop.f32.mrf.mxu1 }
 0x9c0   : > { %17962 = vst [vmem:[#allocation56_spill] sm:$0xff] %v14201_v35  ;;  %v4299_v35 = vmul.f32 %v4293_v62, %v14110_v53  ;;  %v4523_v53 = vmul.f32 %v4519_v24, %v14104_v25  ;;  %v4310_v62 = vadd.f32 %v4302_v52, %v4076_v33  ;;  %v4528_v25 = vmul.f32 %v4515_v40, %v14124_v0  ;;  %v5620_v0 = vld [vmem:[#allocation3 + $0x7] ss:$8 sm:$0x3] }
 0x9c1   : > { %v14171_v19 = vpop.f32.mrf.mxu1  ;;  %v4756_v60 = vadd.f32 %v4748_v51, %v4530_v41  ;;  %v14255_v38 = vrot.slane %v5620_v0, %v17954_v15  ;;  %v5180_v33 = vmul.f32 %v14195_v42, %v14168_v36 }
 0x9c2   : > { %v4307_v16 = vadd.f32 %v4299_v35, %v4073_v61  ;;  %v4749_v35 = vmul.f32 %v4745_v30, %v14134_v58  ;;  %v4536_v37 = vadd.f32 %v4528_v25, %v4310_v62 }
 0x9c5   : > { %v14182_v32 = vpop.f32.mrf.mxu1  ;;  %v14184_v11 = vpop.f32.mrf.mxu0 }
 0x9c6   : > { %17959 = vst [vmem:[#allocation76_spill] sm:$0xff] %v14184_v11  ;;  %v4308_v11 = vadd.f32 %v4300_v28, %v4074_v55 }
 0x9c7   : > { %v14190_v63 = vpop.f32.mrf.mxu1  ;;  %v14192_v44 = vpop.f32.mrf.mxu0 }
 0x9c8   : > { %17960 = vst [vmem:[#allocation27_spill] sm:$0xff] %v14190_v63  ;;  %17961 = vst [vmem:[#allocation37_spill] sm:$0xff] %v14192_v44  ;;  %v14209_v44 = vpop.permute.xlu1 %7440  ;;  %v4072_v63 = vmul.f32 %v4063_v26, %v14088_v54  ;;  %v4077_v54 = vmul.f32 %v4067_v14, %v14098_v5  ;;  %v4309_v26 = vadd.f32 %v4301_v29, %v4075_v49 }
 0x9c9   : > { %17964 = vst [vmem:[#allocation23_spill] sm:$0xff] %v14209_v44  ;;  %v4526_v14 = vmul.f32 %v4515_v40, %v14116_v2  ;;  %v4529_v2 = vmul.f32 %v4519_v24, %v14128_v10  ;;  %v4962_v29 = vadd.f32 %v14132_v6, %v4756_v60 }
 0x9ca   : > { %v4306_v1 = vadd.f32 %v4298_v9, %v4072_v63  ;;  %v14239_v9 = vpop.permute.xlu0 %7432  ;;  %v4531_v63 = vadd.f32 %v4523_v53, %v4305_v12  ;;  %v4535_v10 = vadd.f32 %v4527_v20, %v4309_v26  ;;  %v17973_v20 = vld [vmem:[#allocation56_spill] sm:$0xff] }
 0x9cb   : > { %v14221_v59 = vpop.f32.mrf.mxu1  ;;  %v14223_v44 = vpop.f32.mrf.mxu0  ;;  %17968 = vst [vmem:[#allocation246_spill] sm:$0xff] %v14239_v9 }
 0x9cc   : > { %17966 = vst [vmem:[#allocation259_spill] sm:$0xff] %v14221_v59  ;;  %17967 = vst [vmem:[#allocation270_spill] sm:$0xff] %v14223_v44  ;;  %v4524_v59 = vmul.f32 %v4515_v40, %v14108_v22  ;;  %v4525_v44 = vmul.f32 %v4519_v24, %v14112_v50  ;;  %v4750_v22 = vmul.f32 %v4741_v34, %v14136_v27  ;;  %v14244_v43 = vpop.permute.xlu1 %7712  ;;  %v5846_v24 = vld [vmem:[#allocation3 + $0x10] ss:$8 sm:$0x3] }
 0x9cd   : > { %v14230_v47 = vpop.f32.mrf.mxu0  ;;  %v14237_v5 = vpop.f32.mrf.mxu1  ;;  %17969 = vst [vmem:[#allocation233_spill] sm:$0xff] %v14244_v43  ;;  %v4311_v50 = vadd.f32 %v4303_v17, %v4077_v54  ;;  %v4754_v40 = vmul.f32 %v4741_v34, %v14158_v21  ;;  %v4534_v27 = vadd.f32 %v4526_v14, %v4308_v11  ;;  %v4757_v61 = vadd.f32 %v4749_v35, %v4531_v63  ;;  %v17972_v36 = vld [vmem:[#allocation76_spill] sm:$0xff]  ;;  %v17975_v35 = vld [vmem:[#allocation123_spill] sm:$0xff] }
 0x9ce   : > { %v4532_v18 = vadd.f32 %v4524_v59, %v4306_v1  ;;  %v4533_v58 = vadd.f32 %v4525_v44, %v4307_v16  ;;  %v14257_v34 = vpop.permute.xlu0 %7704  ;;  %v4761_v21 = vadd.f32 %v4753_v56, %v4535_v10  ;;  %v14260_v44 = vrot.slane %v5620_v0, %v17958_v7 }
 0x9cf   : > { %v5163_v28 = vpop.f32.mrf.mxu1  ;;  %v4537_v49 = vadd.f32 %v4529_v2, %v4311_v50  ;;  %v4760_v1 = vadd.f32 %v4752_v8, %v4534_v27  ;;  %17970 = vst [vmem:[#allocation248_spill] sm:$0xff] %v14257_v34  ;;  %v4762_v11 = vadd.f32 %v4754_v40, %v4536_v37  ;;  %v14263_v30 = vrot.slane %v5846_v24, %v17954_v15  ;;  %v17974_v62 = vld [vmem:[#allocation27_spill] sm:$0xff]  ;;  %v17978_v2 = vld [vmem:[#allocation272_spill] sm:$0xff] }
 0x9d0   : > { %v14249_v39 = vpop.f32.mrf.mxu0  ;;  %v4758_v57 = vadd.f32 %v4750_v22, %v4532_v18  ;;  %v4759_v12 = vadd.f32 %v4751_v3, %v4533_v58  ;;  %v14265_v45 = vpop.permute.xlu1 %7708  ;;  %v14271_v53 = vrot.slane %v5846_v24, %v17958_v7  ;;  %v4963_v52 = vadd.f32 %v14138_v23, %v4757_v61  ;;  %v17976_v22 = vld [vmem:[#allocation92_spill] sm:$0xff] }
 0x9d1   : > { %17971 = vst [vmem:[#allocation222_spill] sm:$0xff] %v14265_v45  ;;  %v4763_v59 = vadd.f32 %v4755_v31, %v4537_v49  ;;  %v5165_v54 = vpop.f32.mrf.mxu1  ;;  %v5181_v17 = vmul.f32 %v14198_v46, %v14171_v19  ;;  %v5182_v16 = vmul.f32 %v14195_v42, %v14182_v32  ;;  %v4966_v14 = vadd.f32 %v14154_v48, %v4760_v1  ;;  %v17977_v19 = vld [vmem:[#allocation37_spill] sm:$0xff] }
 0x9d2   : > { %v5385_v55 = vpop.f32.mrf.mxu0  ;;  %v4964_v41 = vadd.f32 %v14144_v4, %v4758_v57  ;;  %v4965_v6 = vadd.f32 %v14150_v13, %v4759_v12  ;;  %v5406_v51 = vmul.f32 %v17973_v20, %v17972_v36  ;;  %v5183_v25 = vmul.f32 %v14198_v46, %v17974_v62  ;;  %v17980_v13 = vld [vmem:[#allocation105_spill] sm:$0xff]  ;;  %v14295_v58 = vpop.permute.xlu0 %7430 }
 0x9d3   : > { %v4967_v4 = vadd.f32 %v17975_v35, %v4761_v21  ;;  %v4968_v50 = vadd.f32 %v17976_v22, %v4762_v11  ;;  %v5407_v3 = vmul.f32 %v17978_v2, %v17977_v19  ;;  %v17979_v32 = vld [vmem:[#allocation259_spill] sm:$0xff]  ;;  %v4969_v63 = vadd.f32 %v17980_v13, %v4763_v59  ;;  %v17981_v18 = vld [vmem:[#allocation270_spill] sm:$0xff]  ;;  %17982 = vst [vmem:[#allocation258_spill] sm:$0xff] %v14295_v58 }
 0x9d4   : > { %v5389_v26 = vpop.f32.mrf.mxu0  ;;  %v5184_v8 = vmul.f32 %v14195_v42, %v17979_v32  ;;  %v5188_v48 = vadd.f32 %v5180_v33, %v4962_v29  ;;  %v5408_v56 = vmul.f32 %v17973_v20, %v17981_v18  ;;  %v5189_v27 = vadd.f32 %v5181_v17, %v4963_v52  ;;  %v14301_v37 = vpop.permute.xlu1 %7434 }
 0x9d5   : > { %v5190_v60 = vadd.f32 %v5182_v16, %v4964_v41  ;;  %v5185_v31 = vmul.f32 %v14198_v46, %v14237_v5  ;;  %v5409_v24 = vmul.f32 %v17978_v2, %v14230_v47  ;;  %17983 = vst [vmem:[#allocation108_spill] sm:$0xff] %v14301_v37  ;;  %v5191_v57 = vadd.f32 %v5183_v25, %v4965_v6 }
 0x9d6   : > { %v5391_v10 = vpop.f32.mrf.mxu0  ;;  %v5414_v61 = vadd.f32 %v5406_v51, %v5188_v48  ;;  %v5186_v49 = vmul.f32 %v14195_v42, %v5163_v28  ;;  %v5415_v21 = vadd.f32 %v5407_v3, %v5189_v27  ;;  %v5192_v11 = vadd.f32 %v5184_v8, %v4966_v14  ;;  %v14313_v62 = vpop.permute.xlu0 %7426 }
 0x9d7   : > { %v5410_v29 = vmul.f32 %v17973_v20, %v14249_v39  ;;  %v5187_v5 = vmul.f32 %v14198_v46, %v5165_v54  ;;  %v5416_v33 = vadd.f32 %v5408_v56, %v5190_v60  ;;  %v5193_v16 = vadd.f32 %v5185_v31, %v4967_v4  ;;  %17984 = vst [vmem:[#allocation11_spill] sm:$0xff] %v14313_v62 }
 0x9d8   : > { %v5417_v42 = vadd.f32 %v5409_v24, %v5191_v57  ;;  %v5411_v28 = vmul.f32 %v17978_v2, %v5385_v55  ;;  %v5412_v6 = vmul.f32 %v17973_v20, %v5389_v26  ;;  %v5194_v36 = vadd.f32 %v5186_v49, %v4968_v50  ;;  %v14317_v19 = vpop.permute.xlu1 %7706  ;;  %v17986_v26 = vld [vmem:[#allocation16_spill] sm:$0xff] }
 0x9d9   : > { %v5418_v25 = vadd.f32 %v5410_v29, %v5192_v11  ;;  %17985 = vst [vmem:[#allocation193_spill] sm:$0xff] %v14317_v19  ;;  %v5413_v48 = vmul.f32 %v17978_v2, %v5391_v10 }
 0x9da   : > { %v5419_v8 = vadd.f32 %v5411_v28, %v5193_v16  ;;  %v5420_v13 = vadd.f32 %v5412_v6, %v5194_v36 }
 0x9de   : > { %v5597_v23 = vpop.f32.mrf.mxu1 }
 0x9df   : > { %v5632_v40 = vmul.f32 %v14255_v38, %v5597_v23  ;;  %v5195_v23 = vadd.f32 %v5187_v5, %v4969_v63 }
 0x9e0   : > { %v5599_v0 = vpop.f32.mrf.mxu1 }
 0x9e1   : > { %v5633_v12 = vmul.f32 %v14260_v44, %v5599_v0  ;;  %v5640_v47 = vadd.f32 %v5632_v40, %v5414_v61 }
 0x9e2   : > { %v5603_v1 = vpop.f32.mrf.mxu1 }
 0x9e3   : > { %v5823_v59 = vpop.f32.mrf.mxu0  ;;  %v5634_v52 = vmul.f32 %v14255_v38, %v5603_v1  ;;  %v5641_v51 = vadd.f32 %v5633_v12, %v5415_v21  ;;  %v17987_v12 = vld [vmem:[#allocation15_spill] sm:$0xff]  ;;  %v14328_v21 = vpop.permute.xlu0 %7698 }
 0x9e4   : > { %v5858_v41 = vmul.f32 %v14263_v30, %v5823_v59  ;;  %v5605_v17 = vpop.f32.mrf.mxu1  ;;  %17988 = vst [vmem:[#allocation230_spill] sm:$0xff] %v14328_v21 }
 0x9e5   : > { %v5825_v14 = vpop.f32.mrf.mxu0  ;;  %v5635_v35 = vmul.f32 %v14260_v44, %v5605_v17  ;;  %v5642_v55 = vadd.f32 %v5634_v52, %v5416_v33 }
 0x9e6   : > { %v5866_v39 = vadd.f32 %v5858_v41, %v5640_v47  ;;  %v5859_v46 = vmul.f32 %v14271_v53, %v5825_v14  ;;  %v5609_v54 = vpop.f32.mrf.mxu1  ;;  %v14331_v47 = vpop.permute.xlu1 %7702  ;;  %v17990_v14 = vld [vmem:[#allocation18_spill] sm:$0xff] }
 0x9e7   : > { %v5636_v4 = vmul.f32 %v14255_v38, %v5609_v54  ;;  %v5829_v22 = vpop.f32.mrf.mxu0  ;;  %v5643_v60 = vadd.f32 %v5635_v35, %v5417_v42  ;;  %17989 = vst [vmem:[#allocation240_spill] sm:$0xff] %v14331_v47  ;;  %v5421_v54 = vadd.f32 %v5413_v48, %v5195_v23 }
 0x9e8   : > { %v5898_v20 = vadd.f32 %v17986_v26, %v5866_v39  ;;  %v5867_v50 = vadd.f32 %v5859_v46, %v5641_v51  ;;  %v5860_v3 = vmul.f32 %v14263_v30, %v5829_v22  ;;  %v5611_v32 = vpop.f32.mrf.mxu1 }
 0x9e9   : > { %v5637_v63 = vmul.f32 %v14260_v44, %v5611_v32  ;;  %v5831_v18 = vpop.f32.mrf.mxu0  ;;  %v5644_v31 = vadd.f32 %v5636_v4, %v5418_v25 }
 0x9ea   : > { %vm5906_vm15 = vcmp.ge.f32.partialorder %v5898_v20, 0.0  ;;  %v5914_v56 = vmul.f32 0.2, %v5898_v20  ;;  %v5899_v40 = vadd.f32 %v17986_v26, %v5867_v50  ;;  %v5868_v0 = vadd.f32 %v5860_v3, %v5642_v55  ;;  %v5615_v27 = vpop.f32.mrf.mxu1  ;;  %v14343_v26 = vpop.permute.xlu0 %7424 }
 0x9eb   : > { %v5861_v24 = vmul.f32 %v14271_v53, %v5831_v18  ;;  %v5638_v61 = vmul.f32 %v14255_v38, %v5615_v27  ;;  %v5835_v57 = vpop.f32.mrf.mxu0  ;;  %v5645_v11 = vadd.f32 %v5637_v63, %v5419_v8  ;;  %17991 = vst [vmem:[#allocation161_spill] sm:$0xff] %v14343_v26  ;;  %v14346_v3 = vpop.permute.xlu1 %7428  ;;  %v17993_v8 = vld [vmem:[#allocation17_spill] sm:$0xff] }
 0x9ec   : > { %vm5907_vm14 = vcmp.ge.f32.partialorder %v5899_v40, 0.0  ;;  %v5915_v49 = vmul.f32 0.2, %v5899_v40  ;;  %v5900_v2 = vadd.f32 %v17987_v12, %v5868_v0  ;;  %v5862_v10 = vmul.f32 %v14263_v30, %v5835_v57  ;;  %v5617_v1 = vpop.f32.mrf.mxu1  ;;  %17992 = vst [vmem:[#allocation103_spill] sm:$0xff] %v14346_v3 }
 0x9ed   : > { %v5869_v29 = vadd.f32 %v5861_v24, %v5643_v60  ;;  %v5646_v5 = vadd.f32 %v5638_v61, %v5420_v13  ;;  %v5837_v59 = vpop.f32.mrf.mxu0  ;;  %v5922_v33 = vsel %vm5906_vm15, %v5898_v20, %v5914_v56  ;;  %v5639_v16 = vmul.f32 %v14260_v44, %v5617_v1 }
 0x9ee   : > { %vm5908_vm10 = vcmp.ge.f32.partialorder %v5900_v2, 0.0  ;;  %v5916_v38 = vmul.f32 0.2, %v5900_v2  ;;  %v5870_v52 = vadd.f32 %v5862_v10, %v5644_v31  ;;  %v5863_v41 = vmul.f32 %v14271_v53, %v5837_v59  ;;  %v14356_v57 = vpop.permute.xlu0 %7420 }
 0x9ef   : > { %v5901_v17 = vadd.f32 %v17987_v12, %v5869_v29  ;;  %v5938_v42 = vrot.slane %v5922_v33, 4  ;;  %v5841_v28 = vpop.f32.mrf.mxu0  ;;  %v5923_v6 = vsel %vm5907_vm14, %v5899_v40, %v5915_v49  ;;  %v5647_v20 = vadd.f32 %v5639_v16, %v5421_v54  ;;  %17994 = vst [vmem:[#allocation219_spill] sm:$0xff] %v14356_v57  ;;  %v14358_v12 = vpop.permute.xlu1 %7700 }
 0x9f0   : > { %v5902_v36 = vadd.f32 %v17990_v14, %v5870_v52  ;;  %v5871_v51 = vadd.f32 %v5863_v41, %v5645_v11  ;;  %v5864_v39 = vmul.f32 %v14263_v30, %v5841_v28  ;;  %v5939_v46 = vrot.slane %v5923_v6, 4  ;;  %17995 = vst [vmem:[#allocation52_spill] sm:$0xff] %v14358_v12 }
 0x9f1   : > { %vm5909_vm9 = vcmp.ge.f32.partialorder %v5901_v17, 0.0  ;;  %v5917_v25 = vmul.f32 0.2, %v5901_v17  ;;  %5952 = vrot.lane.b32.xlu0 %v5938_v42, %s10076_s15  ;;  %v5843_v35 = vpop.f32.mrf.mxu0  ;;  %v5924_v4 = vsel %vm5908_vm10, %v5900_v2, %v5916_v38  ;;  %vm6217_vm10 = vcmask 818176  }
 0x9f2   : > { %vm5910_vm11 = vcmp.ge.f32.partialorder %v5902_v36, 0.0  ;;  %v5918_v44 = vmul.f32 0.2, %v5902_v36  ;;  %v5903_v22 = vadd.f32 %v17990_v14, %v5871_v51  ;;  %v5872_v55 = vadd.f32 %v5864_v39, %v5646_v5  ;;  %5954 = vrot.lane.b32.xlu1 %v5939_v46, %s10076_s15  ;;  %v14364_v29 = vpop.permute.xlu0 %7692 }
 0x9f3   : > { %v5865_v30 = vmul.f32 %v14271_v53, %v5843_v35  ;;  %v5940_v23 = vrot.slane %v5924_v4, 4  ;;  %v5925_v50 = vsel %vm5909_vm9, %v5901_v17, %v5917_v25  ;;  %17996 = vst [vmem:[#allocation74_spill] sm:$0xff] %v14364_v29  ;;  %v14367_v5 = vpop.permute.xlu1 %7696 }
 0x9f4   : > { %vm5911_vm12 = vcmp.ge.f32.partialorder %v5903_v22, 0.0  ;;  %v5919_v32 = vmul.f32 0.2, %v5903_v22  ;;  %v5904_v13 = vadd.f32 %v17993_v8, %v5872_v55  ;;  %v5942_v48 = vrot.slane %v5925_v50, 4  ;;  %17997 = vst [vmem:[#allocation138_spill] sm:$0xff] %v14367_v5 }
 0x9f5   : > { %v5873_v63 = vadd.f32 %v5865_v30, %v5647_v20  ;;  %v5941_v18 = vsel %vm568_vm5, %v5938_v42, %v5940_v23  ;;  %v5926_v56 = vsel %vm5910_vm11, %v5902_v36, %v5918_v44 }
 0x9f6   : > { %vm5912_vm15 = vcmp.ge.f32.partialorder %v5904_v13, 0.0  ;;  %v5920_v40 = vmul.f32 0.2, %v5904_v13  ;;  %5956 = vrot.lane.b32.xlu0 %v5941_v18, %s10076_s15  ;;  %v5943_v53 = vsel %vm568_vm5, %v5939_v46, %v5942_v48  ;;  %v5944_v0 = vrot.slane %v5926_v56, 4  ;;  %v14373_v38 = vpop.permute.xlu0 %7418 }
 0x9f7   : > { %v5905_v27 = vadd.f32 %v17993_v8, %v5873_v63  ;;  %5958 = vrot.lane.b32.xlu1 %v5943_v53, %s10076_s15  ;;  %v5927_v60 = vsel %vm5911_vm12, %v5903_v22, %v5919_v32  ;;  %17998 = vst [vmem:[#allocation208_spill] sm:$0xff] %v14373_v38  ;;  %v14375_v52 = vpop.permute.xlu1 %7422 }
 0x9f8   : > { %v5945_v31 = vsel %vm568_vm5, %v5940_v23, %v5944_v0  ;;  %v5946_v24 = vrot.slane %v5927_v60, 4  ;;  %v5928_v61 = vsel %vm5912_vm15, %v5904_v13, %v5920_v40  ;;  %17999 = vst [vmem:[#allocation85_spill] sm:$0xff] %v14375_v52 }
 0x9f9   : > { %vm5913_vm14 = vcmp.ge.f32.partialorder %v5905_v27, 0.0  ;;  %v5921_v49 = vmul.f32 0.2, %v5905_v27  ;;  %v5948_v10 = vrot.slane %v5928_v61, 4 }
 0x9fa   : > { %5960 = vrot.lane.b32.xlu0 %v5945_v31, %s10076_s15  ;;  %v5947_v2 = vsel %vm568_vm5, %v5942_v48, %v5946_v24  ;;  %v14377_v41 = vpop.permute.xlu0 %7414 }
 0x9fb   : > { %5962 = vrot.lane.b32.xlu1 %v5947_v2, %s10076_s15  ;;  %v5929_v1 = vsel %vm5913_vm14, %v5905_v27, %v5921_v49  ;;  %v5949_v59 = vsel %vm568_vm5, %v5944_v0, %v5948_v10  ;;  %18000 = vst [vmem:[#allocation19_spill] sm:$0xff] %v14377_v41  ;;  %v14379_v17 = vpop.permute.xlu1 %7694 }
 0x9fc   : > { %v5950_v11 = vrot.slane %v5929_v1, 4  ;;  %18001 = vst [vmem:[#allocation183_spill] sm:$0xff] %v14379_v17 }
 0x9fe   : > { %5968 = vrot.lane.b32.xlu0 %v5948_v10, %s10076_s15  ;;  %v5951_v33 = vsel %vm568_vm5, %v5946_v24, %v5950_v11  ;;  %v14381_v16 = vpop.permute.xlu0 %7686 }
 0x9ff   : > { %5970 = vrot.lane.b32.xlu1 %v5950_v11, %s10076_s15  ;;  %18002 = vst [vmem:[#allocation159_spill] sm:$0xff] %v14381_v16  ;;  %v14383_v42 = vpop.permute.xlu1 %7690 }
 0xa00   : > { %18003 = vst [vmem:[#allocation176_spill] sm:$0xff] %v14383_v42 }
 0xa02   : > { %5964 = vrot.lane.b32.xlu0 %v5949_v59, %s10076_s15  ;;  %v14385_v28 = vpop.permute.xlu0 %7412 }
 0xa03   : > { %5966 = vrot.lane.b32.xlu1 %v5951_v33, %s10076_s15  ;;  %18004 = vst [vmem:[#allocation148_spill] sm:$0xff] %v14385_v28  ;;  %v14387_v6 = vpop.permute.xlu1 %7416 }
 0xa04   : > { %18005 = vst [vmem:[#allocation173_spill] sm:$0xff] %v14387_v6 }
 0xa06   : > { %v14389_v14 = vpop.permute.xlu0 %7408 }
 0xa07   : > { %18006 = vst [vmem:[#allocation70_spill] sm:$0xff] %v14389_v14  ;;  %v14391_v36 = vpop.permute.xlu1 %7688 }
 0xa08   : > { %18007 = vst [vmem:[#allocation130_spill] sm:$0xff] %v14391_v36 }
 0xa0a   : > { %v14393_v51 = vpop.permute.xlu0 %7680 }
 0xa0b   : > { %18008 = vst [vmem:[#allocation269_spill] sm:$0xff] %v14393_v51  ;;  %v14395_v39 = vpop.permute.xlu1 %7684 }
 0xa0c   : > { %18009 = vst [vmem:[#allocation207_spill] sm:$0xff] %v14395_v39 }
 0xa0e   : > { %v14397_v46 = vpop.permute.xlu0 %6133 }
 0xa0f   : > { %v14399_v54 = vpop.permute.xlu1 %7410 }
 0xa10   : > { %18010 = vst [vmem:[#allocation68_spill] sm:$0xff] %v14399_v54 }
 0xa12   : > { %v14401_v25 = vpop.permute.xlu0 %6666 }
 0xa13   : > { %v14403_v35 = vpop.permute.xlu1 %6400 }
 0xa16   : > { %v14405_v4 = vpop.permute.xlu0 %7444 }
 0xa17   : > { %18011 = vst [vmem:[#allocation273_spill] sm:$0xff] %v14405_v4  ;;  %v14407_v44 = vpop.permute.xlu1 %6932 }
 0xa18   : > { %18012 = vst [vmem:[#allocation93_spill] sm:$0xff] %v14407_v44 }
 0xa1a   : > { %v14409_v22 = vpop.permute.xlu0 %7710 }
 0xa1b   : > { %18013 = vst [vmem:[#allocation114_spill] sm:$0xff] %v14409_v22  ;;  %v14411_v55 = vpop.permute.xlu1 %7198 }
 0xa1c   : > { %18014 = vst [vmem:[#allocation184_spill] sm:$0xff] %v14411_v55 }
 0xa1e   : > { %v14413_v20 = vpop.permute.xlu0 %7406 }
 0xa1f   : > { %18015 = vst [vmem:[#allocation75_spill] sm:$0xff] %v14413_v20  ;;  %v14415_v30 = vpop.permute.xlu1 %7682 }
 0xa20   : > { %18016 = vst [vmem:[#allocation141_spill] sm:$0xff] %v14415_v30 }
 0xa22   : > { %v14417_v23 = vpop.permute.xlu0 %7402 }
 0xa23   : > { %18017 = vst [vmem:[#allocation160_spill] sm:$0xff] %v14417_v23  ;;  %v14419_v50 = vpop.permute.xlu1 %7678 }
 0xa24   : > { %18018 = vst [vmem:[#allocation46_spill] sm:$0xff] %v14419_v50 }
 0xa26   : > { %v14421_v32 = vpop.permute.xlu0 %7674 }
 0xa27   : > { %18019 = vst [vmem:[#allocation61_spill] sm:$0xff] %v14421_v32  ;;  %v14423_v8 = vpop.permute.xlu1 %7404 }
 0xa28   : > { %18020 = vst [vmem:[#allocation125_spill] sm:$0xff] %v14423_v8 }
 0xa2a   : > { %v14425_v13 = vpop.permute.xlu0 %7400 }
 0xa2b   : > { %18021 = vst [vmem:[#allocation7_spill] sm:$0xff] %v14425_v13  ;;  %v14427_v48 = vpop.permute.xlu1 %7676 }
 0xa2c   : > { %18022 = vst [vmem:[#allocation94_spill] sm:$0xff] %v14427_v48 }
 0xa2e   : > { %v14429_v63 = vpop.permute.xlu0 %7668 }
 0xa2f   : > { %18023 = vst [vmem:[#allocation107_spill] sm:$0xff] %v14429_v63  ;;  %v14431_v18 = vpop.permute.xlu1 %7672 }
 0xa30   : > { %18024 = vst [vmem:[#allocation274_spill] sm:$0xff] %v14431_v18 }
 0xa32   : > { %v14433_v56 = vpop.permute.xlu0 %7666 }
 0xa33   : > { %18025 = vst [vmem:[#allocation78_spill] sm:$0xff] %v14433_v56  ;;  %v14435_v40 = vpop.permute.xlu1 %7670 }
 0xa34   : > { %18026 = vst [vmem:[#allocation39_spill] sm:$0xff] %v14435_v40 }
 0xa63   : > { %v5953_v53 = vpop.permute.xlu0 %5952 }
 0xa64   : > { %5992 = vst.msk [vmem:[#allocation2 + $0xc0] sm:$0xf0] %vm1971_vm2, %v5953_v53  ;;  %v5955_v0 = vpop.permute.xlu1 %5954 }
 0xa65   : > { %v5972_v27 = vsel %vm483_vm0, %v5953_v53, %v5955_v0  ;;  %5994 = vst.msk [vmem:[#allocation2 + $0xd0] sm:$0xf0] %vm1974_vm7, %v5955_v0 }
 0xa66   : > { %5993 = vst [vmem:[#allocation2 + $0xc8] sm:$0xf0] %v5972_v27 }
 0xa68   : > { %v5957_v60 = vpop.permute.xlu0 %5956 }
 0xa69   : > { %5995 = vst.msk [vmem:[#allocation2 + $0xd8] sm:$0xff] %vm1976_vm13, %v5957_v60  ;;  %v5959_v31 = vpop.permute.xlu1 %5958 }
 0xa6a   : > { %v14442_v24 = vsel %vm483_vm0, %v5957_v60, %v5959_v31  ;;  %5997 = vst.msk [vmem:[#allocation2 + $0xe8] sm:$0xff] %vm483_vm0, %v5959_v31 }
 0xa6b   : > { %5996 = vst [vmem:[#allocation2 + $0xe0] sm:$0xff] %v14442_v24  ;;  %v14446_v61 = vld [vmem:[#allocation2 + $0xc0] sm:$0xff] }
 0xa6c   : > { %v5961_v49 = vpop.permute.xlu0 %5960  ;;  %6137 = vrot.lane.b32.xlu0 %v14446_v61, %s18027_s16  ;;  %6404 = vrot.lane.b32.xlu1 %v14446_v61, %s18028_s17  ;;  %v14475_v27 = vld [vmem:[#allocation2 + $0xd0] sm:$0xff] }
 0xa6d   : > { %5998 = vst.msk [vmem:[#allocation2 + $0xf0] sm:$0xff] %vm1976_vm13, %v5961_v49  ;;  %v5963_v2 = vpop.permute.xlu1 %5962  ;;  %v14493_v60 = vld [vmem:[#allocation2 + $0xc8] sm:$0xff] }
 0xa6e   : > { %v14454_v10 = vsel %vm483_vm0, %v5961_v49, %v5963_v2  ;;  %6000 = vst.msk [vmem:[#allocation2 + $0x100] sm:$0xff] %vm483_vm0, %v5963_v2 }
 0xa6f   : > { %5999 = vst [vmem:[#allocation2 + $0xf8] sm:$0xff] %v14454_v10 }
 0xa70   : > { %v5969_v1 = vpop.permute.xlu0 %5968  ;;  %6670 = vrot.lane.b32.xlu0 %v14446_v61, %s17540_s21  ;;  %6936 = vrot.lane.b32.xlu1 %v14446_v61, %s18029_s23  ;;  %v14511_v31 = vld [vmem:[#allocation2 + $0xd8] sm:$0xff] }
 0xa71   : > { %6004 = vst.msk [vmem:[#allocation2 + $0x120] sm:$0xf] %vm532_vm3, %v5969_v1  ;;  %v5971_v11 = vpop.permute.xlu1 %5970  ;;  %v14529_v49 = vld [vmem:[#allocation2 + $0xe8] sm:$0xff] }
 0xa72   : > { %v5976_v59 = vsel %vm483_vm0, %v5969_v1, %v5971_v11  ;;  %6006 = vst.msk [vmem:[#allocation2 + $0x130] sm:$0xf] %vm500_vm1, %v5971_v11 }
 0xa73   : > { %6005 = vst [vmem:[#allocation2 + $0x128] sm:$0xf] %v5976_v59 }
 0xa74   : > { %7202 = vrot.lane.b32.xlu0 %v14446_v61, %s17542_s28  ;;  %v5965_v33 = vpop.permute.xlu0 %5964  ;;  %7714 = vrot.lane.b32.xlu1 %v14446_v61, %s17229_s22  ;;  %v14563_v2 = vld [vmem:[#allocation2 + $0xf0] sm:$0xff] }
 0xa75   : > { %6001 = vst.msk [vmem:[#allocation2 + $0x108] sm:$0xff] %vm1976_vm13, %v5965_v33  ;;  %v5967_v53 = vpop.permute.xlu1 %5966  ;;  %v6039_v1 = vld [vmem:[#allocation2 + $0x100] sm:$0xff] }
 0xa76   : > { %v14471_v0 = vsel %vm483_vm0, %v5965_v33, %v5967_v53  ;;  %6003 = vst.msk [vmem:[#allocation2 + $0x118] sm:$0xff] %vm483_vm0, %v5967_v53 }
 0xa77   : > { %6002 = vst [vmem:[#allocation2 + $0x110] sm:$0xff] %v14471_v0 }
 0xa78   : > { %7448 = vrot.lane.b32.xlu0 %v14446_v61, %s17541_s25  ;;  %6408 = vrot.lane.b32.xlu1 %v14475_v27, %s18028_s17  ;;  %v6043_v40 = vld [vmem:[#allocation2 + $0x120] sm:$0xf] }
 0xa79   : > { %v6045_v47 = vld [vmem:[#allocation2 + $0x130] sm:$0xf] }
 0xa7a   : > { %v6044_v22 = vld [vmem:[#allocation2 + $0x128] sm:$0xf] }
 0xa7c   : > { %7452 = vrot.lane.b32.xlu1 %v14475_v27, %s17541_s25  ;;  %6141 = vrot.lane.b32.xlu0 %v14475_v27, %s18027_s16  ;;  %v14671_v14 = vld [vmem:[#allocation2 + $0x108] sm:$0xff] }
 0xa7d   : > { %v6042_v52 = vld [vmem:[#allocation2 + $0x118] sm:$0xff] }
 0xa80   : > { %7718 = vrot.lane.b32.xlu1 %v14475_v27, %s17229_s22  ;;  %6674 = vrot.lane.b32.xlu0 %v14475_v27, %s17540_s21 }
 0xa84   : > { %7984 = vrot.lane.b32.xlu1 %v14475_v27, %s17230_s24  ;;  %6940 = vrot.lane.b32.xlu0 %v14475_v27, %s18029_s23 }
 0xa88   : > { %7206 = vrot.lane.b32.xlu0 %v14475_v27, %s17542_s28  ;;  %6139 = vrot.lane.b32.xlu1 %v14493_v60, %s18027_s16 }
 0xa8c   : > { %6406 = vrot.lane.b32.xlu0 %v14493_v60, %s18028_s17  ;;  %6672 = vrot.lane.b32.xlu1 %v14493_v60, %s17540_s21 }
 0xa90   : > { %7450 = vrot.lane.b32.xlu0 %v14493_v60, %s17541_s25  ;;  %6938 = vrot.lane.b32.xlu1 %v14493_v60, %s18029_s23 }
 0xa94   : > { %7716 = vrot.lane.b32.xlu0 %v14493_v60, %s17229_s22  ;;  %7204 = vrot.lane.b32.xlu1 %v14493_v60, %s17542_s28 }
 0xa98   : > { %7982 = vrot.lane.b32.xlu0 %v14493_v60, %s17230_s24  ;;  %6143 = vrot.lane.b32.xlu1 %v14511_v31, %s18027_s16 }
 0xa9c   : > { %6410 = vrot.lane.b32.xlu0 %v14511_v31, %s18028_s17  ;;  %6676 = vrot.lane.b32.xlu1 %v14511_v31, %s17540_s21 }
 0xaa0   : > { %7208 = vrot.lane.b32.xlu0 %v14511_v31, %s17542_s28  ;;  %6942 = vrot.lane.b32.xlu1 %v14511_v31, %s18029_s23 }
 0xaa4   : > { %7454 = vrot.lane.b32.xlu0 %v14511_v31, %s17541_s25  ;;  %7720 = vrot.lane.b32.xlu1 %v14511_v31, %s17229_s22 }
 0xaa8   : > { %7986 = vrot.lane.b32.xlu0 %v14511_v31, %s17230_s24  ;;  %6147 = vrot.lane.b32.xlu1 %v14529_v49, %s18027_s16 }
 0xaac   : > { %6414 = vrot.lane.b32.xlu0 %v14529_v49, %s18028_s17  ;;  %6680 = vrot.lane.b32.xlu1 %v14529_v49, %s17540_s21 }
 0xab0   : > { %6946 = vrot.lane.b32.xlu0 %v14529_v49, %s18029_s23  ;;  %7458 = vrot.lane.b32.xlu1 %v14529_v49, %s17541_s25 }
 0xab4   : > { %7212 = vrot.lane.b32.xlu0 %v14529_v49, %s17542_s28  ;;  %7724 = vrot.lane.b32.xlu1 %v14529_v49, %s17229_s22 }
 0xab8   : > { %7990 = vrot.lane.b32.xlu1 %v14529_v49, %s17230_s24  ;;  %6145 = vrot.lane.b32.xlu0 %v14442_v24, %s18027_s16 }
 0xabc   : > { %6412 = vrot.lane.b32.xlu1 %v14442_v24, %s18028_s17  ;;  %6678 = vrot.lane.b32.xlu0 %v14442_v24, %s17540_s21 }
 0xac0   : > { %6944 = vrot.lane.b32.xlu1 %v14442_v24, %s18029_s23  ;;  %7456 = vrot.lane.b32.xlu0 %v14442_v24, %s17541_s25 }
 0xac4   : > { %7210 = vrot.lane.b32.xlu1 %v14442_v24, %s17542_s28  ;;  %7722 = vrot.lane.b32.xlu0 %v14442_v24, %s17229_s22 }
 0xac8   : > { %6416 = vrot.lane.b32.xlu1 %v14563_v2, %s18028_s17  ;;  %7988 = vrot.lane.b32.xlu0 %v14442_v24, %s17230_s24 }
 0xacc   : > { %6948 = vrot.lane.b32.xlu1 %v14563_v2, %s18029_s23  ;;  %6149 = vrot.lane.b32.xlu0 %v14563_v2, %s18027_s16 }
 0xad0   : > { %7726 = vrot.lane.b32.xlu1 %v14563_v2, %s17229_s22  ;;  %6682 = vrot.lane.b32.xlu0 %v14563_v2, %s17540_s21 }
 0xad4   : > { %8258 = vrot.lane.b32.xlu1 %v14563_v2, %s17231_s27  ;;  %7214 = vrot.lane.b32.xlu0 %v14563_v2, %s17542_s28 }
 0xad8   : > { %7460 = vrot.lane.b32.xlu0 %v14563_v2, %s17541_s25  ;;  %6420 = vrot.lane.b32.xlu1 %v6039_v1, %s18028_s17 }
 0xadc   : > { %7992 = vrot.lane.b32.xlu0 %v14563_v2, %s17230_s24  ;;  %6686 = vrot.lane.b32.xlu1 %v6039_v1, %s17540_s21 }
 0xade   : > { %v14587_v11 = vpop.permute.xlu0 %6137  ;;  %v14589_v59 = vpop.permute.xlu1 %6404 }
 0xae0   : > { %7464 = vrot.lane.b32.xlu1 %v6039_v1, %s17541_s25  ;;  %6153 = vrot.lane.b32.xlu0 %v6039_v1, %s18027_s16 }
 0xae2   : > { %v14593_v33 = vpop.permute.xlu0 %6670  ;;  %v14595_v53 = vpop.permute.xlu1 %6936 }
 0xae3   : > { %18030 = vst [vmem:[#allocation58_spill] sm:$0xff] %v14595_v53 }
 0xae4   : > { %7730 = vrot.lane.b32.xlu1 %v6039_v1, %s17229_s22  ;;  %6952 = vrot.lane.b32.xlu0 %v6039_v1, %s18029_s23 }
 0xae6   : > { %v14599_v7 = vpop.permute.xlu0 %7202  ;;  %v14601_v15 = vpop.permute.xlu1 %7714 }
 0xae7   : > { %18031 = vst [vmem:[#allocation244_spill] sm:$0xff] %v14599_v7  ;;  %18032 = vst [vmem:[#allocation28_spill] sm:$0xff] %v14601_v15 }
 0xae8   : > { %7996 = vrot.lane.b32.xlu1 %v6039_v1, %s17230_s24  ;;  %7218 = vrot.lane.b32.xlu0 %v6039_v1, %s17542_s28 }
 0xaea   : > { %v14605_v56 = vpop.permute.xlu0 %7448  ;;  %v14607_v63 = vpop.permute.xlu1 %6408 }
 0xaeb   : > { %18033 = vst [vmem:[#allocation271_spill] sm:$0xff] %v14605_v56 }
 0xaec   : > { %8262 = vrot.lane.b32.xlu1 %v6039_v1, %s17231_s27  ;;  %6161 = vrot.lane.b32.xlu0 %v6043_v40, %s18027_s16 }
 0xaee   : > { %v14611_v18 = vpop.permute.xlu0 %6141  ;;  %v14613_v32 = vpop.permute.xlu1 %7452 }
 0xaef   : > { %18034 = vst [vmem:[#allocation278_spill] sm:$0xff] %v14613_v32 }
 0xaf0   : > { %6418 = vrot.lane.b32.xlu0 %v14454_v10, %s18028_s17  ;;  %6151 = vrot.lane.b32.xlu1 %v14454_v10, %s18027_s16 }
 0xaf2   : > { %v14619_v48 = vpop.permute.xlu0 %6674  ;;  %v14621_v50 = vpop.permute.xlu1 %7718 }
 0xaf3   : > { %18035 = vst [vmem:[#allocation250_spill] sm:$0xff] %v14621_v50 }
 0xaf4   : > { %6694 = vrot.lane.b32.xlu0 %v6043_v40, %s17540_s21  ;;  %6428 = vrot.lane.b32.xlu1 %v6043_v40, %s18028_s17 }
 0xaf6   : > { %v14625_v1 = vpop.permute.xlu0 %6940  ;;  %v14627_v51 = vpop.permute.xlu1 %7984 }
 0xaf7   : > { %18036 = vst [vmem:[#allocation260_spill] sm:$0xff] %v14625_v1  ;;  %18037 = vst [vmem:[#allocation277_spill] sm:$0xff] %v14627_v51 }
 0xaf8   : > { %6684 = vrot.lane.b32.xlu0 %v14454_v10, %s17540_s21  ;;  %6950 = vrot.lane.b32.xlu1 %v14454_v10, %s18029_s23 }
 0xafa   : > { %v14633_v30 = vpop.permute.xlu0 %7206  ;;  %v14635_v39 = vpop.permute.xlu1 %6139 }
 0xafb   : > { %18038 = vst [vmem:[#allocation231_spill] sm:$0xff] %v14633_v30 }
 0xafc   : > { %6960 = vrot.lane.b32.xlu0 %v6043_v40, %s18029_s23  ;;  %7216 = vrot.lane.b32.xlu1 %v14454_v10, %s17542_s28 }
 0xafe   : > { %v14640_v16 = vpop.permute.xlu0 %6406  ;;  %v14642_v36 = vpop.permute.xlu1 %6672 }
 0xb00   : > { %7226 = vrot.lane.b32.xlu0 %v6043_v40, %s17542_s28  ;;  %7472 = vrot.lane.b32.xlu1 %v6043_v40, %s17541_s25 }
 0xb02   : > { %v14646_v51 = vpop.permute.xlu0 %7450  ;;  %v14648_v13 = vpop.permute.xlu1 %6938 }
 0xb03   : > { %18039 = vst [vmem:[#allocation243_spill] sm:$0xff] %v14646_v51  ;;  %18040 = vst [vmem:[#allocation220_spill] sm:$0xff] %v14648_v13  ;;  %v9987_v13 = vld [vmem:[#allocation2 + $0x60] sm:$0xff] }
 0xb04   : > { %7462 = vrot.lane.b32.xlu0 %v14454_v10, %s17541_s25  ;;  %7738 = vrot.lane.b32.xlu1 %v6043_v40, %s17229_s22 }
 0xb06   : > { %v14653_v23 = vpop.permute.xlu0 %7716  ;;  %v14655_v8 = vpop.permute.xlu1 %7204 }
 0xb07   : > { %18041 = vst [vmem:[#allocation55_spill] sm:$0xff] %v14653_v23  ;;  %18042 = vst [vmem:[#allocation157_spill] sm:$0xff] %v14655_v8  ;;  %v9980_v8 = vld [vmem:[#allocation2 + $0x98] sm:$0xff] }
 0xb08   : > { %7728 = vrot.lane.b32.xlu0 %v14454_v10, %s17229_s22  ;;  %8004 = vrot.lane.b32.xlu1 %v6043_v40, %s17230_s24 }
 0xb0a   : > { %v14660_v42 = vpop.permute.xlu0 %7982  ;;  %v14662_v29 = vpop.permute.xlu1 %6143 }
 0xb0b   : > { %18043 = vst [vmem:[#allocation261_spill] sm:$0xff] %v14660_v42 }
 0xb0c   : > { %7994 = vrot.lane.b32.xlu0 %v14454_v10, %s17230_s24  ;;  %8270 = vrot.lane.b32.xlu1 %v6043_v40, %s17231_s27 }
 0xb0e   : > { %v14667_v17 = vpop.permute.xlu0 %6410  ;;  %v14669_v20 = vpop.permute.xlu1 %6676 }
 0xb10   : > { %8260 = vrot.lane.b32.xlu0 %v14454_v10, %s17231_s27  ;;  %6155 = vrot.lane.b32.xlu1 %v14671_v14, %s18027_s16 }
 0xb12   : > { %v14677_v42 = vpop.permute.xlu0 %7208  ;;  %v14679_v54 = vpop.permute.xlu1 %6942 }
 0xb13   : > { %18044 = vst [vmem:[#allocation203_spill] sm:$0xff] %v14677_v42  ;;  %18045 = vst [vmem:[#allocation140_spill] sm:$0xff] %v14679_v54 }
 0xb14   : > { %6422 = vrot.lane.b32.xlu0 %v14671_v14, %s18028_s17  ;;  %6688 = vrot.lane.b32.xlu1 %v14671_v14, %s17540_s21 }
 0xb16   : > { %v14685_v40 = vpop.permute.xlu0 %7454  ;;  %v14687_v5 = vpop.permute.xlu1 %7720 }
 0xb17   : > { %18046 = vst [vmem:[#allocation137_spill] sm:$0xff] %v14685_v40  ;;  %18047 = vst [vmem:[#allocation232_spill] sm:$0xff] %v14687_v5 }
 0xb18   : > { %7220 = vrot.lane.b32.xlu0 %v14671_v14, %s17542_s28  ;;  %6954 = vrot.lane.b32.xlu1 %v14671_v14, %s18029_s23 }
 0xb1a   : > { %v14693_v21 = vpop.permute.xlu0 %7986  ;;  %v14695_v12 = vpop.permute.xlu1 %6147 }
 0xb1b   : > { %18048 = vst [vmem:[#allocation245_spill] sm:$0xff] %v14693_v21 }
 0xb1c   : > { %7466 = vrot.lane.b32.xlu0 %v14671_v14, %s17541_s25  ;;  %7732 = vrot.lane.b32.xlu1 %v14671_v14, %s17229_s22 }
 0xb1e   : > { %v14701_v28 = vpop.permute.xlu0 %6414  ;;  %v14703_v41 = vpop.permute.xlu1 %6680 }
 0xb20   : > { %7998 = vrot.lane.b32.xlu0 %v14671_v14, %s17230_s24  ;;  %8264 = vrot.lane.b32.xlu1 %v14671_v14, %s17231_s27 }
 0xb22   : > { %v14709_v6 = vpop.permute.xlu0 %6946  ;;  %v14711_v21 = vpop.permute.xlu1 %7458 }
 0xb23   : > { %18049 = vst [vmem:[#allocation34_spill] sm:$0xff] %v14709_v6  ;;  %18050 = vst [vmem:[#allocation224_spill] sm:$0xff] %v14711_v21 }
 0xb24   : > { %6432 = vrot.lane.b32.xlu1 %v6045_v47, %s18028_s17  ;;  %6165 = vrot.lane.b32.xlu0 %v6045_v47, %s18027_s16 }
 0xb26   : > { %v14715_v34 = vpop.permute.xlu0 %7212  ;;  %v14717_v19 = vpop.permute.xlu1 %7724 }
 0xb27   : > { %18051 = vst [vmem:[#allocation209_spill] sm:$0xff] %v14715_v34  ;;  %18052 = vst [vmem:[#allocation136_spill] sm:$0xff] %v14717_v19  ;;  %v9981_v34 = vld [vmem:[#allocation2 + $0x90] sm:$0xff] }
 0xb28   : > { %6698 = vrot.lane.b32.xlu1 %v6045_v47, %s17540_s21  ;;  %7230 = vrot.lane.b32.xlu0 %v6045_v47, %s17542_s28 }
 0xb2a   : > { %v14721_v38 = vpop.permute.xlu0 %6145  ;;  %v14723_v57 = vpop.permute.xlu1 %7990 }
 0xb2b   : > { %18053 = vst [vmem:[#allocation122_spill] sm:$0xff] %v14723_v57 }
 0xb2c   : > { %6426 = vrot.lane.b32.xlu0 %v6042_v52, %s18028_s17  ;;  %6964 = vrot.lane.b32.xlu1 %v6045_v47, %s18029_s23 }
 0xb2e   : > { %v14727_v45 = vpop.permute.xlu0 %6678  ;;  %v14729_v26 = vpop.permute.xlu1 %6412 }
 0xb30   : > { %6430 = vrot.lane.b32.xlu0 %v6044_v22, %s18028_s17  ;;  %7476 = vrot.lane.b32.xlu1 %v6045_v47, %s17541_s25 }
 0xb32   : > { %v14733_v43 = vpop.permute.xlu0 %7456  ;;  %v14735_v62 = vpop.permute.xlu1 %6944 }
 0xb33   : > { %18054 = vst [vmem:[#allocation12_spill] sm:$0xff] %v14733_v43  ;;  %18055 = vst [vmem:[#allocation186_spill] sm:$0xff] %v14735_v62  ;;  %v9978_v43 = vld [vmem:[#allocation2 + $0xb8] sm:$0xff] }
 0xb34   : > { %6696 = vrot.lane.b32.xlu0 %v6044_v22, %s17540_s21  ;;  %7742 = vrot.lane.b32.xlu1 %v6045_v47, %s17229_s22 }
 0xb36   : > { %v14739_v57 = vpop.permute.xlu0 %7722  ;;  %v14741_v3 = vpop.permute.xlu1 %7210 }
 0xb37   : > { %18056 = vst [vmem:[#allocation165_spill] sm:$0xff] %v14739_v57  ;;  %18057 = vst [vmem:[#allocation143_spill] sm:$0xff] %v14741_v3 }
 0xb38   : > { %6692 = vrot.lane.b32.xlu0 %v6042_v52, %s17540_s21  ;;  %8008 = vrot.lane.b32.xlu1 %v6045_v47, %s17230_s24 }
 0xb3a   : > { %v14745_v15 = vpop.permute.xlu0 %7988  ;;  %v14747_v23 = vpop.permute.xlu1 %6416 }
 0xb3b   : > { %18058 = vst [vmem:[#allocation162_spill] sm:$0xff] %v14745_v15 }
 0xb3c   : > { %6962 = vrot.lane.b32.xlu0 %v6044_v22, %s18029_s23  ;;  %8274 = vrot.lane.b32.xlu1 %v6045_v47, %s17231_s27 }
 0xb3e   : > { %v14751_v50 = vpop.permute.xlu0 %6149  ;;  %v14753_v58 = vpop.permute.xlu1 %6948 }
 0xb3f   : > { %18059 = vst [vmem:[#allocation124_spill] sm:$0xff] %v14753_v58 }
 0xb40   : > { %6958 = vrot.lane.b32.xlu0 %v6042_v52, %s18029_s23  ;;  %6159 = vrot.lane.b32.xlu1 %v6042_v52, %s18027_s16 }
 0xb42   : > { %v14757_v9 = vpop.permute.xlu0 %6682  ;;  %v14759_v37 = vpop.permute.xlu1 %7726 }
 0xb43   : > { %18060 = vst [vmem:[#allocation38_spill] sm:$0xff] %v14759_v37 }
 0xb44   : > { %7224 = vrot.lane.b32.xlu0 %v6042_v52, %s17542_s28  ;;  %6163 = vrot.lane.b32.xlu1 %v6044_v22, %s18027_s16 }
 0xb46   : > { %v14763_v15 = vpop.permute.xlu0 %7214  ;;  %v14765_v5 = vpop.permute.xlu1 %8258 }
 0xb47   : > { %18061 = vst [vmem:[#allocation127_spill] sm:$0xff] %v14763_v15  ;;  %18062 = vst [vmem:[#allocation192_spill] sm:$0xff] %v14765_v5  ;;  %v9982_v15 = vld [vmem:[#allocation2 + $0xa0] sm:$0xff] }
 0xb48   : > { %7474 = vrot.lane.b32.xlu0 %v6044_v22, %s17541_s25  ;;  %7228 = vrot.lane.b32.xlu1 %v6044_v22, %s17542_s28 }
 0xb4a   : > { %v14769_v47 = vpop.permute.xlu0 %7460  ;;  %v14771_v57 = vpop.permute.xlu1 %6420 }
 0xb4b   : > { %18063 = vst [vmem:[#allocation96_spill] sm:$0xff] %v14769_v47 }
 0xb4c   : > { %7740 = vrot.lane.b32.xlu0 %v6044_v22, %s17229_s22  ;;  %7470 = vrot.lane.b32.xlu1 %v6042_v52, %s17541_s25 }
 0xb4e   : > { %v14775_v19 = vpop.permute.xlu0 %7992  ;;  %v14777_v37 = vpop.permute.xlu1 %6686 }
 0xb4f   : > { %18064 = vst [vmem:[#allocation109_spill] sm:$0xff] %v14775_v19 }
 0xb50   : > { %8006 = vrot.lane.b32.xlu0 %v6044_v22, %s17230_s24  ;;  %7736 = vrot.lane.b32.xlu1 %v6042_v52, %s17229_s22 }
 0xb52   : > { %v14781_v5 = vpop.permute.xlu0 %6153  ;;  %v14783_v4 = vpop.permute.xlu1 %7464 }
 0xb53   : > { %18065 = vst [vmem:[#allocation211_spill] sm:$0xff] %v14783_v4  ;;  %v9979_v4 = vld [vmem:[#allocation2 + $0xa8] sm:$0xff] }
 0xb54   : > { %8272 = vrot.lane.b32.xlu0 %v6044_v22, %s17231_s27  ;;  %8002 = vrot.lane.b32.xlu1 %v6042_v52, %s17230_s24 }
 0xb56   : > { %v14787_v56 = vpop.permute.xlu0 %6952  ;;  %v14789_v51 = vpop.permute.xlu1 %7730 }
 0xb57   : > { %18066 = vst [vmem:[#allocation36_spill] sm:$0xff] %v14787_v56  ;;  %18067 = vst [vmem:[#allocation80_spill] sm:$0xff] %v14789_v51  ;;  %v9995_v56 = vld [vmem:[#allocation2 + $0x20] sm:$0xff] }
 0xb58   : > { %6157 = vrot.lane.b32.xlu0 %v14471_v0, %s18027_s16  ;;  %8268 = vrot.lane.b32.xlu1 %v6042_v52, %s17231_s27 }
 0xb5a   : > { %v14794_v19 = vpop.permute.xlu0 %7218  ;;  %v14796_v32 = vpop.permute.xlu1 %7996 }
 0xb5b   : > { %18068 = vst [vmem:[#allocation185_spill] sm:$0xff] %v14794_v19  ;;  %18069 = vst [vmem:[#allocation41_spill] sm:$0xff] %v14796_v32  ;;  %v9977_v32 = vld [vmem:[#allocation2 + $0xb0] sm:$0xff] }
 0xb5c   : > { %8254 = vrot.lane.b32.xlu0 %v14442_v24, %s17231_s27  ;;  %8256 = vrot.lane.b32.xlu1 %v14529_v49, %s17231_s27 }
 0xb5e   : > { %v14802_v22 = vpop.permute.xlu0 %6161  ;;  %v14804_v40 = vpop.permute.xlu1 %8262 }
 0xb5f   : > { %18070 = vst [vmem:[#allocation60_spill] sm:$0xff] %v14804_v40 }
 0xb60   : > { %7980 = vrot.lane.b32.xlu0 %v14446_v61, %s17230_s24  ;;  %8252 = vrot.lane.b32.xlu1 %v14511_v31, %s17231_s27 }
 0xb62   : > { %v14810_v52 = vpop.permute.xlu0 %6418  ;;  %v14812_v51 = vpop.permute.xlu1 %6151 }
 0xb64   : > { %7976 = vrot.lane.b32.xlu0 %v9977_v32, %s17230_s24  ;;  %7978 = vrot.lane.b32.xlu1 %v9978_v43, %s17230_s24 }
 0xb66   : > { %v14816_v49 = vpop.permute.xlu0 %6694  ;;  %v14818_v21 = vpop.permute.xlu1 %6428 }
 0xb68   : > { %8248 = vrot.lane.b32.xlu0 %v14493_v60, %s17231_s27  ;;  %8250 = vrot.lane.b32.xlu1 %v14475_v27, %s17231_s27 }
 0xb6a   : > { %v14824_v40 = vpop.permute.xlu0 %6684  ;;  %v14826_v47 = vpop.permute.xlu1 %6950 }
 0xb6b   : > { %18071 = vst [vmem:[#allocation145_spill] sm:$0xff] %v14826_v47 }
 0xb6c   : > { %7974 = vrot.lane.b32.xlu0 %v9979_v4, %s17230_s24  ;;  %6424 = vrot.lane.b32.xlu1 %v14471_v0, %s18028_s17 }
 0xb6e   : > { %v14831_v55 = vpop.permute.xlu0 %6960  ;;  %v14833_v7 = vpop.permute.xlu1 %7216 }
 0xb6f   : > { %18072 = vst [vmem:[#allocation164_spill] sm:$0xff] %v14833_v7 }
 0xb70   : > { %7970 = vrot.lane.b32.xlu0 %v9980_v8, %s17230_s24  ;;  %6690 = vrot.lane.b32.xlu1 %v14471_v0, %s17540_s21 }
 0xb72   : > { %v14838_v27 = vpop.permute.xlu0 %7226  ;;  %v14840_v30 = vpop.permute.xlu1 %7472 }
 0xb73   : > { %18073 = vst [vmem:[#allocation10_spill] sm:$0xff] %v14838_v27  ;;  %18074 = vst [vmem:[#allocation132_spill] sm:$0xff] %v14840_v30  ;;  %v9983_v30 = vld [vmem:[#allocation2 + $0x80] sm:$0xff] }
 0xb74   : > { %8242 = vrot.lane.b32.xlu0 %v9977_v32, %s17231_s27  ;;  %8246 = vrot.lane.b32.xlu1 %v14446_v61, %s17231_s27 }
 0xb76   : > { %v14845_v42 = vpop.permute.xlu0 %7462  ;;  %v14847_v3 = vpop.permute.xlu1 %7738 }
 0xb77   : > { %18075 = vst [vmem:[#allocation98_spill] sm:$0xff] %v14845_v42  ;;  %18076 = vst [vmem:[#allocation111_spill] sm:$0xff] %v14847_v3 }
 0xb78   : > { %7968 = vrot.lane.b32.xlu0 %v9981_v34, %s17230_s24  ;;  %7972 = vrot.lane.b32.xlu1 %v9982_v15, %s17230_s24 }
 0xb7a   : > { %v14851_v7 = vpop.permute.xlu0 %7728  ;;  %v14853_v19 = vpop.permute.xlu1 %8004 }
 0xb7b   : > { %18077 = vst [vmem:[#allocation275_spill] sm:$0xff] %v14851_v7  ;;  %18078 = vst [vmem:[#allocation252_spill] sm:$0xff] %v14853_v19  ;;  %v9984_v7 = vld [vmem:[#allocation2 + $0x78] sm:$0xff] }
 0xb7c   : > { %7964 = vrot.lane.b32.xlu0 %v9983_v30, %s17230_s24  ;;  %8244 = vrot.lane.b32.xlu1 %v9978_v43, %s17231_s27 }
 0xb7e   : > { %v14857_v32 = vpop.permute.xlu0 %7994  ;;  %v14859_v42 = vpop.permute.xlu1 %8270 }
 0xb7f   : > { %18079 = vst [vmem:[#allocation77_spill] sm:$0xff] %v14857_v32  ;;  %18080 = vst [vmem:[#allocation48_spill] sm:$0xff] %v14859_v42  ;;  %v9985_v32 = vld [vmem:[#allocation2 + $0x68] sm:$0xff] }
 0xb80   : > { %8236 = vrot.lane.b32.xlu0 %v9980_v8, %s17231_s27  ;;  %8240 = vrot.lane.b32.xlu1 %v9979_v4, %s17231_s27 }
 0xb82   : > { %v14863_v3 = vpop.permute.xlu0 %8260  ;;  %v14865_v44 = vpop.permute.xlu1 %6155 }
 0xb83   : > { %18081 = vst [vmem:[#allocation63_spill] sm:$0xff] %v14863_v3  ;;  %v9986_v3 = vld [vmem:[#allocation2 + $0x88] sm:$0xff] }
 0xb84   : > { %7962 = vrot.lane.b32.xlu0 %v9984_v7, %s17230_s24  ;;  %6956 = vrot.lane.b32.xlu1 %v14471_v0, %s18029_s23 }
 0xb86   : > { %v14870_v19 = vpop.permute.xlu0 %6422  ;;  %v14872_v43 = vpop.permute.xlu1 %6688 }
 0xb88   : > { %7958 = vrot.lane.b32.xlu0 %v9985_v32, %s17230_s24  ;;  %7222 = vrot.lane.b32.xlu1 %v14471_v0, %s17542_s28 }
 0xb8a   : > { %v14877_v4 = vpop.permute.xlu0 %7220  ;;  %v14879_v8 = vpop.permute.xlu1 %6954 }
 0xb8b   : > { %18082 = vst [vmem:[#allocation279_spill] sm:$0xff] %v14877_v4  ;;  %18083 = vst [vmem:[#allocation8_spill] sm:$0xff] %v14879_v8  ;;  %v9988_v4 = vld [vmem:[#allocation2 + $0x50] sm:$0xff] }
 0xb8c   : > { %8230 = vrot.lane.b32.xlu0 %v9983_v30, %s17231_s27  ;;  %7966 = vrot.lane.b32.xlu1 %v9986_v3, %s17230_s24 }
 0xb8e   : > { %v14883_v42 = vpop.permute.xlu0 %7466  ;;  %v14885_v53 = vpop.permute.xlu1 %7732 }
 0xb8f   : > { %18084 = vst [vmem:[#allocation262_spill] sm:$0xff] %v14883_v42  ;;  %18085 = vst [vmem:[#allocation234_spill] sm:$0xff] %v14885_v53  ;;  %v9989_v42 = vld [vmem:[#allocation2 + $0x70] sm:$0xff] }
 0xb90   : > { %7956 = vrot.lane.b32.xlu0 %v9987_v13, %s17230_s24  ;;  %8238 = vrot.lane.b32.xlu1 %v9982_v15, %s17231_s27  ;;  %v9990_v15 = vld [vmem:[#allocation2 + $0x48] sm:$0xff] }
 0xb92   : > { %v14889_v1 = vpop.permute.xlu0 %7998  ;;  %v14891_v54 = vpop.permute.xlu1 %8264 }
 0xb93   : > { %18086 = vst [vmem:[#allocation247_spill] sm:$0xff] %v14889_v1  ;;  %18087 = vst [vmem:[#allocation276_spill] sm:$0xff] %v14891_v54 }
 0xb94   : > { %7952 = vrot.lane.b32.xlu0 %v9988_v4, %s17230_s24  ;;  %8234 = vrot.lane.b32.xlu1 %v9981_v34, %s17231_s27 }
 0xb96   : > { %v6166_v30 = vpop.permute.xlu0 %6165  ;;  %v6433_v27 = vpop.permute.xlu1 %6432 }
 0xb98   : > { %8224 = vrot.lane.b32.xlu0 %v9985_v32, %s17231_s27  ;;  %7960 = vrot.lane.b32.xlu1 %v9989_v42, %s17230_s24 }
 0xb9a   : > { %v14897_v53 = vpop.permute.xlu0 %7230  ;;  %v14899_v62 = vpop.permute.xlu1 %6698 }
 0xb9b   : > { %18088 = vst [vmem:[#allocation280_spill] sm:$0xff] %v14897_v53 }
 0xb9c   : > { %7950 = vrot.lane.b32.xlu0 %v9990_v15, %s17230_s24  ;;  %8232 = vrot.lane.b32.xlu1 %v9986_v3, %s17231_s27  ;;  %v9991_v3 = vld [vmem:[#allocation2 + $0x58] sm:$0xff] }
 0xb9e   : > { %v14903_v54 = vpop.permute.xlu0 %6426  ;;  %v14905_v1 = vpop.permute.xlu1 %6964 }
 0xba0   : > { %7468 = vrot.lane.b32.xlu0 %v14471_v0, %s17541_s25  ;;  %8228 = vrot.lane.b32.xlu1 %v9984_v7, %s17231_s27 }
 0xba2   : > { %v6431_v34 = vpop.permute.xlu0 %6430  ;;  %v14910_v32 = vpop.permute.xlu1 %7476 }
 0xba3   : > { %18089 = vst [vmem:[#allocation254_spill] sm:$0xff] %v14910_v32  ;;  %v6458_v53 = vsel %vm701_vm8, %v14818_v21, %v6431_v34  ;;  %v6459_v6 = vsel %vm701_vm8, %v6431_v34, %v6433_v27  ;;  %v9992_v32 = vld [vmem:[#allocation2 + $0x38] sm:$0xff]  ;;  %v9993_v34 = vld [vmem:[#allocation2 + $0x30] sm:$0xff] }
 0xba4   : > { %7734 = vrot.lane.b32.xlu0 %v14471_v0, %s17229_s22  ;;  %7954 = vrot.lane.b32.xlu1 %v9991_v3, %s17230_s24 }
 0xba5   : > { %9835 = vmatprep.subr.msk.mxu0 %vm568_vm5, %v6459_v6 }
 0xba6   : > { %9836 = vmatpush1.msk.msra.mxu0 %vm568_vm5, %v6458_v53  ;;  %v14920_v58 = vpop.permute.xlu0 %6696  ;;  %v14922_v7 = vpop.permute.xlu1 %7742 }
 0xba7   : > { %18090 = vst [vmem:[#allocation226_spill] sm:$0xff] %v14922_v7  ;;  %v9994_v7 = vld [vmem:[#allocation2 + $0x40] sm:$0xff] }
 0xba8   : > { %7946 = vrot.lane.b32.xlu0 %v9992_v32, %s17230_s24  ;;  %8226 = vrot.lane.b32.xlu1 %v9989_v42, %s17231_s27 }
 0xbaa   : > { %v14926_v21 = vpop.permute.xlu0 %6692  ;;  %v14928_v27 = vpop.permute.xlu1 %8008 }
 0xbab   : > { %18091 = vst [vmem:[#allocation40_spill] sm:$0xff] %v14928_v27 }
 0xbac   : > { %8218 = vrot.lane.b32.xlu0 %v9988_v4, %s17231_s27  ;;  %8222 = vrot.lane.b32.xlu1 %v9987_v13, %s17231_s27 }
 0xbae   : > { %v14932_v6 = vpop.permute.xlu0 %6962  ;;  %v14934_v53 = vpop.permute.xlu1 %8274 }
 0xbaf   : > { %18092 = vst [vmem:[#allocation13_spill] sm:$0xff] %v14934_v53 }
 0xbb0   : > { %7944 = vrot.lane.b32.xlu0 %v9993_v34, %s17230_s24  ;;  %7948 = vrot.lane.b32.xlu1 %v9994_v7, %s17230_s24 }
 0xbb2   : > { %v14938_v47 = vpop.permute.xlu0 %6958  ;;  %v6160_v42 = vpop.permute.xlu1 %6159 }
 0xbb3   : > { %18093 = vst [vmem:[#allocation281_spill] sm:$0xff] %v14938_v47 }
 0xbb4   : > { %7940 = vrot.lane.b32.xlu0 %v9995_v56, %s17230_s24  ;;  %8220 = vrot.lane.b32.xlu1 %v9991_v3, %s17231_s27  ;;  %v9996_v3 = vld [vmem:[#allocation2 + $0x28] sm:$0xff] }
 0xbb6   : > { %v14942_v4 = vpop.permute.xlu0 %7224  ;;  %v6164_v13 = vpop.permute.xlu1 %6163 }
 0xbb7   : > { %v6191_v53 = vsel %vm552_vm4, %v14802_v22, %v6164_v13  ;;  %v6192_v27 = vsel %vm552_vm4, %v6164_v13, %v6166_v30 }
 0xbb8   : > { %8212 = vrot.lane.b32.xlu0 %v9992_v32, %s17231_s27  ;;  %8216 = vrot.lane.b32.xlu1 %v9990_v15, %s17231_s27 }
 0xbb9   : > { %9825 = vmatprep.subr.msk.mxu1 %vm568_vm5, %v6192_v27  ;;  %v9997_v27 = vld [vmem:[#allocation2 + $0x18] sm:$0xff] }
 0xbba   : > { %9826 = vmatpush1.msk.msra.mxu1 %vm568_vm5, %v6191_v53  ;;  %v14951_v8 = vpop.permute.xlu0 %7474  ;;  %v14953_v47 = vpop.permute.xlu1 %7228 }
 0xbbc   : > { %8000 = vrot.lane.b32.xlu0 %v14471_v0, %s17230_s24  ;;  %7942 = vrot.lane.b32.xlu1 %v9996_v3, %s17230_s24 }
 0xbbe   : > { %v14958_v22 = vpop.permute.xlu0 %7740  ;;  %v14960_v30 = vpop.permute.xlu1 %7470 }
 0xbbf   : > { %18094 = vst [vmem:[#allocation202_spill] sm:$0xff] %v14958_v22  ;;  %18095 = vst [vmem:[#allocation263_spill] sm:$0xff] %v14960_v30  ;;  %v9998_v22 = vld [vmem:[#allocation2 + $0x8] sm:$0xff]  ;;  %v9999_v30 = vld [vmem:[#allocation2 + $0x10] sm:$0xff] }
 0xbc0   : > { %8266 = vrot.lane.b32.xlu0 %v14471_v0, %s17231_s27  ;;  %8214 = vrot.lane.b32.xlu1 %v9994_v7, %s17231_s27 }
 0xbc2   : > { %v14965_v15 = vpop.permute.xlu0 %8006  ;;  %v14967_v32 = vpop.permute.xlu1 %7736 }
 0xbc3   : > { %18096 = vst [vmem:[#allocation86_spill] sm:$0xff] %v14965_v15  ;;  %18097 = vst [vmem:[#allocation120_spill] sm:$0xff] %v14967_v32 }
 0xbc4   : > { %7938 = vrot.lane.b32.xlu0 %v9997_v27, %s17230_s24  ;;  %8210 = vrot.lane.b32.xlu1 %v9993_v34, %s17231_s27 }
 0xbc6   : > { %v14971_v53 = vpop.permute.xlu0 %8272  ;;  %v14973_v13 = vpop.permute.xlu1 %8002 }
 0xbc7   : > { %18098 = vst [vmem:[#allocation236_spill] sm:$0xff] %v14971_v53  ;;  %18099 = vst [vmem:[#allocation249_spill] sm:$0xff] %v14973_v13  ;;  %v6188_v53 = vsel %vm552_vm4, %v14812_v51, %v14781_v5  ;;  %v6185_v5 = vsel %vm552_vm4, %v14662_v29, %v14721_v38 }
 0xbc8   : > { %7934 = vrot.lane.b32.xlu0 %v9998_v22, %s17230_s24  ;;  %7936 = vrot.lane.b32.xlu1 %v9999_v30, %s17230_s24 }
 0xbca   : > { %v6158_v0 = vpop.permute.xlu0 %6157  ;;  %v14977_v7 = vpop.permute.xlu1 %8268 }
 0xbcb   : > { %v6190_v15 = vsel %vm552_vm4, %v6158_v0, %v6160_v42  ;;  %v6189_v32 = vsel %vm552_vm4, %v14865_v44, %v6158_v0  ;;  %v6187_v42 = vsel %vm552_vm4, %v14751_v50, %v14812_v51  ;;  %v10000_v44 = vld [vmem:[#allocation2] sm:$0xff]  ;;  %v6184_v51 = vsel %vm552_vm4, %v14635_v39, %v14611_v18 }
 0xbcc   : > { %8206 = vrot.lane.b32.xlu0 %v9995_v56, %s17231_s27  ;;  %8208 = vrot.lane.b32.xlu1 %v9996_v3, %s17231_s27  ;;  %v6186_v56 = vsel %vm552_vm4, %v14721_v38, %v14695_v12  ;;  %v6183_v12 = vsel %vm552_vm4, %v14587_v11, %v14635_v39  ;;  %v18101_v38 = vld [vmem:[#allocation264_spill] sm:$0xff] }
 0xbcd   : > { %6242 = vmatprep.subr.mxu1 %v6190_v15  ;;  %v18100_v15 = vld [vmem:[#allocation282_spill] sm:$0xff]  ;;  %v6181_v18 = vsel %vm552_vm4, %v18101_v38, %v14397_v46 }
 0xbce   : > { %6243 = vmatpush1.msra.mxu1 %v6189_v32  ;;  %v14984_v34 = vpop.permute.xlu0 %8254  ;;  %v14989_v13 = vpop.permute.xlu1 %8256  ;;  %v6182_v29 = vsel %vm552_vm4, %v14397_v46, %v18100_v15  ;;  %v18105_v46 = vld [vmem:[#allocation154_spill] sm:$0xff] }
 0xbcf   : > { %6244 = vmatprep.subr.mxu1 %v6188_v53  ;;  %v18103_v53 = vld [vmem:[#allocation251_spill] sm:$0xff]  ;;  %v18109_v38 = vld [vmem:[#allocation90_spill] sm:$0xff] }
 0xbd0   : > { %6245 = vmatpush1.msra.mxu1 %v6187_v42  ;;  %7932 = vrot.lane.b32.xlu0 %v10000_v44, %s17230_s24  ;;  %v18106_v42 = vld [vmem:[#allocation14_spill] sm:$0xff] }
 0xbd1   : > { %8204 = vrot.lane.b32.xlu1 %v9997_v27, %s17231_s27  ;;  %6246 = vmatprep.subr.mxu1 %v6186_v56  ;;  %v18102_v27 = vld [vmem:[#allocation237_spill] sm:$0xff]  ;;  %v6178_v56 = vsel %vm552_vm4, %v18106_v42, %v18105_v46  ;;  %v18113_v46 = vld [vmem:[#allocation190_spill] sm:$0xff] }
 0xbd2   : > { %6247 = vmatpush1.msra.mxu1 %v6185_v5  ;;  %v15002_v3 = vpop.permute.xlu0 %7980  ;;  %v15007_v50 = vpop.permute.xlu1 %8252  ;;  %v6180_v39 = vsel %vm552_vm4, %v18103_v53, %v18102_v27  ;;  %v18107_v5 = vld [vmem:[#allocation142_spill] sm:$0xff]  ;;  %v8460_v27 = vld [vmem:[%s16952_s9 + $0x8] sm:$0xff] }
 0xbd3   : > { %6248 = vmatprep.subr.mxu1 %v6184_v51  ;;  %v6177_v51 = vsel %vm552_vm4, %v18107_v5, %v18106_v42 }
 0xbd4   : > { %6249 = vmatpush1.msra.mxu1 %v6183_v12  ;;  %8200 = vrot.lane.b32.xlu0 %v9998_v22, %s17231_s27  ;;  %v8461_v22 = vld [vmem:[%s16952_s9 + $0x10] sm:$0xff]  ;;  %v8462_v12 = vld [vmem:[%s16952_s9 + $0x18] sm:$0xff] }
 0xbd5   : > { %8202 = vrot.lane.b32.xlu1 %v9999_v30, %s17231_s27  ;;  %6250 = vmatprep.subr.mxu1 %v6182_v29  ;;  %v18104_v30 = vld [vmem:[#allocation223_spill] sm:$0xff]  ;;  %v18108_v29 = vld [vmem:[#allocation69_spill] sm:$0xff] }
 0xbd6   : > { %6251 = vmatpush1.msra.mxu1 %v6181_v18  ;;  %v15020_v32 = vpop.permute.xlu0 %7976  ;;  %v15025_v11 = vpop.permute.xlu1 %7978  ;;  %v6179_v0 = vsel %vm552_vm4, %v18104_v30, %v18103_v53  ;;  %v18110_v53 = vld [vmem:[#allocation201_spill] sm:$0xff]  ;;  %v18112_v30 = vld [vmem:[#allocation119_spill] sm:$0xff] }
 0xbd7   : > { %6252 = vmatprep.subr.mxu1 %v6180_v39  ;;  %v6175_v39 = vsel %vm552_vm4, %v18110_v53, %v18109_v38  ;;  %v6173_v42 = vsel %vm552_vm4, %v18113_v46, %v18112_v30  ;;  %v18119_v46 = vld [vmem:[#allocation83_spill] sm:$0xff] }
 0xbd8   : > { %6253 = vmatpush1.msra.mxu1 %v6179_v0  ;;  %8198 = vrot.lane.b32.xlu0 %v10000_v44, %s17231_s27  ;;  %v6176_v44 = vsel %vm552_vm4, %v18109_v38, %v18108_v29  ;;  %v18115_v29 = vld [vmem:[#allocation170_spill] sm:$0xff]  ;;  %s10087_s27 = smov 64  }
 0xbd9   : > { %8475 = vperm.xlu1 %9961, %v8461_v22   ;;  %6254 = vmatprep.subr.mxu1 %v6178_v56  ;;  %v18111_v22 = vld [vmem:[#allocation213_spill] sm:$0xff]  ;;  %v8459_v56 = vld [vmem:[%s16952_s9] sm:$0xff] }
 0xbda   : > { %6255 = vmatpush1.msra.mxu1 %v6177_v51  ;;  %v15043_v15 = vpop.permute.xlu0 %8248  ;;  %v15048_v18 = vpop.permute.xlu1 %8250  ;;  %v6174_v0 = vsel %vm552_vm4, %v18112_v30, %v18111_v22  ;;  %v18114_v51 = vld [vmem:[#allocation151_spill] sm:$0xff]  ;;  %v18118_v22 = vld [vmem:[#allocation113_spill] sm:$0xff] }
 0xbdb   : > { %6256 = vmatprep.subr.mxu1 %v6176_v44  ;;  %v18116_v44 = vld [vmem:[#allocation131_spill] sm:$0xff] }
 0xbdc   : > { %6257 = vmatpush1.msra.mxu1 %v6175_v39  ;;  %8480 = vperm.xlu0 %9962, %v8462_v12   ;;  %v6172_v12 = vsel %vm552_vm4, %v18115_v29, %v18114_v51  ;;  %v18117_v39 = vld [vmem:[#allocation100_spill] sm:$0xff]  ;;  %v18121_v51 = vld [vmem:[#allocation66_spill] sm:$0xff] }
 0xbdd   : > { %8470 = vperm.xlu1 %9961, %v8460_v27   ;;  %6258 = vmatprep.subr.mxu1 %v6174_v0  ;;  %v6171_v27 = vsel %vm552_vm4, %v18116_v44, %v18115_v29  ;;  %v6170_v30 = vsel %vm552_vm4, %v18118_v22, %v18117_v39  ;;  %v6454_v44 = vsel %vm701_vm8, %v14747_v23, %v14810_v52 }
 0xbde   : > { %6259 = vmatpush1.msra.mxu1 %v6173_v42  ;;  %v15065_v5 = vpop.permute.xlu0 %7974  ;;  %v6425_v38 = vpop.permute.xlu1 %6424  ;;  %v6169_v42 = vsel %vm552_vm4, %v18119_v46, %v18118_v22  ;;  %v6725_v23 = vsel %vm849_vm6, %v14920_v58, %v14899_v62  ;;  %v6451_v62 = vsel %vm701_vm8, %v14640_v16, %v14607_v63  ;;  %v6717_v46 = vsel %vm849_vm6, %v14642_v36, %v14619_v48 }
 0xbdf   : > { %6260 = vmatprep.subr.mxu1 %v6172_v12  ;;  %v6457_v53 = vsel %vm701_vm8, %v6425_v38, %v14903_v54  ;;  %v6456_v0 = vsel %vm701_vm8, %v14870_v19, %v6425_v38  ;;  %v6455_v19 = vsel %vm701_vm8, %v14810_v52, %v14771_v57  ;;  %v6453_v57 = vsel %vm701_vm8, %v14729_v26, %v14701_v28 }
 0xbe0   : > { %6261 = vmatpush1.msra.mxu1 %v6171_v27  ;;  %8465 = vperm.xlu0 %9962, %v8459_v56   ;;  %v18120_v56 = vld [vmem:[#allocation47_spill] sm:$0xff]  ;;  %v6452_v28 = vsel %vm701_vm8, %v14667_v17, %v14729_v26 }
 0xbe1   : > { %9062 = vrot.lane.b32.xlu1 %v14671_v14, %s17542_s28  ;;  %6262 = vmatprep.subr.mxu1 %v6170_v30  ;;  %v6168_v29 = vsel %vm552_vm4, %v18121_v51, %v18120_v56  ;;  %v18122_v14 = vld [vmem:[#allocation9_spill] sm:$0xff]  ;;  %v6046_v27 = vld [vmem:[%s16951_s8] sm:$0xff] }
 0xbe2   : > { %6508 = vmatprep.subr.mxu0 %v6457_v53  ;;  %6263 = vmatpush1.msra.mxu1 %v6169_v42  ;;  %v15085_v54 = vpop.permute.xlu0 %7970  ;;  %v6167_v12 = vsel %vm552_vm4, %v18122_v14, %v18121_v51  ;;  %v6691_v38 = vpop.permute.xlu1 %6690  ;;  %v6724_v53 = vsel %vm849_vm6, %v14816_v49, %v14920_v58  ;;  %v6450_v58 = vsel %vm701_vm8, %v14589_v59, %v14640_v16  ;;  %v18123_v17 = vld [vmem:[#allocation283_spill] sm:$0xff]  ;;  %v18124_v59 = vld [vmem:[#allocation265_spill] sm:$0xff]  ;;  %vm18163_vm4 = vcmask 924672  }
 0xbe3   : > { %6509 = vmatpush1.msra.mxu0 %v6456_v0  ;;  %6264 = vmatprep.subr.mxu1 %v6168_v29  ;;  %v6449_v63 = vsel %vm701_vm8, %v14403_v35, %v18123_v17  ;;  %v6721_v16 = vsel %vm849_vm6, %v14824_v40, %v14777_v37  ;;  %v6448_v49 = vsel %vm701_vm8, %v18124_v59, %v14403_v35  ;;  %v18127_v35 = vld [vmem:[#allocation228_spill] sm:$0xff]  ;;  %v18129_v30 = vld [vmem:[#allocation217_spill] sm:$0xff]  ;;  %v18131_v42 = vld [vmem:[#allocation199_spill] sm:$0xff] }
 0xbe4   : > { %6510 = vmatprep.subr.mxu0 %v6455_v19  ;;  %6265 = vmatpush1.msra.mxu1 %v6167_v12  ;;  %v6719_v37 = vsel %vm849_vm6, %v14727_v45, %v14703_v41  ;;  %v18128_v41 = vld [vmem:[#allocation197_spill] sm:$0xff]  ;;  %v18132_v56 = vld [vmem:[#allocation35_spill] sm:$0xff]  ;;  %v18133_v29 = vld [vmem:[#allocation284_spill] sm:$0xff] }
 0xbe5   : > { %6511 = vmatpush1.msra.mxu0 %v6454_v44  ;;  %9060 = vrot.lane.b32.xlu0 %v14454_v10, %s17542_s28  ;;  %v6723_v10 = vsel %vm849_vm6, %v6691_v38, %v14926_v21  ;;  %v18126_v21 = vld [vmem:[#allocation256_spill] sm:$0xff]  ;;  %v6445_v0 = vsel %vm701_vm8, %v18129_v30, %v18128_v41  ;;  %v6443_v51 = vsel %vm701_vm8, %v18132_v56, %v18131_v42  ;;  %v18134_v19 = vld [vmem:[#allocation178_spill] sm:$0xff]  ;;  %v15197_v12 = vld [vmem:[#allocation2 + $0xb0] sm:$0xff] }
 0xbe6   : > { %9058 = vrot.lane.b32.xlu1 %v14563_v2, %s17542_s28  ;;  %6512 = vmatprep.subr.mxu0 %v6453_v57  ;;  %v15112_v52 = vpop.permute.xlu0 %8242  ;;  %v6722_v2 = vsel %vm849_vm6, %v14872_v43, %v6691_v38  ;;  %v15133_v26 = vpop.permute.xlu1 %8246  ;;  %v6446_v22 = vsel %vm701_vm8, %v18127_v35, %v18126_v21  ;;  %v6715_v48 = vsel %vm849_vm6, %v14401_v25, %v18133_v29  ;;  %v15199_v38 = vld [vmem:[#allocation2 + $0xa8] sm:$0xff]  ;;  %v18136_v44 = vld [vmem:[#allocation214_spill] sm:$0xff]  ;;  %v18142_v17 = vld [vmem:[#allocation225_spill] sm:$0xff] }
 0xbe7   : > { %9845 = vmatprep.subr.msk.mxu1 %vm568_vm5, %v6725_v23  ;;  %9827 = vmatmul.mubr.msk.f32.vlgmr.msra.gmra.mxu1 %vm6217_vm10, %v6046_v27  ;;  %v6442_v14 = vsel %vm701_vm8, %v18134_v19, %v18132_v56  ;;  %v18137_v27 = vld [vmem:[#allocation153_spill] sm:$0xff]  ;;  %v18138_v23 = vld [vmem:[#allocation238_spill] sm:$0xff]  ;;  %v18154_v19 = vld [vmem:[#allocation200_spill] sm:$0xff] }
 0xbe8   : > { %6513 = vmatpush1.msra.mxu0 %v6452_v28  ;;  %9846 = vmatpush1.msk.msra.mxu1 %vm568_vm5, %v6724_v53  ;;  %v6441_v57 = vsel %vm701_vm8, %v18137_v27, %v18136_v44  ;;  %v18139_v53 = vld [vmem:[#allocation253_spill] sm:$0xff]  ;;  %v18144_v59 = vld [vmem:[#allocation174_spill] sm:$0xff]  ;;  %vm18169_vm9 = vmmov %vm18163_vm4 }
 0xbe9   : > { %6514 = vmatprep.subr.mxu0 %v6451_v62  ;;  %6774 = vmatprep.subr.mxu1 %v6723_v10  ;;  %v18140_v62 = vld [vmem:[#allocation189_spill] sm:$0xff]  ;;  %v15238_v41 = vld [vmem:[#allocation2 + $0x98] sm:$0xff]  ;;  %vm18172_vm11 = vmmov %vm18163_vm4 }
 0xbea   : > { %6515 = vmatpush1.msra.mxu0 %v6450_v58  ;;  %6775 = vmatpush1.msra.mxu1 %v6722_v2  ;;  %v15151_v43 = vpop.permute.xlu0 %7968  ;;  %v6440_v10 = vsel %vm701_vm8, %v18140_v62, %v18137_v27  ;;  %v6047_v58 = vld [vmem:[%s16951_s8 + $0x8] sm:$0xff]  ;;  %v18141_v2 = vmov 0.0   ;;  %vm18177_vm12 = vmmov %vm18163_vm4 }
 0xbeb   : > { %9056 = vrot.lane.b32.xlu0 %v14442_v24, %s17542_s28  ;;  %9054 = vrot.lane.b32.xlu1 %v14511_v31, %s17542_s28  ;;  %v6720_v24 = vsel %vm849_vm6, %v14757_v9, %v14824_v40  ;;  %v18125_v31 = vld [vmem:[#allocation235_spill] sm:$0xff]  ;;  %v6718_v9 = vsel %vm849_vm6, %v14669_v20, %v14727_v45  ;;  %v15165_v40 = vpop.permute.xlu1 %7972  ;;  %vm18180_vm15 = vmmov %vm18163_vm4 }
 0xbec   : > { %6516 = vmatprep.subr.mxu0 %v6449_v63  ;;  %6776 = vmatprep.subr.mxu1 %v6721_v16  ;;  %v6447_v39 = vsel %vm701_vm8, %v18126_v21, %v18125_v31  ;;  %v18130_v45 = vld [vmem:[#allocation167_spill] sm:$0xff]  ;;  %v6712_v63 = vsel %vm849_vm6, %v18142_v17, %v18139_v53  ;;  %v18143_v16 = vld [vmem:[#allocation150_spill] sm:$0xff]  ;;  %v18145_v31 = vld [vmem:[#allocation177_spill] sm:$0xff] }
 0xbed   : > { %6517 = vmatpush1.msra.mxu0 %v6448_v49  ;;  %6777 = vmatpush1.msra.mxu1 %v6720_v24  ;;  %v6444_v20 = vsel %vm701_vm8, %v18130_v45, %v18129_v30  ;;  %v6439_v49 = vsel %vm701_vm8, %v18144_v59, %v18143_v16  ;;  %v18146_v21 = vld [vmem:[#allocation216_spill] sm:$0xff]  ;;  %v15240_v30 = vld [vmem:[#allocation2 + $0x90] sm:$0xff]  ;;  %v9831_v17 = vld [vmem:[%s16951_s8 + $0x20] sm:$0xff] }
 0xbee   : > { %6518 = vmatprep.subr.mxu0 %v6447_v39  ;;  %6778 = vmatprep.subr.mxu1 %v6719_v37  ;;  %v6711_v39 = vsel %vm849_vm6, %v18146_v21, %v18145_v31  ;;  %v18147_v37 = vld [vmem:[#allocation135_spill] sm:$0xff]  ;;  %v15284_v16 = vld [vmem:[#allocation2 + $0x78] sm:$0xff]  ;;  %vm18183_vm14 = vmmov %vm18163_vm4 }
 0xbef   : > { %6519 = vmatpush1.msra.mxu0 %v6446_v22  ;;  %6779 = vmatpush1.msra.mxu1 %v6718_v9  ;;  %v15211_v28 = vpop.permute.xlu1 %8244  ;;  %v6438_v35 = vsel %vm701_vm8, %v18147_v37, %v18144_v59  ;;  %v18148_v22 = vld [vmem:[#allocation121_spill] sm:$0xff]  ;;  %v18161_v59 = vld [vmem:[#allocation152_spill] sm:$0xff]  ;;  %v6049_v37 = vld [vmem:[%s16951_s8 + $0x18] sm:$0xff] }
 0xbf0   : > { %9052 = vrot.lane.b32.xlu0 %v14493_v60, %s17542_s28  ;;  %9050 = vrot.lane.b32.xlu1 %v14446_v61, %s17542_s28  ;;  %v6716_v60 = vsel %vm849_vm6, %v14593_v33, %v14642_v36  ;;  %v15183_v61 = vpop.permute.xlu0 %7964  ;;  %v18135_v36 = vld [vmem:[#allocation266_spill] sm:$0xff]  ;;  %v6710_v9 = vsel %vm849_vm6, %v18148_v22, %v18146_v21  ;;  %v18165_v22 = vld [vmem:[#allocation133_spill] sm:$0xff] }
 0xbf1   : > { %6520 = vmatprep.subr.mxu0 %v6445_v0  ;;  %6780 = vmatprep.subr.mxu1 %v6717_v46  ;;  %v6714_v33 = vsel %vm849_vm6, %v18135_v36, %v14401_v25  ;;  %v6713_v25 = vsel %vm849_vm6, %v18139_v53, %v18138_v23  ;;  %v18149_v0 = vld [vmem:[#allocation99_spill] sm:$0xff]  ;;  %v18150_v46 = vld [vmem:[#allocation118_spill] sm:$0xff]  ;;  %v18158_v23 = vld [vmem:[#allocation88_spill] sm:$0xff] }
 0xbf2   : > { %6521 = vmatpush1.msra.mxu0 %v6444_v20  ;;  %6781 = vmatpush1.msra.mxu1 %v6716_v60  ;;  %v6437_v45 = vsel %vm701_vm8, %v18150_v46, %v18149_v0  ;;  %v18151_v20 = vld [vmem:[#allocation156_spill] sm:$0xff]  ;;  %v18155_v36 = vld [vmem:[#allocation50_spill] sm:$0xff]  ;;  %v18166_v0 = vld [vmem:[#allocation101_spill] sm:$0xff] }
 0xbf3   : > { %6522 = vmatprep.subr.mxu0 %v6443_v51  ;;  %6782 = vmatprep.subr.mxu1 %v6715_v48  ;;  %v18152_v60 = vld [vmem:[#allocation72_spill] sm:$0xff]  ;;  %v15252_v56 = vpop.permute.xlu1 %8240  ;;  %v18153_v51 = vld [vmem:[#allocation81_spill] sm:$0xff] }
 0xbf4   : > { %6523 = vmatpush1.msra.mxu0 %v6442_v14  ;;  %6783 = vmatpush1.msra.mxu1 %v6714_v33  ;;  %v15226_v24 = vpop.permute.xlu0 %8236  ;;  %v6709_v42 = vsel %vm849_vm6, %v18152_v60, %v18151_v20  ;;  %v6436_v29 = vsel %vm701_vm8, %v18153_v51, %v18150_v46  ;;  %v6048_v48 = vld [vmem:[%s16951_s8 + $0x10] sm:$0xff]  ;;  %v6708_v14 = vsel %vm849_vm6, %v18154_v19, %v18152_v60  ;;  %v18167_v46 = vld [vmem:[#allocation115_spill] sm:$0xff]  ;;  %v18170_v20 = vld [vmem:[#allocation84_spill] sm:$0xff] }
 0xbf5   : > { %9048 = vrot.lane.b32.xlu0 %v15197_v12, %s17542_s28  ;;  %9046 = vrot.lane.b32.xlu1 %v15199_v38, %s17542_s28  ;;  %v18156_v33 = vld [vmem:[#allocation65_spill] sm:$0xff]  ;;  %v6702_v60 = vsel %vm849_vm6, %v18170_v20, %v18167_v46  ;;  %v15328_v19 = vld [vmem:[#allocation2 + $0x60] sm:$0xff] }
 0xbf6   : > { %6524 = vmatprep.subr.mxu0 %v6441_v57  ;;  %6784 = vmatprep.subr.mxu1 %v6713_v25  ;;  %v6435_v44 = vsel %vm701_vm8, %v18156_v33, %v18155_v36  ;;  %v18157_v57 = vld [vmem:[#allocation51_spill] sm:$0xff]  ;;  %v18159_v25 = vld [vmem:[#allocation33_spill] sm:$0xff] }
 0xbf7   : > { %6304 = vmatprep.mubr.f32.mxu1 %v18141_v2  ;;  %6525 = vmatpush1.msra.mxu0 %v6440_v10  ;;  %v6707_v53 = vsel %vm849_vm6, %v18158_v23, %v18157_v57  ;;  %v6434_v62 = vsel %vm701_vm8, %v18159_v25, %v18156_v33  ;;  %v18160_v10 = vld [vmem:[#allocation191_spill] sm:$0xff]  ;;  %v6957_v21 = vpop.permute.xlu1 %6956  ;;  %vm18164_vm8 = vmmov %vm18163_vm4  ;;  %v18176_v57 = vld [vmem:[#allocation145_spill] sm:$0xff] }
 0xbf8   : > { %6785 = vmatpush1.msra.mxu1 %v6712_v63  ;;  %6526 = vmatprep.subr.mxu0 %v6439_v49  ;;  %v15267_v27 = vpop.permute.xlu0 %7962  ;;  %v15282_v63 = vld [vmem:[#allocation2 + $0x80] sm:$0xff]  ;;  %v18162_v49 = vld [vmem:[#allocation172_spill] sm:$0xff] }
 0xbf9   : > { %9828 = vmatmul.mubr.msk.f32.gmra.mxu1 %vm6217_vm10, %v6047_v58  ;;  %6786 = vmatprep.subr.mxu1 %v6711_v39  ;;  %v6706_v58 = vsel %vm849_vm6, %v18160_v10, %v18158_v23  ;;  %v6705_v31 = vsel %vm849_vm6, %v18162_v49, %v18161_v59  ;;  %v6991_v39 = vsel %vm18163_vm4, %v14932_v6, %v14905_v1  ;;  %v18174_v36 = vld [vmem:[#allocation67_spill] sm:$0xff] }
 0xbfa   : > { %6527 = vmatpush1.msra.mxu0 %v6438_v35  ;;  %6787 = vmatpush1.msra.mxu1 %v6710_v9  ;;  %v6990_v35 = vsel %vm18164_vm8, %v14831_v55, %v14932_v6  ;;  %v6704_v9 = vsel %vm849_vm6, %v18165_v22, %v18162_v49  ;;  %v18168_v55 = vld [vmem:[#allocation281_spill] sm:$0xff]  ;;  %v18181_v49 = vld [vmem:[#allocation34_spill] sm:$0xff] }
 0xbfb   : > { %9044 = vrot.lane.b32.xlu0 %v15238_v41, %s17542_s28  ;;  %9042 = vrot.lane.b32.xlu1 %v15240_v30, %s17542_s28  ;;  %v6989_v6 = vsel %vm18169_vm9, %v6957_v21, %v18168_v55  ;;  %v7223_v10 = vpop.permute.xlu1 %7222  ;;  %v15374_v55 = vld [vmem:[#allocation2 + $0x48] sm:$0xff]  ;;  %vm18191_vm9 = vmmov %vm18164_vm8 }
 0xbfc   : > { %6528 = vmatprep.subr.mxu0 %v6437_v45  ;;  %6788 = vmatprep.subr.mxu1 %v6709_v42  ;;  %v15309_v1 = vpop.permute.xlu0 %7958  ;;  %v6703_v45 = vsel %vm849_vm6, %v18167_v46, %v18166_v0  ;;  %v18171_v42 = vld [vmem:[#allocation8_spill] sm:$0xff]  ;;  %v9833_v46 = vld [vmem:[%s16951_s8 + $0x30] sm:$0xff] }
 0xbfd   : > { %6310 = vmatprep.mubr.f32.mxu1 %v18141_v2  ;;  %6529 = vmatpush1.msra.mxu0 %v6436_v29  ;;  %v6988_v51 = vsel %vm18172_vm11, %v18171_v42, %v6957_v21  ;;  %v9832_v29 = vld [vmem:[%s16951_s8 + $0x28] sm:$0xff] }
 0xbfe   : > { %6789 = vmatpush1.msra.mxu1 %v6708_v14  ;;  %6530 = vmatprep.subr.mxu0 %v6435_v44  ;;  %v18173_v14 = vld [vmem:[#allocation49_spill] sm:$0xff]  ;;  %v18175_v44 = vld [vmem:[#allocation36_spill] sm:$0xff] }
 0xbff   : > { %9829 = vmatmul.mubr.msk.f32.gmra.mxu1 %vm6217_vm10, %v6048_v48  ;;  %6790 = vmatprep.subr.mxu1 %v6707_v53  ;;  %v15326_v48 = vld [vmem:[#allocation2 + $0x68] sm:$0xff]  ;;  %v6701_v33 = vsel %vm849_vm6, %v18174_v36, %v18173_v14  ;;  %v6987_v23 = vsel %vm18177_vm12, %v18176_v57, %v18175_v44  ;;  %v18178_v53 = vld [vmem:[#allocation31_spill] sm:$0xff]  ;;  %v18193_v14 = vld [vmem:[#allocation58_spill] sm:$0xff] }
 0xc00   : > { %6531 = vmatpush1.msra.mxu0 %v6434_v62  ;;  %6791 = vmatpush1.msra.mxu1 %v6706_v58  ;;  %v6700_v25 = vsel %vm849_vm6, %v18178_v53, %v18174_v36  ;;  %v9841_v62 = vld [vmem:[%s16951_s8 + $0x40] sm:$0xff]  ;;  %v18179_v58 = vld [vmem:[#allocation124_spill] sm:$0xff]  ;;  %v15350_v59 = vpop.permute.xlu0 %8230  ;;  %vm18185_vm6 = vcmask 916480   ;;  %vm18194_vm12 = vmmov %vm18164_vm8 }
 0xc01   : > { %9040 = vrot.lane.b32.xlu0 %v15282_v63, %s17542_s28  ;;  %9038 = vrot.lane.b32.xlu1 %v15284_v16, %s17542_s28  ;;  %vm18187_vm4 = vmmov %vm18185_vm6  ;;  %v18200_v53 = vld [vmem:[#allocation185_spill] sm:$0xff] }
 0xc02   : > { %9837 = vmatmul.mubr.msk.f32.vlgmr.msra.gmra.mxu0 %vm6217_vm10, %v9831_v17  ;;  %6792 = vmatprep.subr.mxu1 %v6705_v31  ;;  %v6986_v17 = vsel %vm18180_vm15, %v18179_v58, %v18176_v57  ;;  %v18182_v31 = vld [vmem:[#allocation186_spill] sm:$0xff]  ;;  %vm18192_vm11 = vmmov %vm18187_vm4  ;;  %v18197_v57 = vld [vmem:[#allocation285_spill] sm:$0xff] }
 0xc03   : > { %9855 = vmatprep.subr.msk.mxu0 %vm568_vm5, %v6991_v39  ;;  %6316 = vmatprep.mubr.f32.mxu1 %v18141_v2  ;;  %v6985_v21 = vsel %vm18183_vm14, %v18182_v31, %v18181_v49  ;;  %v18184_v39 = vld [vmem:[#allocation280_spill] sm:$0xff]  ;;  %v7255_v42 = vsel %vm18192_vm11, %v7223_v10, %v14942_v4  ;;  %vm18196_vm15 = vmmov %vm18187_vm4  ;;  %v18198_v4 = vld [vmem:[#allocation93_spill] sm:$0xff] }
 0xc04   : > { %6793 = vmatpush1.msra.mxu1 %v6704_v9  ;;  %9856 = vmatpush1.msk.msra.mxu0 %vm568_vm5, %v6990_v35  ;;  %v18186_v35 = vld [vmem:[#allocation10_spill] sm:$0xff]  ;;  %v18188_v9 = vld [vmem:[#allocation140_spill] sm:$0xff]  ;;  %vm18199_vm14 = vmmov %vm18164_vm8 }
 0xc05   : > { %9830 = vmatmul.mubr.msk.f32.gmra.mxu1 %vm6217_vm10, %v6049_v37  ;;  %6794 = vmatprep.subr.mxu1 %v6703_v45  ;;  %v7257_v37 = vsel %vm18185_vm6, %v14953_v47, %v18184_v39  ;;  %v7256_v22 = vsel %vm18187_vm4, %v18186_v35, %v14953_v47  ;;  %v6984_v0 = vsel %vm18164_vm8, %v18188_v9, %v18182_v31  ;;  %v15372_v45 = vld [vmem:[#allocation2 + $0x50] sm:$0xff]  ;;  %v18189_v47 = vld [vmem:[#allocation260_spill] sm:$0xff]  ;;  %vm18202_vm6 = vmmov %vm18187_vm4 }
 0xc06   : > { %7040 = vmatprep.subr.mxu0 %v6989_v6  ;;  %6570 = vmatprep.mubr.f32.mxu0 %v18141_v2  ;;  %v18190_v6 = vld [vmem:[#allocation220_spill] sm:$0xff]  ;;  %vm18204_vm4 = vmmov %vm18164_vm8  ;;  %v9834_v31 = vld [vmem:[%s16951_s8 + $0x38] sm:$0xff] }
 0xc07   : > { %6795 = vmatpush1.msra.mxu1 %v6702_v60  ;;  %7041 = vmatpush1.msra.mxu0 %v6988_v51  ;;  %v6983_v20 = vsel %vm18191_vm9, %v18190_v6, %v18189_v47  ;;  %v15383_v60 = vpop.permute.xlu1 %7966  ;;  %v15388_v51 = vpop.permute.xlu0 %7956  ;;  %v6982_v36 = vsel %vm18194_vm12, %v18193_v14, %v18190_v6  ;;  %v18203_v58 = vld [vmem:[#allocation268_spill] sm:$0xff]  ;;  %vm18206_vm8 = vmmov %vm18202_vm6  ;;  %v15418_v39 = vld [vmem:[#allocation2 + $0x38] sm:$0xff] }
 0xc08   : > { %9036 = vrot.lane.b32.xlu0 %v15326_v48, %s17542_s28  ;;  %9034 = vrot.lane.b32.xlu1 %v15328_v19, %s17542_s28  ;;  %v18208_v35 = vld [vmem:[#allocation239_spill] sm:$0xff]  ;;  %vm18210_vm9 = vmmov %vm18204_vm4 }
 0xc09   : > { %9838 = vmatmul.mubr.msk.f32.gmra.mxu0 %vm6217_vm10, %v9832_v29  ;;  %6796 = vmatprep.subr.mxu1 %v6701_v33  ;;  %v9842_v29 = vld [vmem:[%s16951_s8 + $0x48] sm:$0xff]  ;;  %v18195_v33 = vld [vmem:[#allocation279_spill] sm:$0xff]  ;;  %vm18213_vm11 = vmmov %vm18202_vm6 }
 0xc0a   : > { %7042 = vmatprep.subr.mxu0 %v6987_v23  ;;  %6797 = vmatpush1.msra.mxu1 %v6700_v25  ;;  %v7254_v44 = vsel %vm18196_vm15, %v18195_v33, %v7223_v10  ;;  %v6981_v23 = vsel %vm18199_vm14, %v18198_v4, %v18197_v57  ;;  %v18201_v25 = vld [vmem:[#allocation164_spill] sm:$0xff]  ;;  %v6980_v10 = vsel %vm18204_vm4, %v18203_v58, %v18198_v4  ;;  %v18212_v47 = vld [vmem:[#allocation143_spill] sm:$0xff]  ;;  %vm18215_vm12 = vmmov %vm18204_vm4 }
 0xc0b   : > { %6830 = vmatprep.mubr.f32.mxu1 %v18141_v2  ;;  %7043 = vmatpush1.msra.mxu0 %v6986_v17  ;;  %v18205_v17 = vld [vmem:[#allocation127_spill] sm:$0xff]  ;;  %vm18217_vm15 = vmmov %vm18202_vm6  ;;  %v18224_v58 = vld [vmem:[#allocation244_spill] sm:$0xff] }
 0xc0c   : > { %9847 = vmatmul.mubr.msk.f32.vlgmr.msra.gmra.mxu1 %vm6217_vm10, %v9841_v62  ;;  %7044 = vmatprep.subr.mxu0 %v6985_v21  ;;  %v7253_v62 = vsel %vm18202_vm6, %v18201_v25, %v18200_v53  ;;  %v7252_v49 = vsel %vm18206_vm8, %v18205_v17, %v18201_v25  ;;  %v15416_v21 = vld [vmem:[#allocation2 + $0x30] sm:$0xff]  ;;  %v18216_v14 = vld [vmem:[#allocation203_spill] sm:$0xff]  ;;  %vm18220_vm14 = vmmov %vm18204_vm4 }
 0xc0d   : > { %9865 = vmatprep.subr.msk.mxu1 %vm568_vm5, %v7257_v37  ;;  %6576 = vmatprep.mubr.f32.mxu0 %v18141_v2  ;;  %18207 = vst [vmem:[#allocation163_spill] sm:$0xff] %v15416_v21  ;;  %v15420_v37 = vpop.permute.xlu1 %8238  ;;  %v18218_v33 = vld [vmem:[#allocation195_spill] sm:$0xff]  ;;  %vm18225_vm8 = vmmov %vm18202_vm6 }
 0xc0e   : > { %7045 = vmatpush1.msra.mxu0 %v6984_v0  ;;  %9866 = vmatpush1.msk.msra.mxu1 %vm568_vm5, %v7256_v22  ;;  %v18209_v22 = vld [vmem:[#allocation255_spill] sm:$0xff]  ;;  %v15429_v0 = vpop.permute.xlu0 %7952 }
 0xc0f   : > { %9032 = vrot.lane.b32.xlu0 %v15372_v45, %s17542_s28  ;;  %9030 = vrot.lane.b32.xlu1 %v15374_v55, %s17542_s28  ;;  %v6979_v9 = vsel %vm18210_vm9, %v18209_v22, %v18208_v35  ;;  %v18221_v4 = vld [vmem:[#allocation231_spill] sm:$0xff]  ;;  %v18227_v35 = vld [vmem:[#allocation53_spill] sm:$0xff]  ;;  %vm18229_vm9 = vmmov %vm18204_vm4 }
 0xc10   : > { %9839 = vmatmul.mubr.msk.f32.gmra.mxu0 %vm6217_vm10, %v9833_v46  ;;  %7046 = vmatprep.subr.mxu0 %v6983_v20  ;;  %v18211_v46 = vld [vmem:[#allocation209_spill] sm:$0xff]  ;;  %v18223_v25 = vld [vmem:[#allocation87_spill] sm:$0xff] }
 0xc11   : > { %7306 = vmatprep.subr.mxu1 %v7255_v42  ;;  %6836 = vmatprep.mubr.f32.mxu1 %v18141_v2  ;;  %v7251_v6 = vsel %vm18213_vm11, %v18212_v47, %v18211_v46  ;;  %v9843_v20 = vld [vmem:[%s16951_s8 + $0x50] sm:$0xff]  ;;  %v15458_v17 = vld [vmem:[#allocation2 + $0x20] sm:$0xff]  ;;  %vm18232_vm11 = vmmov %vm18202_vm6 }
 0xc12   : > { %7047 = vmatpush1.msra.mxu0 %v6982_v36  ;;  %7307 = vmatpush1.msra.mxu1 %v7254_v44  ;;  %v18214_v42 = vld [vmem:[#allocation229_spill] sm:$0xff]  ;;  %v7250_v36 = vsel %vm18217_vm15, %v18216_v14, %v18212_v47  ;;  %v18219_v44 = vld [vmem:[#allocation218_spill] sm:$0xff]  ;;  %18226 = vst [vmem:[#allocation221_spill] sm:$0xff] %v15458_v17  ;;  %v15467_v46 = vpop.permute.xlu0 %8224  ;;  %vm18236_vm15 = vmmov %vm18202_vm6 }
 0xc13   : > { %9848 = vmatmul.mubr.msk.f32.gmra.mxu1 %vm6217_vm10, %v9842_v29  ;;  %7048 = vmatprep.subr.mxu0 %v6981_v23  ;;  %v6978_v29 = vsel %vm18215_vm12, %v18214_v42, %v18209_v22  ;;  %v6977_v57 = vsel %vm18220_vm14, %v18219_v44, %v18218_v33  ;;  %v18222_v23 = vld [vmem:[#allocation157_spill] sm:$0xff]  ;;  %v18228_v22 = vld [vmem:[#allocation54_spill] sm:$0xff]  ;;  %vm18234_vm12 = vmmov %vm18204_vm4 }
 0xc14   : > { %7308 = vmatprep.subr.mxu1 %v7253_v62  ;;  %6582 = vmatprep.mubr.f32.mxu0 %v18141_v2  ;;  %v7249_v53 = vsel %vm18202_vm6, %v18222_v23, %v18221_v4  ;;  %v6976_v62 = vsel %vm18204_vm4, %v18223_v25, %v18219_v44  ;;  %v18230_v47 = vld [vmem:[#allocation286_spill] sm:$0xff]  ;;  %v18237_v44 = vld [vmem:[#allocation144_spill] sm:$0xff]  ;;  %vm18239_vm14 = vmmov %vm18204_vm4 }
 0xc15   : > { %7049 = vmatpush1.msra.mxu0 %v6980_v10  ;;  %7309 = vmatpush1.msra.mxu1 %v7252_v49  ;;  %v7248_v10 = vsel %vm18225_vm8, %v18224_v58, %v18222_v23  ;;  %v15460_v49 = vpop.permute.xlu1 %8234  ;;  %v9844_v42 = vld [vmem:[%s16951_s8 + $0x58] sm:$0xff]  ;;  %v18240_v23 = vld [vmem:[#allocation89_spill] sm:$0xff]  ;;  %vm18241_vm6 = vmmov %vm18204_vm4 }
 0xc16   : > { %9026 = vrot.lane.b32.xlu0 %v15416_v21, %s17542_s28  ;;  %9028 = vrot.lane.b32.xlu1 %v15418_v39, %s17542_s28  ;;  %v18242_v25 = vld [vmem:[#allocation241_spill] sm:$0xff]  ;;  %vm18244_vm4 = vmmov %vm18225_vm8  ;;  %v18367_v21 = vld [vmem:[#allocation19_spill] sm:$0xff] }
 0xc17   : > { %9840 = vmatmul.mubr.msk.f32.gmra.mxu0 %vm6217_vm10, %v9834_v31  ;;  %7050 = vmatprep.subr.mxu0 %v6979_v9  ;;  %v8952_v31 = vld [vmem:[#allocation2 + $0x18] sm:$0xff]  ;;  %v6975_v9 = vsel %vm18229_vm9, %v18228_v22, %v18227_v35  ;;  %vm18246_vm8 = vmmov %vm18244_vm4  ;;  %v8950_v35 = vld [vmem:[#allocation2] sm:$0xff] }
 0xc18   : > { %7310 = vmatprep.subr.mxu1 %v7251_v6  ;;  %6842 = vmatprep.mubr.f32.mxu1 %v18141_v2  ;;  %v18231_v6 = vld [vmem:[#allocation184_spill] sm:$0xff]  ;;  %vm18249_vm9 = vmmov %vm18241_vm6 }
 0xc19   : > { %7051 = vmatpush1.msra.mxu0 %v6978_v29  ;;  %7311 = vmatpush1.msra.mxu1 %v7250_v36  ;;  %v18233_v29 = vld [vmem:[#allocation289_spill] sm:$0xff]  ;;  %v18235_v36 = vld [vmem:[#allocation267_spill] sm:$0xff] }
 0xc1a   : > { %9849 = vmatmul.mubr.msk.f32.gmra.mxu1 %vm6217_vm10, %v9843_v20  ;;  %7052 = vmatprep.subr.mxu0 %v6977_v57  ;;  %v7247_v20 = vsel %vm18232_vm11, %v18231_v6, %v18230_v47  ;;  %v6974_v14 = vsel %vm18234_vm12, %v18233_v29, %v18228_v22  ;;  %v7246_v33 = vsel %vm18236_vm15, %v18235_v36, %v18231_v6  ;;  %v18238_v57 = vld [vmem:[#allocation179_spill] sm:$0xff]  ;;  %v15496_v22 = vpop.permute.xlu1 %7960  ;;  %v18247_v47 = vld [vmem:[#allocation42_spill] sm:$0xff]  ;;  %vm18251_vm11 = vmmov %vm18241_vm6 }
 0xc1b   : > { %7312 = vmatprep.subr.mxu1 %v7249_v53  ;;  %7053 = vmatpush1.msra.mxu0 %v6976_v62  ;;  %v6973_v4 = vsel %vm18239_vm14, %v18238_v57, %v18237_v44  ;;  %v6972_v53 = vsel %vm18241_vm6, %v18240_v23, %v18238_v57  ;;  %v18243_v62 = vld [vmem:[#allocation257_spill] sm:$0xff]  ;;  %v18248_v6 = vld [vmem:[#allocation71_spill] sm:$0xff]  ;;  %v18250_v29 = vld [vmem:[#allocation198_spill] sm:$0xff] }
 0xc1c   : > { %7313 = vmatpush1.msra.mxu1 %v7248_v10  ;;  %9024 = vrot.lane.b32.xlu0 %v15458_v17, %s17542_s28  ;;  %v7245_v58 = vsel %vm18244_vm4, %v18243_v62, %v18242_v25  ;;  %v18245_v10 = vld [vmem:[#allocation227_spill] sm:$0xff]  ;;  %v18252_v36 = vld [vmem:[#allocation288_spill] sm:$0xff]  ;;  %vm18254_vm12 = vmmov %vm18244_vm4 }
 0xc1d   : > { %9022 = vrot.lane.b32.xlu1 %v8952_v31, %s17542_s28  ;;  %7054 = vmatprep.subr.mxu0 %v6975_v9  ;;  %v7244_v31 = vsel %vm18246_vm8, %v18245_v10, %v18243_v62  ;;  %v8951_v9 = vld [vmem:[#allocation2 + $0x8] sm:$0xff]  ;;  %vm18256_vm15 = vmmov %vm18244_vm4  ;;  %v18257_v23 = vld [vmem:[#allocation155_spill] sm:$0xff] }
 0xc1e   : > { %7314 = vmatprep.subr.mxu1 %v7247_v20  ;;  %6848 = vmatprep.mubr.f32.mxu1 %v18141_v2  ;;  %v6971_v20 = vsel %vm18249_vm9, %v18248_v6, %v18247_v47  ;;  %v18255_v57 = vld [vmem:[#allocation204_spill] sm:$0xff]  ;;  %vm18259_vm14 = vmmov %vm18241_vm6  ;;  %v18260_v62 = vld [vmem:[#allocation171_spill] sm:$0xff] }
 0xc1f   : > { %7055 = vmatpush1.msra.mxu0 %v6974_v14  ;;  %7315 = vmatpush1.msra.mxu1 %v7246_v33  ;;  %v6970_v14 = vsel %vm18251_vm11, %v18250_v29, %v18248_v6  ;;  %v18253_v33 = vld [vmem:[#allocation287_spill] sm:$0xff]  ;;  %v18261_v10 = vld [vmem:[#allocation126_spill] sm:$0xff]  ;;  %vm18264_vm8 = vmmov %vm18244_vm4 }
 0xc20   : > { %9850 = vmatmul.mubr.msk.f32.gmra.mxu1 %vm6217_vm10, %v9844_v42  ;;  %7056 = vmatprep.subr.mxu0 %v6973_v4  ;;  %v15502_v42 = vpop.permute.xlu0 %7950  ;;  %v7243_v44 = vsel %vm18254_vm12, %v18253_v33, %v18252_v36  ;;  %v7242_v4 = vsel %vm18256_vm15, %v18255_v57, %v18253_v33  ;;  %v8629_v6 = vld [vmem:[#allocation2 + $0x118] sm:$0xff]  ;;  %vm18267_vm9 = vmmov %vm18241_vm6  ;;  %v18268_v33 = vld [vmem:[#allocation25_spill] sm:$0xff]  ;;  %v15533_v57 = vpop.permute.xlu1 %8232 }
 0xc21   : > { %7316 = vmatprep.subr.mxu1 %v7245_v58  ;;  %7057 = vmatpush1.msra.mxu0 %v6972_v53  ;;  %v18258_v53 = vld [vmem:[#allocation205_spill] sm:$0xff]  ;;  %v18265_v29 = vld [vmem:[#allocation102_spill] sm:$0xff]  ;;  %vm18269_vm11 = vmmov %vm18241_vm6 }
 0xc22   : > { %7317 = vmatpush1.msra.mxu1 %v7244_v31  ;;  %9018 = vrot.lane.b32.xlu0 %v8950_v35, %s17542_s28  ;;  %v6969_v25 = vsel %vm18259_vm14, %v18258_v53, %v18257_v23  ;;  %v6968_v58 = vsel %vm18241_vm6, %v18260_v62, %v18258_v53  ;;  %v18262_v31 = vld [vmem:[#allocation169_spill] sm:$0xff]  ;;  %vm18272_vm12 = vmmov %vm18244_vm4  ;;  %v9851_v62 = vld [vmem:[%s16951_s8 + $0x60] sm:$0xff] }
 0xc23   : > { %9020 = vrot.lane.b32.xlu1 %v8951_v9, %s17542_s28  ;;  %7058 = vmatprep.subr.mxu0 %v6971_v20  ;;  %v7241_v35 = vsel %vm18244_vm4, %v18262_v31, %v18261_v10  ;;  %v18263_v9 = vld [vmem:[#allocation110_spill] sm:$0xff]  ;;  %v8627_v20 = vld [vmem:[#allocation2 + $0x108] sm:$0xff]  ;;  %v18271_v23 = vld [vmem:[#allocation57_spill] sm:$0xff] }
 0xc24   : > { %7318 = vmatprep.subr.mxu1 %v7243_v44  ;;  %7059 = vmatpush1.msra.mxu0 %v6970_v14  ;;  %v7240_v47 = vsel %vm18264_vm8, %v18263_v9, %v18262_v31  ;;  %v18266_v14 = vld [vmem:[#allocation194_spill] sm:$0xff]  ;;  %vm18274_vm15 = vmmov %vm18244_vm4  ;;  %v18275_v31 = vld [vmem:[#allocation181_spill] sm:$0xff] }
 0xc25   : > { %7319 = vmatpush1.msra.mxu1 %v7242_v4  ;;  %7060 = vmatprep.subr.mxu0 %v6969_v25  ;;  %v6967_v36 = vsel %vm18267_vm9, %v18266_v14, %v18265_v29  ;;  %v6966_v44 = vsel %vm18269_vm11, %v18268_v33, %v18266_v14  ;;  %v18270_v4 = vld [vmem:[#allocation29_spill] sm:$0xff]  ;;  %v7469_v25 = vpop.permute.xlu0 %7468  ;;  %vm18277_vm14 = vmmov %vm18244_vm4  ;;  %v18282_v14 = vld [vmem:[#allocation132_spill] sm:$0xff] }
 0xc26   : > { %7320 = vmatprep.subr.mxu1 %v7241_v35  ;;  %7061 = vmatpush1.msra.mxu0 %v6968_v58  ;;  %v7239_v53 = vsel %vm18272_vm12, %v18271_v23, %v18270_v4  ;;  %v18273_v58 = vld [vmem:[#allocation206_spill] sm:$0xff]  ;;  %vm18279_vm6 = vmmov %vm18244_vm4  ;;  %vm18281_vm4 = vcmask 908288   ;;  %v18349_v17 = vld [vmem:[#allocation11_spill] sm:$0xff] }
 0xc27   : > { %7321 = vmatpush1.msra.mxu1 %v7240_v47  ;;  %8772 = vrot.lane.b32.xlu0 %v8629_v6, %s17542_s28  ;;  %v7238_v10 = vsel %vm18274_vm15, %v18273_v58, %v18271_v23  ;;  %v18276_v35 = vld [vmem:[#allocation146_spill] sm:$0xff]  ;;  %v18278_v47 = vld [vmem:[#allocation104_spill] sm:$0xff]  ;;  %vm18283_vm8 = vmmov %vm18281_vm4 }
 0xc28   : > { %8768 = vrot.lane.b32.xlu1 %v8627_v20, %s17542_s28  ;;  %7062 = vmatprep.subr.mxu0 %v6967_v36  ;;  %v7237_v9 = vsel %vm18277_vm14, %v18276_v35, %v18275_v31  ;;  %v7236_v6 = vsel %vm18279_vm6, %v18278_v47, %v18276_v35  ;;  %v18280_v20 = vld [vmem:[#allocation254_spill] sm:$0xff]  ;;  %v7502_v36 = vsel %vm18283_vm8, %v18282_v14, %v14951_v8  ;;  %vm18285_vm9 = vmmov %vm18281_vm4  ;;  %v8626_v23 = vld [vmem:[#allocation2 + $0x100] sm:$0xff] }
 0xc29   : > { %7322 = vmatprep.subr.mxu1 %v7239_v53  ;;  %7063 = vmatpush1.msra.mxu0 %v6966_v44  ;;  %v7503_v29 = vsel %vm18281_vm4, %v14951_v8, %v18280_v20  ;;  %v8625_v33 = vld [vmem:[#allocation2 + $0xf8] sm:$0xff]  ;;  %v18284_v44 = vld [vmem:[#allocation263_spill] sm:$0xff]  ;;  %vm18288_vm11 = vmmov %vm18279_vm6  ;;  %v15569_v8 = vpop.permute.xlu1 %8228  ;;  %v7735_v35 = vpop.permute.xlu0 %7734 }
 0xc2a   : > { %7096 = vmatprep.mubr.f32.mxu0 %v18141_v2  ;;  %7323 = vmatpush1.msra.mxu1 %v7238_v10  ;;  %v7501_v4 = vsel %vm18285_vm9, %v7469_v25, %v18284_v44  ;;  %v18286_v53 = vld [vmem:[#allocation158_spill] sm:$0xff]  ;;  %vm18290_vm12 = vmmov %vm18281_vm4  ;;  %v18291_v47 = vld [vmem:[#allocation128_spill] sm:$0xff] }
 0xc2b   : > { %9857 = vmatmul.mubr.msk.f32.vlgmr.msra.gmra.mxu0 %vm6217_vm10, %v9851_v62  ;;  %7324 = vmatprep.subr.mxu1 %v7237_v9  ;;  %v18287_v62 = vld [vmem:[#allocation182_spill] sm:$0xff]  ;;  %v9852_v9 = vld [vmem:[%s16951_s8 + $0x68] sm:$0xff]  ;;  %vm18292_vm15 = vmmov %vm18279_vm6 }
 0xc2c   : > { %9875 = vmatprep.subr.msk.mxu0 %vm568_vm5, %v7503_v29  ;;  %7325 = vmatpush1.msra.mxu1 %v7236_v6  ;;  %v7235_v58 = vsel %vm18288_vm11, %v18287_v62, %v18286_v53  ;;  %v18289_v10 = vld [vmem:[#allocation262_spill] sm:$0xff]  ;;  %v7234_v6 = vsel %vm18292_vm15, %v18291_v47, %v18287_v62  ;;  %v18294_v20 = vld [vmem:[#allocation91_spill] sm:$0xff]  ;;  %vm18295_vm14 = vmmov %vm18279_vm6  ;;  %vm18306_vm11 = vcmask 859136  }
 0xc2d   : > { %9876 = vmatpush1.msk.msra.mxu0 %vm568_vm5, %v7502_v36  ;;  %8764 = vrot.lane.b32.xlu0 %v8625_v33, %s17542_s28  ;;  %v7500_v31 = vsel %vm18290_vm12, %v18289_v10, %v7469_v25  ;;  %v18293_v25 = vld [vmem:[#allocation139_spill] sm:$0xff]  ;;  %v18296_v14 = vld [vmem:[#allocation112_spill] sm:$0xff]  ;;  %v18298_v44 = vld [vmem:[#allocation98_spill] sm:$0xff] }
 0xc2e   : > { %8766 = vrot.lane.b32.xlu1 %v8626_v23, %s17542_s28  ;;  %7326 = vmatprep.subr.mxu1 %v7235_v58  ;;  %v7233_v29 = vsel %vm18295_vm14, %v18294_v20, %v18293_v25  ;;  %v7232_v36 = vsel %vm18279_vm6, %v18296_v14, %v18294_v20  ;;  %v18297_v33 = vld [vmem:[#allocation211_spill] sm:$0xff]  ;;  %vm18300_vm8 = vmmov %vm18281_vm4  ;;  %v8624_v58 = vld [vmem:[#allocation2 + $0xf0] sm:$0xff]  ;;  %v15603_v25 = vpop.permute.xlu0 %7946 }
 0xc2f   : > { %7552 = vmatprep.subr.mxu0 %v7501_v4  ;;  %7102 = vmatprep.mubr.f32.mxu0 %v18141_v2  ;;  %v7499_v23 = vsel %vm18281_vm4, %v18298_v44, %v18297_v33  ;;  %v18299_v4 = vld [vmem:[#allocation96_spill] sm:$0xff]  ;;  %v9861_v62 = vld [vmem:[%s16951_s8 + $0x80] sm:$0xff]  ;;  %vm18303_vm9 = vmmov %vm18281_vm4 }
 0xc30   : > { %7327 = vmatpush1.msra.mxu1 %v7234_v6  ;;  %7553 = vmatpush1.msra.mxu0 %v7500_v31  ;;  %v7498_v53 = vsel %vm18300_vm8, %v18299_v4, %v18298_v44  ;;  %v8622_v10 = vld [vmem:[#allocation2 + $0xe0] sm:$0xff]  ;;  %v15596_v31 = vpop.permute.xlu1 %7954  ;;  %v18302_v47 = vld [vmem:[#allocation12_spill] sm:$0xff]  ;;  %v18304_v20 = vld [vmem:[#allocation226_spill] sm:$0xff] }
 0xc31   : > { %9858 = vmatmul.mubr.msk.f32.gmra.mxu0 %vm6217_vm10, %v9852_v9  ;;  %7328 = vmatprep.subr.mxu1 %v7233_v29  ;;  %v18301_v9 = vld [vmem:[#allocation224_spill] sm:$0xff]  ;;  %v18305_v29 = vld [vmem:[#allocation202_spill] sm:$0xff]  ;;  %v18307_v33 = vld [vmem:[#allocation111_spill] sm:$0xff] }
 0xc32   : > { %7554 = vmatprep.subr.mxu0 %v7499_v23  ;;  %7329 = vmatpush1.msra.mxu1 %v7232_v36  ;;  %v7497_v6 = vsel %vm18303_vm9, %v18302_v47, %v18301_v9  ;;  %v7769_v14 = vsel %vm18306_vm11, %v18305_v29, %v18304_v20  ;;  %v9853_v36 = vld [vmem:[%s16951_s8 + $0x70] sm:$0xff]  ;;  %vm18308_vm12 = vmmov %vm18306_vm11  ;;  %v18317_v20 = vld [vmem:[#allocation234_spill] sm:$0xff] }
 0xc33   : > { %7362 = vmatprep.mubr.f32.mxu1 %v18141_v2  ;;  %7555 = vmatpush1.msra.mxu0 %v7498_v53  ;;  %v7768_v44 = vsel %vm18308_vm12, %v18307_v33, %v18305_v29  ;;  %v18309_v23 = vld [vmem:[#allocation137_spill] sm:$0xff]  ;;  %vm18310_vm15 = vmmov %vm18281_vm4  ;;  %v18311_v53 = vld [vmem:[#allocation278_spill] sm:$0xff] }
 0xc34   : > { %8762 = vrot.lane.b32.xlu0 %v8624_v58, %s17542_s28  ;;  %8758 = vrot.lane.b32.xlu1 %v8622_v10, %s17542_s28  ;;  %v7496_v4 = vsel %vm18310_vm15, %v18309_v23, %v18302_v47  ;;  %vm18313_vm14 = vmmov %vm18281_vm4  ;;  %v18314_v10 = vld [vmem:[#allocation120_spill] sm:$0xff]  ;;  %v15636_v33 = vpop.permute.xlu1 %8226  ;;  %v15638_v23 = vpop.permute.xlu0 %8218 }
 0xc35   : > { %9867 = vmatmul.mubr.msk.f32.vlgmr.msra.gmra.mxu1 %vm6217_vm10, %v9861_v62  ;;  %7556 = vmatprep.subr.mxu0 %v7497_v6  ;;  %v18312_v62 = vld [vmem:[#allocation243_spill] sm:$0xff]  ;;  %vm18315_vm6 = vmmov %vm18306_vm11  ;;  %18319 = vst [vmem:[#allocation210_spill] sm:$0xff] %v15638_v23  ;;  %v18369_v23 = vld [vmem:[#allocation148_spill] sm:$0xff] }
 0xc36   : > { %9885 = vmatprep.subr.msk.mxu1 %vm568_vm5, %v7769_v14  ;;  %7108 = vmatprep.mubr.f32.mxu0 %v18141_v2  ;;  %v7495_v58 = vsel %vm18313_vm14, %v18312_v62, %v18311_v53  ;;  %v7767_v9 = vsel %vm18315_vm6, %v7735_v35, %v18314_v10  ;;  %v18316_v6 = vld [vmem:[#allocation271_spill] sm:$0xff]  ;;  %vm18318_vm8 = vmmov %vm18315_vm6  ;;  %v9862_v14 = vld [vmem:[%s16951_s8 + $0x88] sm:$0xff] }
 0xc37   : > { %7557 = vmatpush1.msra.mxu0 %v7496_v4  ;;  %9886 = vmatpush1.msk.msra.mxu1 %vm568_vm5, %v7768_v44  ;;  %v7494_v47 = vsel %vm18281_vm4, %v18316_v6, %v18312_v62  ;;  %v7766_v29 = vsel %vm18318_vm8, %v18317_v20, %v7735_v35  ;;  %v8621_v44 = vld [vmem:[#allocation2 + $0xd8] sm:$0xff]  ;;  %v18320_v4 = vld [vmem:[#allocation44_spill] sm:$0xff]  ;;  %v18321_v53 = vld [vmem:[#allocation273_spill] sm:$0xff] }
 0xc38   : > { %9859 = vmatmul.mubr.msk.f32.gmra.mxu0 %vm6217_vm10, %v9853_v36  ;;  %7558 = vmatprep.subr.mxu0 %v7495_v58  ;;  %v8623_v36 = vld [vmem:[#allocation2 + $0xe8] sm:$0xff]  ;;  %vm18322_vm9 = vmmov %vm18281_vm4  ;;  %v18324_v58 = vld [vmem:[#allocation275_spill] sm:$0xff] }
 0xc39   : > { %7818 = vmatprep.subr.mxu1 %v7767_v9  ;;  %7368 = vmatprep.mubr.f32.mxu1 %v18141_v2  ;;  %v7493_v35 = vsel %vm18322_vm9, %v18321_v53, %v18320_v4  ;;  %v18323_v62 = vld [vmem:[#allocation80_spill] sm:$0xff]  ;;  %vm18325_vm11 = vmmov %vm18315_vm6  ;;  %v9854_v9 = vld [vmem:[%s16951_s8 + $0x78] sm:$0xff] }
 0xc3a   : > { %7559 = vmatpush1.msra.mxu0 %v7494_v47  ;;  %7819 = vmatpush1.msra.mxu1 %v7766_v29  ;;  %v7765_v10 = vsel %vm18325_vm11, %v18324_v58, %v18323_v62  ;;  %v18326_v6 = vld [vmem:[#allocation73_spill] sm:$0xff]  ;;  %vm18327_vm12 = vmmov %vm18281_vm4  ;;  %v18328_v20 = vld [vmem:[#allocation38_spill] sm:$0xff] }
 0xc3b   : > { %8760 = vrot.lane.b32.xlu0 %v8623_v36, %s17542_s28  ;;  %8756 = vrot.lane.b32.xlu1 %v8621_v44, %s17542_s28  ;;  %v7492_v47 = vsel %vm18327_vm12, %v18326_v6, %v18321_v53  ;;  %vm18329_vm15 = vmmov %vm18315_vm6  ;;  %v18331_v36 = vld [vmem:[#allocation59_spill] sm:$0xff]  ;;  %v18333_v4 = vld [vmem:[#allocation136_spill] sm:$0xff]  ;;  %v15669_v6 = vpop.permute.xlu1 %8222 }
 0xc3c   : > { %9868 = vmatmul.mubr.msk.f32.gmra.mxu1 %vm6217_vm10, %v9862_v14  ;;  %7560 = vmatprep.subr.mxu0 %v7493_v35  ;;  %v7764_v29 = vsel %vm18329_vm15, %v18328_v20, %v18324_v58  ;;  %v18330_v14 = vld [vmem:[#allocation23_spill] sm:$0xff]  ;;  %vm18332_vm14 = vmmov %vm18281_vm4  ;;  %v18334_v35 = vld [vmem:[#allocation165_spill] sm:$0xff]  ;;  %v15678_v20 = vpop.permute.xlu0 %7944 }
 0xc3d   : > { %7820 = vmatprep.subr.mxu1 %v7765_v10  ;;  %7114 = vmatprep.mubr.f32.mxu0 %v18141_v2  ;;  %v7491_v44 = vsel %vm18332_vm14, %v18331_v36, %v18330_v14  ;;  %v7763_v62 = vsel %vm18315_vm6, %v18334_v35, %v18333_v4  ;;  %v18335_v10 = vld [vmem:[#allocation242_spill] sm:$0xff]  ;;  %v18336_v58 = vld [vmem:[#allocation232_spill] sm:$0xff]  ;;  %vm18337_vm8 = vmmov %vm18315_vm6 }
 0xc3e   : > { %7561 = vmatpush1.msra.mxu0 %v7492_v47  ;;  %7821 = vmatpush1.msra.mxu1 %v7764_v29  ;;  %v7490_v53 = vsel %vm18281_vm4, %v18335_v10, %v18331_v36  ;;  %v7762_v47 = vsel %vm18337_vm8, %v18336_v58, %v18334_v35  ;;  %v8619_v29 = vld [vmem:[#allocation2 + $0xc8] sm:$0xff]  ;;  %v8620_v14 = vld [vmem:[#allocation2 + $0xd0] sm:$0xff]  ;;  %vm18340_vm9 = vmmov %vm18281_vm4 }
 0xc3f   : > { %9860 = vmatmul.mubr.msk.f32.gmra.mxu0 %vm6217_vm10, %v9854_v9  ;;  %7562 = vmatprep.subr.mxu0 %v7491_v44  ;;  %v9863_v9 = vld [vmem:[%s16951_s8 + $0x90] sm:$0xff]  ;;  %v18338_v36 = vld [vmem:[#allocation108_spill] sm:$0xff]  ;;  %v18339_v44 = vld [vmem:[#allocation246_spill] sm:$0xff] }
 0xc40   : > { %7822 = vmatprep.subr.mxu1 %v7763_v62  ;;  %7374 = vmatprep.mubr.f32.mxu1 %v18141_v2  ;;  %v7489_v4 = vsel %vm18340_vm9, %v18339_v44, %v18338_v36  ;;  %v18341_v35 = vld [vmem:[#allocation258_spill] sm:$0xff]  ;;  %vm18342_vm11 = vmmov %vm18281_vm4 }
 0xc41   : > { %7563 = vmatpush1.msra.mxu0 %v7490_v53  ;;  %7823 = vmatpush1.msra.mxu1 %v7762_v47  ;;  %v7488_v62 = vsel %vm18342_vm11, %v18341_v35, %v18339_v44  ;;  %v18343_v10 = vld [vmem:[#allocation250_spill] sm:$0xff]  ;;  %v18344_v53 = vld [vmem:[#allocation55_spill] sm:$0xff]  ;;  %vm18345_vm12 = vmmov %vm18315_vm6 }
 0xc42   : > { %8752 = vrot.lane.b32.xlu0 %v8619_v29, %s17542_s28  ;;  %8754 = vrot.lane.b32.xlu1 %v8620_v14, %s17542_s28  ;;  %v7761_v58 = vsel %vm18345_vm12, %v18344_v53, %v18343_v10  ;;  %v18346_v47 = vld [vmem:[#allocation28_spill] sm:$0xff]  ;;  %vm18347_vm15 = vmmov %vm18315_vm6  ;;  %v18348_v14 = vld [vmem:[#allocation103_spill] sm:$0xff] }
 0xc43   : > { %9869 = vmatmul.mubr.msk.f32.gmra.mxu1 %vm6217_vm10, %v9863_v9  ;;  %7564 = vmatprep.subr.mxu0 %v7489_v4  ;;  %v7760_v29 = vsel %vm18347_vm15, %v18346_v47, %v18344_v53  ;;  %vm18350_vm14 = vmmov %vm18281_vm4  ;;  %v18351_v44 = vld [vmem:[#allocation233_spill] sm:$0xff]  ;;  %v18352_v35 = vld [vmem:[#allocation114_spill] sm:$0xff] }
 0xc44   : > { %7824 = vmatprep.subr.mxu1 %v7761_v58  ;;  %7565 = vmatpush1.msra.mxu0 %v7488_v62  ;;  %v7487_v36 = vsel %vm18350_vm14, %v18349_v17, %v18348_v14  ;;  %v7759_v9 = vsel %vm18315_vm6, %v18352_v35, %v18351_v44  ;;  %v18353_v4 = vld [vmem:[#allocation161_spill] sm:$0xff]  ;;  %v15704_v62 = vpop.permute.xlu1 %7948  ;;  %v18354_v53 = vld [vmem:[#allocation222_spill] sm:$0xff]  ;;  %vm18355_vm8 = vmmov %vm18315_vm6 }
 0xc45   : > { %7825 = vmatpush1.msra.mxu1 %v7760_v29  ;;  %7566 = vmatprep.subr.mxu0 %v7487_v36  ;;  %v7486_v10 = vsel %vm18281_vm4, %v18353_v4, %v18349_v17  ;;  %v7758_v58 = vsel %vm18355_vm8, %v18354_v53, %v18352_v35  ;;  %v9864_v47 = vld [vmem:[%s16951_s8 + $0x98] sm:$0xff]  ;;  %v15713_v29 = vpop.permute.xlu0 %7940  ;;  %v8618_v14 = vld [vmem:[#allocation2 + $0xc0] sm:$0xff]  ;;  %v18356_v17 = vld [vmem:[#allocation85_spill] sm:$0xff] }
 0xc46   : > { %7826 = vmatprep.subr.mxu1 %v7759_v9  ;;  %7380 = vmatprep.mubr.f32.mxu1 %v18141_v2  ;;  %v18357_v36 = vld [vmem:[#allocation219_spill] sm:$0xff]  ;;  %vm18358_vm9 = vmmov %vm18281_vm4  ;;  %v18359_v35 = vld [vmem:[#allocation208_spill] sm:$0xff] }
 0xc47   : > { %7567 = vmatpush1.msra.mxu0 %v7486_v10  ;;  %7827 = vmatpush1.msra.mxu1 %v7758_v58  ;;  %v7485_v44 = vsel %vm18358_vm9, %v18357_v36, %v18356_v17  ;;  %vm18360_vm11 = vmmov %vm18281_vm4  ;;  %v18361_v4 = vld [vmem:[#allocation193_spill] sm:$0xff]  ;;  %v18362_v10 = vld [vmem:[#allocation248_spill] sm:$0xff] }
 0xc48   : > { %8750 = vrot.lane.b32.xlu0 %v8618_v14, %s17542_s28  ;;  %8746 = vrot.lane.b32.xlu1 %v15197_v12, %s17542_s28  ;;  %v7484_v9 = vsel %vm18360_vm11, %v18359_v35, %v18357_v36  ;;  %vm18363_vm12 = vmmov %vm18315_vm6  ;;  %v18364_v58 = vld [vmem:[#allocation240_spill] sm:$0xff]  ;;  %v18366_v12 = vld [vmem:[#allocation173_spill] sm:$0xff] }
 0xc49   : > { %9870 = vmatmul.mubr.msk.f32.gmra.mxu1 %vm6217_vm10, %v9864_v47  ;;  %7568 = vmatprep.subr.mxu0 %v7485_v44  ;;  %v7757_v53 = vsel %vm18363_vm12, %v18362_v10, %v18361_v4  ;;  %vm18365_vm15 = vmmov %vm18315_vm6  ;;  %v18371_v47 = vld [vmem:[#allocation52_spill] sm:$0xff]  ;;  %v18372_v44 = vld [vmem:[#allocation230_spill] sm:$0xff] }
 0xc4a   : > { %v7756_v14 = vsel %vm18365_vm15, %v18364_v58, %v18362_v10  ;;  %7828 = vmatprep.subr.mxu1 %v7757_v53  ;;  %7569 = vmatpush1.msra.mxu0 %v7484_v9  ;;  %vm18368_vm14 = vmmov %vm18281_vm4  ;;  %v18374_v4 = vld [vmem:[#allocation138_spill] sm:$0xff]  ;;  %v15743_v9 = vpop.permute.xlu1 %8220  ;;  %v15745_v58 = vpop.permute.xlu0 %8212 }
 0xc4b   : > { %v7483_v17 = vsel %vm18368_vm14, %v18367_v21, %v18366_v12  ;;  %vm18370_vm6 = vmmov %vm18281_vm4  ;;  %7829 = vmatpush1.msra.mxu1 %v7756_v14  ;;  %v8617_v53 = vld [vmem:[#allocation2 + $0xb8] sm:$0xff]  ;;  %18376 = vst [vmem:[#allocation196_spill] sm:$0xff] %v15745_v58  ;;  %v18380_v12 = vld [vmem:[#allocation75_spill] sm:$0xff]  ;;  %7608 = vmatprep.mubr.f32.mxu0 %v18141_v2 }
 0xc4c   : > { %v7482_v36 = vsel %vm18370_vm6, %v18369_v23, %v18367_v21  ;;  %7570 = vmatprep.subr.mxu0 %v7483_v17  ;;  %vm18373_vm4 = vmmov %vm18355_vm8  ;;  %8748 = vrot.lane.b32.xlu0 %v8617_v53, %s17542_s28  ;;  %v18377_v21 = vld [vmem:[#allocation68_spill] sm:$0xff]  ;;  %v18378_v23 = vld [vmem:[#allocation70_spill] sm:$0xff] }
 0xc4d   : > { %v7755_v35 = vsel %vm18373_vm4, %v18372_v44, %v18371_v47  ;;  %vm18375_vm8 = vmmov %vm18373_vm4  ;;  %7571 = vmatpush1.msra.mxu0 %v7482_v36  ;;  %8744 = vrot.lane.b32.xlu1 %v15199_v38, %s17542_s28  ;;  %v18382_v47 = vld [vmem:[#allocation183_spill] sm:$0xff]  ;;  %v18383_v36 = vld [vmem:[#allocation74_spill] sm:$0xff] }
 0xc4e   : > { %v7754_v10 = vsel %vm18375_vm8, %v18374_v4, %v18372_v44  ;;  %7830 = vmatprep.subr.mxu1 %v7755_v35  ;;  %vm18379_vm9 = vmmov %vm18370_vm6  ;;  %v18385_v35 = vld [vmem:[#allocation176_spill] sm:$0xff]  ;;  %v18391_v38 = vld [vmem:[#allocation130_spill] sm:$0xff]  ;;  %7874 = vmatprep.mubr.f32.mxu1 %v18141_v2 }
 0xc4f   : > { %7831 = vmatpush1.msra.mxu1 %v7754_v10  ;;  %v7481_v14 = vsel %vm18379_vm9, %v18378_v23, %v18377_v21  ;;  %vm18381_vm11 = vmmov %vm18370_vm6  ;;  %v18387_v10 = vld [vmem:[#allocation125_spill] sm:$0xff]  ;;  %v18388_v53 = vld [vmem:[#allocation160_spill] sm:$0xff] }
 0xc50   : > { %v7480_v17 = vsel %vm18381_vm11, %v18380_v12, %v18378_v23  ;;  %7572 = vmatprep.subr.mxu0 %v7481_v14  ;;  %vm18384_vm12 = vmmov %vm18373_vm4  ;;  %v18390_v23 = vld [vmem:[#allocation7_spill] sm:$0xff]  ;;  %8740 = vrot.lane.b32.xlu0 %v15238_v41, %s17542_s28 }
 0xc51   : > { %v7753_v44 = vsel %vm18384_vm12, %v18383_v36, %v18382_v47  ;;  %vm18386_vm15 = vmmov %vm18373_vm4  ;;  %7573 = vmatpush1.msra.mxu0 %v7480_v17  ;;  %v7478_v12 = vsel %vm18370_vm6, %v18390_v23, %v18388_v53  ;;  %v18392_v14 = vld [vmem:[#allocation159_spill] sm:$0xff]  ;;  %vm18402_vm12 = vcmask 850944  }
 0xc52   : > { %v7752_v4 = vsel %vm18386_vm15, %v18385_v35, %v18383_v36  ;;  %7832 = vmatprep.subr.mxu1 %v7753_v44  ;;  %vm18389_vm14 = vmmov %vm18370_vm6  ;;  %v7751_v47 = vsel %vm18373_vm4, %v18392_v14, %v18391_v38  ;;  %v18393_v58 = vld [vmem:[#allocation207_spill] sm:$0xff]  ;;  %v15777_v44 = vpop.permute.xlu1 %8216  ;;  %v18401_v38 = vld [vmem:[#allocation86_spill] sm:$0xff] }
 0xc53   : > { %v7479_v21 = vsel %vm18389_vm14, %v18388_v53, %v18387_v10  ;;  %7833 = vmatpush1.msra.mxu1 %v7752_v4  ;;  %vm18394_vm8 = vmmov %vm18373_vm4  ;;  %v9871_v17 = vld [vmem:[%s16951_s8 + $0xa0] sm:$0xff]  ;;  %v8001_v4 = vpop.permute.xlu0 %8000  ;;  %v18395_v10 = vld [vmem:[#allocation141_spill] sm:$0xff] }
 0xc54   : > { %7574 = vmatprep.subr.mxu0 %v7479_v21  ;;  %v7750_v36 = vsel %vm18394_vm8, %v18393_v58, %v18392_v14  ;;  %7834 = vmatprep.subr.mxu1 %v7751_v47  ;;  %v8614_v35 = vld [vmem:[#allocation2 + $0xa0] sm:$0xff]  ;;  %v18396_v58 = vld [vmem:[#allocation269_spill] sm:$0xff]  ;;  %vm18397_vm9 = vmmov %vm18373_vm4 }
 0xc55   : > { %7575 = vmatpush1.msra.mxu0 %v7478_v12  ;;  %7835 = vmatpush1.msra.mxu1 %v7750_v36  ;;  %v7749_v53 = vsel %vm18397_vm9, %v18396_v58, %v18395_v10  ;;  %v18398_v21 = vld [vmem:[#allocation46_spill] sm:$0xff]  ;;  %vm18399_vm11 = vmmov %vm18373_vm4  ;;  %v18400_v12 = vld [vmem:[#allocation40_spill] sm:$0xff] }
 0xc56   : > { %8742 = vrot.lane.b32.xlu1 %v8614_v35, %s17542_s28  ;;  %v7748_v23 = vsel %vm18399_vm11, %v18398_v21, %v18396_v58  ;;  %9877 = vmatmul.mubr.msk.f32.vlgmr.msra.gmra.mxu0 %vm6217_vm10, %v9871_v17  ;;  %v8035_v14 = vsel %vm18402_vm12, %v18401_v38, %v18400_v12  ;;  %v18403_v47 = vld [vmem:[#allocation252_spill] sm:$0xff]  ;;  %vm18404_vm15 = vmmov %vm18402_vm12  ;;  %v18405_v36 = vld [vmem:[#allocation94_spill] sm:$0xff]  ;;  %v15810_v12 = vpop.permute.xlu1 %7942 }
 0xc57   : > { %7836 = vmatprep.subr.mxu1 %v7749_v53  ;;  %v8034_v41 = vsel %vm18404_vm15, %v18403_v47, %v18401_v38  ;;  %9895 = vmatprep.subr.msk.mxu0 %vm568_vm5, %v8035_v14  ;;  %v18406_v35 = vld [vmem:[#allocation61_spill] sm:$0xff]  ;;  %vm18407_vm14 = vmmov %vm18373_vm4  ;;  %v18408_v58 = vld [vmem:[#allocation274_spill] sm:$0xff]  ;;  %vm18424_vm15 = vcmask 842752  }
 0xc58   : > { %7837 = vmatpush1.msra.mxu1 %v7748_v23  ;;  %v7747_v10 = vsel %vm18407_vm14, %v18406_v35, %v18405_v36  ;;  %vm18409_vm6 = vmmov %vm18373_vm4  ;;  %9896 = vmatpush1.msk.msra.mxu0 %vm568_vm5, %v8034_v41  ;;  %v9872_v53 = vld [vmem:[%s16951_s8 + $0xa8] sm:$0xff]  ;;  %v18410_v21 = vld [vmem:[#allocation249_spill] sm:$0xff] }
 0xc59   : > { %v7746_v17 = vsel %vm18409_vm6, %v18408_v58, %v18406_v35  ;;  %7838 = vmatprep.subr.mxu1 %v7747_v10  ;;  %7614 = vmatprep.mubr.f32.mxu0 %v18141_v2  ;;  %vm18411_vm4 = vmmov %vm18402_vm12  ;;  %v18412_v38 = vld [vmem:[#allocation39_spill] sm:$0xff]  ;;  %v8267_v35 = vpop.permute.xlu0 %8266  ;;  %v18417_v10 = vld [vmem:[#allocation78_spill] sm:$0xff] }
 0xc5a   : > { %7839 = vmatpush1.msra.mxu1 %v7746_v17  ;;  %v8033_v23 = vsel %vm18411_vm4, %v8001_v4, %v18410_v21  ;;  %8738 = vrot.lane.b32.xlu0 %v15240_v30, %s17542_s28  ;;  %v18413_v14 = vld [vmem:[#allocation107_spill] sm:$0xff]  ;;  %vm18414_vm8 = vmmov %vm18409_vm6  ;;  %v18420_v17 = vld [vmem:[#allocation77_spill] sm:$0xff] }
 0xc5b   : > { %8734 = vrot.lane.b32.xlu1 %v15282_v63, %s17542_s28  ;;  %v7745_v47 = vsel %vm18414_vm8, %v18413_v14, %v18412_v38  ;;  %v18415_v41 = vld [vmem:[#allocation247_spill] sm:$0xff]  ;;  %vm18416_vm9 = vmmov %vm18411_vm4  ;;  %9878 = vmatmul.mubr.msk.f32.gmra.mxu0 %vm6217_vm10, %v9872_v53  ;;  %v18419_v63 = vld [vmem:[#allocation41_spill] sm:$0xff] }
 0xc5c   : > { %v8032_v36 = vsel %vm18416_vm9, %v18415_v41, %v8001_v4  ;;  %vm18418_vm11 = vmmov %vm18409_vm6  ;;  %7840 = vmatprep.subr.mxu1 %v7745_v47  ;;  %v9881_v30 = vld [vmem:[%s16951_s8 + $0xc0] sm:$0xff]  ;;  %8084 = vmatprep.subr.mxu0 %v8033_v23  ;;  %v18422_v21 = vld [vmem:[#allocation13_spill] sm:$0xff] }
 0xc5d   : > { %v7744_v58 = vsel %vm18418_vm11, %v18417_v10, %v18413_v14  ;;  %8085 = vmatpush1.msra.mxu0 %v8032_v36  ;;  %vm18421_vm12 = vmmov %vm18411_vm4  ;;  %v18423_v38 = vld [vmem:[#allocation236_spill] sm:$0xff]  ;;  %7620 = vmatprep.mubr.f32.mxu0 %v18141_v2  ;;  %v18427_v23 = vld [vmem:[#allocation109_spill] sm:$0xff]  ;;  %v15847_v10 = vpop.permute.xlu1 %8214 }
 0xc5e   : > { %7841 = vmatpush1.msra.mxu1 %v7744_v58  ;;  %v8031_v4 = vsel %vm18421_vm12, %v18420_v17, %v18419_v63  ;;  %v8301_v53 = vsel %vm18424_vm15, %v18423_v38, %v18422_v21  ;;  %v18425_v14 = vld [vmem:[#allocation48_spill] sm:$0xff]  ;;  %vm18426_vm14 = vmmov %vm18424_vm15  ;;  %v9873_v36 = vld [vmem:[%s16951_s8 + $0xb0] sm:$0xff]  ;;  %v15852_v63 = vpop.permute.xlu0 %7938 }
 0xc5f   : > { %9887 = vmatmul.mubr.msk.f32.vlgmr.msra.gmra.mxu1 %vm6217_vm10, %v9881_v30  ;;  %8086 = vmatprep.subr.mxu0 %v8031_v4  ;;  %v8300_v47 = vsel %vm18426_vm14, %v18425_v14, %v18423_v38  ;;  %vm18428_vm6 = vmmov %vm18411_vm4  ;;  %v8611_v58 = vld [vmem:[#allocation2 + $0x88] sm:$0xff]  ;;  %v18431_v4 = vld [vmem:[#allocation162_spill] sm:$0xff] }
 0xc60   : > { %9905 = vmatprep.subr.msk.mxu1 %vm568_vm5, %v8301_v53  ;;  %v8030_v41 = vsel %vm18428_vm6, %v18427_v23, %v18420_v17  ;;  %vm18429_vm4 = vmmov %vm18426_vm14  ;;  %8736 = vrot.lane.b32.xlu0 %v8611_v58, %s17542_s28  ;;  %v18430_v17 = vld [vmem:[#allocation122_spill] sm:$0xff]  ;;  %v18433_v38 = vld [vmem:[#allocation276_spill] sm:$0xff] }
 0xc61   : > { %8087 = vmatpush1.msra.mxu0 %v8030_v41  ;;  %9906 = vmatpush1.msk.msra.mxu1 %vm568_vm5, %v8300_v47  ;;  %v8299_v30 = vsel %vm18429_vm4, %v8267_v35, %v14977_v7  ;;  %vm18432_vm8 = vmmov %vm18428_vm6  ;;  %v9882_v7 = vld [vmem:[%s16951_s8 + $0xc8] sm:$0xff]  ;;  %v18435_v14 = vld [vmem:[#allocation245_spill] sm:$0xff] }
 0xc62   : > { %8732 = vrot.lane.b32.xlu1 %v15284_v16, %s17542_s28  ;;  %v8029_v21 = vsel %vm18432_vm8, %v18431_v4, %v18430_v17  ;;  %vm18434_vm9 = vmmov %vm18429_vm4  ;;  %9879 = vmatmul.mubr.msk.f32.gmra.mxu0 %vm6217_vm10, %v9873_v36  ;;  %v18437_v47 = vld [vmem:[#allocation277_spill] sm:$0xff]  ;;  %v18440_v41 = vld [vmem:[#allocation60_spill] sm:$0xff]  ;;  %v15880_v17 = vpop.permute.xlu1 %8210 }
 0xc63   : > { %v8298_v53 = vsel %vm18434_vm9, %v18433_v38, %v8267_v35  ;;  %8088 = vmatprep.subr.mxu0 %v8029_v21  ;;  %8350 = vmatprep.subr.mxu1 %v8299_v30  ;;  %vm18436_vm11 = vmmov %vm18428_vm6  ;;  %v18438_v23 = vld [vmem:[#allocation261_spill] sm:$0xff]  ;;  %v18441_v36 = vld [vmem:[#allocation63_spill] sm:$0xff] }
 0xc64   : > { %7880 = vmatprep.mubr.f32.mxu1 %v18141_v2  ;;  %v8028_v16 = vsel %vm18436_vm11, %v18435_v14, %v18431_v4  ;;  %8351 = vmatpush1.msra.mxu1 %v8298_v53  ;;  %vm18439_vm12 = vmmov %vm18428_vm6  ;;  %v18444_v4 = vld [vmem:[#allocation192_spill] sm:$0xff]  ;;  %v9874_v38 = vld [vmem:[%s16951_s8 + $0xb8] sm:$0xff]  ;;  %v15889_v53 = vpop.permute.xlu0 %7934 }
 0xc65   : > { %8089 = vmatpush1.msra.mxu0 %v8028_v16  ;;  %v8027_v35 = vsel %vm18439_vm12, %v18438_v23, %v18437_v47  ;;  %9888 = vmatmul.mubr.msk.f32.gmra.mxu1 %vm6217_vm10, %v9882_v7  ;;  %vm18442_vm15 = vmmov %vm18429_vm4  ;;  %v8608_v7 = vld [vmem:[#allocation2 + $0x70] sm:$0xff] }
 0xc66   : > { %8090 = vmatprep.subr.mxu0 %v8027_v35  ;;  %v8297_v58 = vsel %vm18442_vm15, %v18441_v36, %v18440_v41  ;;  %vm18443_vm14 = vmmov %vm18428_vm6  ;;  %7626 = vmatprep.mubr.f32.mxu0 %v18141_v2  ;;  %v9883_v16 = vld [vmem:[%s16951_s8 + $0xd0] sm:$0xff]  ;;  %v9892_v41 = vld [vmem:[%s16951_s8 + $0xe8] sm:$0xff] }
 0xc67   : > { %v8026_v30 = vsel %vm18443_vm14, %v15002_v3, %v18438_v23  ;;  %8352 = vmatprep.subr.mxu1 %v8297_v58  ;;  %vm18445_vm6 = vmmov %vm18429_vm4  ;;  %8728 = vrot.lane.b32.xlu0 %v15326_v48, %s17542_s28  ;;  %v16031_v58 = vld [vmem:[#allocation2 + $0x110] sm:$0xff] }
 0xc68   : > { %v8296_v21 = vsel %vm18445_vm6, %v18444_v4, %v18441_v36  ;;  %8091 = vmatpush1.msra.mxu0 %v8026_v30  ;;  %8730 = vrot.lane.b32.xlu1 %v8608_v7, %s17542_s28  ;;  %vm18446_vm4 = vmmov %vm18432_vm8  ;;  %v8599_v36 = vld [vmem:[#allocation2 + $0x28] sm:$0xff]  ;;  %18479 = vst [vmem:[#allocation20_spill] sm:$0xff] %v16031_v58  ;;  %v9901_v30 = vld [vmem:[%s16951_s8 + $0x100] sm:$0xff] }
 0xc69   : > { %8353 = vmatpush1.msra.mxu1 %v8296_v21  ;;  %v8025_v3 = vsel %vm18446_vm4, %v15020_v32, %v15025_v11  ;;  %9880 = vmatmul.mubr.msk.f32.gmra.mxu0 %vm6217_vm10, %v9874_v38  ;;  %vm18447_vm8 = vmmov %vm18445_vm6  ;;  %v9902_v4 = vld [vmem:[%s16951_s8 + $0x108] sm:$0xff]  ;;  %v9894_v21 = vld [vmem:[%s16951_s8 + $0xf8] sm:$0xff] }
 0xc6a   : > { %8092 = vmatprep.subr.mxu0 %v8025_v3  ;;  %v8295_v14 = vsel %vm18447_vm8, %v14984_v34, %v14989_v13  ;;  %vm18448_vm9 = vmmov %vm18445_vm6  ;;  %7886 = vmatprep.mubr.f32.mxu1 %v18141_v2  ;;  %v9903_v38 = vld [vmem:[%s16951_s8 + $0x110] sm:$0xff] }
 0xc6b   : > { %v8294_v48 = vsel %vm18448_vm9, %v15007_v50, %v14984_v34  ;;  %vm18449_vm11 = vmmov %vm18446_vm4  ;;  %8354 = vmatprep.subr.mxu1 %v8295_v14  ;;  %9889 = vmatmul.mubr.msk.f32.gmra.mxu1 %vm6217_vm10, %v9883_v16  ;;  %v7937_v50 = vpop.permute.xlu1 %7936 }
 0xc6c   : > { %v8024_v47 = vsel %vm18449_vm11, %v15065_v5, %v15020_v32  ;;  %8355 = vmatpush1.msra.mxu1 %v8294_v48  ;;  %vm18450_vm12 = vmmov %vm18446_vm4  ;;  %v15921_v32 = vpop.permute.xlu0 %8206  ;;  %v8292_v5 = vsel %vm18445_vm6, %v15133_v26, %v15043_v15  ;;  %8726 = vrot.lane.b32.xlu0 %v15328_v19, %s17542_s28  ;;  %v8605_v19 = vld [vmem:[#allocation2 + $0x58] sm:$0xff] }
 0xc6d   : > { %8093 = vmatpush1.msra.mxu0 %v8024_v47  ;;  %v8023_v13 = vsel %vm18450_vm12, %v15085_v54, %v15165_v40  ;;  %vm18451_vm15 = vmmov %vm18446_vm4  ;;  %8722 = vrot.lane.b32.xlu1 %v15372_v45, %s17542_s28 }
 0xc6e   : > { %v8022_v11 = vsel %vm18451_vm15, %v15151_v43, %v15085_v54  ;;  %8094 = vmatprep.subr.mxu0 %v8023_v13  ;;  %vm18452_vm14 = vmmov %vm18445_vm6  ;;  %v8021_v54 = vsel %vm18446_vm4, %v15183_v61, %v15383_v60  ;;  %7892 = vmatprep.mubr.f32.mxu1 %v18141_v2 }
 0xc6f   : > { %v8293_v34 = vsel %vm18452_vm14, %v15043_v15, %v15048_v18  ;;  %8095 = vmatpush1.msra.mxu0 %v8022_v11  ;;  %vm18453_vm8 = vmmov %vm18445_vm6  ;;  %v9884_v15 = vld [vmem:[%s16951_s8 + $0xd8] sm:$0xff]  ;;  %8140 = vmatprep.mubr.f32.mxu0 %v18141_v2 }
 0xc70   : > { %8356 = vmatprep.subr.mxu1 %v8293_v34  ;;  %8096 = vmatprep.subr.mxu0 %v8021_v54  ;;  %v8291_v18 = vsel %vm18453_vm8, %v15112_v52, %v15211_v28  ;;  %vm18454_vm9 = vmmov %vm18445_vm6 }
 0xc71   : > { %8357 = vmatpush1.msra.mxu1 %v8292_v5  ;;  %v8290_v26 = vsel %vm18454_vm9, %v15252_v56, %v15112_v52  ;;  %vm18455_vm11 = vmmov %vm18446_vm4  ;;  %v7933_v56 = vpop.permute.xlu0 %7932  ;;  %8724 = vrot.lane.b32.xlu0 %v8605_v19, %s17542_s28 }
 0xc72   : > { %v8020_v43 = vsel %vm18455_vm11, %v15267_v27, %v15183_v61  ;;  %8358 = vmatprep.subr.mxu1 %v8291_v18  ;;  %vm18456_vm12 = vmmov %vm18446_vm4  ;;  %9890 = vmatmul.mubr.msk.f32.gmra.mxu1 %vm6217_vm10, %v9884_v15  ;;  %v8209_v61 = vpop.permute.xlu1 %8208  ;;  %v8288_v27 = vsel %vm18445_vm6, %v15460_v49, %v15226_v24 }
 0xc73   : > { %8097 = vmatpush1.msra.mxu0 %v8020_v43  ;;  %8359 = vmatpush1.msra.mxu1 %v8290_v26  ;;  %v8019_v40 = vsel %vm18456_vm12, %v15309_v1, %v15496_v22  ;;  %vm18457_vm15 = vmmov %vm18446_vm4  ;;  %v8602_v22 = vld [vmem:[#allocation2 + $0x40] sm:$0xff] }
 0xc74   : > { %v8018_v28 = vsel %vm18457_vm15, %v15388_v51, %v15309_v1  ;;  %8098 = vmatprep.subr.mxu0 %v8019_v40  ;;  %vm18458_vm14 = vmmov %vm18445_vm6  ;;  %v8017_v1 = vsel %vm18446_vm4, %v15429_v0, %v15596_v31  ;;  %8720 = vrot.lane.b32.xlu1 %v15374_v55, %s17542_s28 }
 0xc75   : > { %v8289_v52 = vsel %vm18458_vm14, %v15226_v24, %v15420_v37  ;;  %8099 = vmatpush1.msra.mxu0 %v8018_v28  ;;  %vm18459_vm8 = vmmov %vm18446_vm4  ;;  %v8201_v49 = vpop.permute.xlu0 %8200  ;;  %8716 = vrot.lane.b32.xlu0 %v15418_v39, %s17542_s28 }
 0xc76   : > { %8360 = vmatprep.subr.mxu1 %v8289_v52  ;;  %v8016_v45 = vsel %vm18459_vm8, %v15502_v42, %v15429_v0  ;;  %8100 = vmatprep.subr.mxu0 %v8017_v1  ;;  %vm18460_vm9 = vmmov %vm18445_vm6  ;;  %v8205_v0 = vpop.permute.xlu1 %8204  ;;  %v8013_v42 = vsel %vm18446_vm4, %v15713_v29, %v15810_v12  ;;  %v18474_v12 = vld [vmem:[#allocation221_spill] sm:$0xff] }
 0xc77   : > { %8361 = vmatpush1.msra.mxu1 %v8288_v27  ;;  %v8287_v24 = vsel %vm18460_vm9, %v15350_v59, %v15533_v57  ;;  %vm18461_vm11 = vmmov %vm18445_vm6  ;;  %8101 = vmatpush1.msra.mxu0 %v8016_v45 }
 0xc78   : > { %v8286_v60 = vsel %vm18461_vm11, %v15569_v8, %v15350_v59  ;;  %8362 = vmatprep.subr.mxu1 %v8287_v24  ;;  %vm18462_vm12 = vmmov %vm18446_vm4  ;;  %v8284_v59 = vsel %vm18445_vm6, %v15669_v6, %v15467_v46  ;;  %8718 = vrot.lane.b32.xlu1 %v8602_v22, %s17542_s28 }
 0xc79   : > { %v8015_v51 = vsel %vm18462_vm12, %v15603_v25, %v15704_v62  ;;  %vm18463_vm15 = vmmov %vm18446_vm4  ;;  %8363 = vmatpush1.msra.mxu1 %v8286_v60  ;;  %v9891_v62 = vld [vmem:[%s16951_s8 + $0xe0] sm:$0xff]  ;;  %8406 = vmatprep.mubr.f32.mxu1 %v18141_v2 }
 0xc7a   : > { %v8014_v37 = vsel %vm18463_vm15, %v15678_v20, %v15603_v25  ;;  %8102 = vmatprep.subr.mxu0 %v8015_v51  ;;  %vm18464_vm14 = vmmov %vm18445_vm6 }
 0xc7b   : > { %v8285_v55 = vsel %vm18464_vm14, %v15467_v46, %v15636_v33  ;;  %8103 = vmatpush1.msra.mxu0 %v8014_v37  ;;  %vm18465_vm8 = vmmov %vm18446_vm4  ;;  %v18466_v46 = vld [vmem:[#allocation210_spill] sm:$0xff]  ;;  %v18471_v33 = vld [vmem:[#allocation196_spill] sm:$0xff] }
 0xc7c   : > { %8364 = vmatprep.subr.mxu1 %v8285_v55  ;;  %v8012_v57 = vsel %vm18465_vm8, %v15852_v63, %v15713_v29  ;;  %8104 = vmatprep.subr.mxu0 %v8013_v42  ;;  %vm18467_vm9 = vmmov %vm18445_vm6  ;;  %v8280_v20 = vsel %vm18445_vm6, %v15880_v17, %v18471_v33  ;;  %v8203_v29 = vpop.permute.xlu1 %8202  ;;  %v9893_v17 = vld [vmem:[%s16951_s8 + $0xf0] sm:$0xff] }
 0xc7d   : > { %8365 = vmatpush1.msra.mxu1 %v8284_v59  ;;  %v8283_v8 = vsel %vm18467_vm9, %v18466_v46, %v15743_v9  ;;  %vm18468_vm11 = vmmov %vm18445_vm6  ;;  %8105 = vmatpush1.msra.mxu0 %v8012_v57  ;;  %v8199_v9 = vpop.permute.xlu0 %8198 }
 0xc7e   : > { %v8282_v39 = vsel %vm18468_vm11, %v15777_v44, %v18466_v46  ;;  %8366 = vmatprep.subr.mxu1 %v8283_v8  ;;  %vm18469_vm12 = vmmov %vm18446_vm4  ;;  %v18473_v44 = vld [vmem:[#allocation163_spill] sm:$0xff]  ;;  %8710 = vrot.lane.b32.xlu1 %v18474_v12, %s17542_s28 }
 0xc7f   : > { %v8011_v31 = vsel %vm18469_vm12, %v15889_v53, %v7937_v50  ;;  %vm18470_vm15 = vmmov %vm18446_vm4  ;;  %8367 = vmatpush1.msra.mxu1 %v8282_v39  ;;  %8714 = vrot.lane.b32.xlu0 %v18473_v44, %s17542_s28 }
 0xc80   : > { %v8010_v25 = vsel %vm18470_vm15, %v7933_v56, %v15889_v53  ;;  %8106 = vmatprep.subr.mxu0 %v8011_v31  ;;  %vm18472_vm14 = vmmov %vm18445_vm6  ;;  %v9904_v53 = vld [vmem:[%s16951_s8 + $0x118] sm:$0xff]  ;;  %v16130_v59 = vpop.permute.xlu1 %8475 }
 0xc81   : > { %v8281_v6 = vsel %vm18472_vm14, %v18471_v33, %v15847_v10  ;;  %8107 = vmatpush1.msra.mxu0 %v8010_v25  ;;  %vm18475_vm4 = vmmov %vm18445_vm6  ;;  %18480 = vst [vmem:[#allocation215_spill] sm:$0xff] %v16130_v59  ;;  %vm519_vm6 = vcmask 257152  }
 0xc82   : > { %8368 = vmatprep.subr.mxu1 %v8281_v6  ;;  %v8279_v10 = vsel %vm18475_vm4, %v15921_v32, %v8209_v61  ;;  %vm18476_vm8 = vmmov %vm18475_vm4  ;;  %9897 = vmatmul.mubr.msk.f32.vlgmr.msra.gmra.mxu0 %vm6217_vm10, %v9891_v62 }
 0xc83   : > { %8369 = vmatpush1.msra.mxu1 %v8280_v20  ;;  %v8278_v63 = vsel %vm18476_vm8, %v8205_v0, %v15921_v32  ;;  %vm18477_vm9 = vmmov %vm18475_vm4  ;;  %8146 = vmatprep.mubr.f32.mxu0 %v18141_v2  ;;  %v16132_v0 = vpop.permute.xlu0 %8480 }
 0xc84   : > { %8370 = vmatprep.subr.mxu1 %v8279_v10  ;;  %v8276_v23 = vsel %vm18477_vm9, %v8199_v9, %v8201_v49  ;;  %vm18478_vm11 = vmmov %vm18475_vm4  ;;  %8712 = vrot.lane.b32.xlu0 %v8599_v36, %s17542_s28  ;;  %18481 = vst [vmem:[#allocation188_spill] sm:$0xff] %v16132_v0  ;;  %v16140_v57 = vpop.permute.xlu1 %8470 }
 0xc85   : > { %8371 = vmatpush1.msra.mxu1 %v8278_v63  ;;  %v8277_v35 = vsel %vm18478_vm11, %v8201_v49, %v8203_v29  ;;  %8770 = vrot.lane.b32.xlu1 %v16031_v58, %s17542_s28  ;;  %18482 = vst [vmem:[#allocation180_spill] sm:$0xff] %v16140_v57  ;;  %v6323_v63 = vld [vmem:[#allocation3] ss:$8 sm:$0x3] }
 0xc86   : > { %8372 = vmatprep.subr.mxu1 %v8277_v35  ;;  %9898 = vmatmul.mubr.msk.f32.gmra.mxu0 %vm6217_vm10, %v9892_v41  ;;  %v6855_v35 = vld [vmem:[#allocation3 + $0x2] ss:$8 sm:$0x3]  ;;  %v7121_v41 = vld [vmem:[#allocation3 + $0x3] ss:$8 sm:$0x3] }
 0xc87   : > { %8373 = vmatpush1.msra.mxu1 %v8276_v23  ;;  %8152 = vmatprep.mubr.f32.mxu0 %v18141_v2  ;;  %v16144_v8 = vpop.permute.xlu0 %8465  ;;  %v6589_v23 = vld [vmem:[#allocation3 + $0x1] ss:$8 sm:$0x3] }
 0xc88   : > { %9907 = vmatmul.mubr.msk.f32.vlgmr.msra.gmra.mxu1 %vm6217_vm10, %v9901_v30  ;;  %9064 = vrot.lane.b32.xlu0 %v16031_v58, %s17542_s28  ;;  %18484 = vst [vmem:[#allocation166_spill] sm:$0xff] %v16144_v8  ;;  %v16150_v25 = vpop.permute.xlu1 %9062 }
 0xc89   : > { %8412 = vmatprep.mubr.f32.mxu1 %v18141_v2  ;;  %18486 = vst [vmem:[#allocation26_spill] sm:$0xff] %v16150_v25 }
 0xc8a   : > { %9899 = vmatmul.mubr.msk.f32.gmra.mxu0 %vm6217_vm10, %v9893_v17  ;;  %v18494_v17 = vld [vmem:[#allocation21_spill] sm:$0xff] }
 0xc8b   : > { %8158 = vmatprep.mubr.f32.mxu0 %v18141_v2  ;;  %v16152_v33 = vpop.permute.xlu0 %9060  ;;  %v6860_v0 = vrot.slane %v6855_v35, %v18494_v17 }
 0xc8c   : > { %9908 = vmatmul.mubr.msk.f32.gmra.mxu1 %vm6217_vm10, %v9902_v4  ;;  %18487 = vst [vmem:[#allocation134_spill] sm:$0xff] %v16152_v33  ;;  %v16160_v29 = vpop.permute.xlu1 %9058  ;;  %v6328_v4 = vrot.slane %v6323_v63, %v18494_v17 }
 0xc8d   : > { %8418 = vmatprep.mubr.f32.mxu1 %v18141_v2  ;;  %18489 = vst [vmem:[#allocation95_spill] sm:$0xff] %v16160_v29  ;;  %v7633_v29 = vld [vmem:[#allocation3 + $0x5] ss:$8 sm:$0x3] }
 0xc8e   : > { %9900 = vmatmul.mubr.msk.f32.gmra.mxu0 %vm6217_vm10, %v9894_v21  ;;  %v18495_v21 = vld [vmem:[#allocation22_spill] sm:$0xff] }
 0xc8f   : > { %v16164_v44 = vpop.permute.xlu0 %9056  ;;  %v6598_v58 = vrot.slane %v6589_v23, %v18495_v21  ;;  %v16188_v59 = vrot.slane %v7121_v41, %v18495_v21  ;;  %v16194_v57 = vrot.slane %v7633_v29, %v18495_v21 }
 0xc90   : > { %9909 = vmatmul.mubr.msk.f32.gmra.mxu1 %vm6217_vm10, %v9903_v38  ;;  %18491 = vst [vmem:[#allocation212_spill] sm:$0xff] %v16164_v44  ;;  %v16172_v30 = vpop.permute.xlu1 %9054  ;;  %v6332_v38 = vrot.slane %v6323_v63, %v18495_v21  ;;  %v7899_v44 = vld [vmem:[#allocation3 + $0x6] ss:$8 sm:$0x3]  ;;  %v16191_v63 = vrot.slane %v7633_v29, %v18494_v17 }
 0xc91   : > { %8424 = vmatprep.mubr.f32.mxu1 %v18141_v2  ;;  %18493 = vst [vmem:[#allocation82_spill] sm:$0xff] %v16172_v30  ;;  %v6864_v2 = vrot.slane %v6855_v35, %v18495_v21  ;;  %v16185_v30 = vrot.slane %v7121_v41, %v18494_v17  ;;  %v16205_v41 = vrot.slane %v7899_v44, %v18495_v21 }
 0xc93   : > { %v16179_v25 = vpop.permute.xlu0 %9052  ;;  %18500 = vst [vmem:[#allocation168_spill] sm:$0xff] %v16205_v41 }
 0xc94   : > { %9910 = vmatmul.mubr.msk.f32.gmra.mxu1 %vm6217_vm10, %v9904_v53  ;;  %v6594_v53 = vrot.slane %v6589_v23, %v18494_v17  ;;  %18497 = vst [vmem:[#allocation43_spill] sm:$0xff] %v16179_v25  ;;  %v16199_v23 = vrot.slane %v7899_v44, %v18494_v17  ;;  %v8165_v25 = vld [vmem:[#allocation3 + $0x7] ss:$8 sm:$0x3] }
 0xc95   : > { %v16221_v44 = vrot.slane %v8165_v25, %v18495_v21 }
 0xc96   : > { %18499 = vst [vmem:[#allocation149_spill] sm:$0xff] %v16199_v23 }
 0xc97   : > { %18504 = vst [vmem:[#allocation117_spill] sm:$0xff] %v16221_v44 }
 0xca7   : > { %v16068_v7 = vpop.f32.mrf.mxu1 }
 0xca8   : > { %v6335_v35 = vmul.f32 %v6328_v4, %v16068_v7 }
 0xca9   : > { %v16070_v3 = vpop.f32.mrf.mxu1 }
 0xcb9   : > { %v16072_v14 = vpop.f32.mrf.mxu1 }
 0xcba   : > { %v6337_v29 = vmul.f32 %v6328_v4, %v16072_v14 }
 0xcbb   : > { %v16074_v16 = vpop.f32.mrf.mxu1 }
 0xcbf   : > { %v16076_v48 = vpop.f32.mrf.mxu1 }
 0xcc0   : > { %v6339_v14 = vmul.f32 %v6328_v4, %v16076_v48 }
 0xcc1   : > { %v16078_v47 = vpop.f32.mrf.mxu1 }
 0xcc2   : > { %v16082_v11 = vpop.f32.mrf.mxu0 }
 0xcc4   : > { %v16086_v50 = vpop.f32.mrf.mxu0 }
 0xcc5   : > { %v16080_v13 = vpop.f32.mrf.mxu1 }
 0xcc7   : > { %v16084_v34 = vpop.f32.mrf.mxu1 }
 0xcc9   : > { %v16090_v5 = vpop.f32.mrf.mxu0 }
 0xcca   : > { %v6603_v23 = vmul.f32 %v6594_v53, %v16090_v5 }
 0xccb   : > { %v16094_v18 = vpop.f32.mrf.mxu0 }
 0xccc   : > { %v16088_v32 = vpop.f32.mrf.mxu1  ;;  %v6604_v7 = vmul.f32 %v6598_v58, %v16094_v18  ;;  %v6611_v44 = vadd.f32 %v6603_v23, %v6337_v29 }
 0xcce   : > { %v16092_v54 = vpop.f32.mrf.mxu1 }
 0xcd0   : > { %v16098_v26 = vpop.f32.mrf.mxu0 }
 0xcd2   : > { %v16102_v40 = vpop.f32.mrf.mxu0 }
 0xcd3   : > { %v16096_v15 = vpop.f32.mrf.mxu1 }
 0xcd5   : > { %v16100_v43 = vpop.f32.mrf.mxu1 }
 0xcd7   : > { %v16106_v52 = vpop.f32.mrf.mxu0 }
 0xcd9   : > { %v16110_v56 = vpop.f32.mrf.mxu0 }
 0xcda   : > { %v16104_v28 = vpop.f32.mrf.mxu1 }
 0xcdc   : > { %v16108_v61 = vpop.f32.mrf.mxu1 }
 0xce0   : > { %v16112_v27 = vpop.f32.mrf.mxu1 }
 0xce2   : > { %v16116_v1 = vpop.f32.mrf.mxu1 }
 0xceb   : > { %v16114_v19 = vpop.f32.mrf.mxu0 }
 0xced   : > { %v16118_v45 = vpop.f32.mrf.mxu0 }
 0xcf1   : > { %v16122_v60 = vpop.f32.mrf.mxu0 }
 0xcf3   : > { %v16126_v37 = vpop.f32.mrf.mxu0 }
 0xcf5   : > { %v16120_v24 = vpop.f32.mrf.mxu1 }
 0xcf7   : > { %v16124_v51 = vpop.f32.mrf.mxu1 }
 0xcf8   : > { %v16134_v49 = vpop.f32.mrf.mxu0 }
 0xcfa   : > { %v16138_v42 = vpop.f32.mrf.mxu0 }
 0xcfb   : > { %v7138_v29 = vmul.f32 %v16188_v59, %v16138_v42 }
 0xcfc   : > { %v16128_v55 = vpop.f32.mrf.mxu1 }
 0xcfe   : > { %v16136_v22 = vpop.f32.mrf.mxu1 }
 0xcff   : > { %v16146_v39 = vpop.f32.mrf.mxu0 }
 0xd01   : > { %v16154_v6 = vpop.f32.mrf.mxu0 }
 0xd03   : > { %v16142_v46 = vpop.f32.mrf.mxu1 }
 0xd04   : > { %18483 = vst [vmem:[#allocation147_spill] sm:$0xff] %v16142_v46  ;;  %v6602_v46 = vmul.f32 %v6598_v58, %v16086_v50  ;;  %v6868_v50 = vmul.f32 %v6864_v2, %v16092_v54  ;;  %v6606_v54 = vmul.f32 %v6598_v58, %v16102_v40  ;;  %v7133_v40 = vmul.f32 %v16185_v30, %v16114_v19 }
 0xd05   : > { %v16148_v31 = vpop.f32.mrf.mxu1  ;;  %v7136_v19 = vmul.f32 %v16188_v59, %v16126_v37 }
 0xd06   : > { %18485 = vst [vmem:[#allocation106_spill] sm:$0xff] %v16148_v31 }
 0xd09   : > { %v16156_v20 = vpop.f32.mrf.mxu1 }
 0xd0a   : > { %18488 = vst [vmem:[#allocation24_spill] sm:$0xff] %v16156_v20  ;;  %v6601_v20 = vmul.f32 %v6594_v53, %v16082_v11  ;;  %v16218_v11 = vrot.slane %v8165_v25, %v18494_v17 }
 0xd0b   : > { %v16162_v9 = vpop.f32.mrf.mxu1 }
 0xd0c   : > { %18490 = vst [vmem:[#allocation116_spill] sm:$0xff] %v16162_v9  ;;  %v6336_v9 = vmul.f32 %v6332_v38, %v16070_v3  ;;  %v6867_v3 = vmul.f32 %v6860_v0, %v16088_v32  ;;  %18503 = vst [vmem:[#allocation97_spill] sm:$0xff] %v16218_v11  ;;  %v6609_v32 = vadd.f32 %v6601_v20, %v6335_v35 }
 0xd0d   : > { %v6605_v11 = vmul.f32 %v6594_v53, %v16098_v26  ;;  %v6870_v20 = vmul.f32 %v6864_v2, %v16100_v43  ;;  %v6607_v26 = vmul.f32 %v6594_v53, %v16106_v52 }
 0xd0e   : > { %v6610_v48 = vadd.f32 %v6602_v46, %v6336_v9  ;;  %v6875_v41 = vadd.f32 %v6867_v3, %v6609_v32  ;;  %v6872_v9 = vmul.f32 %v6864_v2, %v16108_v61 }
 0xd16   : > { %v16158_v62 = vpop.f32.mrf.mxu0 }
 0xd18   : > { %v16166_v12 = vpop.f32.mrf.mxu0 }
 0xd1b   : > { %v16170_v36 = vpop.f32.mrf.mxu0 }
 0xd1d   : > { %v16196_v8 = vpop.f32.mrf.mxu0 }
 0xd1e   : > { %18498 = vst [vmem:[#allocation62_spill] sm:$0xff] %v16196_v8  ;;  %v16213_v8 = vpop.permute.xlu1 %9050 }
 0xd1f   : > { %v16168_v10 = vpop.f32.mrf.mxu1  ;;  %18502 = vst [vmem:[#allocation129_spill] sm:$0xff] %v16213_v8  ;;  %v6341_v8 = vmul.f32 %v6328_v4, %v16080_v13  ;;  %v6876_v13 = vadd.f32 %v6868_v50, %v6610_v48  ;;  %v6608_v4 = vmul.f32 %v6598_v58, %v16110_v56  ;;  %v6873_v58 = vmul.f32 %v6860_v0, %v16112_v27 }
 0xd20   : > { %18492 = vst [vmem:[#allocation175_spill] sm:$0xff] %v16168_v10  ;;  %v6338_v10 = vmul.f32 %v6332_v38, %v16074_v16  ;;  %v6340_v16 = vmul.f32 %v6332_v38, %v16078_v47  ;;  %v6342_v47 = vmul.f32 %v6332_v38, %v16084_v34  ;;  %v6613_v34 = vadd.f32 %v6605_v11, %v6339_v14 }
 0xd21   : > { %v16177_v33 = vpop.f32.mrf.mxu1  ;;  %v7135_v56 = vmul.f32 %v16185_v30, %v16122_v60  ;;  %v6615_v53 = vadd.f32 %v6607_v26, %v6341_v8  ;;  %v7139_v60 = vmul.f32 %v16185_v30, %v16146_v39 }
 0xd22   : > { %18496 = vst [vmem:[#allocation187_spill] sm:$0xff] %v16177_v33  ;;  %v8431_v33 = vld [vmem:[#allocation3 + $0x10] ss:$8 sm:$0x3]  ;;  %v16228_v5 = vpop.f32.mrf.mxu0  ;;  %v16247_v46 = vpop.permute.xlu1 %9046  ;;  %v6614_v52 = vadd.f32 %v6606_v54, %v6340_v16  ;;  %v6616_v23 = vadd.f32 %v6608_v4, %v6342_v47  ;;  %v18508_v54 = vld [vmem:[#allocation147_spill] sm:$0xff] }
 0xd23   : > { %18506 = vst [vmem:[#allocation45_spill] sm:$0xff] %v16228_v5  ;;  %v16231_v18 = vrot.slane %v8431_v33, %v18494_v17  ;;  %v6612_v5 = vadd.f32 %v6604_v7, %v6338_v10  ;;  %v6869_v17 = vmul.f32 %v6860_v0, %v16096_v15  ;;  %v7134_v15 = vmul.f32 %v16188_v59, %v16118_v45  ;;  %v18512_v4 = vld [vmem:[#allocation168_spill] sm:$0xff] }
 0xd24   : > { %v7137_v45 = vmul.f32 %v16185_v30, %v16134_v49  ;;  %v6881_v3 = vadd.f32 %v6873_v58, %v6615_v53  ;;  %v7140_v49 = vmul.f32 %v16188_v59, %v16154_v6  ;;  %v7645_v30 = vmul.f32 %v16191_v63, %v16158_v62 }
 0xd25   : > { %v16207_v31 = vpop.f32.mrf.mxu1  ;;  %v6877_v38 = vadd.f32 %v6869_v17, %v6611_v44  ;;  %v6878_v61 = vadd.f32 %v6870_v20, %v6612_v5  ;;  %v7646_v5 = vmul.f32 %v16194_v57, %v16166_v12 }
 0xd26   : > { %18501 = vst [vmem:[#allocation30_spill] sm:$0xff] %v16207_v31  ;;  %v16223_v31 = vpop.permute.xlu0 %9048  ;;  %v16272_v8 = vpop.permute.xlu1 %9042  ;;  %v7147_v32 = vadd.f32 %v7139_v60, %v6881_v3 }
 0xd27   : > { %18505 = vst [vmem:[#allocation79_spill] sm:$0xff] %v16223_v31  ;;  %v16235_v25 = vpop.f32.mrf.mxu1  ;;  %v16238_v31 = vrot.slane %v8431_v33, %v18495_v21  ;;  %v6871_v33 = vmul.f32 %v6860_v0, %v16104_v28  ;;  %v7624_v21 = vpop.f32.mrf.mxu0  ;;  %v6874_v28 = vmul.f32 %v6864_v2, %v16116_v1  ;;  %v6880_v0 = vadd.f32 %v6872_v9, %v6614_v52  ;;  %v18509_v20 = vld [vmem:[#allocation175_spill] sm:$0xff]  ;;  %v18514_v9 = vld [vmem:[#allocation24_spill] sm:$0xff] }
 0xd28   : > { %v7141_v2 = vadd.f32 %v7133_v40, %v6875_v41  ;;  %v7142_v1 = vadd.f32 %v7134_v15, %v6876_v13  ;;  %v7143_v37 = vadd.f32 %v7135_v56, %v6877_v38  ;;  %v7144_v14 = vadd.f32 %v7136_v19, %v6878_v61  ;;  %v18510_v13 = vld [vmem:[#allocation149_spill] sm:$0xff] }
 0xd29   : > { %v6879_v35 = vadd.f32 %v6871_v33, %v6613_v34  ;;  %v7628_v27 = vpop.f32.mrf.mxu0  ;;  %v6882_v11 = vadd.f32 %v6874_v28, %v6616_v23  ;;  %v7146_v39 = vadd.f32 %v7138_v29, %v6880_v0  ;;  %v7911_v62 = vmul.f32 %v18510_v13, %v18509_v20  ;;  %v18511_v26 = vld [vmem:[#allocation187_spill] sm:$0xff]  ;;  %v18513_v34 = vld [vmem:[#allocation106_spill] sm:$0xff]  ;;  %v18517_v61 = vld [vmem:[#allocation97_spill] sm:$0xff] }
 0xd2a   : > { %v16256_v10 = vpop.permute.xlu0 %9044  ;;  %v7387_v44 = vadd.f32 %v16120_v24, %v7141_v2  ;;  %v7388_v42 = vadd.f32 %v16124_v51, %v7142_v1  ;;  %v7389_v50 = vadd.f32 %v16128_v55, %v7143_v37  ;;  %v7390_v6 = vadd.f32 %v16136_v22, %v7144_v14  ;;  %v18507_v51 = vld [vmem:[#allocation62_spill] sm:$0xff]  ;;  %v18515_v15 = vld [vmem:[#allocation45_spill] sm:$0xff]  ;;  %v16301_v53 = vpop.permute.xlu1 %9038  ;;  %v18518_v23 = vld [vmem:[#allocation116_spill] sm:$0xff] }
 0xd2b   : > { %v16254_v43 = vpop.f32.mrf.mxu1  ;;  %v7145_v16 = vadd.f32 %v7137_v45, %v6879_v35  ;;  %v7630_v59 = vpop.f32.mrf.mxu0  ;;  %v7647_v24 = vmul.f32 %v16191_v63, %v16170_v36  ;;  %v7648_v48 = vmul.f32 %v16194_v57, %v18507_v51  ;;  %v7148_v17 = vadd.f32 %v7140_v49, %v6882_v11  ;;  %v18519_v37 = vld [vmem:[#allocation117_spill] sm:$0xff] }
 0xd2c   : > { %v7912_v12 = vmul.f32 %v18512_v4, %v18511_v26  ;;  %v7392_v22 = vadd.f32 %v18513_v34, %v7146_v39  ;;  %v7393_v40 = vadd.f32 %v18514_v9, %v7147_v32  ;;  %v7649_v36 = vmul.f32 %v16191_v63, %v18515_v15 }
 0xd2d   : > { %v7890_v7 = vpop.f32.mrf.mxu1  ;;  %v7391_v55 = vadd.f32 %v18508_v54, %v7145_v16  ;;  %v7650_v52 = vmul.f32 %v16194_v57, %v7624_v21  ;;  %v7653_v58 = vadd.f32 %v7645_v30, %v7387_v44  ;;  %v7654_v28 = vadd.f32 %v7646_v5, %v7388_v42  ;;  %v18516_v56 = vld [vmem:[#allocation30_spill] sm:$0xff] }
 0xd2e   : > { %v16276_v41 = vpop.permute.xlu0 %9040  ;;  %v7913_v38 = vmul.f32 %v18510_v13, %v18516_v56  ;;  %v7394_v35 = vadd.f32 %v18518_v23, %v7148_v17  ;;  %v7655_v29 = vadd.f32 %v7647_v24, %v7389_v50  ;;  %v7656_v0 = vadd.f32 %v7648_v48, %v7390_v6  ;;  %v16319_v17 = vpop.permute.xlu1 %9034 }
 0xd2f   : > { %v7914_v2 = vmul.f32 %v18512_v4, %v16235_v25  ;;  %v7919_v21 = vadd.f32 %v7911_v62, %v7653_v58  ;;  %v7920_v3 = vadd.f32 %v7912_v12, %v7654_v28  ;;  %v7651_v11 = vmul.f32 %v16191_v63, %v7628_v27 }
 0xd30   : > { %v7657_v42 = vadd.f32 %v7649_v36, %v7391_v55  ;;  %v7658_v14 = vadd.f32 %v7650_v52, %v7392_v22  ;;  %v7652_v16 = vmul.f32 %v16194_v57, %v7630_v59  ;;  %v7915_v50 = vmul.f32 %v18510_v13, %v16254_v43 }
 0xd31   : > { %v7921_v30 = vadd.f32 %v7913_v38, %v7655_v29  ;;  %v7922_v24 = vadd.f32 %v7914_v2, %v7656_v0  ;;  %v7916_v63 = vmul.f32 %v18512_v4, %v7890_v7  ;;  %v7659_v57 = vadd.f32 %v7651_v11, %v7393_v40 }
 0xd32   : > { %v7894_v47 = vpop.f32.mrf.mxu1  ;;  %v16306_v60 = vpop.permute.xlu0 %9036  ;;  %v7660_v20 = vadd.f32 %v7652_v16, %v7394_v35  ;;  %v7923_v62 = vadd.f32 %v7915_v50, %v7657_v42 }
 0xd33   : > { %v7917_v27 = vmul.f32 %v18510_v13, %v7894_v47  ;;  %v18520_v13 = vld [vmem:[#allocation166_spill] sm:$0xff]  ;;  %v7924_v40 = vadd.f32 %v7916_v63, %v7658_v14 }
 0xd34   : > { %v7896_v1 = vpop.f32.mrf.mxu1 }
 0xd35   : > { %v7918_v51 = vmul.f32 %v18512_v4, %v7896_v1  ;;  %v7925_v15 = vadd.f32 %v7917_v27, %v7659_v57  ;;  %v18521_v1 = vld [vmem:[#allocation180_spill] sm:$0xff]  ;;  %v18522_v27 = vld [vmem:[#allocation215_spill] sm:$0xff] }
 0xd37   : > { %v7926_v36 = vadd.f32 %v7918_v51, %v7660_v20 }
 0xd42   : > { %v8142_v33 = vpop.f32.mrf.mxu0 }
 0xd43   : > { %v8177_v19 = vmul.f32 %v18517_v61, %v8142_v33  ;;  %v16323_v33 = vpop.permute.xlu0 %9032 }
 0xd44   : > { %v8144_v45 = vpop.f32.mrf.mxu0 }
 0xd45   : > { %v8178_v49 = vmul.f32 %v18519_v37, %v8144_v45  ;;  %v8185_v25 = vadd.f32 %v8177_v19, %v7919_v21 }
 0xd46   : > { %v8148_v44 = vpop.f32.mrf.mxu0 }
 0xd47   : > { %v8179_v5 = vmul.f32 %v18517_v61, %v8148_v44  ;;  %v8186_v59 = vadd.f32 %v8178_v49, %v7920_v3  ;;  %v16333_v49 = vpop.permute.xlu1 %9030 }
 0xd48   : > { %v8408_v39 = vpop.f32.mrf.mxu1  ;;  %v8150_v32 = vpop.f32.mrf.mxu0 }
 0xd49   : > { %v8443_v6 = vmul.f32 %v16231_v18, %v8408_v39  ;;  %v8180_v26 = vmul.f32 %v18519_v37, %v8150_v32  ;;  %v8187_v47 = vadd.f32 %v8179_v5, %v7921_v30  ;;  %v16336_v39 = vpop.permute.xlu0 %9026 }
 0xd4a   : > { %v8410_v48 = vpop.f32.mrf.mxu1  ;;  %v8154_v55 = vpop.f32.mrf.mxu0 }
 0xd4b   : > { %v8451_v54 = vadd.f32 %v8443_v6, %v8185_v25  ;;  %v8444_v43 = vmul.f32 %v16238_v31, %v8410_v48  ;;  %v8181_v12 = vmul.f32 %v18517_v61, %v8154_v55  ;;  %v8188_v45 = vadd.f32 %v8180_v26, %v7922_v24 }
 0xd4c   : > { %v8414_v7 = vpop.f32.mrf.mxu1  ;;  %v8156_v9 = vpop.f32.mrf.mxu0  ;;  %v18523_v26 = vmov 0.0  }
 0xd4d   : > { %v8483_v4 = vadd.f32 %v18520_v13, %v8451_v54  ;;  %v8452_v34 = vadd.f32 %v8444_v43, %v8186_v59  ;;  %v8445_v22 = vmul.f32 %v16231_v18, %v8414_v7  ;;  %v8182_v52 = vmul.f32 %v18519_v37, %v8156_v9  ;;  %520 = vst.msk [vmem:[#allocation2 + $0x190] sm:$0xf] %vm519_vm6, %v18523_v26 }
 0xd4e   : > { %v8416_v58 = vpop.f32.mrf.mxu1  ;;  %v8160_v19 = vpop.f32.mrf.mxu0  ;;  %v8189_v23 = vadd.f32 %v8181_v12, %v7923_v62 }
 0xd4f   : > { %vm8491_vm10 = vcmp.ge.f32.partialorder %v8483_v4, 0.0  ;;  %v8499_v28 = vmul.f32 0.2, %v8483_v4  ;;  %v8484_v56 = vadd.f32 %v18520_v13, %v8452_v34  ;;  %v8453_v38 = vadd.f32 %v8445_v22, %v8187_v47  ;;  %v16349_v12 = vpop.permute.xlu1 %9028  ;;  %v18524_v22 = vld [vmem:[#allocation188_spill] sm:$0xff] }
 0xd50   : > { %v8446_v35 = vmul.f32 %v16238_v31, %v8416_v58  ;;  %v8183_v29 = vmul.f32 %v18517_v61, %v8160_v19  ;;  %v8420_v0 = vpop.f32.mrf.mxu1  ;;  %v8162_v11 = vpop.f32.mrf.mxu0  ;;  %v8190_v44 = vadd.f32 %v8182_v52, %v7924_v40 }
 0xd51   : > { %vm8492_vm12 = vcmp.ge.f32.partialorder %v8484_v56, 0.0  ;;  %v8500_v2 = vmul.f32 0.2, %v8484_v56  ;;  %v8485_v21 = vadd.f32 %v18521_v1, %v8453_v38  ;;  %v8447_v3 = vmul.f32 %v16231_v18, %v8420_v0 }
 0xd52   : > { %v8454_v42 = vadd.f32 %v8446_v35, %v8188_v45  ;;  %v8191_v14 = vadd.f32 %v8183_v29, %v7925_v15  ;;  %v8422_v16 = vpop.f32.mrf.mxu1  ;;  %v8507_v50 = vsel %vm8491_vm10, %v8483_v4, %v8499_v28  ;;  %v8184_v6 = vmul.f32 %v18519_v37, %v8162_v11  ;;  %v16353_v4 = vpop.permute.xlu0 %9024 }
 0xd53   : > { %vm8493_vm15 = vcmp.ge.f32.partialorder %v8485_v21, 0.0  ;;  %v8501_v61 = vmul.f32 0.2, %v8485_v21  ;;  %v8455_v30 = vadd.f32 %v8447_v3, %v8189_v23  ;;  %v8448_v25 = vmul.f32 %v16238_v31, %v8422_v16  ;;  %v16363_v35 = vpop.permute.xlu1 %9022 }
 0xd54   : > { %v8486_v5 = vadd.f32 %v18521_v1, %v8454_v42  ;;  %v8523_v32 = vrot.slane %v8507_v50, 4  ;;  %v8426_v24 = vpop.f32.mrf.mxu1  ;;  %v8508_v63 = vsel %vm8492_vm12, %v8484_v56, %v8500_v2  ;;  %v16382_v50 = vld [vmem:[#allocation2 + $0x18] sm:$0xff] }
 0xd55   : > { %v8487_v51 = vadd.f32 %v18522_v27, %v8455_v30  ;;  %v8456_v48 = vadd.f32 %v8448_v25, %v8190_v44  ;;  %v8449_v57 = vmul.f32 %v16231_v18, %v8426_v24  ;;  %v8524_v59 = vrot.slane %v8508_v63, 4  ;;  %v16388_v30 = vld [vmem:[#allocation2 + $0x8] sm:$0xff]  ;;  %v16392_v25 = vld [vmem:[#allocation2 + $0x10] sm:$0xff] }
 0xd56   : > { %vm8494_vm14 = vcmp.ge.f32.partialorder %v8486_v5, 0.0  ;;  %v8502_v54 = vmul.f32 0.2, %v8486_v5  ;;  %8537 = vrot.lane.b32.xlu1 %v8523_v32, %s10076_s15  ;;  %v8428_v43 = vpop.f32.mrf.mxu1  ;;  %v8509_v55 = vsel %vm8493_vm15, %v8485_v21, %v8501_v61  ;;  %v8192_v18 = vadd.f32 %v8184_v6, %v7926_v36  ;;  %v16365_v0 = vpop.permute.xlu0 %9018 }
 0xd57   : > { %vm8495_vm4 = vcmp.ge.f32.partialorder %v8487_v51, 0.0  ;;  %v8503_v37 = vmul.f32 0.2, %v8487_v51  ;;  %v8488_v20 = vadd.f32 %v18522_v27, %v8456_v48  ;;  %v8457_v62 = vadd.f32 %v8449_v57, %v8191_v14  ;;  %8539 = vrot.lane.b32.xlu0 %v8524_v59, %s10076_s15  ;;  %v16371_v11 = vpop.permute.xlu1 %9020 }
 0xd58   : > { %v8450_v7 = vmul.f32 %v16238_v31, %v8428_v43  ;;  %v8525_v47 = vrot.slane %v8509_v55, 4  ;;  %v8510_v13 = vsel %vm8494_vm14, %v8486_v5, %v8502_v54  ;;  %v16396_v5 = vld [vmem:[#allocation2] sm:$0xff] }
 0xd59   : > { %vm8496_vm8 = vcmp.ge.f32.partialorder %v8488_v20, 0.0  ;;  %v8504_v34 = vmul.f32 0.2, %v8488_v20  ;;  %v8489_v9 = vadd.f32 %v18524_v22, %v8457_v62  ;;  %v8527_v40 = vrot.slane %v8510_v13, 4 }
 0xd5a   : > { %v8458_v15 = vadd.f32 %v8450_v7, %v8192_v18  ;;  %v8526_v52 = vsel %vm568_vm5, %v8523_v32, %v8525_v47  ;;  %v8511_v58 = vsel %vm8495_vm4, %v8487_v51, %v8503_v37  ;;  %v16374_v44 = vpop.permute.xlu0 %8772 }
 0xd5b   : > { %vm8497_vm9 = vcmp.ge.f32.partialorder %v8489_v9, 0.0  ;;  %v8505_v28 = vmul.f32 0.2, %v8489_v9  ;;  %8541 = vrot.lane.b32.xlu1 %v8526_v52, %s10076_s15  ;;  %v8528_v31 = vsel %vm568_vm5, %v8524_v59, %v8527_v40  ;;  %v8529_v36 = vrot.slane %v8511_v58, 4  ;;  %v16380_v16 = vpop.permute.xlu1 %8768 }
 0xd5c   : > { %v8490_v56 = vadd.f32 %v18524_v22, %v8458_v15  ;;  %8543 = vrot.lane.b32.xlu0 %v8528_v31, %s10076_s15  ;;  %v8512_v38 = vsel %vm8496_vm8, %v8488_v20, %v8504_v34 }
 0xd5d   : > { %v8530_v19 = vsel %vm568_vm5, %v8525_v47, %v8529_v36  ;;  %v8531_v45 = vrot.slane %v8512_v38, 4  ;;  %v8513_v23 = vsel %vm8497_vm9, %v8489_v9, %v8505_v28 }
 0xd5e   : > { %vm8498_vm11 = vcmp.ge.f32.partialorder %v8490_v56, 0.0  ;;  %v8506_v29 = vmul.f32 0.2, %v8490_v56  ;;  %v8533_v1 = vrot.slane %v8513_v23, 4  ;;  %v16384_v61 = vpop.permute.xlu0 %8764 }
 0xd5f   : > { %8545 = vrot.lane.b32.xlu1 %v8530_v19, %s10076_s15  ;;  %v8532_v2 = vsel %vm568_vm5, %v8527_v40, %v8531_v45  ;;  %v16398_v6 = vpop.permute.xlu1 %8766 }
 0xd60   : > { %8547 = vrot.lane.b32.xlu0 %v8532_v2, %s10076_s15  ;;  %v8514_v21 = vsel %vm8498_vm11, %v8490_v56, %v8506_v29  ;;  %v8534_v42 = vsel %vm568_vm5, %v8529_v36, %v8533_v1 }
 0xd61   : > { %v8535_v3 = vrot.slane %v8514_v21, 4 }
 0xd62   : > { %v16402_v32 = vpop.permute.xlu0 %8762 }
 0xd63   : > { %8553 = vrot.lane.b32.xlu1 %v8533_v1, %s10076_s15  ;;  %v8536_v14 = vsel %vm568_vm5, %v8531_v45, %v8535_v3  ;;  %v16404_v24 = vpop.permute.xlu1 %8758 }
 0xd64   : > { %8555 = vrot.lane.b32.xlu0 %v8535_v3, %s10076_s15 }
 0xd66   : > { %v16406_v63 = vpop.permute.xlu0 %8760 }
 0xd67   : > { %8549 = vrot.lane.b32.xlu1 %v8534_v42, %s10076_s15  ;;  %v16408_v27 = vpop.permute.xlu1 %8756 }
 0xd68   : > { %8551 = vrot.lane.b32.xlu0 %v8536_v14, %s10076_s15  ;;  %s10086_s15 = smov 48  }
 0xd6a   : > { %v16410_v51 = vpop.permute.xlu0 %8752 }
 0xd6b   : > { %8708 = vrot.lane.b32.xlu1 %v16382_v50, %s17542_s28  ;;  %v16412_v48 = vpop.permute.xlu1 %8754 }
 0xd6c   : > { %8704 = vrot.lane.b32.xlu0 %v16388_v30, %s17542_s28 }
 0xd6e   : > { %v16414_v57 = vpop.permute.xlu0 %8750 }
 0xd6f   : > { %8706 = vrot.lane.b32.xlu1 %v16392_v25, %s17542_s28  ;;  %v16416_v59 = vpop.permute.xlu1 %8746 }
 0xd70   : > { %8702 = vrot.lane.b32.xlu0 %v16396_v5, %s17542_s28 }
 0xd72   : > { %v16418_v54 = vpop.permute.xlu0 %8748 }
 0xd73   : > { %v16420_v43 = vpop.permute.xlu1 %8744 }
 0xd76   : > { %v16422_v55 = vpop.permute.xlu0 %8740 }
 0xd77   : > { %v16424_v37 = vpop.permute.xlu1 %8742 }
 0xd7a   : > { %v16426_v20 = vpop.permute.xlu0 %8738 }
 0xd7b   : > { %v16428_v62 = vpop.permute.xlu1 %8734 }
 0xd7e   : > { %v16430_v26 = vpop.permute.xlu0 %8736 }
 0xd7f   : > { %v16432_v18 = vpop.permute.xlu1 %8732 }
 0xd80   : > { %18525 = vst [vmem:[#allocation64_spill] sm:$0xff] %v16432_v18 }
 0xd82   : > { %v16434_v7 = vpop.permute.xlu0 %8728 }
 0xd83   : > { %18526 = vst [vmem:[#allocation32_spill] sm:$0xff] %v16434_v7  ;;  %v16436_v47 = vpop.permute.xlu1 %8730 }
 0xd84   : > { %18527 = vst [vmem:[#allocation76_spill] sm:$0xff] %v16436_v47 }
 0xd86   : > { %v16438_v13 = vpop.permute.xlu0 %8726 }
 0xd87   : > { %18528 = vst [vmem:[#allocation56_spill] sm:$0xff] %v16438_v13  ;;  %v16440_v34 = vpop.permute.xlu1 %8722 }
 0xd88   : > { %18529 = vst [vmem:[#allocation27_spill] sm:$0xff] %v16440_v34  ;;  %v10029_v34 = vld [vmem:[#allocation2 + $0x20] sm:$0xff] }
 0xd8a   : > { %v16442_v22 = vpop.permute.xlu0 %8724 }
 0xd8b   : > { %18530 = vst [vmem:[#allocation123_spill] sm:$0xff] %v16442_v22  ;;  %v16444_v9 = vpop.permute.xlu1 %8720 }
 0xd8c   : > { %18531 = vst [vmem:[#allocation92_spill] sm:$0xff] %v16444_v9 }
 0xd8e   : > { %v16446_v40 = vpop.permute.xlu0 %8716 }
 0xd8f   : > { %18532 = vst [vmem:[#allocation37_spill] sm:$0xff] %v16446_v40  ;;  %v16448_v15 = vpop.permute.xlu1 %8718 }
 0xd90   : > { %18533 = vst [vmem:[#allocation272_spill] sm:$0xff] %v16448_v15  ;;  %v10027_v15 = vld [vmem:[#allocation2 + $0x40] sm:$0xff] }
 0xd92   : > { %v16450_v52 = vpop.permute.xlu0 %8714 }
 0xd93   : > { %18534 = vst [vmem:[#allocation259_spill] sm:$0xff] %v16450_v52  ;;  %v16452_v58 = vpop.permute.xlu1 %8710  ;;  %v10025_v52 = vld [vmem:[#allocation2 + $0x48] sm:$0xff] }
 0xd94   : > { %18535 = vst [vmem:[#allocation105_spill] sm:$0xff] %v16452_v58 }
 0xd96   : > { %v16454_v28 = vpop.permute.xlu0 %8712 }
 0xd97   : > { %18536 = vst [vmem:[#allocation270_spill] sm:$0xff] %v16454_v28  ;;  %v16456_v31 = vpop.permute.xlu1 %8770 }
 0xd9a   : > { %v16458_v36 = vpop.permute.xlu0 %9064 }
 0xdc8   : > { %v8538_v56 = vpop.permute.xlu1 %8537 }
 0xdc9   : > { %8577 = vst.msk [vmem:[#allocation2 + $0x120] sm:$0xf0] %vm1971_vm2, %v8538_v56  ;;  %v8540_v38 = vpop.permute.xlu0 %8539 }
 0xdca   : > { %v8557_v19 = vsel %vm483_vm0, %v8538_v56, %v8540_v38  ;;  %8579 = vst.msk [vmem:[#allocation2 + $0x130] sm:$0xf0] %vm1974_vm7, %v8540_v38  ;;  %vm9317_vm7 = vcmask 392192  }
 0xdcb   : > { %8578 = vst [vmem:[#allocation2 + $0x128] sm:$0xf0] %v8557_v19 }
 0xdcd   : > { %v8542_v45 = vpop.permute.xlu1 %8541 }
 0xdce   : > { %8580 = vst.msk [vmem:[#allocation2 + $0x138] sm:$0xff] %vm1976_vm13, %v8542_v45  ;;  %v8544_v23 = vpop.permute.xlu0 %8543 }
 0xdcf   : > { %v8558_v29 = vsel %vm483_vm0, %v8542_v45, %v8544_v23  ;;  %8582 = vst.msk [vmem:[#allocation2 + $0x148] sm:$0xff] %vm483_vm0, %v8544_v23 }
 0xdd0   : > { %v16466_v2 = vld [vmem:[#allocation2 + $0x120] sm:$0xff] }
 0xdd1   : > { %9066 = vrot.lane.b32.xlu1 %v16466_v2, %s17542_s28  ;;  %8774 = vrot.lane.b32.xlu0 %v16466_v2, %s17542_s28  ;;  %v8546_v1 = vpop.permute.xlu1 %8545  ;;  %v8632_v14 = vld [vmem:[#allocation2 + $0x130] sm:$0xff] }
 0xdd2   : > { %8583 = vst.msk [vmem:[#allocation2 + $0x150] sm:$0xff] %vm1976_vm13, %v8546_v1  ;;  %v8548_v21 = vpop.permute.xlu0 %8547  ;;  %v8975_v3 = vld [vmem:[#allocation2 + $0x128] sm:$0xff] }
 0xdd3   : > { %v8559_v42 = vsel %vm483_vm0, %v8546_v1, %v8548_v21  ;;  %8585 = vst.msk [vmem:[#allocation2 + $0x160] sm:$0xff] %vm483_vm0, %v8548_v21 }
 0xdd5   : > { %8778 = vrot.lane.b32.xlu1 %v8632_v14, %s17542_s28  ;;  %9068 = vrot.lane.b32.xlu0 %v8975_v3, %s17542_s28  ;;  %v8554_v56 = vpop.permute.xlu1 %8553  ;;  %v8976_v45 = vld [vmem:[#allocation2 + $0x138] sm:$0xff] }
 0xdd6   : > { %8589 = vst.msk [vmem:[#allocation2 + $0x180] sm:$0xf] %vm532_vm3, %v8554_v56  ;;  %v8556_v38 = vpop.permute.xlu0 %8555  ;;  %v8635_v58 = vld [vmem:[#allocation2 + $0x148] sm:$0xff]  ;;  %vm18544_vm3 = vcmask 916480  }
 0xdd7   : > { %v8561_v19 = vsel %vm483_vm0, %v8554_v56, %v8556_v38  ;;  %8591 = vst.msk [vmem:[#allocation2 + $0x190] sm:$0xf] %vm500_vm1, %v8556_v38  ;;  %vm18545_vm2 = vmmov %vm18544_vm3 }
 0xdd8   : > { %8590 = vst [vmem:[#allocation2 + $0x188] sm:$0xf] %v8561_v19  ;;  %vm18548_vm10 = vmmov %vm18545_vm2 }
 0xdd9   : > { %8776 = vrot.lane.b32.xlu0 %v8975_v3, %s17542_s28  ;;  %9070 = vrot.lane.b32.xlu1 %v8976_v45, %s17542_s28  ;;  %v8550_v23 = vpop.permute.xlu1 %8549  ;;  %v8978_v56 = vld [vmem:[#allocation2 + $0x150] sm:$0xff]  ;;  %vm18553_vm12 = vmmov %vm18545_vm2 }
 0xdda   : > { %8586 = vst.msk [vmem:[#allocation2 + $0x168] sm:$0xff] %vm1976_vm13, %v8550_v23  ;;  %v8552_v1 = vpop.permute.xlu0 %8551  ;;  %v8638_v38 = vld [vmem:[#allocation2 + $0x160] sm:$0xff]  ;;  %vm18547_vm13 = vmmov %vm18545_vm2 }
 0xddb   : > { %v16484_v21 = vsel %vm483_vm0, %v8550_v23, %v8552_v1  ;;  %8588 = vst.msk [vmem:[#allocation2 + $0x178] sm:$0xff] %vm483_vm0, %v8552_v1  ;;  %vm18538_vm0 = vcmask 31744   ;;  %vm18554_vm15 = vmmov %vm18545_vm2 }
 0xddc   : > { %vm18539_vm1 = vmmov %vm18538_vm0 }
 0xddd   : > { %8784 = vrot.lane.b32.xlu0 %v8635_v58, %s17542_s28  ;;  %8780 = vrot.lane.b32.xlu1 %v8976_v45, %s17542_s28  ;;  %vm18555_vm14 = vmmov %vm18545_vm2 }
 0xdde   : > { %v16506_v23 = vld [vmem:[#allocation2 + $0x190] sm:$0xf]  ;;  %vm18556_vm6 = vmmov %vm18545_vm2 }
 0xddf   : > { %vm18558_vm4 = vmmov %vm18545_vm2 }
 0xde0   : > { %vm18561_vm8 = vmmov %vm18545_vm2 }
 0xde1   : > { %9297 = vrot.lane.b32.xlu1 %v8635_v58, %s10086_s15  ;;  %9072 = vrot.lane.b32.xlu0 %v8558_v29, %s17542_s28  ;;  %v8982_v58 = vld [vmem:[#allocation2 + $0x180] sm:$0xf]  ;;  %v8639_v19 = vld [vmem:[#allocation2 + $0x168] sm:$0xff]  ;;  %vm18565_vm9 = vmmov %vm18545_vm2 }
 0xde2   : > { %v8641_v1 = vld [vmem:[#allocation2 + $0x178] sm:$0xff]  ;;  %vm18568_vm11 = vmmov %vm18545_vm2 }
 0xde5   : > { %9295 = vrot.lane.b32.xlu0 %v8558_v29, %s10086_s15  ;;  %8782 = vrot.lane.b32.xlu1 %v8558_v29, %s17542_s28  ;;  %v16501_v29 = vld [vmem:[#allocation2 + $0x180] sm:$0xf] }
 0xde9   : > { %9074 = vrot.lane.b32.xlu1 %v8978_v56, %s17542_s28  ;;  %8786 = vrot.lane.b32.xlu0 %v8978_v56, %s17542_s28 }
 0xded   : > { %9299 = vrot.lane.b32.xlu1 %v8978_v56, %s10086_s15  ;;  %9303 = vrot.lane.b32.xlu0 %v8638_v38, %s10086_s15  ;;  %v8983_v56 = vld [vmem:[#allocation2 + $0x188] sm:$0xf] }
 0xdf1   : > { %8790 = vrot.lane.b32.xlu1 %v8638_v38, %s17542_s28  ;;  %9076 = vrot.lane.b32.xlu0 %v8559_v42, %s17542_s28  ;;  %v16515_v38 = vld [vmem:[#allocation2 + $0x188] sm:$0xf] }
 0xdf5   : > { %8788 = vrot.lane.b32.xlu0 %v8559_v42, %s17542_s28  ;;  %9082 = vrot.lane.b32.xlu1 %v8982_v58, %s17542_s28  ;;  %v10001_v58 = vld [vmem:[#allocation2 + $0x118] sm:$0xff] }
 0xdf9   : > { %8798 = vrot.lane.b32.xlu1 %v16501_v29, %s17542_s28  ;;  %9305 = vrot.lane.b32.xlu0 %v8639_v19, %s10086_s15 }
 0xdfd   : > { %9301 = vrot.lane.b32.xlu1 %v8559_v42, %s10086_s15  ;;  %8802 = vrot.lane.b32.xlu0 %v16506_v23, %s17542_s28  ;;  %v18537_v42 = vld [vmem:[#allocation20_spill] sm:$0xff] }
 0xe01   : > { %9078 = vrot.lane.b32.xlu1 %v8639_v19, %s17542_s28  ;;  %8796 = vrot.lane.b32.xlu0 %v8641_v1, %s17542_s28 }
 0xe05   : > { %9084 = vrot.lane.b32.xlu0 %v8983_v56, %s17542_s28  ;;  %8792 = vrot.lane.b32.xlu1 %v8639_v19, %s17542_s28  ;;  %v10002_v19 = vld [vmem:[#allocation2 + $0x108] sm:$0xff]  ;;  %v10007_v56 = vld [vmem:[#allocation2 + $0xf0] sm:$0xff] }
 0xe09   : > { %8800 = vrot.lane.b32.xlu1 %v16515_v38, %s17542_s28  ;;  %9080 = vrot.lane.b32.xlu0 %v16484_v21, %s17542_s28 }
 0xe0d   : > { %9309 = vrot.lane.b32.xlu1 %v8641_v1, %s10086_s15  ;;  %9293 = vrot.lane.b32.xlu0 %v8976_v45, %s10086_s15  ;;  %v8949_v45 = vld [vmem:[%s16953_s10 + $0x8] sm:$0xff]  ;;  %v10003_v1 = vld [vmem:[#allocation2 + $0xf8] sm:$0xff] }
 0xe0e   : > { %9916 = vmatprep.mubr.msk.f32.mxu1 %vm18538_vm0, %v8949_v45  ;;  %v10011_v45 = vld [vmem:[#allocation2 + $0xc8] sm:$0xff]  ;;  %vm18570_vm0 = vmmov %vm18545_vm2 }
 0xe11   : > { %9289 = vrot.lane.b32.xlu1 %v8975_v3, %s10086_s15  ;;  %9291 = vrot.lane.b32.xlu0 %v8632_v14, %s10086_s15  ;;  %v10004_v3 = vld [vmem:[#allocation2 + $0x100] sm:$0xff]  ;;  %v10006_v14 = vld [vmem:[#allocation2 + $0xd8] sm:$0xff] }
 0xe15   : > { %9287 = vrot.lane.b32.xlu1 %v16466_v2, %s10086_s15  ;;  %9283 = vrot.lane.b32.xlu0 %v18537_v42, %s10086_s15  ;;  %v10005_v2 = vld [vmem:[#allocation2 + $0xe0] sm:$0xff]  ;;  %v10008_v42 = vld [vmem:[#allocation2 + $0xd0] sm:$0xff] }
 0xe19   : > { %9285 = vrot.lane.b32.xlu1 %v10001_v58, %s10086_s15  ;;  %9281 = vrot.lane.b32.xlu0 %v10002_v19, %s10086_s15  ;;  %v10009_v58 = vld [vmem:[#allocation2 + $0xe8] sm:$0xff]  ;;  %v10010_v19 = vld [vmem:[#allocation2 + $0xb0] sm:$0xff] }
 0xe1d   : > { %9277 = vrot.lane.b32.xlu1 %v10003_v1, %s10086_s15  ;;  %9279 = vrot.lane.b32.xlu0 %v10004_v3, %s10086_s15  ;;  %v10012_v1 = vld [vmem:[#allocation2 + $0xa8] sm:$0xff]  ;;  %v10013_v3 = vld [vmem:[#allocation2 + $0xc0] sm:$0xff] }
 0xe21   : > { %9271 = vrot.lane.b32.xlu0 %v10005_v2, %s10086_s15  ;;  %8794 = vrot.lane.b32.xlu1 %v16484_v21, %s17542_s28  ;;  %v10014_v2 = vld [vmem:[#allocation2 + $0xa0] sm:$0xff]  ;;  %s18631_s28 = sshll.u32 %s18633_s30, 3 }
 0xe22   : > { %s482_s20 = scalar_lea.vmem %s16957_s14, %s18631_s28 }
 0xe25   : > { %9269 = vrot.lane.b32.xlu0 %v10006_v14, %s10086_s15  ;;  %9275 = vrot.lane.b32.xlu1 %v10007_v56, %s10086_s15  ;;  %v10015_v14 = vld [vmem:[#allocation2 + $0xb8] sm:$0xff]  ;;  %v8593_v56 = vld [vmem:[%s16954_s11 + $0x8] sm:$0xff] }
 0xe26   : > { %9913 = vmatprep.mubr.msk.f32.mxu0 %vm18539_vm1, %v8593_v56  ;;  %v10020_v56 = vld [vmem:[#allocation2 + $0x88] sm:$0xff]  ;;  %vm18571_vm1 = vmmov %vm18570_vm0 }
 0xe29   : > { %9267 = vrot.lane.b32.xlu0 %v10008_v42, %s10086_s15  ;;  %9273 = vrot.lane.b32.xlu1 %v10009_v58, %s10086_s15  ;;  %v16554_v42 = vpop.permute.xlu1 %8708  ;;  %v16556_v58 = vpop.permute.xlu0 %8704 }
 0xe2a   : > { %18540 = vst [vmem:[#allocation16_spill] sm:$0xff] %v16554_v42  ;;  %18541 = vst [vmem:[#allocation15_spill] sm:$0xff] %v16556_v58  ;;  %v10023_v42 = vld [vmem:[#allocation2 + $0x50] sm:$0xff] }
 0xe2d   : > { %9259 = vrot.lane.b32.xlu0 %v10010_v19, %s10086_s15  ;;  %9265 = vrot.lane.b32.xlu1 %v10011_v45, %s10086_s15  ;;  %v10016_v19 = vld [vmem:[#allocation2 + $0x80] sm:$0xff]  ;;  %v10017_v45 = vld [vmem:[#allocation2 + $0x98] sm:$0xff] }
 0xe31   : > { %9257 = vrot.lane.b32.xlu0 %v10012_v1, %s10086_s15  ;;  %9263 = vrot.lane.b32.xlu1 %v10013_v3, %s10086_s15  ;;  %v10018_v1 = vld [vmem:[#allocation2 + $0x78] sm:$0xff]  ;;  %v10019_v3 = vld [vmem:[#allocation2 + $0x90] sm:$0xff] }
 0xe35   : > { %9255 = vrot.lane.b32.xlu0 %v10014_v2, %s10086_s15  ;;  %9261 = vrot.lane.b32.xlu1 %v10015_v14, %s10086_s15  ;;  %v16562_v2 = vpop.permute.xlu1 %8706  ;;  %v16564_v14 = vpop.permute.xlu0 %8702 }
 0xe36   : > { %18542 = vst [vmem:[#allocation18_spill] sm:$0xff] %v16562_v2  ;;  %18543 = vst [vmem:[#allocation17_spill] sm:$0xff] %v16564_v14  ;;  %v10024_v14 = vld [vmem:[#allocation2 + $0x60] sm:$0xff] }
 0xe39   : > { %9247 = vrot.lane.b32.xlu0 %v10016_v19, %s10086_s15  ;;  %9253 = vrot.lane.b32.xlu1 %v10017_v45, %s10086_s15  ;;  %v10021_v45 = vld [vmem:[#allocation2 + $0x70] sm:$0xff] }
 0xe3d   : > { %9245 = vrot.lane.b32.xlu0 %v10018_v1, %s10086_s15  ;;  %9251 = vrot.lane.b32.xlu1 %v10019_v3, %s10086_s15  ;;  %v10022_v1 = vld [vmem:[#allocation2 + $0x68] sm:$0xff] }
 0xe41   : > { %9307 = vrot.lane.b32.xlu0 %v16484_v21, %s10086_s15  ;;  %9249 = vrot.lane.b32.xlu1 %v10020_v56, %s10086_s15 }
 0xe43   : > { %v8775_v19 = vpop.permute.xlu0 %8774  ;;  %v16569_v58 = vpop.permute.xlu1 %9066 }
 0xe45   : > { %9243 = vrot.lane.b32.xlu0 %v10021_v45, %s10086_s15  ;;  %9241 = vrot.lane.b32.xlu1 %v10022_v1, %s10086_s15  ;;  %v10026_v1 = vld [vmem:[#allocation2 + $0x58] sm:$0xff] }
 0xe47   : > { %v16573_v3 = vpop.permute.xlu0 %9068  ;;  %v8779_v2 = vpop.permute.xlu1 %8778 }
 0xe49   : > { %9235 = vrot.lane.b32.xlu0 %v10023_v42, %s10086_s15  ;;  %9239 = vrot.lane.b32.xlu1 %v10024_v14, %s10086_s15  ;;  %v10028_v14 = vld [vmem:[#allocation2 + $0x38] sm:$0xff] }
 0xe4b   : > { %v8777_v21 = vpop.permute.xlu0 %8776  ;;  %v16577_v56 = vpop.permute.xlu1 %9070 }
 0xe4c   : > { %v16580_v28 = vsel %vm18544_vm3, %v8775_v19, %v8777_v21  ;;  %v16583_v45 = vsel %vm18545_vm2, %v8777_v21, %v8779_v2  ;;  %v10030_v2 = vld [vmem:[#allocation2 + $0x30] sm:$0xff]  ;;  %vm18572_vm3 = vmmov %vm18570_vm0 }
 0xe4d   : > { %9233 = vrot.lane.b32.xlu0 %v10025_v52, %s10086_s15  ;;  %9237 = vrot.lane.b32.xlu1 %v10026_v1, %s10086_s15  ;;  %vm18573_vm2 = vmmov %vm18570_vm0 }
 0xe4f   : > { %v8785_v40 = vpop.permute.xlu0 %8784  ;;  %v8781_v42 = vpop.permute.xlu1 %8780 }
 0xe51   : > { %9231 = vrot.lane.b32.xlu0 %v10027_v15, %s10086_s15  ;;  %9229 = vrot.lane.b32.xlu1 %v10028_v14, %s10086_s15 }
 0xe53   : > { %v9073_v9 = vpop.permute.xlu0 %9072  ;;  %v9298_v19 = vpop.permute.xlu1 %9297 }
 0xe55   : > { %9223 = vrot.lane.b32.xlu0 %v10029_v34, %s10086_s15  ;;  %9227 = vrot.lane.b32.xlu1 %v10030_v2, %s10086_s15  ;;  %v10031_v34 = vld [vmem:[#allocation2 + $0x28] sm:$0xff] }
 0xe57   : > { %v16591_v52 = vpop.permute.xlu0 %9295  ;;  %v8783_v21 = vpop.permute.xlu1 %8782 }
 0xe58   : > { %18546 = vst [vmem:[#allocation282_spill] sm:$0xff] %v16591_v52  ;;  %v16594_v1 = vsel %vm18547_vm13, %v8781_v42, %v8783_v21  ;;  %v16597_v15 = vsel %vm18548_vm10, %v8783_v21, %v8785_v40  ;;  %v16601_v14 = vsel %vm9317_vm7, %v16591_v52, %v9298_v19  ;;  %vm18574_vm13 = vmmov %vm18570_vm0 }
 0xe59   : > { %18549 = vst [vmem:[#allocation264_spill] sm:$0xff] %v16601_v14  ;;  %9221 = vrot.lane.b32.xlu0 %v16382_v50, %s10086_s15  ;;  %9225 = vrot.lane.b32.xlu1 %v10031_v34, %s10086_s15  ;;  %vm18575_vm10 = vmmov %vm18570_vm0 }
 0xe5b   : > { %v16606_v2 = vpop.permute.xlu0 %8786  ;;  %v9075_v22 = vpop.permute.xlu1 %9074 }
 0xe5d   : > { %9219 = vrot.lane.b32.xlu0 %v16392_v25, %s10086_s15  ;;  %9217 = vrot.lane.b32.xlu1 %v16388_v30, %s10086_s15  ;;  %v8645_v30 = vld [vmem:[%s16956_s13] sm:$0xff] }
 0xe5f   : > { %v9304_v40 = vpop.permute.xlu0 %9303  ;;  %v9300_v42 = vpop.permute.xlu1 %9299 }
 0xe61   : > { %9313 = vrot.lane.b32.xlu0 %v16515_v38, %s10086_s15  ;;  %9215 = vrot.lane.b32.xlu1 %v16396_v5, %s10086_s15 }
 0xe63   : > { %v9077_v50 = vpop.permute.xlu0 %9076  ;;  %v16616_v19 = vpop.permute.xlu1 %8790 }
 0xe65   : > { %9311 = vrot.lane.b32.xlu0 %v16501_v29, %s10086_s15  ;;  %9315 = vrot.lane.b32.xlu1 %v16506_v23, %s10086_s15 }
 0xe67   : > { %v16625_v25 = vpop.permute.xlu0 %8788  ;;  %v16627_v21 = vpop.permute.xlu1 %9082 }
 0xe69   : > { %8648 = vperm.xlu1 %9961, %v8645_v30  }
 0xe6b   : > { %v16629_v38 = vpop.permute.xlu0 %9305  ;;  %v16631_v5 = vpop.permute.xlu1 %8798 }
 0xe6c   : > { %18550 = vst [vmem:[#allocation237_spill] sm:$0xff] %v16629_v38  ;;  %18551 = vst [vmem:[#allocation251_spill] sm:$0xff] %v16631_v5  ;;  %v9100_v5 = vsel %vm18554_vm15, %v9075_v22, %v9077_v50  ;;  %v18557_v22 = vld [vmem:[#allocation26_spill] sm:$0xff] }
 0xe6d   : > { %vm18577_vm15 = vmmov %vm18570_vm0 }
 0xe6f   : > { %v16633_v34 = vpop.permute.xlu0 %8802  ;;  %v9302_v14 = vpop.permute.xlu1 %9301 }
 0xe70   : > { %v16636_v29 = vsel %vm9317_vm7, %v9300_v42, %v9302_v14  ;;  %v16639_v23 = vsel %vm9317_vm7, %v9302_v14, %v9304_v40  ;;  %v9099_v40 = vsel %vm18555_vm14, %v16577_v56, %v9073_v9  ;;  %v18560_v56 = vld [vmem:[#allocation95_spill] sm:$0xff]  ;;  %vm18578_vm14 = vmmov %vm18570_vm0 }
 0xe71   : > { %18552 = vst [vmem:[#allocation223_spill] sm:$0xff] %v16636_v29  ;;  %v9098_v29 = vsel %vm18556_vm6, %v16569_v58, %v16573_v3  ;;  %vm18579_vm6 = vmmov %vm18570_vm0 }
 0xe73   : > { %v8797_v52 = vpop.permute.xlu0 %8796  ;;  %v9079_v13 = vpop.permute.xlu1 %9078 }
 0xe77   : > { %v16641_v7 = vpop.permute.xlu0 %9084  ;;  %v8793_v47 = vpop.permute.xlu1 %8792 }
 0xe7b   : > { %v9081_v18 = vpop.permute.xlu0 %9080  ;;  %v16643_v30 = vpop.permute.xlu1 %8800 }
 0xe7c   : > { %v9101_v38 = vsel %vm18553_vm12, %v9079_v13, %v9081_v18  ;;  %9142 = vmatprep.subr.mxu1 %v9081_v18  ;;  %vm18576_vm12 = vmmov %vm18570_vm0 }
 0xe7d   : > { %9143 = vmatpush1.msra.mxu1 %v9101_v38 }
 0xe7e   : > { %9144 = vmatprep.subr.mxu1 %v9077_v50  ;;  %v9097_v50 = vsel %vm18558_vm4, %v18557_v22, %v16458_v36  ;;  %v18567_v22 = vld [vmem:[#allocation129_spill] sm:$0xff]  ;;  %vm18580_vm4 = vmmov %vm18570_vm0 }
 0xe7f   : > { %v16647_v42 = vpop.permute.xlu0 %9293  ;;  %9145 = vmatpush1.msra.mxu1 %v9100_v5  ;;  %v16649_v14 = vpop.permute.xlu1 %9309  ;;  %v18563_v5 = vld [vmem:[#allocation212_spill] sm:$0xff] }
 0xe80   : > { %9146 = vmatprep.subr.mxu1 %v9073_v9  ;;  %v18559_v9 = vld [vmem:[#allocation134_spill] sm:$0xff] }
 0xe81   : > { %9147 = vmatpush1.msra.mxu1 %v9099_v40  ;;  %v9096_v38 = vsel %vm18561_vm8, %v18560_v56, %v18559_v9  ;;  %vm18581_vm8 = vmmov %vm18570_vm0 }
 0xe82   : > { %9148 = vmatprep.subr.mxu1 %v16573_v3 }
 0xe83   : > { %v16657_v18 = vpop.permute.xlu0 %9291  ;;  %9149 = vmatpush1.msra.mxu1 %v9098_v29  ;;  %v16659_v13 = vpop.permute.xlu1 %9289  ;;  %v18564_v29 = vld [vmem:[#allocation82_spill] sm:$0xff] }
 0xe84   : > { %9150 = vmatprep.subr.mxu1 %v16458_v36  ;;  %v9095_v40 = vsel %vm18565_vm9, %v18564_v29, %v18563_v5  ;;  %v18566_v36 = vld [vmem:[#allocation43_spill] sm:$0xff]  ;;  %vm18582_vm9 = vmmov %vm18570_vm0 }
 0xe85   : > { %9151 = vmatpush1.msra.mxu1 %v9097_v50  ;;  %v9094_v50 = vsel %vm18568_vm11, %v18567_v22, %v18566_v36  ;;  %vm18583_vm11 = vmmov %vm18570_vm0 }
 0xe86   : > { %9152 = vmatprep.subr.mxu1 %v18559_v9 }
 0xe87   : > { %v16669_v58 = vpop.permute.xlu0 %9283  ;;  %9153 = vmatpush1.msra.mxu1 %v9096_v38  ;;  %v16671_v3 = vpop.permute.xlu1 %9287  ;;  %v18569_v38 = vld [vmem:[#allocation79_spill] sm:$0xff] }
 0xe88   : > { %18562 = vst [vmem:[#allocation154_spill] sm:$0xff] %v16669_v58  ;;  %9154 = vmatprep.subr.mxu1 %v18563_v5  ;;  %v9093_v58 = vsel %vm18570_vm0, %v16247_v46, %v18569_v38  ;;  %v9092_v5 = vsel %vm18571_vm1, %v16272_v8, %v16256_v10  ;;  %v9090_v46 = vsel %vm18573_vm2, %v16319_v17, %v16306_v60  ;;  %vm18584_vm1 = vmmov %vm18570_vm0 }
 0xe89   : > { %9155 = vmatpush1.msra.mxu1 %v9095_v40  ;;  %v8832_v17 = vsel %vm18579_vm6, %v16606_v2, %v16625_v25  ;;  %vm18586_vm2 = vmmov %vm18570_vm0 }
 0xe8a   : > { %9156 = vmatprep.subr.mxu1 %v18566_v36  ;;  %v9091_v36 = vsel %vm18572_vm3, %v16301_v53, %v16276_v41  ;;  %v8833_v53 = vsel %vm18577_vm15, %v16625_v25, %v16616_v19  ;;  %vm18585_vm3 = vmmov %vm18570_vm0 }
 0xe8b   : > { %v16681_v56 = vpop.permute.xlu0 %9281  ;;  %9157 = vmatpush1.msra.mxu1 %v9094_v50  ;;  %v16683_v9 = vpop.permute.xlu1 %9285  ;;  %vm18590_vm15 = vmmov %vm18570_vm0  ;;  %v18604_v50 = vld [vmem:[#allocation92_spill] sm:$0xff] }
 0xe8c   : > { %9158 = vmatprep.subr.mxu1 %v18569_v38  ;;  %vm18592_vm6 = vmmov %vm18570_vm0 }
 0xe8d   : > { %9159 = vmatpush1.msra.mxu1 %v9093_v58  ;;  %v9089_v58 = vsel %vm18574_vm13, %v16333_v49, %v16323_v33  ;;  %vm18587_vm13 = vmmov %vm18570_vm0 }
 0xe8e   : > { %9160 = vmatprep.subr.mxu1 %v16256_v10 }
 0xe8f   : > { %v16693_v29 = vpop.permute.xlu0 %9279  ;;  %9161 = vmatpush1.msra.mxu1 %v9092_v5  ;;  %v16695_v40 = vpop.permute.xlu1 %9277  ;;  %v18606_v5 = vld [vmem:[#allocation272_spill] sm:$0xff] }
 0xe90   : > { %9162 = vmatprep.subr.mxu1 %v16276_v41 }
 0xe91   : > { %9163 = vmatpush1.msra.mxu1 %v9091_v36  ;;  %v18607_v36 = vld [vmem:[#allocation37_spill] sm:$0xff] }
 0xe92   : > { %9164 = vmatprep.subr.mxu1 %v16306_v60  ;;  %v9088_v60 = vsel %vm18578_vm14, %v16336_v39, %v16349_v12  ;;  %v9086_v39 = vsel %vm18581_vm8, %v16365_v0, %v16371_v11  ;;  %v8827_v0 = vsel %vm18583_vm11, %v16456_v31, %v16374_v44  ;;  %vm18591_vm14 = vmmov %vm18570_vm0 }
 0xe93   : > { %v16705_v8 = vpop.permute.xlu0 %9271  ;;  %9165 = vmatpush1.msra.mxu1 %v9090_v46  ;;  %v8795_v10 = vpop.permute.xlu1 %8794  ;;  %vm18594_vm8 = vmmov %vm18570_vm0 }
 0xe94   : > { %v8834_v22 = vsel %vm18575_vm10, %v8793_v47, %v8795_v10  ;;  %9166 = vmatprep.subr.mxu1 %v16323_v33  ;;  %v8835_v41 = vsel %vm18576_vm12, %v8795_v10, %v8797_v52  ;;  %v9087_v47 = vsel %vm18580_vm4, %v16363_v35, %v16353_v4  ;;  %v9102_v52 = vsel %vm18582_vm9, %v16627_v21, %v16641_v7  ;;  %vm18588_vm10 = vmmov %vm18570_vm0  ;;  %v18602_v21 = vld [vmem:[#allocation27_spill] sm:$0xff] }
 0xe95   : > { %8877 = vmatprep.subr.mxu0 %v8835_v41  ;;  %9167 = vmatpush1.msra.mxu1 %v9089_v58  ;;  %vm18589_vm12 = vmmov %vm18570_vm0  ;;  %v18609_v10 = vld [vmem:[#allocation259_spill] sm:$0xff] }
 0xe96   : > { %8878 = vmatpush1.msra.mxu0 %v8834_v22  ;;  %9168 = vmatprep.subr.mxu1 %v16349_v12  ;;  %vm18593_vm4 = vmmov %vm18570_vm0 }
 0xe97   : > { %v16723_v33 = vpop.permute.xlu0 %9269  ;;  %8879 = vmatprep.subr.mxu0 %v8833_v53  ;;  %9169 = vmatpush1.msra.mxu1 %v9088_v60  ;;  %v16725_v49 = vpop.permute.xlu1 %9275  ;;  %vm18596_vm9 = vmmov %vm18570_vm0  ;;  %v18611_v53 = vld [vmem:[#allocation270_spill] sm:$0xff]  ;;  %v18612_v60 = vld [vmem:[#allocation105_spill] sm:$0xff] }
 0xe98   : > { %8880 = vmatpush1.msra.mxu0 %v8832_v17  ;;  %9170 = vmatprep.subr.mxu1 %v16353_v4  ;;  %v8948_v4 = vld [vmem:[%s16953_s10] sm:$0xff]  ;;  %vm18599_vm11 = vmmov %vm18570_vm0 }
 0xe99   : > { %8881 = vmatprep.subr.mxu0 %v16597_v15  ;;  %9171 = vmatpush1.msra.mxu1 %v9087_v47  ;;  %v18598_v15 = vld [vmem:[#allocation32_spill] sm:$0xff] }
 0xe9a   : > { %8882 = vmatpush1.msra.mxu0 %v16594_v1  ;;  %9172 = vmatprep.subr.mxu1 %v16371_v11  ;;  %v8826_v11 = vsel %vm18570_vm0, %v16380_v16, %v16456_v31  ;;  %v8823_v16 = vsel %vm18586_vm2, %v16404_v24, %v16406_v63  ;;  %v8822_v31 = vsel %vm18587_vm13, %v16408_v27, %v16404_v24  ;;  %vm18608_vm2 = vmmov %vm18570_vm0  ;;  %v18614_v47 = vld [vmem:[#allocation16_spill] sm:$0xff] }
 0xe9b   : > { %v16737_v12 = vpop.permute.xlu0 %9267  ;;  %8883 = vmatprep.subr.mxu0 %v16583_v45  ;;  %9173 = vmatpush1.msra.mxu1 %v9086_v39  ;;  %v16740_v35 = vpop.permute.xlu1 %9273  ;;  %v8819_v24 = vsel %vm18590_vm15, %v16416_v59, %v16418_v54  ;;  %v8818_v63 = vsel %vm18591_vm14, %v16420_v43, %v16416_v59  ;;  %v8817_v27 = vsel %vm18592_vm6, %v16422_v55, %v16424_v37  ;;  %v18595_v54 = vld [vmem:[#allocation64_spill] sm:$0xff]  ;;  %vm18610_vm13 = vmmov %vm18570_vm0 }
 0xe9c   : > { %8884 = vmatpush1.msra.mxu0 %v16580_v28  ;;  %9914 = vmatprep.subr.msk.mxu1 %vm568_vm5, %v16641_v7  ;;  %v8825_v28 = vsel %vm18584_vm1, %v16384_v61, %v16398_v6  ;;  %v8824_v7 = vsel %vm18585_vm3, %v16402_v32, %v16384_v61  ;;  %v8821_v61 = vsel %vm18588_vm10, %v16410_v51, %v16412_v48  ;;  %v18597_v37 = vld [vmem:[#allocation76_spill] sm:$0xff]  ;;  %vm18603_vm1 = vmmov %vm18570_vm0 }
 0xe9d   : > { %8885 = vmatprep.subr.mxu0 %v8827_v0  ;;  %9915 = vmatpush2.msk.msra.mxu1 %vm568_vm5, %v9102_v52  ;;  %v8820_v6 = vsel %vm18589_vm12, %v16414_v57, %v16410_v51  ;;  %v8816_v51 = vsel %vm18593_vm4, %v16426_v20, %v16422_v55  ;;  %v8815_v59 = vsel %vm18594_vm8, %v16428_v62, %v16430_v26  ;;  %v18600_v20 = vld [vmem:[#allocation56_spill] sm:$0xff]  ;;  %v18601_v26 = vld [vmem:[#allocation123_spill] sm:$0xff]  ;;  %vm18605_vm3 = vmmov %vm18570_vm0  ;;  %vm18625_vm8 = vcmask 31744  }
 0xe9e   : > { %8886 = vmatpush1.msra.mxu0 %v8826_v11  ;;  %9207 = vmatmul.mubr.f32.vlgmr.msra.gmra.mxu1 %v8948_v4  ;;  %v8814_v43 = vsel %vm18596_vm9, %v18595_v54, %v16428_v62  ;;  %v8813_v55 = vsel %vm18599_vm11, %v18598_v15, %v18597_v37  ;;  %v8812_v2 = vsel %vm18570_vm0, %v18600_v20, %v18598_v15  ;;  %vm18613_vm10 = vmmov %vm18570_vm0  ;;  %v18616_v4 = vld [vmem:[#allocation18_spill] sm:$0xff]  ;;  %v18617_v52 = vld [vmem:[#allocation15_spill] sm:$0xff]  ;;  %vm9468_vm9 = vcmask 523264  }
 0xe9f   : > { %v16764_v45 = vpop.permute.xlu0 %9259  ;;  %8887 = vmatprep.subr.mxu0 %v8825_v28  ;;  %v16766_v44 = vpop.permute.xlu1 %9265  ;;  %v8811_v62 = vsel %vm18603_vm1, %v18602_v21, %v18601_v26  ;;  %v8810_v38 = vsel %vm18605_vm3, %v18604_v50, %v18602_v21  ;;  %v8809_v46 = vsel %vm18608_vm2, %v18607_v36, %v18606_v5  ;;  %v8808_v58 = vsel %vm18610_vm13, %v18609_v10, %v18607_v36  ;;  %vm18615_vm12 = vmmov %vm18570_vm0  ;;  %v18619_v11 = vld [vmem:[#allocation17_spill] sm:$0xff] }
 0xea0   : > { %8888 = vmatpush1.msra.mxu0 %v8824_v7  ;;  %v8807_v17 = vsel %vm18613_vm10, %v18612_v60, %v18611_v53  ;;  %v8806_v39 = vsel %vm18615_vm12, %v18614_v47, %v18612_v60  ;;  %vm18618_vm15 = vmmov %vm18570_vm0  ;;  %v9343_v20 = vsel %vm9317_vm7, %v16659_v13, %v16657_v18  ;;  %v9339_v18 = vsel %vm9317_vm7, %v16695_v40, %v16693_v29 }
 0xea1   : > { %8889 = vmatprep.subr.mxu0 %v8823_v16  ;;  %v8805_v0 = vsel %vm18618_vm15, %v18617_v52, %v18616_v4  ;;  %vm18620_vm14 = vmmov %vm18570_vm0  ;;  %v9335_v29 = vsel %vm9317_vm7, %v16766_v44, %v16737_v12 }
 0xea2   : > { %8890 = vmatpush1.msra.mxu0 %v8822_v31  ;;  %v8804_v28 = vsel %vm18620_vm14, %v18619_v11, %v18617_v52  ;;  %vm18621_vm6 = vmmov %vm18570_vm0 }
 0xea3   : > { %v16780_v32 = vpop.permute.xlu0 %9257  ;;  %8891 = vmatprep.subr.mxu0 %v8821_v61  ;;  %v16782_v1 = vpop.permute.xlu1 %9263  ;;  %v8837_v31 = vsel %vm18621_vm6, %v16643_v30, %v16633_v34  ;;  %v8592_v61 = vld [vmem:[%s16954_s11] sm:$0xff]  ;;  %vm18623_vm4 = vmmov %vm18570_vm0 }
 0xea4   : > { %8892 = vmatpush1.msra.mxu0 %v8820_v6  ;;  %v18622_v6 = vld [vmem:[#allocation251_spill] sm:$0xff] }
 0xea5   : > { %8893 = vmatprep.subr.mxu0 %v8819_v24  ;;  %v8836_v24 = vsel %vm18623_vm4, %v18622_v6, %v16643_v30  ;;  %v18626_v30 = vld [vmem:[#allocation223_spill] sm:$0xff] }
 0xea6   : > { %8894 = vmatpush1.msra.mxu0 %v8818_v63  ;;  %v9214_v63 = vld [vmem:[%s16955_s12 + $0x8] sm:$0xff] }
 0xea7   : > { %v16796_v48 = vpop.permute.xlu0 %9255  ;;  %8895 = vmatprep.subr.mxu0 %v8817_v27  ;;  %v16798_v57 = vpop.permute.xlu1 %9261  ;;  %v18624_v27 = vld [vmem:[#allocation237_spill] sm:$0xff] }
 0xea8   : > { %8896 = vmatpush1.msra.mxu0 %v8816_v51 }
 0xea9   : > { %8897 = vmatprep.subr.mxu0 %v8815_v59 }
 0xeaa   : > { %8898 = vmatpush1.msra.mxu0 %v8814_v43  ;;  %v18627_v43 = vld [vmem:[#allocation282_spill] sm:$0xff] }
 0xeab   : > { %v16812_v19 = vpop.permute.xlu0 %9247  ;;  %8899 = vmatprep.subr.mxu0 %v8813_v55  ;;  %v16814_v25 = vpop.permute.xlu1 %9253  ;;  %v9344_v37 = vsel %vm9317_vm7, %v16647_v42, %v18627_v43 }
 0xeac   : > { %8900 = vmatpush1.msra.mxu0 %v8812_v2  ;;  %v9342_v2 = vsel %vm9317_vm7, %v16671_v3, %v16659_v13  ;;  %v9338_v13 = vsel %vm9317_vm7, %v16725_v49, %v16695_v40  ;;  %v9337_v3 = vsel %vm9317_vm7, %v16705_v8, %v16740_v35  ;;  %v9334_v40 = vsel %vm9317_vm7, %v16782_v1, %v16766_v44 }
 0xead   : > { %8901 = vmatprep.subr.mxu0 %v8811_v62  ;;  %v9333_v49 = vsel %vm9317_vm7, %v16764_v45, %v16798_v57  ;;  %v9331_v12 = vsel %vm9317_vm7, %v16814_v25, %v16796_v48 }
 0xeae   : > { %8902 = vmatpush1.msra.mxu0 %v8810_v38 }
 0xeaf   : > { %v16828_v22 = vpop.permute.xlu0 %9245  ;;  %8903 = vmatprep.subr.mxu0 %v8809_v46  ;;  %v16830_v41 = vpop.permute.xlu1 %9251 }
 0xeb0   : > { %8904 = vmatpush1.msra.mxu0 %v8808_v58  ;;  %v9330_v44 = vsel %vm9317_vm7, %v16830_v41, %v16814_v25 }
 0xeb1   : > { %8905 = vmatprep.subr.mxu0 %v8807_v17 }
 0xeb2   : > { %8906 = vmatpush1.msra.mxu0 %v8806_v39 }
 0xeb3   : > { %v9308_v7 = vpop.permute.xlu0 %9307  ;;  %8907 = vmatprep.subr.mxu0 %v8805_v0  ;;  %v9250_v16 = vpop.permute.xlu1 %9249  ;;  %v9213_v0 = vld [vmem:[%s16955_s12] sm:$0xff] }
 0xeb4   : > { %8908 = vmatpush1.msra.mxu0 %v8804_v28  ;;  %v9349_v34 = vsel %vm9317_vm7, %v9308_v7, %v16649_v14  ;;  %v9348_v51 = vsel %vm9317_vm7, %v18624_v27, %v9308_v7  ;;  %v18628_v14 = vld [vmem:[#allocation264_spill] sm:$0xff]  ;;  %v9329_v1 = vsel %vm9317_vm7, %v16812_v19, %v9250_v16 }
 0xeb5   : > { %9911 = vmatprep.subr.msk.mxu0 %vm568_vm5, %v8837_v31 }
 0xeb6   : > { %9912 = vmatpush2.msk.msra.mxu0 %vm568_vm5, %v8836_v24 }
 0xeb7   : > { %v9244_v59 = vpop.permute.xlu0 %9243  ;;  %8942 = vmatmul.mubr.f32.vlgmr.msra.gmra.mxu0 %v8592_v61  ;;  %9391 = vmatprep.subr.mxu0 %v9349_v34  ;;  %v9242_v54 = vpop.permute.xlu1 %9241 }
 0xeb8   : > { %9392 = vmatpush1.msra.mxu0 %v9348_v51  ;;  %9919 = vmatprep.mubr.msk.f32.mxu0 %vm18625_vm8, %v9214_v63  ;;  %v9327_v38 = vsel %vm9317_vm7, %v9242_v54, %v9244_v59 }
 0xeb9   : > { %9393 = vmatprep.subr.mxu0 %v16639_v23  ;;  %v18629_v23 = vld [vmem:[#allocation154_spill] sm:$0xff] }
 0xeba   : > { %9394 = vmatpush1.msra.mxu0 %v18626_v30  ;;  %v9341_v26 = vsel %vm9317_vm7, %v18629_v23, %v16683_v9  ;;  %v9340_v42 = vsel %vm9317_vm7, %v16681_v56, %v18629_v23  ;;  %v9336_v56 = vsel %vm9317_vm7, %v16723_v33, %v16705_v8  ;;  %v9332_v8 = vsel %vm9317_vm7, %v16780_v32, %v16764_v45 }
 0xebb   : > { %v9236_v15 = vpop.permute.xlu0 %9235  ;;  %9395 = vmatprep.subr.mxu0 %v18628_v14  ;;  %v9240_v55 = vpop.permute.xlu1 %9239  ;;  %v9328_v45 = vsel %vm9317_vm7, %v16828_v22, %v16812_v19  ;;  %v10032_v14 = vld [vmem:[%s10269_s26] sm:$0xff] }
 0xebc   : > { %9396 = vmatpush1.msra.mxu0 %v9344_v37  ;;  %v9326_v48 = vsel %vm9317_vm7, %v9240_v55, %v9242_v54 }
 0xebd   : > { %9397 = vmatprep.subr.mxu0 %v9343_v20  ;;  %v18630_v20 = vld [vmem:[#allocation6_spill] sm:$0xff] }
 0xebe   : > { %9398 = vmatpush1.msra.mxu0 %v9342_v2 }
 0xebf   : > { %v9234_v21 = vpop.permute.xlu0 %9233  ;;  %9399 = vmatprep.subr.mxu0 %v9341_v26  ;;  %v9238_v62 = vpop.permute.xlu1 %9237 }
 0xec0   : > { %9400 = vmatpush1.msra.mxu0 %v9340_v42  ;;  %v9325_v25 = vsel %vm9317_vm7, %v9236_v15, %v9238_v62  ;;  %v9324_v5 = vsel %vm9317_vm7, %v9234_v21, %v9236_v15 }
 0xec1   : > { %9401 = vmatprep.subr.mxu0 %v9339_v18 }
 0xec2   : > { %9402 = vmatpush1.msra.mxu0 %v9338_v13 }
 0xec3   : > { %v9232_v9 = vpop.permute.xlu0 %9231  ;;  %9403 = vmatprep.subr.mxu0 %v9337_v3  ;;  %v9230_v50 = vpop.permute.xlu1 %9229 }
 0xec4   : > { %9404 = vmatpush1.msra.mxu0 %v9336_v56  ;;  %v9323_v19 = vsel %vm9317_vm7, %v9230_v50, %v9232_v9 }
 0xec5   : > { %9405 = vmatprep.subr.mxu0 %v9335_v29 }
 0xec6   : > { %9406 = vmatpush1.msra.mxu0 %v9334_v40 }
 0xec7   : > { %v9224_v33 = vpop.permute.xlu0 %9223  ;;  %9407 = vmatprep.subr.mxu0 %v9333_v49  ;;  %v9228_v35 = vpop.permute.xlu1 %9227 }
 0xec8   : > { %9408 = vmatpush1.msra.mxu0 %v9332_v8  ;;  %v9322_v10 = vsel %vm9317_vm7, %v9228_v35, %v9230_v50 }
 0xec9   : > { %9409 = vmatprep.subr.mxu0 %v9331_v12 }
 0xeca   : > { %9410 = vmatpush1.msra.mxu0 %v9330_v44 }
 0xecb   : > { %v9222_v32 = vpop.permute.xlu0 %9221  ;;  %9411 = vmatprep.subr.mxu0 %v9329_v1  ;;  %v9226_v57 = vpop.permute.xlu1 %9225 }
 0xecc   : > { %9412 = vmatpush1.msra.mxu0 %v9328_v45  ;;  %v9321_v58 = vsel %vm9317_vm7, %v9224_v33, %v9226_v57  ;;  %v9320_v22 = vsel %vm9317_vm7, %v9222_v32, %v9224_v33 }
 0xecd   : > { %9413 = vmatprep.subr.mxu0 %v9327_v38 }
 0xece   : > { %9414 = vmatpush1.msra.mxu0 %v9326_v48 }
 0xecf   : > { %v9220_v36 = vpop.permute.xlu0 %9219  ;;  %9415 = vmatprep.subr.mxu0 %v9325_v25  ;;  %v9218_v46 = vpop.permute.xlu1 %9217 }
 0xed0   : > { %9416 = vmatpush1.msra.mxu0 %v9324_v5  ;;  %v9319_v17 = vsel %vm9317_vm7, %v9218_v46, %v9220_v36 }
 0xed1   : > { %9417 = vmatprep.subr.mxu0 %v9323_v19 }
 0xed2   : > { %9418 = vmatpush1.msra.mxu0 %v9322_v10 }
 0xed3   : > { %v9314_v41 = vpop.permute.xlu0 %9313  ;;  %9419 = vmatprep.subr.mxu0 %v9321_v58  ;;  %v9216_v53 = vpop.permute.xlu1 %9215 }
 0xed4   : > { %v9318_v60 = vsel %vm9317_vm7, %v9216_v53, %v9218_v46  ;;  %9420 = vmatpush1.msra.mxu0 %v9320_v22 }
 0xed5   : > { %9421 = vmatprep.subr.mxu0 %v9319_v17 }
 0xed6   : > { %9422 = vmatpush1.msra.mxu0 %v9318_v60 }
 0xed7   : > { %v9312_v47 = vpop.permute.xlu0 %9311  ;;  %v9316_v39 = vpop.permute.xlu1 %9315 }
 0xed8   : > { %v9350_v4 = vsel %vm9317_vm7, %v9312_v47, %v9314_v41  ;;  %v9351_v52 = vsel %vm9317_vm7, %v9314_v41, %v9316_v39 }
 0xed9   : > { %9917 = vmatprep.subr.msk.mxu0 %vm568_vm5, %v9351_v52 }
 0xeda   : > { %9918 = vmatpush2.msk.msra.mxu0 %vm568_vm5, %v9350_v4 }
 0xedb   : > { %9456 = vmatmul.mubr.f32.vlgmr.msra.gmra.mxu0 %v9213_v0 }
 0xee4   : > { %v8649_v31 = vpop.permute.xlu1 %8648 }
 0xf5e   : > { %v9208_v11 = vpop.f32.mrf.mxu1 }
 0xf5f   : > { %9464 = vrot.lane.b32.xlu0 %v9208_v11, %s10087_s27 }
 0xf60   : > { %v9210_v28 = vpop.f32.mrf.mxu1 }
 0xf61   : > { %9466 = vrot.lane.b32.xlu1 %v9210_v28, %s10087_s27 }
 0xf77   : > { %v8943_v7 = vpop.f32.mrf.mxu0 }
 0xf78   : > { %v8944_v6 = vadd.f32 %v8943_v7, %v8649_v31 }
 0xf79   : > { %v8945_v16 = vpop.f32.mrf.mxu0 }
 0xf7a   : > { %v8946_v34 = vadd.f32 %v8945_v16, %v8649_v31 }
 0xf9b   : > { %v9457_v61 = vpop.f32.mrf.mxu0 }
 0xf9d   : > { %v9459_v59 = vpop.f32.mrf.mxu0 }
 0xf9e   : > { %v9475_v37 = vsel %vm9468_vm9, %v9459_v59, 0.0 }
 0xfd1   : > { %v9465_v24 = vpop.permute.xlu0 %9464 }
 0xfd2   : > { %v9472_v63 = vsel %vm9468_vm9, 0.0, %v9465_v24 }
 0xfd3   : > { %v9473_v27 = vadd.f32 %v9472_v63, %v8944_v6  ;;  %v9467_v51 = vpop.permute.xlu1 %9466 }
 0xfd4   : > { %v9469_v54 = vsel %vm9468_vm9, %v9465_v24, %v9467_v51 }
 0xfd5   : > { %v9476_v30 = vadd.f32 %v9473_v27, %v9457_v61  ;;  %v9474_v43 = vadd.f32 %v9469_v54, %v8946_v34 }
 0xfd7   : > { %v9477_v15 = vadd.f32 %v9475_v37, %v9474_v43  ;;  %v9482_v55 = vadd.f32 %v10032_v14, %v9476_v30 }
 0xfd9   : > { %v9483_v2 = vadd.f32 %v18630_v20, %v9477_v15 }
 0xfdb   : > { %v9486_v23 = vcombine.low %v9482_v55, %v9483_v2 }
 0xfdd   : > { %9488 = vst [vmem:[%s482_s20] sm:$0xff] %v9486_v23 }
 0xfde PF: > { %s25_s29 = sadd.s32 1, %s10069_s29  }
 0xfdf   : > { %p22_p1 = scmp.ge.s32.totalorder %s25_s29, 4  }
 0xfe1   :  { %24 = sbr.rel (!%p22_p1) target bundleno = 1 (0x1), region = 150 }
 0xfe6   :  { %9510 = vsyncpa [#allocation4], 1 }
 0xfe7   :  { %9512 = vsyncpa [#allocation4 + $0x1], 1 }

</bundles_post_ra>
